<compile_context>
chip_gen: v7x
topology: tpu7x:2x2x1
jax: 0.10.0
libtpu: 0.0.40
codegen_flags: <defaults>
</compile_context>

<pallas_src>
import jax
import jax.numpy as jnp
from jax import lax
from jax.experimental import pallas as pl
from jax.experimental.pallas import tpu as pltpu

# ----------------------------- synthetic model dims --------------------------
P = 32          # number of prompts (classnames)
PB = 16         # prompts per grid block -> R = PB*L = 128 MXU rows, n_blocks = 2
L = 8           # padded sequence length
D = 256         # hidden size (multiple of 128 -> lane-dense activations)
H = 2           # attention heads
DH = D // H     # head dim = 128 -> lane-aligned head slices
FF = 4 * D      # MLP intermediate
NL = 4          # transformer layers (streamed over an "arbitrary" grid axis)
PROJ = 128      # text/visual projection dim (lane-dense; real CLIP uses 512)
VOCAB = 64      # vocab size (highest id == EOS, as in the CLIP vocab)
B_IMG = 16      # image batch for the logits head
BT_IMG = 8      # image rows per head-kernel grid step
LN_EPS = 1e-5

R = PB * L                 # matmul row count per prompt block
MXU_DTYPE = jnp.bfloat16   # matmul operand dtype (f32 accumulation everywhere)


def _layer_norm(x, w, b):
    m = jnp.mean(x, axis=-1, keepdims=True)
    v = jnp.mean((x - m) ** 2, axis=-1, keepdims=True)
    return (x - m) * lax.rsqrt(v + LN_EPS) * w + b


def _mm(a, b):
    """MXU matmul: bf16 operands, f32 accumulation."""
    return jnp.dot(a.astype(MXU_DTYPE), b.astype(MXU_DTYPE),
                   preferred_element_type=jnp.float32)


# ----------------------------- text encoder kernel ---------------------------
def _text_encoder_kernel(
    # tensor inputs
    x_ref,          # (PB, L, D) f32      embedded tokens for this prompt block
    eos_ref,        # (PB, 1)    int32    EOS positions (argmax of input_ids)
    qkv_w_ref,      # (1, D, 3D) bf16     fused [Wq | Wk | Wv], (in, out) layout
    qkv_b_ref,      # (1, 1, 3D) f32
    ow_ref,         # (1, D, D)  bf16     out-proj (in = [head0 | head1], out)
    ob_ref,         # (1, 1, D)  f32
    ln_ref,         # (1, 4, D)  f32      packed [ln1_w, ln1_b, ln2_w, ln2_b]
    f1w_ref,        # (1, D, FF) bf16
    f1b_ref,        # (1, 1, FF) f32
    f2w_ref,        # (1, FF, D) bf16
    f2b_ref,        # (1, 1, D)  f32
    lnf_ref,        # (2, D)     f32      packed [final_ln_w, final_ln_b]
    proj_w_ref,     # (D, PROJ)  bf16
    # output
    out_ref,        # (PB, PROJ) f32
    # scratch
    xs_ref,         # (R, D)     f32      residual stream carried across layers
):
    layer = pl.program_id(1)
    n_layers = pl.num_programs(1)

    # ---- init residual stream at the first layer of this prompt block ----
    @pl.when(layer == 0)
    def _():
        xs_ref[...] = x_ref[...].reshape(R, D)

    x = xs_ref[...]                                        # (R, D) f32
    ln = ln_ref[0]                                         # (4, D)

    # ---------------- self-attention block ----------------
    resid = x
    h = _layer_norm(x, ln[0:1], ln[1:2])
    qkv = _mm(h, qkv_w_ref[0]) + qkv_b_ref[0]              # (R, 3D) f32, fused QKV

    def split_heads(base, q_scale=None):
        # All slice offsets are multiples of 128 (DH = 128) -> pure lane tiles,
        # no XLU relayouts.  Heads fold into the leading (batch) dim.
        blk = qkv[:, base:base + D]                        # (R, D)
        if q_scale is not None:
            blk = blk * q_scale                            # fold 1/sqrt(DH) into q
        parts = [blk[:, hh * DH:(hh + 1) * DH].reshape(PB, L, DH)
                 for hh in range(H)]
        return jnp.concatenate(parts, axis=0).astype(MXU_DTYPE)   # (H*PB, L, DH)

    qh = split_heads(0, q_scale=DH ** -0.5)
    kh = split_heads(D)
    vh = split_heads(2 * D)

    # causal mask (HF CLIP text model applies a causal mask only)
    row = lax.broadcasted_iota(jnp.int32, (L, L), 0)
    col = lax.broadcasted_iota(jnp.int32, (L, L), 1)
    causal = jnp.where(row >= col, 0.0, -1e9).astype(jnp.float32)

    # one batched contraction over all (head, prompt) pairs
    s = jnp.einsum('bld,bmd->blm', qh, kh,
                   preferred_element_type=jnp.float32)     # (H*PB, L, L)
    s = s + causal[None, :, :]
    s = s - jnp.max(s, axis=-1, keepdims=True)
    e = jnp.exp(s)
    inv = pl.reciprocal(jnp.sum(e, axis=-1, keepdims=True), approx=True)
    probs = (e * inv).astype(MXU_DTYPE)
    ctx = jnp.einsum('blm,bmd->bld', probs, vh,
                     preferred_element_type=jnp.float32)   # (H*PB, L, DH)

    # reassemble heads on the lane axis (full-vreg 128-wide pieces -> pure
    # tiling) and run ONE (R, D) x (D, D) out-projection matmul.
    ctx_flat = jnp.concatenate(
        [ctx[hh * PB:(hh + 1) * PB].reshape(R, DH) for hh in range(H)], axis=-1)
    x = resid + _mm(ctx_flat, ow_ref[0]) + ob_ref[0]

    # ---------------- MLP block (quick_gelu) ----------------
    resid = x
    h = _layer_norm(x, ln[2:3], ln[3:4])
    h = _mm(h, f1w_ref[0]) + f1b_ref[0]
    h = h * jax.nn.sigmoid(1.702 * h)                      # quick_gelu, f32
    h = _mm(h, f2w_ref[0]) + f2b_ref[0]
    x = resid + h

    xs_ref[...] = x                                        # carry to next layer

    # ---- last layer: pool EOS rows, then final LN + text_projection ----
    @pl.when(layer == n_layers - 1)
    def _():
        x3 = x.reshape(PB, L, D)
        pos = lax.broadcasted_iota(jnp.int32, (PB, L, 1), 1)
        eos = eos_ref[...].reshape(PB, 1, 1)               # vectorized EOS mask
        sel = (pos == eos).astype(jnp.float32)             # (PB, L, 1)
        pooled = jnp.sum(x3 * sel, axis=1)                 # (PB, D)
        pooled = _layer_norm(pooled, lnf_ref[0:1], lnf_ref[1:2])
        out_ref[...] = _mm(pooled, proj_w_ref[...])        # lane-dense store


def text_encoder_forward(x_embed, eos_idx, params):
    """x_embed: (P, L, D) f32 token+pos embeddings; eos_idx: (P, 1) int32."""
    assert P % PB == 0
    n_blocks = P // PB

    def per_layer(name):
        shape = params[name].shape
        nd = len(shape)
        return pl.BlockSpec((1,) + shape[1:],
                            lambda i, l, _nd=nd: (l,) + (0,) * (_nd - 1))

    def grid_const(name):
        shape = params[name].shape
        nd = len(shape)
        return pl.BlockSpec(shape, lambda i, l, _nd=nd: (0,) * _nd)

    in_specs = [
        pl.BlockSpec((PB, L, D), lambda i, l: (i, 0, 0)),   # x (const over layers)
        pl.BlockSpec((PB, 1), lambda i, l: (i, 0)),         # eos positions
        per_layer("qkv_w"), per_layer("qkv_b"),
        per_layer("ow"), per_layer("ob"),
        per_layer("ln"),
        per_layer("f1w"), per_layer("f1b"),
        per_layer("f2w"), per_layer("f2b"),
        grid_const("lnf"), grid_const("proj_w"),
    ]

    grid_spec = pltpu.PrefetchScalarGridSpec(
        num_scalar_prefetch=0,
        grid=(n_blocks, NL),                                # (parallel, arbitrary)
        in_specs=in_specs,
        out_specs=pl.BlockSpec((PB, PROJ), lambda i, l: (i, 0)),
        scratch_shapes=[pltpu.VMEM((R, D), jnp.float32)],   # residual stream
    )
    fn = pl.pallas_call(
        _text_encoder_kernel,
        out_shape=jax.ShapeDtypeStruct((P, PROJ), jnp.float32),
        grid_spec=grid_spec,
        compiler_params=pltpu.CompilerParams(
            # prompt blocks shard across v7x's two TensorCores; the layer axis
            # is a carried dependency (VMEM scratch) -> "arbitrary".
            dimension_semantics=("parallel", "arbitrary"),
            # 48 MiB: under v7x's 64 MiB/TC, above v5e's 16 MiB scoped default.
            vmem_limit_bytes=48 * 1024 * 1024,
        ),
    )
    w = params
    return fn(x_embed, eos_idx,
              w["qkv_w"], w["qkv_b"], w["ow"], w["ob"], w["ln"],
              w["f1w"], w["f1b"], w["f2w"], w["f2b"], w["lnf"], w["proj_w"])


# ----------------------------- CustomCLIP logits head ------------------------
def _clip_head_kernel(vis_ref, vproj_ref, txt_ref, ls_ref, li_ref):
    # visual_projection (Linear, no bias)
    img = _mm(vis_ref[...], vproj_ref[...])                         # (BT, PROJ) f32
    txt = txt_ref[...]                                              # (P, PROJ) f32

    img_n = img * lax.rsqrt(jnp.sum(img * img, axis=-1, keepdims=True))
    txt_n = txt * lax.rsqrt(jnp.sum(txt * txt, axis=-1, keepdims=True))

    scale = jnp.exp(ls_ref[...])                                    # (1, 1)
    # contract over PROJ without materializing a transpose of txt_n
    li_ref[...] = lax.dot_general(
        img_n, txt_n,
        dimension_numbers=(((1,), (1,)), ((), ())),
        preferred_element_type=jnp.float32) * scale


def clip_head_forward(vis_pooled, vproj_w, text_features, logit_scale):
    b, d = vis_pooled.shape
    p, proj = text_features.shape
    bt = min(b, BT_IMG)
    assert b % bt == 0
    # TODO(synk): at real class counts, additionally tile the P axis of
    # text_features into lane-dense (>=128) blocks instead of one VMEM slab.
    logits_img = pl.pallas_call(
        _clip_head_kernel,
        out_shape=jax.ShapeDtypeStruct((b, p), jnp.float32),
        grid_spec=pltpu.PrefetchScalarGridSpec(
            num_scalar_prefetch=0,
            grid=(b // bt,),
            in_specs=[pl.BlockSpec((bt, d), lambda i: (i, 0)),
                      pl.BlockSpec((d, proj), lambda i: (0, 0)),
                      pl.BlockSpec((p, proj), lambda i: (0, 0)),
                      pl.BlockSpec((1, 1), lambda i: (0, 0))],
            out_specs=pl.BlockSpec((bt, p), lambda i: (i, 0)),
        ),
        compiler_params=pltpu.CompilerParams(
            dimension_semantics=("parallel",)),
    )(vis_pooled, vproj_w, text_features, logit_scale)
    # logits_text = scale * txt_n @ img_n.T == logits_img.T; avoid a second
    # MXU matmul + in-kernel transpose (performance review rec).
    logits_text = logits_img.T
    return logits_img, logits_text


# ----------------------------- params -----------------------------------------
def init_params(key):
    ks = jax.random.split(key, 10)
    s = 0.02
    bf = MXU_DTYPE

    def w(k, shape):
        return (jax.random.normal(k, shape, jnp.float32) * s).astype(bf)

    return {
        "tok_emb": jax.random.normal(ks[0], (VOCAB, D), jnp.float32) * s,
        "pos_emb": jax.random.normal(ks[1], (L, D), jnp.float32) * s,
        # fused QKV (in, out) layout == x @ W, columns packed [Wq | Wk | Wv],
        # each head's 128-wide column group starts on a lane boundary.
        "qkv_w": w(ks[2], (NL, D, 3 * D)),
        "qkv_b": jnp.zeros((NL, 1, 3 * D), jnp.float32),
        # out-proj: rows ordered [head0 | head1] to match the lane concat.
        "ow": w(ks[3], (NL, D, D)),
        "ob": jnp.zeros((NL, 1, D), jnp.float32),
        # packed LayerNorm params: [ln1_w, ln1_b, ln2_w, ln2_b]
        "ln": jnp.tile(jnp.array([1.0, 0.0, 1.0, 0.0], jnp.float32)[None, :, None],
                       (NL, 1, D)),
        "f1w": w(ks[4], (NL, D, FF)),
        "f1b": jnp.zeros((NL, 1, FF), jnp.float32),
        "f2w": w(ks[5], (NL, FF, D)),
        "f2b": jnp.zeros((NL, 1, D), jnp.float32),
        "lnf": jnp.stack([jnp.ones((D,), jnp.float32), jnp.zeros((D,), jnp.float32)]),
        "proj_w": w(ks[6], (D, PROJ)),
        "vproj_w": w(ks[7], (D, PROJ)),
    }


if __name__ == "__main__":
    key = jax.random.PRNGKey(0)
    params = init_params(key)

    # TODO(synk): the HF tokenizer (string -> input_ids) and the CLIP vision
    # transformer have no Pallas equivalent; synthesize padded input_ids (max
    # id acts as EOS, as in the CLIP vocab) and a pooled image-feature batch,
    # and run everything downstream of them in Pallas.
    kid = jax.random.fold_in(key, 1)
    input_ids = jax.random.randint(kid, (P, L), 1, VOCAB - 2, dtype=jnp.int32)
    eos_pos = jax.random.randint(jax.random.fold_in(key, 2), (P,),
                                 L // 2, L, dtype=jnp.int32)
    input_ids = input_ids.at[jnp.arange(P), eos_pos].set(VOCAB - 1)

    # glue: embedding gather + positional embedding (plain JAX)
    x_embed = (params["tok_emb"][input_ids]
               + params["pos_emb"][None, :, :]).astype(jnp.float32)
    # CLIP pools at argmax(input_ids) == the EOS token.
    eos_idx = jnp.argmax(input_ids, axis=-1).astype(jnp.int32).reshape(P, 1)

    text_features = text_encoder_forward(x_embed, eos_idx, params)

    kimg = jax.random.fold_in(key, 3)
    vis_pooled = jax.random.normal(kimg, (B_IMG, D), jnp.float32)
    logit_scale = jnp.full((1, 1), jnp.log(1.0 / 0.07), jnp.float32)

    logits_img, logits_text = clip_head_forward(
        vis_pooled, params["vproj_w"], text_features, logit_scale)

    jax.block_until_ready((text_features, logits_img, logits_text))
    assert text_features.shape == (P, PROJ)
    assert logits_img.shape == (B_IMG, P) and logits_text.shape == (P, B_IMG)
    assert bool(jnp.all(jnp.isfinite(text_features)))
    assert bool(jnp.all(jnp.isfinite(logits_img)))
    assert bool(jnp.all(jnp.isfinite(logits_text)))
    print("KERNEL_OK")
</pallas_src>

<mosaic_0001>
module attributes {stable_mosaic.version = 11 : i64} {
  func.func @_text_encoder_kernel(%arg0: i32, %arg1: i32, %arg2: memref<16x8x256xf32, #tpu.memory_space<vmem>>, %arg3: memref<16x1xi32, #tpu.memory_space<vmem>>, %arg4: memref<1x256x768xbf16, #tpu.memory_space<vmem>>, %arg5: memref<1x1x768xf32, #tpu.memory_space<vmem>>, %arg6: memref<1x256x256xbf16, #tpu.memory_space<vmem>>, %arg7: memref<1x1x256xf32, #tpu.memory_space<vmem>>, %arg8: memref<1x4x256xf32, #tpu.memory_space<vmem>>, %arg9: memref<1x256x1024xbf16, #tpu.memory_space<vmem>>, %arg10: memref<1x1x1024xf32, #tpu.memory_space<vmem>>, %arg11: memref<1x1024x256xbf16, #tpu.memory_space<vmem>>, %arg12: memref<1x1x256xf32, #tpu.memory_space<vmem>>, %arg13: memref<2x256xf32, #tpu.memory_space<vmem>>, %arg14: memref<256x128xbf16, #tpu.memory_space<vmem>>, %arg15: memref<16x128xf32, #tpu.memory_space<vmem>>, %arg16: memref<128x256xf32, #tpu.memory_space<vmem>>) attributes {dimension_semantics = [#tpu.dimension_semantics<parallel>, #tpu.dimension_semantics<arbitrary>], iteration_bounds = array<i64: 2, 4>, scalar_prefetch = 0 : i64, scratch_operands = 1 : i64, tpu.core_type = #tpu.core_type<tc>, window_params = [{transform_indices = @transform_0, window_bounds = array<i64: 16, 8, 256>}, {transform_indices = @transform_1, window_bounds = array<i64: 16, 1>}, {transform_indices = @transform_2, window_bounds = array<i64: 1, 256, 768>}, {transform_indices = @transform_3, window_bounds = array<i64: 1, 1, 768>}, {transform_indices = @transform_4, window_bounds = array<i64: 1, 256, 256>}, {transform_indices = @transform_5, window_bounds = array<i64: 1, 1, 256>}, {transform_indices = @transform_6, window_bounds = array<i64: 1, 4, 256>}, {transform_indices = @transform_7, window_bounds = array<i64: 1, 256, 1024>}, {transform_indices = @transform_8, window_bounds = array<i64: 1, 1, 1024>}, {transform_indices = @transform_9, window_bounds = array<i64: 1, 1024, 256>}, {transform_indices = @transform_10, window_bounds = array<i64: 1, 1, 256>}, {pipeline_mode = #tpu.pipeline_mode<synchronous>, transform_indices = @transform_11, window_bounds = array<i64: 2, 256>}, {pipeline_mode = #tpu.pipeline_mode<synchronous>, transform_indices = @transform_12, window_bounds = array<i64: 256, 128>}, {transform_indices = @transform_13, window_bounds = array<i64: 16, 128>}]} {
    %c0_i32 = arith.constant 0 : i32
    %0 = arith.cmpi eq, %arg1, %c0_i32 : i32
    %1 = arith.extui %0 : i1 to i32
    %c0_i32_0 = arith.constant 0 : i32
    %2 = arith.cmpi ne, %1, %c0_i32_0 : i32
    scf.if %2 {
      %c0_54 = arith.constant 0 : index
      %c0_55 = arith.constant 0 : index
      %c0_56 = arith.constant 0 : index
      %150 = vector.load %arg2[%c0_54, %c0_55, %c0_56] : memref<16x8x256xf32, #tpu.memory_space<vmem>>, vector<16x8x256xf32>
      %151 = vector.shape_cast %150 : vector<16x8x256xf32> to vector<128x256xf32>
      %c0_57 = arith.constant 0 : index
      %c0_58 = arith.constant 0 : index
      %152 = vector.load %arg16[%c0_57, %c0_58] : memref<128x256xf32, #tpu.memory_space<vmem>>, vector<128x256xf32>
      tpu.vector_store %arg16[%c0_57, %c0_58], %151 {strides = array<i32>} : memref<128x256xf32, #tpu.memory_space<vmem>>, vector<128x256xf32>,
    } else {
    }
    %c0 = arith.constant 0 : index
    %c0_1 = arith.constant 0 : index
    %3 = vector.load %arg16[%c0, %c0_1] : memref<128x256xf32, #tpu.memory_space<vmem>>, vector<128x256xf32>
    %c0_2 = arith.constant 0 : index
    %c0_3 = arith.constant 0 : index
    %c0_4 = arith.constant 0 : index
    %4 = vector.load %arg8[%c0_2, %c0_3, %c0_4] : memref<1x4x256xf32, #tpu.memory_space<vmem>>, vector<1x4x256xf32>
    %5 = vector.shape_cast %4 : vector<1x4x256xf32> to vector<4x256xf32>
    %6 = vector.extract_strided_slice %5 {offsets = [0, 0], sizes = [1, 256], strides = [1, 1]} : vector<4x256xf32> to vector<1x256xf32>
    %7 = vector.extract_strided_slice %5 {offsets = [1, 0], sizes = [1, 256], strides = [1, 1]} : vector<4x256xf32> to vector<1x256xf32>
    %cst = arith.constant dense<0.000000e+00> : vector<128xf32>
    %8 = vector.multi_reduction <add>, %3, %cst [1] : vector<128x256xf32> to vector<128xf32>
    %9 = vector.shape_cast %8 : vector<128xf32> to vector<128x1xf32>
    %cst_5 = arith.constant 2.560000e+02 : f32
    %10 = vector.broadcast %cst_5 : f32 to vector<128x1xf32>
    %11 = arith.divf %9, %10 : vector<128x1xf32>
    %12 = vector.broadcast %11 : vector<128x1xf32> to vector<128x256xf32>
    %13 = arith.subf %3, %12 : vector<128x256xf32>
    %14 = arith.mulf %13, %13 : vector<128x256xf32>
    %cst_6 = arith.constant dense<0.000000e+00> : vector<128xf32>
    %15 = vector.multi_reduction <add>, %14, %cst_6 [1] : vector<128x256xf32> to vector<128xf32>
    %16 = vector.shape_cast %15 : vector<128xf32> to vector<128x1xf32>
    %cst_7 = arith.constant 2.560000e+02 : f32
    %17 = vector.broadcast %cst_7 : f32 to vector<128x1xf32>
    %18 = arith.divf %16, %17 : vector<128x1xf32>
    %19 = vector.broadcast %11 : vector<128x1xf32> to vector<128x256xf32>
    %20 = arith.subf %3, %19 : vector<128x256xf32>
    %cst_8 = arith.constant 9.99999974E-6 : f32
    %21 = vector.broadcast %cst_8 : f32 to vector<128x1xf32>
    %22 = arith.addf %18, %21 : vector<128x1xf32>
    %23 = math.rsqrt %22 : vector<128x1xf32>
    %24 = vector.broadcast %23 : vector<128x1xf32> to vector<128x256xf32>
    %25 = arith.mulf %20, %24 : vector<128x256xf32>
    %26 = vector.broadcast %6 : vector<1x256xf32> to vector<128x256xf32>
    %27 = arith.mulf %25, %26 : vector<128x256xf32>
    %28 = vector.broadcast %7 : vector<1x256xf32> to vector<128x256xf32>
    %29 = arith.addf %27, %28 : vector<128x256xf32>
    %c0_9 = arith.constant 0 : index
    %c0_10 = arith.constant 0 : index
    %c0_11 = arith.constant 0 : index
    %30 = vector.load %arg4[%c0_9, %c0_10, %c0_11] : memref<1x256x768xbf16, #tpu.memory_space<vmem>>, vector<1x256x768xbf16>
    %31 = vector.shape_cast %30 : vector<1x256x768xbf16> to vector<256x768xbf16>
    %32 = arith.truncf %29 : vector<128x256xf32> to vector<128x256xbf16>
    %cst_12 = arith.constant dense<0.000000e+00> : vector<128x768xf32>
    %33 = tpu.matmul %32, %31, %cst_12 {dimension_numbers = #tpu.dot_dimension_numbers<[1], [0], [0], [1], [0, 0, 1, 1], [], []>} : vector<128x256xbf16>, vector<256x768xbf16>, vector<128x768xf32> -> vector<128x768xf32>
    %c0_13 = arith.constant 0 : index
    %c0_14 = arith.constant 0 : index
    %c0_15 = arith.constant 0 : index
    %34 = vector.load %arg5[%c0_13, %c0_14, %c0_15] : memref<1x1x768xf32, #tpu.memory_space<vmem>>, vector<1x1x768xf32>
    %35 = vector.shape_cast %34 : vector<1x1x768xf32> to vector<1x768xf32>
    %36 = vector.broadcast %35 : vector<1x768xf32> to vector<128x768xf32>
    %37 = arith.addf %33, %36 : vector<128x768xf32>
    %38 = vector.extract_strided_slice %37 {offsets = [0, 0], sizes = [128, 256], strides = [1, 1]} : vector<128x768xf32> to vector<128x256xf32>
    %cst_16 = arith.constant 0.0883883461 : f32
    %39 = vector.broadcast %cst_16 : f32 to vector<128x256xf32>
    %40 = arith.mulf %38, %39 : vector<128x256xf32>
    %41 = vector.extract_strided_slice %40 {offsets = [0, 0], sizes = [128, 128], strides = [1, 1]} : vector<128x256xf32> to vector<128x128xf32>
    %42 = vector.shape_cast %41 : vector<128x128xf32> to vector<16x8x128xf32>
    %43 = vector.extract_strided_slice %40 {offsets = [0, 128], sizes = [128, 128], strides = [1, 1]} : vector<128x256xf32> to vector<128x128xf32>
    %44 = vector.shape_cast %43 : vector<128x128xf32> to vector<16x8x128xf32>
    %45 = tpu.concatenate %42, %44 in 0 : vector<16x8x128xf32>, vector<16x8x128xf32> -> vector<32x8x128xf32>
    %46 = arith.truncf %45 : vector<32x8x128xf32> to vector<32x8x128xbf16>
    %47 = vector.extract_strided_slice %37 {offsets = [0, 256], sizes = [128, 256], strides = [1, 1]} : vector<128x768xf32> to vector<128x256xf32>
    %48 = vector.extract_strided_slice %47 {offsets = [0, 0], sizes = [128, 128], strides = [1, 1]} : vector<128x256xf32> to vector<128x128xf32>
    %49 = vector.shape_cast %48 : vector<128x128xf32> to vector<16x8x128xf32>
    %50 = vector.extract_strided_slice %47 {offsets = [0, 128], sizes = [128, 128], strides = [1, 1]} : vector<128x256xf32> to vector<128x128xf32>
    %51 = vector.shape_cast %50 : vector<128x128xf32> to vector<16x8x128xf32>
    %52 = tpu.concatenate %49, %51 in 0 : vector<16x8x128xf32>, vector<16x8x128xf32> -> vector<32x8x128xf32>
    %53 = arith.truncf %52 : vector<32x8x128xf32> to vector<32x8x128xbf16>
    %54 = vector.extract_strided_slice %37 {offsets = [0, 512], sizes = [128, 256], strides = [1, 1]} : vector<128x768xf32> to vector<128x256xf32>
    %55 = vector.extract_strided_slice %54 {offsets = [0, 0], sizes = [128, 128], strides = [1, 1]} : vector<128x256xf32> to vector<128x128xf32>
    %56 = vector.shape_cast %55 : vector<128x128xf32> to vector<16x8x128xf32>
    %57 = vector.extract_strided_slice %54 {offsets = [0, 128], sizes = [128, 128], strides = [1, 1]} : vector<128x256xf32> to vector<128x128xf32>
    %58 = vector.shape_cast %57 : vector<128x128xf32> to vector<16x8x128xf32>
    %59 = tpu.concatenate %56, %58 in 0 : vector<16x8x128xf32>, vector<16x8x128xf32> -> vector<32x8x128xf32>
    %60 = arith.truncf %59 : vector<32x8x128xf32> to vector<32x8x128xbf16>
    %61 = tpu.iota {dimensions = array<i32: 0>} : vector<8x8xi32>
    %62 = tpu.iota {dimensions = array<i32: 1>} : vector<8x8xi32>
    %63 = arith.cmpi sge, %61, %62 : vector<8x8xi32>
    %cst_17 = arith.constant 0.000000e+00 : f32
    %cst_18 = arith.constant -1.000000e+09 : f32
    %64 = vector.broadcast %cst_17 : f32 to vector<8x8xf32>
    %65 = vector.broadcast %cst_18 : f32 to vector<8x8xf32>
    %66 = arith.select %63, %64, %65 : vector<8x8xi1>, vector<8x8xf32>
    "tpu.trace_start"() <{level = 10 : i32, message = "bld,bmd->blm"}> : () -> ()
    %cst_19 = arith.constant dense<0.000000e+00> : vector<32x8x8xf32>
    %67 = tpu.matmul %46, %53, %cst_19 {dimension_numbers = #tpu.dot_dimension_numbers<[2], [2], [1], [1], [0, 0, 0, 1, 1, 1], [0], [0]>} : vector<32x8x128xbf16>, vector<32x8x128xbf16>, vector<32x8x8xf32> -> vector<32x8x8xf32>
    "tpu.trace_stop"() : () -> ()
    %68 = vector.shape_cast %66 : vector<8x8xf32> to vector<1x8x8xf32>
    %69 = vector.broadcast %68 : vector<1x8x8xf32> to vector<32x8x8xf32>
    %70 = arith.addf %67, %69 : vector<32x8x8xf32>
    %cst_20 = arith.constant dense<0xFF800000> : vector<32x8xf32>
    %71 = vector.multi_reduction <maximumf>, %70, %cst_20 [2] : vector<32x8x8xf32> to vector<32x8xf32>
    %72 = vector.shape_cast %71 : vector<32x8xf32> to vector<32x8x1xf32>
    %73 = vector.broadcast %72 : vector<32x8x1xf32> to vector<32x8x8xf32>
    %74 = arith.subf %70, %73 : vector<32x8x8xf32>
    %75 = math.exp %74 : vector<32x8x8xf32>
    %cst_21 = arith.constant dense<0.000000e+00> : vector<32x8xf32>
    %76 = vector.multi_reduction <add>, %75, %cst_21 [2] : vector<32x8x8xf32> to vector<32x8xf32>
    %77 = vector.shape_cast %76 : vector<32x8xf32> to vector<32x8x1xf32>
    %78 = tpu.reciprocal %77 {approx = true} : vector<32x8x1xf32> -> vector<32x8x1xf32>
    %79 = vector.broadcast %78 : vector<32x8x1xf32> to vector<32x8x8xf32>
    %80 = arith.mulf %75, %79 : vector<32x8x8xf32>
    %81 = arith.truncf %80 : vector<32x8x8xf32> to vector<32x8x8xbf16>
    "tpu.trace_start"() <{level = 10 : i32, message = "blm,bmd->bld"}> : () -> ()
    %cst_22 = arith.constant dense<0.000000e+00> : vector<32x8x128xf32>
    %82 = tpu.matmul %81, %60, %cst_22 {dimension_numbers = #tpu.dot_dimension_numbers<[2], [1], [1], [2], [0, 0, 0, 1, 1, 2], [0], [0]>} : vector<32x8x8xbf16>, vector<32x8x128xbf16>, vector<32x8x128xf32> -> vector<32x8x128xf32>
    "tpu.trace_stop"() : () -> ()
    %83 = vector.extract_strided_slice %82 {offsets = [0, 0, 0], sizes = [16, 8, 128], strides = [1, 1, 1]} : vector<32x8x128xf32> to vector<16x8x128xf32>
    %84 = vector.shape_cast %83 : vector<16x8x128xf32> to vector<128x128xf32>
    %85 = vector.extract_strided_slice %82 {offsets = [16, 0, 0], sizes = [16, 8, 128], strides = [1, 1, 1]} : vector<32x8x128xf32> to vector<16x8x128xf32>
    %86 = vector.shape_cast %85 : vector<16x8x128xf32> to vector<128x128xf32>
    %87 = tpu.concatenate %84, %86 in 1 : vector<128x128xf32>, vector<128x128xf32> -> vector<128x256xf32>
    %c0_23 = arith.constant 0 : index
    %c0_24 = arith.constant 0 : index
    %c0_25 = arith.constant 0 : index
    %88 = vector.load %arg6[%c0_23, %c0_24, %c0_25] : memref<1x256x256xbf16, #tpu.memory_space<vmem>>, vector<1x256x256xbf16>
    %89 = vector.shape_cast %88 : vector<1x256x256xbf16> to vector<256x256xbf16>
    %90 = arith.truncf %87 : vector<128x256xf32> to vector<128x256xbf16>
    %cst_26 = arith.constant dense<0.000000e+00> : vector<128x256xf32>
    %91 = tpu.matmul %90, %89, %cst_26 {dimension_numbers = #tpu.dot_dimension_numbers<[1], [0], [0], [1], [0, 0, 1, 1], [], []>} : vector<128x256xbf16>, vector<256x256xbf16>, vector<128x256xf32> -> vector<128x256xf32>
    %92 = arith.addf %3, %91 : vector<128x256xf32>
    %c0_27 = arith.constant 0 : index
    %c0_28 = arith.constant 0 : index
    %c0_29 = arith.constant 0 : index
    %93 = vector.load %arg7[%c0_27, %c0_28, %c0_29] : memref<1x1x256xf32, #tpu.memory_space<vmem>>, vector<1x1x256xf32>
    %94 = vector.shape_cast %93 : vector<1x1x256xf32> to vector<1x256xf32>
    %95 = vector.broadcast %94 : vector<1x256xf32> to vector<128x256xf32>
    %96 = arith.addf %92, %95 : vector<128x256xf32>
    %97 = vector.extract_strided_slice %5 {offsets = [2, 0], sizes = [1, 256], strides = [1, 1]} : vector<4x256xf32> to vector<1x256xf32>
    %98 = vector.extract_strided_slice %5 {offsets = [3, 0], sizes = [1, 256], strides = [1, 1]} : vector<4x256xf32> to vector<1x256xf32>
    %cst_30 = arith.constant dense<0.000000e+00> : vector<128xf32>
    %99 = vector.multi_reduction <add>, %96, %cst_30 [1] : vector<128x256xf32> to vector<128xf32>
    %100 = vector.shape_cast %99 : vector<128xf32> to vector<128x1xf32>
    %cst_31 = arith.constant 2.560000e+02 : f32
    %101 = vector.broadcast %cst_31 : f32 to vector<128x1xf32>
    %102 = arith.divf %100, %101 : vector<128x1xf32>
    %103 = vector.broadcast %102 : vector<128x1xf32> to vector<128x256xf32>
    %104 = arith.subf %96, %103 : vector<128x256xf32>
    %105 = arith.mulf %104, %104 : vector<128x256xf32>
    %cst_32 = arith.constant dense<0.000000e+00> : vector<128xf32>
    %106 = vector.multi_reduction <add>, %105, %cst_32 [1] : vector<128x256xf32> to vector<128xf32>
    %107 = vector.shape_cast %106 : vector<128xf32> to vector<128x1xf32>
    %cst_33 = arith.constant 2.560000e+02 : f32
    %108 = vector.broadcast %cst_33 : f32 to vector<128x1xf32>
    %109 = arith.divf %107, %108 : vector<128x1xf32>
    %110 = vector.broadcast %102 : vector<128x1xf32> to vector<128x256xf32>
    %111 = arith.subf %96, %110 : vector<128x256xf32>
    %cst_34 = arith.constant 9.99999974E-6 : f32
    %112 = vector.broadcast %cst_34 : f32 to vector<128x1xf32>
    %113 = arith.addf %109, %112 : vector<128x1xf32>
    %114 = math.rsqrt %113 : vector<128x1xf32>
    %115 = vector.broadcast %114 : vector<128x1xf32> to vector<128x256xf32>
    %116 = arith.mulf %111, %115 : vector<128x256xf32>
    %117 = vector.broadcast %97 : vector<1x256xf32> to vector<128x256xf32>
    %118 = arith.mulf %116, %117 : vector<128x256xf32>
    %119 = vector.broadcast %98 : vector<1x256xf32> to vector<128x256xf32>
    %120 = arith.addf %118, %119 : vector<128x256xf32>
    %c0_35 = arith.constant 0 : index
    %c0_36 = arith.constant 0 : index
    %c0_37 = arith.constant 0 : index
    %121 = vector.load %arg9[%c0_35, %c0_36, %c0_37] : memref<1x256x1024xbf16, #tpu.memory_space<vmem>>, vector<1x256x1024xbf16>
    %122 = vector.shape_cast %121 : vector<1x256x1024xbf16> to vector<256x1024xbf16>
    %123 = arith.truncf %120 : vector<128x256xf32> to vector<128x256xbf16>
    %cst_38 = arith.constant dense<0.000000e+00> : vector<128x1024xf32>
    %124 = tpu.matmul %123, %122, %cst_38 {dimension_numbers = #tpu.dot_dimension_numbers<[1], [0], [0], [1], [0, 0, 1, 1], [], []>} : vector<128x256xbf16>, vector<256x1024xbf16>, vector<128x1024xf32> -> vector<128x1024xf32>
    %c0_39 = arith.constant 0 : index
    %c0_40 = arith.constant 0 : index
    %c0_41 = arith.constant 0 : index
    %125 = vector.load %arg10[%c0_39, %c0_40, %c0_41] : memref<1x1x1024xf32, #tpu.memory_space<vmem>>, vector<1x1x1024xf32>
    %126 = vector.shape_cast %125 : vector<1x1x1024xf32> to vector<1x1024xf32>
    %127 = vector.broadcast %126 : vector<1x1024xf32> to vector<128x1024xf32>
    %128 = arith.addf %124, %127 : vector<128x1024xf32>
    %cst_42 = arith.constant 1.702000e+00 : f32
    %129 = vector.broadcast %cst_42 : f32 to vector<128x1024xf32>
    %130 = arith.mulf %129, %128 : vector<128x1024xf32>
    %131 = arith.negf %130 : vector<128x1024xf32>
    %132 = math.exp %131 : vector<128x1024xf32>
    %cst_43 = arith.constant 1.000000e+00 : f32
    %133 = vector.broadcast %cst_43 : f32 to vector<128x1024xf32>
    %134 = arith.addf %133, %132 : vector<128x1024xf32>
    %135 = arith.divf %133, %134 : vector<128x1024xf32>
    %136 = arith.mulf %128, %135 : vector<128x1024xf32>
    %c0_44 = arith.constant 0 : index
    %c0_45 = arith.constant 0 : index
    %c0_46 = arith.constant 0 : index
    %137 = vector.load %arg11[%c0_44, %c0_45, %c0_46] : memref<1x1024x256xbf16, #tpu.memory_space<vmem>>, vector<1x1024x256xbf16>
    %138 = vector.shape_cast %137 : vector<1x1024x256xbf16> to vector<1024x256xbf16>
    %139 = arith.truncf %136 : vector<128x1024xf32> to vector<128x1024xbf16>
    %cst_47 = arith.constant dense<0.000000e+00> : vector<128x256xf32>
    %140 = tpu.matmul %139, %138, %cst_47 {dimension_numbers = #tpu.dot_dimension_numbers<[1], [0], [0], [1], [0, 0, 1, 1], [], []>} : vector<128x1024xbf16>, vector<1024x256xbf16>, vector<128x256xf32> -> vector<128x256xf32>
    %c0_48 = arith.constant 0 : index
    %c0_49 = arith.constant 0 : index
    %c0_50 = arith.constant 0 : index
    %141 = vector.load %arg12[%c0_48, %c0_49, %c0_50] : memref<1x1x256xf32, #tpu.memory_space<vmem>>, vector<1x1x256xf32>
    %142 = vector.shape_cast %141 : vector<1x1x256xf32> to vector<1x256xf32>
    %143 = vector.broadcast %142 : vector<1x256xf32> to vector<128x256xf32>
    %144 = arith.addf %140, %143 : vector<128x256xf32>
    %145 = arith.addf %96, %144 : vector<128x256xf32>
    %c0_51 = arith.constant 0 : index
    %c0_52 = arith.constant 0 : index
    %146 = vector.load %arg16[%c0_51, %c0_52] : memref<128x256xf32, #tpu.memory_space<vmem>>, vector<128x256xf32>
    tpu.vector_store %arg16[%c0_51, %c0_52], %145 {strides = array<i32>} : memref<128x256xf32, #tpu.memory_space<vmem>>, vector<128x256xf32>,
    %c3_i32 = arith.constant 3 : i32
    %147 = arith.cmpi eq, %arg1, %c3_i32 : i32
    %148 = arith.extui %147 : i1 to i32
    %c0_i32_53 = arith.constant 0 : i32
    %149 = arith.cmpi ne, %148, %c0_i32_53 : i32
    scf.if %149 {
      %150 = vector.shape_cast %145 : vector<128x256xf32> to vector<16x8x256xf32>
      %151 = tpu.iota {dimensions = array<i32: 1>} : vector<16x8x1xi32>
      %c0_54 = arith.constant 0 : index
      %c0_55 = arith.constant 0 : index
      %152 = vector.load %arg3[%c0_54, %c0_55] : memref<16x1xi32, #tpu.memory_space<vmem>>, vector<16x1xi32>
      %153 = vector.shape_cast %152 : vector<16x1xi32> to vector<16x1x1xi32>
      %154 = vector.broadcast %153 : vector<16x1x1xi32> to vector<16x8x1xi32>
      %155 = arith.cmpi eq, %151, %154 : vector<16x8x1xi32>
      %156 = arith.extui %155 : vector<16x8x1xi1> to vector<16x8x1xi32>
      %157 = arith.sitofp %156 : vector<16x8x1xi32> to vector<16x8x1xf32>
      %158 = vector.broadcast %157 : vector<16x8x1xf32> to vector<16x8x256xf32>
      %159 = arith.mulf %150, %158 : vector<16x8x256xf32>
      %cst_56 = arith.constant dense<0.000000e+00> : vector<16x256xf32>
      %160 = vector.multi_reduction <add>, %159, %cst_56 [1] : vector<16x8x256xf32> to vector<16x256xf32>
      %c0_57 = arith.constant 0 : index
      %c0_58 = arith.constant 0 : index
      %161 = vector.load %arg13[%c0_57, %c0_58] : memref<2x256xf32, #tpu.memory_space<vmem>>, vector<1x256xf32>
      %c1 = arith.constant 1 : index
      %c0_59 = arith.constant 0 : index
      %162 = vector.load %arg13[%c1, %c0_59] : memref<2x256xf32, #tpu.memory_space<vmem>>, vector<1x256xf32>
      %cst_60 = arith.constant dense<0.000000e+00> : vector<16xf32>
      %163 = vector.multi_reduction <add>, %160, %cst_60 [1] : vector<16x256xf32> to vector<16xf32>
      %164 = vector.shape_cast %163 : vector<16xf32> to vector<16x1xf32>
      %cst_61 = arith.constant 2.560000e+02 : f32
      %165 = vector.broadcast %cst_61 : f32 to vector<16x1xf32>
      %166 = arith.divf %164, %165 : vector<16x1xf32>
      %167 = vector.broadcast %166 : vector<16x1xf32> to vector<16x256xf32>
      %168 = arith.subf %160, %167 : vector<16x256xf32>
      %169 = arith.mulf %168, %168 : vector<16x256xf32>
      %cst_62 = arith.constant dense<0.000000e+00> : vector<16xf32>
      %170 = vector.multi_reduction <add>, %169, %cst_62 [1] : vector<16x256xf32> to vector<16xf32>
      %171 = vector.shape_cast %170 : vector<16xf32> to vector<16x1xf32>
      %cst_63 = arith.constant 2.560000e+02 : f32
      %172 = vector.broadcast %cst_63 : f32 to vector<16x1xf32>
      %173 = arith.divf %171, %172 : vector<16x1xf32>
      %174 = vector.broadcast %166 : vector<16x1xf32> to vector<16x256xf32>
      %175 = arith.subf %160, %174 : vector<16x256xf32>
      %cst_64 = arith.constant 9.99999974E-6 : f32
      %176 = vector.broadcast %cst_64 : f32 to vector<16x1xf32>
      %177 = arith.addf %173, %176 : vector<16x1xf32>
      %178 = math.rsqrt %177 : vector<16x1xf32>
      %179 = vector.broadcast %178 : vector<16x1xf32> to vector<16x256xf32>
      %180 = arith.mulf %175, %179 : vector<16x256xf32>
      %181 = vector.broadcast %161 : vector<1x256xf32> to vector<16x256xf32>
      %182 = arith.mulf %180, %181 : vector<16x256xf32>
      %183 = vector.broadcast %162 : vector<1x256xf32> to vector<16x256xf32>
      %184 = arith.addf %182, %183 : vector<16x256xf32>
      %c0_65 = arith.constant 0 : index
      %c0_66 = arith.constant 0 : index
      %185 = vector.load %arg14[%c0_65, %c0_66] : memref<256x128xbf16, #tpu.memory_space<vmem>>, vector<256x128xbf16>
      %186 = arith.truncf %184 : vector<16x256xf32> to vector<16x256xbf16>
      %cst_67 = arith.constant dense<0.000000e+00> : vector<16x128xf32>
      %187 = tpu.matmul %186, %185, %cst_67 {dimension_numbers = #tpu.dot_dimension_numbers<[1], [0], [0], [1], [0, 0, 1, 1], [], []>} : vector<16x256xbf16>, vector<256x128xbf16>, vector<16x128xf32> -> vector<16x128xf32>
      %c0_68 = arith.constant 0 : index
      %c0_69 = arith.constant 0 : index
      %188 = vector.load %arg15[%c0_68, %c0_69] : memref<16x128xf32, #tpu.memory_space<vmem>>, vector<16x128xf32>
      tpu.vector_store %arg15[%c0_68, %c0_69], %187 {strides = array<i32>} : memref<16x128xf32, #tpu.memory_space<vmem>>, vector<16x128xf32>,
    } else {
    }
    return
  }
  func.func @transform_0(%arg0: i32, %arg1: i32) -> (i32, i32, i32) {
    %c0_i32 = arith.constant 0 : i32
    %c0_i32_0 = arith.constant 0 : i32
    %c0_i32_1 = arith.constant 0 : i32
    return %arg0, %c0_i32, %c0_i32_0 : i32, i32, i32
  }
  func.func @transform_1(%arg0: i32, %arg1: i32) -> (i32, i32) {
    %c0_i32 = arith.constant 0 : i32
    %c0_i32_0 = arith.constant 0 : i32
    return %arg0, %c0_i32 : i32, i32
  }
  func.func @transform_2(%arg0: i32, %arg1: i32) -> (i32, i32, i32) {
    %c0_i32 = arith.constant 0 : i32
    %c0_i32_0 = arith.constant 0 : i32
    %c0_i32_1 = arith.constant 0 : i32
    return %arg1, %c0_i32, %c0_i32_0 : i32, i32, i32
  }
  func.func @transform_3(%arg0: i32, %arg1: i32) -> (i32, i32, i32) {
    %c0_i32 = arith.constant 0 : i32
    %c0_i32_0 = arith.constant 0 : i32
    %c0_i32_1 = arith.constant 0 : i32
    return %arg1, %c0_i32, %c0_i32_0 : i32, i32, i32
  }
  func.func @transform_4(%arg0: i32, %arg1: i32) -> (i32, i32, i32) {
    %c0_i32 = arith.constant 0 : i32
    %c0_i32_0 = arith.constant 0 : i32
    %c0_i32_1 = arith.constant 0 : i32
    return %arg1, %c0_i32, %c0_i32_0 : i32, i32, i32
  }
  func.func @transform_5(%arg0: i32, %arg1: i32) -> (i32, i32, i32) {
    %c0_i32 = arith.constant 0 : i32
    %c0_i32_0 = arith.constant 0 : i32
    %c0_i32_1 = arith.constant 0 : i32
    return %arg1, %c0_i32, %c0_i32_0 : i32, i32, i32
  }
  func.func @transform_6(%arg0: i32, %arg1: i32) -> (i32, i32, i32) {
    %c0_i32 = arith.constant 0 : i32
    %c0_i32_0 = arith.constant 0 : i32
    %c0_i32_1 = arith.constant 0 : i32
    return %arg1, %c0_i32, %c0_i32_0 : i32, i32, i32
  }
  func.func @transform_7(%arg0: i32, %arg1: i32) -> (i32, i32, i32) {
    %c0_i32 = arith.constant 0 : i32
    %c0_i32_0 = arith.constant 0 : i32
    %c0_i32_1 = arith.constant 0 : i32
    return %arg1, %c0_i32, %c0_i32_0 : i32, i32, i32
  }
  func.func @transform_8(%arg0: i32, %arg1: i32) -> (i32, i32, i32) {
    %c0_i32 = arith.constant 0 : i32
    %c0_i32_0 = arith.constant 0 : i32
    %c0_i32_1 = arith.constant 0 : i32
    return %arg1, %c0_i32, %c0_i32_0 : i32, i32, i32
  }
  func.func @transform_9(%arg0: i32, %arg1: i32) -> (i32, i32, i32) {
    %c0_i32 = arith.constant 0 : i32
    %c0_i32_0 = arith.constant 0 : i32
    %c0_i32_1 = arith.constant 0 : i32
    return %arg1, %c0_i32, %c0_i32_0 : i32, i32, i32
  }
  func.func @transform_10(%arg0: i32, %arg1: i32) -> (i32, i32, i32) {
    %c0_i32 = arith.constant 0 : i32
    %c0_i32_0 = arith.constant 0 : i32
    %c0_i32_1 = arith.constant 0 : i32
    return %arg1, %c0_i32, %c0_i32_0 : i32, i32, i32
  }
  func.func @transform_11(%arg0: i32, %arg1: i32) -> (i32, i32) {
    %c0_i32 = arith.constant 0 : i32
    %c0_i32_0 = arith.constant 0 : i32
    %c0_i32_1 = arith.constant 0 : i32
    return %c0_i32, %c0_i32_0 : i32, i32
  }
  func.func @transform_12(%arg0: i32, %arg1: i32) -> (i32, i32) {
    %c0_i32 = arith.constant 0 : i32
    %c0_i32_0 = arith.constant 0 : i32
    %c0_i32_1 = arith.constant 0 : i32
    return %c0_i32, %c0_i32_0 : i32, i32
  }
  func.func @transform_13(%arg0: i32, %arg1: i32) -> (i32, i32) {
    %c0_i32 = arith.constant 0 : i32
    %c0_i32_0 = arith.constant 0 : i32
    return %arg0, %c0_i32 : i32, i32
  }
}

</mosaic_0001>

<bundles_post_ra>
// kernel: tpu_custom_call.1
= control target key start
LH: loop header
LB: loop body
LE: loop exit
PB: predicated region body
PF: predicated region fallthrough
CT: control target
= control target key end

     0   :  { %s20277_s0 = inlined_call_operand.hbm [shape: f32[32,8,256], index: 0, kind: input, shape index: {}]   ;;  %s20278_s1 = inlined_call_operand.vmem [shape: s32[32,1], index: 1, kind: input, shape index: {}]   ;;  %s20279_s2 = inlined_call_operand.hbm [shape: bf16[4,256,768], index: 2, kind: input, shape index: {}]   ;;  %s20280_s3 = inlined_call_operand.hbm [shape: f32[4,1,768], index: 3, kind: input, shape index: {}]   ;;  %s20281_s4 = inlined_call_operand.hbm [shape: bf16[4,256,256], index: 4, kind: input, shape index: {}]   ;;  %s20282_s5 = inlined_call_operand.hbm [shape: f32[4,1,256], index: 5, kind: input, shape index: {}]   ;;  %s20283_s6 = inlined_call_operand.hbm [shape: f32[4,4,256], index: 6, kind: input, shape index: {}]   ;;  %s20284_s7 = inlined_call_operand.hbm [shape: bf16[4,256,1024], index: 7, kind: input, shape index: {}]   ;;  %s20285_s8 = inlined_call_operand.hbm [shape: f32[4,1,1024], index: 8, kind: input, shape index: {}]   ;;  %s20286_s9 = inlined_call_operand.hbm [shape: bf16[4,1024,256], index: 9, kind: input, shape index: {}]   ;;  %s20287_s10 = inlined_call_operand.hbm [shape: f32[4,1,256], index: 10, kind: input, shape index: {}]   ;;  %s20288_s11 = inlined_call_operand.hbm [shape: f32[2,256], index: 11, kind: input, shape index: {}]   ;;  %s20289_s12 = inlined_call_operand.hbm [shape: bf16[256,128], index: 12, kind: input, shape index: {}]   ;;  %s20290_s13 = inlined_call_operand.hbm [shape: f32[32,128], index: 13, kind: output, shape index: {}]  }
   0x1   :  { %20484 = sst [smem:[#allocation144_spill]] %s20277_s0 }
   0x2   :  { %20485 = sst [smem:[#allocation145_spill]] %s20278_s1 }
   0x3   :  { %20486 = sst [smem:[#allocation146_spill]] %s20279_s2 }
   0x4   :  { %20487 = sst [smem:[#allocation147_spill]] %s20280_s3 }
   0x5   :  { %20488 = sst [smem:[#allocation148_spill]] %s20281_s4 }
   0x6   :  { %20489 = sst [smem:[#allocation149_spill]] %s20282_s5 }
   0x7   :  { %20490 = sst [smem:[#allocation150_spill]] %s20283_s6 }
   0x8   :  { %20491 = sst [smem:[#allocation151_spill]] %s20284_s7 }
   0x9   :  { %20492 = sst [smem:[#allocation152_spill]] %s20285_s8 }
   0xa   :  { %20493 = sst [smem:[#allocation153_spill]] %s20286_s9 }
   0xb   :  { %20494 = sst [smem:[#allocation154_spill]] %s20287_s10 }
   0xc   :  { %20495 = sst [smem:[#allocation155_spill]] %s20288_s11 }
   0xd   :  { %20496 = sst [smem:[#allocation156_spill]] %s20289_s12 }
   0xe   :  { %20497 = sst [smem:[#allocation157_spill]] %s20290_s13 }
   0xf   :  { %18 = vsyncpa [#allocation4], 0 }
  0x10   :  { %20 = vsyncpa [#allocation4 + $0x1], 0 }
  0x11   :  { %21 = vsyncpa [#allocation7], 0 }
  0x12   :  { %23 = vsyncpa [#allocation7 + $0x1], 0 }
  0x13   :  { %24 = vsyncpa [#allocation10], 0 }
  0x14   :  { %26 = vsyncpa [#allocation10 + $0x1], 0 }
  0x15   :  { %27 = vsyncpa [#allocation13], 0 }
  0x16   :  { %29 = vsyncpa [#allocation13 + $0x1], 0 }
  0x17   :  { %30 = vsyncpa [#allocation16], 0 }
  0x18   :  { %32 = vsyncpa [#allocation16 + $0x1], 0 }
  0x19   :  { %33 = vsyncpa [#allocation19], 0 }
  0x1a   :  { %35 = vsyncpa [#allocation19 + $0x1], 0 }
  0x1b   :  { %36 = vsyncpa [#allocation22], 0 }
  0x1c   :  { %37 = vsyncpa [#allocation5], 0 }
  0x1d   :  { %39 = vsyncpa [#allocation5 + $0x1], 0  ;;  %s14863_s25 = smov 0   ;;  %s14865_s26 = smov 0  }
  0x1e   :  { %s14867_s27 = smov 0   ;;  %s14869_s28 = smov 0  }
  0x1f   :  { %s14871_s29 = smov 0   ;;  %s14873_s30 = smov 0  }
  0x20   :  { %s14875_s14 = smov 0   ;;  %s14877_s15 = smov 0  }
  0x21   :  { %s14879_s16 = smov 0   ;;  %s14881_s17 = smov 0  }
  0x22   :  { %s14883_s18 = smov 0  }
  0x23 LB: > { %20498 = sst [smem:[#allocation33_spill]] %s14724_s26  ;;  %s14917_s19 = sadd.s32 4294967295, %s14760_s18   ;;  %s14760_s18 = sphi %s14883_s18, %s45_s18   ;;  %s14756_s17 = sphi %s14881_s17, %s20962_s17   ;;  %s14752_s16 = sphi %s14879_s16, %s20969_s16   ;;  %s14748_s15 = sphi %s14877_s15, %s20960_s15   ;;  %s14744_s14 = sphi %s14875_s14, %s20968_s14   ;;  %s14740_s30 = sphi %s14873_s30, %s20967_s30   ;;  %s14736_s29 = sphi %s14871_s29, %s20966_s29   ;;  %s14732_s28 = sphi %s14869_s28, %s20965_s28   ;;  %s14728_s27 = sphi %s14867_s27, %s20964_s27   ;;  %s14724_s26 = sphi %s14865_s26, %s20963_s26   ;;  %s14720_s25 = sphi %s14863_s25, %s20959_s25  }
  0x24   : > { %20499 = sst [smem:[#allocation34_spill]] %s14732_s28  ;;  %s11575_s20 = sadd.s32 4294967294, %s14760_s18  }
  0x25   : > { %20500 = sst [smem:[#allocation35_spill]] %s14744_s14  ;;  %p20302_p0 = scmp.eq.s32.totalorder %s14760_s18, 0 }
  0x26   : > { %20501 = sst [smem:[#allocation36_spill]] %s14748_s15  ;;  %p77_p1 = scmp.ne.s32.totalorder %s14736_s29, %s14732_s28 }
  0x27   : > { %20502 = sst [smem:[#allocation37_spill]] %s14756_s17  ;;  %p20299_p2 = scmp.eq.s32.totalorder %s14917_s19, 0 }
  0x28   : > { %p123_p3 = scmp.ne.s32.totalorder %s14728_s27, %s14724_s26  ;;  %p129_p4 = scmp.ne.s32.totalorder %s14724_s26, %s14720_s25 }
  0x29   : > { %p14930_p5 = por %p20299_p2, %p77_p1  ;;  %p409_p9 = scmp.eq.s32.totalorder %s11575_s20, 7 }
  0x2a   : > { %p14937_p7 = por %p123_p3, %p20302_p0  ;;  %p14943_p8 = por %p129_p4, %p20299_p2 }
  0x2b   : > { %s20503_s22 = scalar_select %p14930_p5, 1, 0 }
  0x2c   : > { %s20506_s24 = scalar_select %p14943_p8, 1, 0 }
  0x2d   : > { %20504 = sst [smem:[#allocation38_spill]] %s20503_s22  ;;  %p11576_p10 = scmp.ge.s32.totalorder %s14760_s18, 1 }
  0x2e   : > { %20507 = sst [smem:[#allocation39_spill]] %s20506_s24  ;;  %p416_p11 = scmp.lt.s32.totalorder %s14760_s18, 9 }
  0x2f   : > { %p14949_p12 = por %p409_p9, %p77_p1  ;;  %s14762_s28 = smov [#allocation20]  }
  0x30   : > { %p14953_p13 = pnand %p11576_p10, %p416_p11  ;;  %s429_s13 = sshll.u32 %s14762_s28, 4  ;;  %s430_s13 = int_to_ptr.vmem [resolvable:$true] %s429_s13 }
  0x31   : > { %s20508_s25 = scalar_select %p14949_p12, 1, 0 }
  0x32   : > { %s20510_s21 = scalar_select %p14953_p13, 1, 0 }
  0x33   : > { %20509 = sst [smem:[#allocation40_spill]] %s20508_s25  ;;  %p12912_p3 = pneg %p14953_p13 }
  0x34   : > { %20511 = sst [smem:[#allocation41_spill]] %s20510_s21  ;;  %p20301_p4 = scmp.lt.s32.totalorder %s14760_s18, 8 }
  0x35   : > { %s14961_s14 = sand.u32 1, %s14760_s18   ;;  %p14965_p6 = pnand %p12912_p3, %p20299_p2 }
  0x36   : > { %p14973_p1 = pnand %p20301_p4, %p14937_p7  ;;  %s20514_s11 = sld [smem:[#allocation155_spill]] }
  0x37   : > { %s20512_s20 = scalar_select %p14965_p6, 1, 0 }
  0x38   : > { %s20513_s25 = scalar_select %p14973_p1, 1, 0 }
  0x39   : > { %p20309_p10 = pneg %p14965_p6 }
  0x3c   : > { %s14254_s15 = scalar_lea.hbm %s20514_s11, 64 }
  0x3d   : > { %p14255_p9 = scmp.ne.s32.totalorder %s20514_s11, %s14254_s15  ;;  %p14261_p7 = scmp.lt.u32.totalorder %s14254_s15, %s20514_s11 }
  0x3f   : > { %p14257_p11 = pnand %p20309_p10, %p14255_p9 }
  0x41   : > { %p14258_p3 = pneg %p14257_p11 }
  0x43   : > { %p14263_p2 = pnand %p14261_p7, %p14258_p3 }
  0x45   : > { %14266 = shalt.err (!%p14263_p2)
}
  0x46   : > { %s14267_s21 = scalar_lea.vmem %s430_s13, 64  ;;  %p14275_p8 = scmp.lt.s32.totalorder %s430_s13, %s430_s13 }
  0x47   : > { %p14268_p4 = scmp.ne.s32.totalorder %s430_s13, %s14267_s21  ;;  %p14276_p5 = scmp.lt.s32.totalorder %s14267_s21, %s14267_s21 }
  0x49   : > { %p14270_p0 = pnand %p14268_p4, %p20309_p10  ;;  %p14277_p13 = por %p14276_p5, %p14275_p8 }
  0x4b   : > { %p14271_p12 = pneg %p14270_p0 }
  0x4d   : > { %p14278_p1 = pnand %p14277_p13, %p14271_p12 }
  0x4f   : > { %14281 = shalt.err (!%p14278_p1)
}
  0x50   : > { %12915 = dma.hbm_to_vmem [thread:$0]  (!%p14965_p6), %s20514_s11, 64, %s430_s13, [#allocation19]  }
  0x51   : > { %s15000_s15 = sand.u32 1, %s14728_s27   ;;  %s12877_s22 = smul.u32 12288, %s14752_s16 }
  0x52   : > { %s12876_s24 = smul.u32 768, %s15000_s15  ;;  %s20515_s2 = sld [smem:[#allocation146_spill]] }
  0x53   : > { %s20315_s13 = scalar_lea.sflag [#allocation7], %s14961_s14  ;;  %p20516_p2 = scmp.ne.s32.totalorder %s20513_s25, 0 }
  0x54   : > { %s488_s1 = scalar_lea.vmem [#allocation6], %s12876_s24 }
  0x55   : > { %s495_s26 = sshll.u32 %s488_s1, 4  ;;  %p15017_p5 = pneg %p20516_p2  ;;  %s15010_s26 = int_to_ptr.vmem [resolvable:$true] %s495_s26 }
  0x57   : > { %s20517_s9 = scalar_select %p15017_p5, 1, 0 }
  0x58   : > { %s15007_s23 = scalar_lea.hbm %s20515_s2, %s12877_s22  ;;  %s14287_s24 = scalar_lea.hbm %s20515_s2, 49152 }
  0x59   : > { %s14282_s11 = scalar_lea.hbm %s15007_s23, 12288  ;;  %p14288_p13 = scmp.lt.u32.totalorder %s15007_s23, %s20515_s2 }
  0x5a   : > { %p14283_p0 = scmp.ne.s32.totalorder %s15007_s23, %s14282_s11  ;;  %p14289_p4 = scmp.lt.u32.totalorder %s14287_s24, %s14282_s11 }
  0x5b   : > { %p14291_p9 = scmp.lt.u32.totalorder %s14282_s11, %s15007_s23 }
  0x5c   : > { %p14285_p8 = pnand %p15017_p5, %p14283_p0  ;;  %p14290_p1 = por %p14289_p4, %p14288_p13 }
  0x5e   : > { %p14286_p12 = pneg %p14285_p8  ;;  %p14292_p11 = por %p14291_p9, %p14290_p1 }
  0x60   : > { %p14293_p3 = pnand %p14292_p11, %p14286_p12 }
  0x62   : > { %14296 = shalt.err (!%p14293_p3)
}
  0x63   : > { %s14297_s10 = scalar_lea.vmem %s15010_s26, 12288  ;;  %s14763_s22 = smov [#allocation6]  }
  0x64   : > { %p14298_p7 = scmp.ne.s32.totalorder %s15010_s26, %s14297_s10  ;;  %s14302_s21 = sshll.u32 %s14763_s22, 4  ;;  %s14303_s21 = int_to_ptr.vmem [resolvable:$false] %s14302_s21 }
  0x65   : > { %s14304_s28 = scalar_lea.vmem %s14303_s21, 24576  ;;  %p14305_p10 = scmp.lt.s32.totalorder %s15010_s26, %s14303_s21 }
  0x66   : > { %p14300_p0 = pnand %p14298_p7, %p15017_p5  ;;  %p14306_p6 = scmp.lt.s32.totalorder %s14304_s28, %s14297_s10 }
  0x68   : > { %p14301_p8 = pneg %p14300_p0  ;;  %p14307_p13 = por %p14306_p6, %p14305_p10 }
  0x6a   : > { %p14308_p4 = pnand %p14307_p13, %p14301_p8 }
  0x6c   : > { %14311 = shalt.err (!%p14308_p4)
}
  0x6d   : > { %s14764_s11 = smov 384   ;;  %s14765_s24 = smov 24  }
  0x6e   : > { %12925 = dma.hbm_to_vmem [thread:$0]  (!%p20516_p2), %s15007_s23, 12288, %s15010_s26, %s20315_s13, %s14764_s11, %s14764_s11, %s14765_s24  }
  0x6f   : > { %s12206_s1 = sshll.u32 %s14752_s16, 12  ;;  %s20518_s22 = sshll.u32 %s15000_s15, 8 }
  0x70   : > { %s528_s21 = scalar_lea.vmem [#allocation9], %s20518_s22  ;;  %s20519_s4 = sld [smem:[#allocation148_spill]] }
  0x71   : > { %s535_s10 = sshll.u32 %s528_s21, 4  ;;  %s20318_s5 = scalar_lea.sflag [#allocation10], %s14961_s14  ;;  %s15050_s10 = int_to_ptr.vmem [resolvable:$true] %s535_s10 }
  0x76   : > { %s15048_s7 = scalar_lea.hbm %s20519_s4, %s12206_s1  ;;  %s14317_s11 = scalar_lea.hbm %s20519_s4, 16384 }
  0x77   : > { %s14312_s3 = scalar_lea.hbm %s15048_s7, 4096  ;;  %p14318_p1 = scmp.lt.u32.totalorder %s15048_s7, %s20519_s4 }
  0x78   : > { %p14313_p6 = scmp.ne.s32.totalorder %s15048_s7, %s14312_s3  ;;  %p14319_p9 = scmp.lt.u32.totalorder %s14317_s11, %s14312_s3 }
  0x79   : > { %p14321_p3 = scmp.lt.u32.totalorder %s14312_s3, %s15048_s7 }
  0x7a   : > { %p14315_p10 = pnand %p14313_p6, %p15017_p5  ;;  %p14320_p11 = por %p14319_p9, %p14318_p1 }
  0x7c   : > { %p14316_p12 = pneg %p14315_p10  ;;  %p14322_p7 = por %p14321_p3, %p14320_p11 }
  0x7e   : > { %p14323_p0 = pnand %p14322_p7, %p14316_p12 }
  0x80   : > { %14326 = shalt.err (!%p14323_p0)
}
  0x81   : > { %s14327_s1 = scalar_lea.vmem %s15050_s10, 4096  ;;  %s14766_s22 = smov [#allocation9]  }
  0x82   : > { %p14328_p8 = scmp.ne.s32.totalorder %s15050_s10, %s14327_s1  ;;  %s14332_s21 = sshll.u32 %s14766_s22, 4  ;;  %s14333_s21 = int_to_ptr.vmem [resolvable:$false] %s14332_s21 }
  0x83   : > { %s14334_s28 = scalar_lea.vmem %s14333_s21, 8192  ;;  %p14335_p6 = scmp.lt.s32.totalorder %s15050_s10, %s14333_s21 }
  0x84   : > { %p14330_p13 = pnand %p14328_p8, %p15017_p5  ;;  %p14336_p10 = scmp.lt.s32.totalorder %s14334_s28, %s14327_s1 }
  0x86   : > { %p14331_p4 = pneg %p14330_p13  ;;  %p14337_p1 = por %p14336_p10, %p14335_p6 }
  0x88   : > { %p14338_p9 = pnand %p14337_p1, %p14331_p4 }
  0x8a   : > { %14341 = shalt.err (!%p14338_p9)
}
  0x8b   : > { %s20316_s3 = smov 128   ;;  %s20317_s23 = smov 8  }
  0x8c   : > { %12931 = dma.hbm_to_vmem [thread:$0]  (!%p20516_p2), %s15048_s7, 4096, %s15050_s10, %s20318_s5, %s20316_s3, %s20316_s3, %s20317_s23  }
  0x8d   : > { %s11592_s26 = sshll.u32 %s15000_s15, 3  ;;  %s12208_s11 = sshll.u32 %s14752_s16, 7 }
  0x8e   : > { %s20520_s6 = sld [smem:[#allocation150_spill]]  ;;  %s568_s22 = scalar_lea.vmem [#allocation12], %s11592_s26 }
  0x8f   : > { %s576_s21 = sshll.u32 %s568_s22, 4  ;;  %s20324_s28 = scalar_lea.sflag [#allocation13], %s14961_s14  ;;  %s577_s21 = int_to_ptr.vmem [resolvable:$true] %s576_s21 }
  0x94   : > { %s15086_s1 = scalar_lea.hbm %s20520_s6, %s12208_s11  ;;  %s14347_s24 = scalar_lea.hbm %s20520_s6, 512 }
  0x95   : > { %s14342_s13 = scalar_lea.hbm %s15086_s1, 128  ;;  %p14348_p7 = scmp.lt.u32.totalorder %s15086_s1, %s20520_s6 }
  0x96   : > { %p14343_p12 = scmp.ne.s32.totalorder %s15086_s1, %s14342_s13  ;;  %p14349_p0 = scmp.lt.u32.totalorder %s14347_s24, %s14342_s13 }
  0x97   : > { %p14351_p13 = scmp.lt.u32.totalorder %s14342_s13, %s15086_s1 }
  0x98   : > { %p14345_p11 = pnand %p14343_p12, %p15017_p5  ;;  %p14350_p8 = por %p14349_p0, %p14348_p7 }
  0x9a   : > { %p14346_p3 = pneg %p14345_p11  ;;  %p14352_p4 = por %p14351_p13, %p14350_p8 }
  0x9c   : > { %p14353_p6 = pnand %p14352_p4, %p14346_p3 }
  0x9e   : > { %14356 = shalt.err (!%p14353_p6)
}
  0x9f   : > { %s14357_s22 = scalar_lea.vmem %s577_s21, 128  ;;  %s14769_s23 = smov [#allocation12]  }
  0xa0   : > { %p14358_p10 = scmp.ne.s32.totalorder %s577_s21, %s14357_s22  ;;  %s14362_s5 = sshll.u32 %s14769_s23, 4  ;;  %s14363_s5 = int_to_ptr.vmem [resolvable:$false] %s14362_s5 }
  0xa1   : > { %s14364_s7 = scalar_lea.vmem %s14363_s5, 256  ;;  %p14365_p12 = scmp.lt.s32.totalorder %s577_s21, %s14363_s5 }
  0xa2   : > { %p14360_p1 = pnand %p14358_p10, %p15017_p5  ;;  %p14366_p11 = scmp.lt.s32.totalorder %s14364_s7, %s14357_s22 }
  0xa4   : > { %p14361_p9 = pneg %p14360_p1  ;;  %p14367_p2 = por %p14366_p11, %p14365_p12 }
  0xa6   : > { %p14368_p0 = pnand %p14367_p2, %p14361_p9 }
  0xa8   : > { %14371 = shalt.err (!%p14368_p0)
}
  0xa9   : > { %p20521_p7 = scmp.ne.s32.totalorder %s20513_s25, 0  ;;  %s20522_s8 = sld [smem:[#allocation152_spill]] }
  0xaa   : > { %s608_s5 = scalar_lea.vmem [#allocation15], %s11592_s26  ;;  %s14770_s24 = smov [#allocation21]  }
  0xab   : > { %12937 = dma.hbm_to_vmem [thread:$0]  (!%p20521_p7), %s15086_s1, 128, %s577_s21, %s20324_s28  }
  0xac   : > { %s616_s10 = sshll.u32 %s608_s5, 4  ;;  %s15121_s2 = sshll.u32 %s14770_s24, 4  ;;  %s15119_s10 = int_to_ptr.vmem [resolvable:$true] %s616_s10  ;;  %s440_s2 = int_to_ptr.vmem [resolvable:$true] %s15121_s2 }
  0xad   : > { %s20323_s22 = scalar_lea.sflag [#allocation16], %s14961_s14 }
  0xaf   : > { %s15115_s23 = scalar_lea.hbm %s20522_s8, %s12208_s11  ;;  %s14377_s7 = scalar_lea.hbm %s20522_s8, 512 }
  0xb0   : > { %s14372_s1 = scalar_lea.hbm %s15115_s23, 128  ;;  %p14378_p13 = scmp.lt.u32.totalorder %s15115_s23, %s20522_s8 }
  0xb1   : > { %p14373_p2 = scmp.ne.s32.totalorder %s15115_s23, %s14372_s1  ;;  %p14379_p4 = scmp.lt.u32.totalorder %s14377_s7, %s14372_s1 }
  0xb2   : > { %p14381_p10 = scmp.lt.u32.totalorder %s14372_s1, %s15115_s23 }
  0xb3   : > { %p14375_p3 = pnand %p14373_p2, %p15017_p5  ;;  %p14380_p6 = por %p14379_p4, %p14378_p13 }
  0xb5   : > { %p14376_p8 = pneg %p14375_p3  ;;  %p14382_p1 = por %p14381_p10, %p14380_p6 }
  0xb7   : > { %p14383_p9 = pnand %p14382_p1, %p14376_p8 }
  0xb9   : > { %14386 = shalt.err (!%p14383_p9)
}
  0xba   : > { %s14387_s26 = scalar_lea.vmem %s15119_s10, 128  ;;  %s14771_s5 = smov [#allocation15]  }
  0xbb   : > { %p14388_p12 = scmp.ne.s32.totalorder %s15119_s10, %s14387_s26  ;;  %s14392_s24 = sshll.u32 %s14771_s5, 4  ;;  %s14393_s24 = int_to_ptr.vmem [resolvable:$false] %s14392_s24 }
  0xbc   : > { %s14394_s11 = scalar_lea.vmem %s14393_s24, 256  ;;  %p14395_p2 = scmp.lt.s32.totalorder %s15119_s10, %s14393_s24 }
  0xbd   : > { %p14390_p11 = pnand %p14388_p12, %p15017_p5  ;;  %p14396_p3 = scmp.lt.s32.totalorder %s14394_s11, %s14387_s26 }
  0xbf   : > { %p14391_p0 = pneg %p14390_p11  ;;  %p14397_p13 = por %p14396_p3, %p14395_p2 }
  0xc1   : > { %p14398_p4 = pnand %p14397_p13, %p14391_p0 }
  0xc3   : > { %14401 = shalt.err (!%p14398_p4)
}
  0xc4   : > { %12943 = dma.hbm_to_vmem [thread:$0]  (!%p20521_p7), %s15115_s23, 128, %s15119_s10, %s20323_s22  }
  0xc5   : > { %s20523_s12 = sld [smem:[#allocation156_spill]]  ;;  %p20524_p6 = scmp.ne.s32.totalorder %s20512_s20, 0 }
  0xc7   : > { %p20525_p10 = pneg %p20524_p6 }
  0xcb   : > { %s14402_s7 = scalar_lea.hbm %s20523_s12, 2048 }
  0xcc   : > { %p14403_p8 = scmp.ne.s32.totalorder %s20523_s12, %s14402_s7  ;;  %p14409_p12 = scmp.lt.u32.totalorder %s14402_s7, %s20523_s12 }
  0xce   : > { %p14405_p1 = pnand %p14403_p8, %p20525_p10 }
  0xd0   : > { %p14406_p9 = pneg %p14405_p1 }
  0xd2   : > { %p14411_p11 = pnand %p14409_p12, %p14406_p9 }
  0xd4   : > { %14414 = shalt.err (!%p14411_p11)
}
  0xd5   : > { %s14415_s23 = scalar_lea.vmem %s440_s2, 2048  ;;  %p20526_p2 = pmov %p20525_p10 }
  0xd6   : > { %p14416_p0 = scmp.ne.s32.totalorder %s440_s2, %s14415_s23  ;;  %p14423_p4 = scmp.lt.s32.totalorder %s440_s2, %s440_s2 }
  0xd7   : > { %p14424_p7 = scmp.lt.s32.totalorder %s14415_s23, %s14415_s23 }
  0xd8   : > { %p14418_p3 = pnand %p14416_p0, %p20526_p2 }
  0xd9   : > { %p14425_p5 = por %p14424_p7, %p14423_p4 }
  0xda   : > { %p14419_p13 = pneg %p14418_p3 }
  0xdc   : > { %p14426_p8 = pnand %p14425_p5, %p14419_p13 }
  0xde   : > { %14429 = shalt.err (!%p14426_p8)
}
  0xdf   : > { %s14772_s10 = smov 64   ;;  %s14773_s24 = smov 4  }
  0xe0   : > { %12918 = dma.hbm_to_vmem [thread:$0]  (!%p20524_p6), %s20523_s12, 2048, %s440_s2, [#allocation22], %s14772_s10, %s14772_s10, %s14773_s24  }
  0xe1   : > { %s54_s21 = sadd.s32 1, %s14752_s16  ;;  %s57_s7 = sadd.s32 1, %s14756_s17 }
  0xe2   : > { %p55_p5 = scmp.ge.s32.totalorder %s54_s21, 4  ;;  %s64_s13 = sadd.s32 1, %s14740_s30 }
  0xe3   : > { %p71_p7 = scmp.ne.s32.totalorder %s14740_s30, %s14736_s29  ;;  %p20528_p10 = scmp.eq.s32.totalorder %s14760_s18, 0 }
  0xe4   : > { %s20971_s21 = smov (%p55_p5, %s54_s21), 0  ;;  %s20973_s7 = smov (!%p55_p5, %s57_s7), %s14756_s17 }
  0xe5   : > { %20527 = sst [smem:[#allocation42_spill]] %s20971_s21  ;;  %p15178_p1 = por %p20528_p10, %p71_p7 }
  0xe6   : > { %s113_s3 = ssub.s32 %s14752_s16, %s20971_s21  ;;  %p59_p6 = scmp.ge.s32.totalorder %s20973_s7, 2 }
  0xe7   : > { %p114_p9 = scmp.eq.s32.totalorder %s113_s3, 0  ;;  %p20530_p12 = scmp.eq.s32.totalorder %s14917_s19, 7 }
  0xe8   : > { %s453_s26 = sand.u32 1, %s14740_s30   ;;  %s20975_s7 = smov (%p59_p6, %s20973_s7), 0 }
  0xe9   : > { %p15186_p11 = por %p20530_p12, %p71_p7  ;;  %20532 = sst [smem:[#allocation43_spill]] %s20975_s7 }
  0xea   : > { %s20533_s5 = sadd.s32 1, %s14728_s27  ;;  %s61_s10 = ssub.s32 %s14756_s17, %s20975_s7 }
  0xeb   : > { %s20531_s2 = scalar_select %p15186_p11, 1, 0 }
  0xec   : > { %s15196_s23 = scalar_select %p114_p9, %s14728_s27, %s20533_s5  }
  0xed   : > { %p62_p0 = scmp.eq.s32.totalorder %s61_s10, 0  ;;  %s11580_s24 = sshll.u32 %s453_s26, 8 }
  0xee   : > { %s12205_s11 = sshll.u32 %s14756_s17, 12  ;;  %s20534_s0 = sld [smem:[#allocation144_spill]] }
  0xef   : > { %s15202_s1 = scalar_select %p62_p0, %s14740_s30, %s64_s13  }
  0xf0   : > { %s457_s4 = scalar_lea.vmem [#allocation3], %s11580_s24  ;;  %p20535_p2 = scmp.lt.s32.totalorder %s14760_s18, 8 }
  0xf1   : > { %s465_s6 = sshll.u32 %s457_s4, 4  ;;  %s12878_s13 = smul.u32 6, %s15000_s15  ;;  %s15209_s6 = int_to_ptr.vmem [resolvable:$true] %s465_s6 }
  0xf2   : > { %p15215_p3 = pnand %p20535_p2, %p15178_p1  ;;  %s15220_s22 = scalar_lea.sflag [#allocation4], %s453_s26 }
  0xf4   : > { %s15207_s28 = scalar_lea.hbm %s20534_s0, %s12205_s11  ;;  %p14432_p4 = pneg %p15215_p3 }
  0xf5   : > { %s14430_s10 = scalar_lea.hbm %s15207_s28, 4096  ;;  %s14435_s24 = scalar_lea.hbm %s20534_s0, 8192 }
  0xf6   : > { %p14431_p13 = scmp.ne.s32.totalorder %s15207_s28, %s14430_s10  ;;  %p14436_p7 = scmp.lt.u32.totalorder %s15207_s28, %s20534_s0 }
  0xf7   : > { %p14437_p10 = scmp.lt.u32.totalorder %s14435_s24, %s14430_s10  ;;  %p14439_p6 = scmp.lt.u32.totalorder %s14430_s10, %s15207_s28 }
  0xf8   : > { %p14433_p8 = pnand %p14432_p4, %p14431_p13 }
  0xf9   : > { %p14438_p1 = por %p14437_p10, %p14436_p7 }
  0xfa   : > { %p14434_p5 = pneg %p14433_p8 }
  0xfb   : > { %p14440_p9 = por %p14439_p6, %p14438_p1 }
  0xfd   : > { %p14441_p12 = pnand %p14440_p9, %p14434_p5 }
  0xff   : > { %14444 = shalt.err (!%p14441_p12)
}
 0x100   : > { %s14445_s26 = scalar_lea.vmem %s15209_s6, 4096  ;;  %s14774_s4 = smov [#allocation3]  }
 0x101   : > { %p14446_p0 = scmp.ne.s32.totalorder %s15209_s6, %s14445_s26  ;;  %s14450_s20 = sshll.u32 %s14774_s4, 4  ;;  %s14451_s20 = int_to_ptr.vmem [resolvable:$false] %s14450_s20 }
 0x102   : > { %s14452_s11 = scalar_lea.vmem %s14451_s20, 8192  ;;  %p14453_p8 = scmp.lt.s32.totalorder %s15209_s6, %s14451_s20 }
 0x103   : > { %p14448_p2 = pnand %p14446_p0, %p14432_p4  ;;  %p14454_p7 = scmp.lt.s32.totalorder %s14452_s11, %s14445_s26 }
 0x105   : > { %p14449_p13 = pneg %p14448_p2  ;;  %p14455_p10 = por %p14454_p7, %p14453_p8 }
 0x107   : > { %p14456_p1 = pnand %p14455_p10, %p14449_p13 }
 0x109   : > { %14459 = shalt.err (!%p14456_p1)
}
 0x10a   : > { %s14775_s10 = smov 256   ;;  %s14776_s24 = smov 16  }
 0x10b   : > { %12922 = dma.hbm_to_vmem [thread:$0]  (!%p15215_p3), %s15207_s28, 4096, %s15209_s6, %s15220_s22, %s14775_s10, %s14775_s10, %s14776_s24  }
 0x10c   : > { %s12879_s3 = smul.u32 96, %s14752_s16  ;;  %s509_s4 = scalar_lea.vmem [#allocation8], %s12878_s13 }
 0x10d   : > { %s517_s20 = sshll.u32 %s509_s4, 4  ;;  %s20329_s26 = sshll.u32 %s15000_s15, 1  ;;  %s518_s20 = int_to_ptr.vmem [resolvable:$true] %s517_s20 }
 0x10e   : > { %s20537_s8 = sld [smem:[#allocation147_spill]]  ;;  %p20538_p5 = scmp.ne.s32.totalorder %s20517_s9, 0 }
 0x114   : > { %s515_s12 = scalar_lea.hbm %s20537_s8, %s12879_s3  ;;  %s14465_s5 = scalar_lea.hbm %s20537_s8, 384 }
 0x115   : > { %s14460_s7 = scalar_lea.hbm %s515_s12, 96  ;;  %p14466_p3 = scmp.lt.u32.totalorder %s515_s12, %s20537_s8 }
 0x116   : > { %p14461_p4 = scmp.ne.s32.totalorder %s515_s12, %s14460_s7  ;;  %p14467_p12 = scmp.lt.u32.totalorder %s14465_s5, %s14460_s7 }
 0x117   : > { %p14469_p2 = scmp.lt.u32.totalorder %s14460_s7, %s515_s12 }
 0x118   : > { %p14463_p6 = pnand %p14461_p4, %p20538_p5  ;;  %p14468_p0 = por %p14467_p12, %p14466_p3 }
 0x11a   : > { %p14464_p9 = pneg %p14463_p6  ;;  %p14470_p13 = por %p14469_p2, %p14468_p0 }
 0x11c   : > { %p14471_p8 = pnand %p14470_p13, %p14464_p9 }
 0x11e   : > { %14474 = shalt.err (!%p14471_p8)
}
 0x11f   : > { %s14475_s0 = scalar_lea.vmem %s518_s20, 96  ;;  %s14777_s13 = smov [#allocation8]  }
 0x120   : > { %p14476_p7 = scmp.ne.s32.totalorder %s518_s20, %s14475_s0  ;;  %s14480_s22 = sshll.u32 %s14777_s13, 4  ;;  %s14481_s22 = int_to_ptr.vmem [resolvable:$false] %s14480_s22 }
 0x121   : > { %s14482_s17 = scalar_lea.vmem %s14481_s22, 192  ;;  %p14483_p4 = scmp.lt.s32.totalorder %s518_s20, %s14481_s22 }
 0x122   : > { %p14478_p10 = pnand %p14476_p7, %p20538_p5  ;;  %p14484_p6 = scmp.lt.s32.totalorder %s14482_s17, %s14475_s0 }
 0x124   : > { %p14479_p1 = pneg %p14478_p10  ;;  %p14485_p11 = por %p14484_p6, %p14483_p4 }
 0x126   : > { %p14486_p3 = pnand %p14485_p11, %p14479_p1 }
 0x128   : > { %14489 = shalt.err (!%p14486_p3)
}
 0x129   : > { %p20539_p12 = scmp.ne.s32.totalorder %s20513_s25, 0  ;;  %s20540_s21 = scalar_lea.sflag [#allocation7], %s14961_s14 }
 0x12a   : > { %s12207_s7 = sshll.u32 %s14752_s16, 5  ;;  %s20541_s3 = sld [smem:[#allocation149_spill]] }
 0x12b   : > { %12928 = dma.hbm_to_vmem [thread:$0]  (!%p20539_p12), %s515_s12, 96, %s518_s20, %s20540_s21  }
 0x12c   : > { %s549_s11 = scalar_lea.vmem [#allocation11], %s20329_s26  ;;  %s11595_s6 = sshll.u32 %s15000_s15, 10 }
 0x12d   : > { %s557_s5 = sshll.u32 %s549_s11, 4  ;;  %s558_s5 = int_to_ptr.vmem [resolvable:$true] %s557_s5 }
 0x130   : > { %s15275_s4 = scalar_lea.hbm %s20541_s3, %s12207_s7  ;;  %s14495_s0 = scalar_lea.hbm %s20541_s3, 128 }
 0x131   : > { %s14490_s28 = scalar_lea.hbm %s15275_s4, 32  ;;  %p14496_p2 = scmp.lt.u32.totalorder %s15275_s4, %s20541_s3 }
 0x132   : > { %p14491_p11 = scmp.ne.s32.totalorder %s15275_s4, %s14490_s28  ;;  %p14497_p13 = scmp.lt.u32.totalorder %s14495_s0, %s14490_s28 }
 0x133   : > { %p14499_p7 = scmp.lt.u32.totalorder %s14490_s28, %s15275_s4 }
 0x134   : > { %p14493_p9 = pnand %p14491_p11, %p20538_p5  ;;  %p14498_p8 = por %p14497_p13, %p14496_p2 }
 0x136   : > { %p14494_p0 = pneg %p14493_p9  ;;  %p14500_p10 = por %p14499_p7, %p14498_p8 }
 0x138   : > { %p14501_p1 = pnand %p14500_p10, %p14494_p0 }
 0x13a   : > { %14504 = shalt.err (!%p14501_p1)
}
 0x13b   : > { %s14505_s17 = scalar_lea.vmem %s558_s5, 32  ;;  %s14778_s21 = smov [#allocation11]  }
 0x13c   : > { %p14506_p4 = scmp.ne.s32.totalorder %s558_s5, %s14505_s17  ;;  %s14510_s10 = sshll.u32 %s14778_s21, 4  ;;  %s14511_s10 = int_to_ptr.vmem [resolvable:$false] %s14510_s10 }
 0x13d   : > { %s14512_s24 = scalar_lea.vmem %s14511_s10, 64  ;;  %p14513_p11 = scmp.lt.s32.totalorder %s558_s5, %s14511_s10 }
 0x13e   : > { %p14508_p6 = pnand %p14506_p4, %p20538_p5  ;;  %p14514_p9 = scmp.lt.s32.totalorder %s14512_s24, %s14505_s17 }
 0x140   : > { %p14509_p3 = pneg %p14508_p6  ;;  %p14515_p12 = por %p14514_p9, %p14513_p11 }
 0x142   : > { %p14516_p2 = pnand %p14515_p12, %p14509_p3 }
 0x144   : > { %14519 = shalt.err (!%p14516_p2)
}
 0x145   : > { %p20542_p13 = scmp.ne.s32.totalorder %s20513_s25, 0  ;;  %s20543_s11 = scalar_lea.sflag [#allocation10], %s14961_s14 }
 0x146   : > { %s12209_s28 = sshll.u32 %s14752_s16, 14  ;;  %s20544_s0 = sld [smem:[#allocation151_spill]] }
 0x147   : > { %12934 = dma.hbm_to_vmem [thread:$0]  (!%p20542_p13), %s15275_s4, 32, %s558_s5, %s20543_s11  }
 0x148   : > { %s587_s22 = scalar_lea.vmem [#allocation14], %s11595_s6 }
 0x149   : > { %s594_s17 = sshll.u32 %s587_s22, 4  ;;  %s15309_s17 = int_to_ptr.vmem [resolvable:$true] %s594_s17 }
 0x14c   : > { %s15305_s13 = scalar_lea.hbm %s20544_s0, %s12209_s28  ;;  %s14525_s10 = scalar_lea.hbm %s20544_s0, 65536 }
 0x14d   : > { %s14520_s21 = scalar_lea.hbm %s15305_s13, 16384  ;;  %p14526_p7 = scmp.lt.u32.totalorder %s15305_s13, %s20544_s0 }
 0x14e   : > { %p14521_p12 = scmp.ne.s32.totalorder %s15305_s13, %s14520_s21  ;;  %p14527_p10 = scmp.lt.u32.totalorder %s14525_s10, %s14520_s21 }
 0x14f   : > { %p14529_p4 = scmp.lt.u32.totalorder %s14520_s21, %s15305_s13 }
 0x150   : > { %p14523_p0 = pnand %p14521_p12, %p20538_p5  ;;  %p14528_p1 = por %p14527_p10, %p14526_p7 }
 0x152   : > { %p14524_p8 = pneg %p14523_p0  ;;  %p14530_p6 = por %p14529_p4, %p14528_p1 }
 0x154   : > { %p14531_p3 = pnand %p14530_p6, %p14524_p8 }
 0x156   : > { %14534 = shalt.err (!%p14531_p3)
}
 0x157   : > { %s14535_s12 = scalar_lea.vmem %s15309_s17, 16384  ;;  %s14779_s20 = smov [#allocation14]  }
 0x158   : > { %p14536_p11 = scmp.ne.s32.totalorder %s15309_s17, %s14535_s12  ;;  %s14540_s22 = sshll.u32 %s14779_s20, 4  ;;  %s14541_s22 = int_to_ptr.vmem [resolvable:$false] %s14540_s22 }
 0x159   : > { %s14542_s4 = scalar_lea.vmem %s14541_s22, 32768  ;;  %p14543_p12 = scmp.lt.s32.totalorder %s15309_s17, %s14541_s22 }
 0x15a   : > { %p14538_p9 = pnand %p14536_p11, %p20538_p5  ;;  %p14544_p0 = scmp.lt.s32.totalorder %s14542_s4, %s14535_s12 }
 0x15c   : > { %p14539_p2 = pneg %p14538_p9  ;;  %p14545_p7 = por %p14544_p0, %p14543_p12 }
 0x15e   : > { %p14546_p10 = pnand %p14545_p7, %p14539_p2 }
 0x160   : > { %14549 = shalt.err (!%p14546_p10)
}
 0x161   : > { %s14780_s21 = smov 512   ;;  %s14781_s5 = smov 32  }
 0x162   : > { %s20545_s10 = scalar_lea.sflag [#allocation13], %s14961_s14  ;;  %s20546_s20 = sld [smem:[#allocation153_spill]] }
 0x163   : > { %12940 = dma.hbm_to_vmem [thread:$0]  (!%p20542_p13), %s15305_s13, 16384, %s15309_s17, %s20545_s10, %s14780_s21, %s14780_s21, %s14781_s5  }
 0x164   : > { %s627_s22 = scalar_lea.vmem [#allocation17], %s11595_s6 }
 0x165   : > { %s634_s4 = sshll.u32 %s627_s22, 4  ;;  %s15343_s4 = int_to_ptr.vmem [resolvable:$true] %s634_s4 }
 0x168   : > { %s15339_s12 = scalar_lea.hbm %s20546_s20, %s12209_s28  ;;  %s14555_s21 = scalar_lea.hbm %s20546_s20, 65536 }
 0x169   : > { %s14550_s26 = scalar_lea.hbm %s15339_s12, 16384  ;;  %p14556_p6 = scmp.lt.u32.totalorder %s15339_s12, %s20546_s20 }
 0x16a   : > { %p14551_p8 = scmp.ne.s32.totalorder %s15339_s12, %s14550_s26  ;;  %p14557_p3 = scmp.lt.u32.totalorder %s14555_s21, %s14550_s26 }
 0x16b   : > { %p14559_p9 = scmp.lt.u32.totalorder %s14550_s26, %s15339_s12 }
 0x16c   : > { %p14553_p1 = pnand %p14551_p8, %p20538_p5  ;;  %p14558_p11 = por %p14557_p3, %p14556_p6 }
 0x16e   : > { %p14554_p4 = pneg %p14553_p1  ;;  %p14560_p2 = por %p14559_p9, %p14558_p11 }
 0x170   : > { %p14561_p12 = pnand %p14560_p2, %p14554_p4 }
 0x172   : > { %14564 = shalt.err (!%p14561_p12)
}
 0x173   : > { %s14565_s6 = scalar_lea.vmem %s15343_s4, 16384  ;;  %s14782_s10 = smov [#allocation17]  }
 0x174   : > { %p14566_p0 = scmp.ne.s32.totalorder %s15343_s4, %s14565_s6  ;;  %s14570_s24 = sshll.u32 %s14782_s10, 4  ;;  %s14571_s24 = int_to_ptr.vmem [resolvable:$false] %s14570_s24 }
 0x175   : > { %s14572_s11 = scalar_lea.vmem %s14571_s24, 32768  ;;  %p14573_p8 = scmp.lt.s32.totalorder %s15343_s4, %s14571_s24 }
 0x176   : > { %p14568_p7 = pnand %p14566_p0, %p20538_p5  ;;  %p14574_p1 = scmp.lt.s32.totalorder %s14572_s11, %s14565_s6 }
 0x178   : > { %p14569_p10 = pneg %p14568_p7  ;;  %p14575_p6 = por %p14574_p1, %p14573_p8 }
 0x17a   : > { %p14576_p3 = pnand %p14575_p6, %p14569_p10 }
 0x17c   : > { %14579 = shalt.err (!%p14576_p3)
}
 0x17d   : > { %s20547_s26 = smov 8   ;;  %s20548_s22 = smov 128  }
 0x17e   : > { %s20549_s13 = scalar_lea.sflag [#allocation16], %s14961_s14  ;;  %s20550_s28 = sld [smem:[#allocation154_spill]] }
 0x17f   : > { %12946 = dma.hbm_to_vmem [thread:$0]  (!%p20542_p13), %s15339_s12, 16384, %s15343_s4, %s20549_s13, %s20548_s22, %s20548_s22, %s20547_s26  }
 0x180   : > { %s20552_s10 = sshll.u32 %s15000_s15, 1  ;;  %s645_s0 = scalar_lea.sflag [#allocation19], %s14961_s14 }
 0x181   : > { %s648_s24 = scalar_lea.vmem [#allocation18], %s20552_s10 }
 0x182   : > { %s656_s11 = sshll.u32 %s648_s24, 4  ;;  %s657_s11 = int_to_ptr.vmem [resolvable:$true] %s656_s11 }
 0x184   : > { %s20551_s5 = smov %s20550_s28  ;;  %s15376_s6 = scalar_lea.hbm %s20550_s28, %s12207_s7 }
 0x185   : > { %s14580_s3 = scalar_lea.hbm %s15376_s6, 32  ;;  %s14585_s26 = scalar_lea.hbm %s20551_s5, 128 }
 0x186   : > { %p14581_p4 = scmp.ne.s32.totalorder %s15376_s6, %s14580_s3  ;;  %p14586_p2 = scmp.lt.u32.totalorder %s15376_s6, %s20551_s5 }
 0x187   : > { %p14587_p12 = scmp.lt.u32.totalorder %s14585_s26, %s14580_s3  ;;  %p14589_p7 = scmp.lt.u32.totalorder %s14580_s3, %s15376_s6 }
 0x188   : > { %p14583_p11 = pnand %p14581_p4, %p20538_p5 }
 0x189   : > { %p14588_p0 = por %p14587_p12, %p14586_p2 }
 0x18a   : > { %p14584_p9 = pneg %p14583_p11 }
 0x18b   : > { %p14590_p10 = por %p14589_p7, %p14588_p0 }
 0x18d   : > { %p14591_p8 = pnand %p14590_p10, %p14584_p9 }
 0x18f   : > { %14594 = shalt.err (!%p14591_p8)
}
 0x190   : > { %s14595_s14 = scalar_lea.vmem %s657_s11, 32  ;;  %s14783_s15 = smov [#allocation18]  }
 0x191   : > { %p14596_p1 = scmp.ne.s32.totalorder %s657_s11, %s14595_s14  ;;  %s14600_s13 = sshll.u32 %s14783_s15, 4  ;;  %s14601_s13 = int_to_ptr.vmem [resolvable:$false] %s14600_s13 }
 0x192   : > { %s14602_s17 = scalar_lea.vmem %s14601_s13, 64  ;;  %p14603_p4 = scmp.lt.s32.totalorder %s657_s11, %s14601_s13 }
 0x193   : > { %p14598_p6 = pnand %p14596_p1, %p20538_p5  ;;  %p14604_p11 = scmp.lt.s32.totalorder %s14602_s17, %s14595_s14 }
 0x195   : > { %p14599_p3 = pneg %p14598_p6  ;;  %p14605_p13 = por %p14604_p11, %p14603_p4 }
 0x197   : > { %p14606_p2 = pnand %p14605_p13, %p14599_p3 }
 0x199   : > { %14609 = shalt.err (!%p14606_p2)
}
 0x19a   : > { %p20553_p12 = scmp.ne.s32.totalorder %s20513_s25, 0  ;;  %s20554_s3 = sld [smem:[#allocation41_spill]] }
 0x19c   : > { %12949 = dma.hbm_to_vmem [thread:$0]  (!%p20553_p12), %s15376_s6, 32, %s657_s11, %s645_s0  }
 0x1a0   : > { %p20555_p9 = scmp.ne.s32.totalorder %s20554_s3, 0 }
 0x1a2   : > { %665 = sbr.rel (%p20555_p9) target bundleno = 4145 (0x1031), region = 72 }
 0x1a9   : > { %s20556_s9 = sld [smem:[#allocation38_spill]]  ;;  %s15401_s21 = sand.u32 1, %s14736_s29  }
 0x1aa   : > { %s11608_s28 = sshll.u32 %s15401_s21, 8  ;;  %s668_s10 = scalar_lea.sflag [#allocation4], %s15401_s21 }
 0x1ab   : > { %s15405_s24 = scalar_lea.vmem [#allocation3], %s11608_s28 }
 0x1af   : > { %p20557_p5 = scmp.ne.s32.totalorder %s20556_s9, 0 }
 0x1b1   : > { %14683 = dma.done.wait (%p20557_p5), %s668_s10, 4096  }
 0x1b2   : > { %14685 = vsyncadd (%p20557_p5), %s668_s10, 4294963200  ;;  %s20558_s25 = sld [smem:[#allocation33_spill]]  ;;  %s15412_s6 = sand.u32 1, %s14917_s19  }
 0x1b3   : > { %s20559_s0 = sld [smem:[#allocation39_spill]]  ;;  %s677_s4 = scalar_lea.sflag [#allocation7], %s15412_s6 }
 0x1b8   : > { %s678_s11 = sand.u32 1, %s20558_s25  }
 0x1b9   : > { %s12880_s12 = smul.u32 768, %s678_s11  ;;  %p20560_p13 = scmp.ne.s32.totalorder %s20559_s0, 0 }
 0x1bb   : > { %s15416_s26 = scalar_lea.vmem [#allocation6], %s12880_s12 }
 0x1bc   : > { %14687 = dma.done.wait (%p20560_p13), %s677_s4, 12384  }
 0x1bd   : > { %14689 = vsyncadd (%p20560_p13), %s677_s4, 4294954912  ;;  %s12881_s7 = smul.u32 6, %s678_s11  ;;  %s11609_s22 = sshll.u32 %s678_s11, 8 }
 0x1be   : > { %s695_s15 = scalar_lea.sflag [#allocation10], %s15412_s6  ;;  %s15425_s13 = scalar_lea.vmem [#allocation9], %s11609_s22 }
 0x1bf   : > { %s15422_s14 = scalar_lea.vmem [#allocation8], %s12881_s7 }
 0x1c0   : > { %14691 = dma.done.wait (%p20560_p13), %s695_s15, 4128  }
 0x1c1   : > { %14693 = vsyncadd (%p20560_p13), %s695_s15, 4294963168  ;;  %s11610_s17 = sshll.u32 %s678_s11, 1  ;;  %s11611_s3 = sshll.u32 %s678_s11, 3 }
 0x1c2   : > { %s15431_s9 = scalar_lea.vmem [#allocation11], %s11610_s17  ;;  %s713_s28 = scalar_lea.sflag [#allocation13], %s15412_s6 }
 0x1c3   : > { %s15434_s10 = scalar_lea.vmem [#allocation12], %s11611_s3 }
 0x1c4   : > { %14695 = dma.done.wait (%p20560_p13), %s713_s28, 16512  }
 0x1c5   : > { %14697 = vsyncadd (%p20560_p13), %s713_s28, 4294950784  ;;  %s11612_s25 = sshll.u32 %s678_s11, 10  ;;  %s731_s4 = scalar_lea.sflag [#allocation16], %s15412_s6 }
 0x1c6   : > { %s15440_s12 = scalar_lea.vmem [#allocation14], %s11612_s25  ;;  %s15443_s7 = scalar_lea.vmem [#allocation15], %s11611_s3 }
 0x1c7   : > { %14699 = dma.done.wait (%p20560_p13), %s731_s4, 16512  }
 0x1c8   : > { %14701 = vsyncadd (%p20560_p13), %s731_s4, 4294950784  ;;  %s15449_s22 = scalar_lea.vmem [#allocation17], %s11612_s25  ;;  %s749_s15 = scalar_lea.sflag [#allocation19], %s15412_s6 }
 0x1c9   : > { %s15452_s5 = scalar_lea.vmem [#allocation18], %s11610_s17 }
 0x1ca   : > { %14703 = dma.done.wait (%p20560_p13), %s749_s15, 32  }
 0x1cb   : > { %14705 = vsyncadd (%p20560_p13), %s749_s15, 4294967264  ;;  %p20561_p0 = scmp.eq.s32.totalorder %s14917_s19, 0 }
 0x1cd   : > { %14707 = dma.done.wait (%p20561_p0), [#allocation19], 64   ;;  %p20562_p7 = pmov %p20561_p0 }
 0x1ce   : > { %p20563_p10 = pmov %p20561_p0 }
 0x1cf   : > { %14709 = vsyncadd (%p20562_p7), [#allocation19], 4294967232 }
 0x1d0   : > { %14711 = dma.done.wait (%p20563_p10), [#allocation22], 2048   ;;  %p20564_p8 = pmov %p20561_p0 }
 0x1d1   : > { %s20565_s6 = sld [smem:[#allocation36_spill]]  ;;  %s11618_s11 = sshll.u32 %s15401_s21, 4 }
 0x1d2   : > { %14713 = vsyncadd (%p20564_p8), [#allocation22], 4294965248  ;;  %s20566_s25 = sld [smem:[#allocation145_spill]]  ;;  %s15473_s15 = scalar_lea.vmem [#allocation23], %s11618_s11 }
 0x1d3   : > { %s20567_s8 = sld [smem:[#allocation35_spill]] }
 0x1d7   : > { %s11619_s17 = sshll.u32 %s20565_s6, 1 }
 0x1d8   : > { %p855_p1 = scmp.lt.s32.totalorder %s11619_s17, 3 }
 0x1d9   : > { %p11621_p6 = scmp.ne.s32.totalorder %s20567_s8, 0 }
 0x1da   : > { %s20977_s17 = smov (!%p855_p1, %s11619_s17), 3  ;;  %v866_v0 = vld [vmem:[%s15405_s24] sm:$0xff] (!%p11621_p6)  ;;  %v867_v1 = vld [vmem:[%s15405_s24 + $0x8] sm:$0xff] (!%p11621_p6)  ;;  %v868_v2 = vld [vmem:[%s15405_s24 + $0x10] sm:$0xff] (!%p11621_p6) }
 0x1db   : > { %s11620_s0 = sshll.u32 %s20977_s17, 3  ;;  %865 = sbr.rel (%p11621_p6) target bundleno = 491 (0x1eb), region = 124  ;;  %898 = vst [vmem:[#allocation2] sm:$0xff] (!%p11621_p6), %v866_v0  ;;  %899 = vst [vmem:[#allocation2 + $0x8] sm:$0xff] (!%p11621_p6), %v867_v1  ;;  %v869_v3 = vld [vmem:[%s15405_s24 + $0x18] sm:$0xff] (!%p11621_p6)  ;;  %v870_v4 = vld [vmem:[%s15405_s24 + $0x20] sm:$0xff] (!%p11621_p6) }
 0x1dc   : > { %s15471_s4 = scalar_lea.vmem %s20566_s25, %s11620_s0  ;;  %900 = vst [vmem:[#allocation2 + $0x10] sm:$0xff] (!%p11621_p6), %v868_v2  ;;  %v871_v5 = vld [vmem:[%s15405_s24 + $0x28] sm:$0xff] (!%p11621_p6)  ;;  %901 = vst [vmem:[#allocation2 + $0x18] sm:$0xff] (!%p11621_p6), %v869_v3  ;;  %v872_v6 = vld [vmem:[%s15405_s24 + $0x30] sm:$0xff] (!%p11621_p6) }
 0x1dd   : > { %902 = vst [vmem:[#allocation2 + $0x20] sm:$0xff] (!%p11621_p6), %v870_v4  ;;  %903 = vst [vmem:[#allocation2 + $0x28] sm:$0xff] (!%p11621_p6), %v871_v5  ;;  %v873_v7 = vld [vmem:[%s15405_s24 + $0x38] sm:$0xff] (!%p11621_p6)  ;;  %v874_v8 = vld [vmem:[%s15405_s24 + $0x40] sm:$0xff] (!%p11621_p6) }
 0x1de   : > { %904 = vst [vmem:[#allocation2 + $0x30] sm:$0xff] (!%p11621_p6), %v872_v6  ;;  %905 = vst [vmem:[#allocation2 + $0x38] sm:$0xff] (!%p11621_p6), %v873_v7  ;;  %v875_v9 = vld [vmem:[%s15405_s24 + $0x48] sm:$0xff] (!%p11621_p6)  ;;  %v876_v10 = vld [vmem:[%s15405_s24 + $0x50] sm:$0xff] (!%p11621_p6) }
 0x1df   : > { %906 = vst [vmem:[#allocation2 + $0x40] sm:$0xff] (!%p11621_p6), %v874_v8  ;;  %v877_v11 = vld [vmem:[%s15405_s24 + $0x58] sm:$0xff] (!%p11621_p6)  ;;  %907 = vst [vmem:[#allocation2 + $0x48] sm:$0xff] (!%p11621_p6), %v875_v9  ;;  %v878_v12 = vld [vmem:[%s15405_s24 + $0x60] sm:$0xff] (!%p11621_p6) }
 0x1e0   : > { %908 = vst [vmem:[#allocation2 + $0x50] sm:$0xff] (!%p11621_p6), %v876_v10  ;;  %909 = vst [vmem:[#allocation2 + $0x58] sm:$0xff] (!%p11621_p6), %v877_v11  ;;  %v879_v13 = vld [vmem:[%s15405_s24 + $0x68] sm:$0xff] (!%p11621_p6)  ;;  %v880_v14 = vld [vmem:[%s15405_s24 + $0x70] sm:$0xff] (!%p11621_p6) }
 0x1e1   : > { %910 = vst [vmem:[#allocation2 + $0x60] sm:$0xff] (!%p11621_p6), %v878_v12  ;;  %911 = vst [vmem:[#allocation2 + $0x68] sm:$0xff] (!%p11621_p6), %v879_v13  ;;  %v881_v15 = vld [vmem:[%s15405_s24 + $0x78] sm:$0xff] (!%p11621_p6)  ;;  %v882_v16 = vld [vmem:[%s15405_s24 + $0x80] sm:$0xff] (!%p11621_p6) }
 0x1e2   : > { %912 = vst [vmem:[#allocation2 + $0x70] sm:$0xff] %v880_v14  ;;  %v883_v17 = vld [vmem:[%s15405_s24 + $0x88] sm:$0xff]  ;;  %913 = vst [vmem:[#allocation2 + $0x78] sm:$0xff] %v881_v15  ;;  %v884_v18 = vld [vmem:[%s15405_s24 + $0x90] sm:$0xff] }
 0x1e3   : > { %914 = vst [vmem:[#allocation2 + $0x80] sm:$0xff] %v882_v16  ;;  %915 = vst [vmem:[#allocation2 + $0x88] sm:$0xff] %v883_v17  ;;  %v885_v19 = vld [vmem:[%s15405_s24 + $0x98] sm:$0xff]  ;;  %v886_v20 = vld [vmem:[%s15405_s24 + $0xa0] sm:$0xff] }
 0x1e4   : > { %916 = vst [vmem:[#allocation2 + $0x90] sm:$0xff] %v884_v18  ;;  %917 = vst [vmem:[#allocation2 + $0x98] sm:$0xff] %v885_v19  ;;  %v887_v21 = vld [vmem:[%s15405_s24 + $0xa8] sm:$0xff]  ;;  %v888_v22 = vld [vmem:[%s15405_s24 + $0xb0] sm:$0xff] }
 0x1e5   : > { %918 = vst [vmem:[#allocation2 + $0xa0] sm:$0xff] %v886_v20  ;;  %v889_v23 = vld [vmem:[%s15405_s24 + $0xb8] sm:$0xff]  ;;  %919 = vst [vmem:[#allocation2 + $0xa8] sm:$0xff] %v887_v21  ;;  %v890_v24 = vld [vmem:[%s15405_s24 + $0xc0] sm:$0xff] }
 0x1e6   : > { %920 = vst [vmem:[#allocation2 + $0xb0] sm:$0xff] %v888_v22  ;;  %921 = vst [vmem:[#allocation2 + $0xb8] sm:$0xff] %v889_v23  ;;  %v891_v25 = vld [vmem:[%s15405_s24 + $0xc8] sm:$0xff]  ;;  %v892_v26 = vld [vmem:[%s15405_s24 + $0xd0] sm:$0xff] }
 0x1e7   : > { %922 = vst [vmem:[#allocation2 + $0xc0] sm:$0xff] %v890_v24  ;;  %923 = vst [vmem:[#allocation2 + $0xc8] sm:$0xff] %v891_v25  ;;  %v893_v27 = vld [vmem:[%s15405_s24 + $0xd8] sm:$0xff]  ;;  %v894_v28 = vld [vmem:[%s15405_s24 + $0xe0] sm:$0xff] }
 0x1e8   : > { %924 = vst [vmem:[#allocation2 + $0xd0] sm:$0xff] %v892_v26  ;;  %v895_v29 = vld [vmem:[%s15405_s24 + $0xe8] sm:$0xff]  ;;  %925 = vst [vmem:[#allocation2 + $0xd8] sm:$0xff] %v893_v27  ;;  %v896_v30 = vld [vmem:[%s15405_s24 + $0xf0] sm:$0xff] }
 0x1e9   : > { %926 = vst [vmem:[#allocation2 + $0xe0] sm:$0xff] %v894_v28  ;;  %927 = vst [vmem:[#allocation2 + $0xe8] sm:$0xff] %v895_v29  ;;  %v897_v31 = vld [vmem:[%s15405_s24 + $0xf8] sm:$0xff] }
 0x1ea   : > { %928 = vst [vmem:[#allocation2 + $0xf0] sm:$0xff] %v896_v30  ;;  %929 = vst [vmem:[#allocation2 + $0xf8] sm:$0xff] %v897_v31 }
 0x1eb PF: > { %v15508_v32 = vld [vmem:[#allocation2] sm:$0xff]  ;;  %v15510_v33 = vld [vmem:[#allocation2 + $0x8] sm:$0xff]  ;;  %v15558_v57 = vld [vmem:[#allocation2 + $0x90] sm:$0xff]  ;;  %vm14785_vm0 = vmmov 0   ;;  %vm4086_vm1 = vcmask 1043456   ;;  %vm3698_vm3 = vcmask 64512  }
 0x1ec   : > { %v963_v35 = vadd.f32 %v15510_v33, %v15508_v32  ;;  %v15518_v37 = vld [vmem:[#allocation2 + $0x10] sm:$0xff]  ;;  %v15520_v38 = vld [vmem:[#allocation2 + $0x18] sm:$0xff]  ;;  %v15552_v54 = vld [vmem:[#allocation2 + $0x80] sm:$0xff]  ;;  %s20935_s8 = sld [smem:[#allocation35_spill]] }
 0x1ed   : > { %v15512_v34 = vld [vmem:[#allocation2 + $0x20] sm:$0xff]  ;;  %v15516_v36 = vld [vmem:[#allocation2 + $0x28] sm:$0xff]  ;;  %v966_v42 = vadd.f32 %v15520_v38, %v15518_v37  ;;  %v15560_v58 = vld [vmem:[#allocation2 + $0x98] sm:$0xff] }
 0x1ee   : > { %v969_v39 = vadd.f32 %v15516_v36, %v15512_v34  ;;  %v15524_v40 = vld [vmem:[#allocation2 + $0x30] sm:$0xff]  ;;  %v15526_v41 = vld [vmem:[#allocation2 + $0x38] sm:$0xff]  ;;  %964 = vadd.xlane.f32.xlu0 %v963_v35  ;;  %v15554_v55 = vld [vmem:[#allocation2 + $0x88] sm:$0xff]  ;;  %v990_v1 = vadd.f32 %v15560_v58, %v15558_v57 }
 0x1ef   : > { %v972_v43 = vadd.f32 %v15526_v41, %v15524_v40  ;;  %v15532_v44 = vld [vmem:[#allocation2 + $0x40] sm:$0xff]  ;;  %v15534_v45 = vld [vmem:[#allocation2 + $0x48] sm:$0xff]  ;;  %v987_v62 = vadd.f32 %v15554_v55, %v15552_v54  ;;  %v15570_v63 = vld [vmem:[#allocation2 + $0xb0] sm:$0xff] }
 0x1f0   : > { %970 = vadd.xlane.f32.xlu1 %v969_v39  ;;  %v15536_v46 = vld [vmem:[#allocation2 + $0x50] sm:$0xff]  ;;  %v15538_v47 = vld [vmem:[#allocation2 + $0x58] sm:$0xff]  ;;  %v975_v48 = vadd.f32 %v15534_v45, %v15532_v44  ;;  %v15564_v60 = vld [vmem:[#allocation2 + $0xa0] sm:$0xff] }
 0x1f1   : > { %v978_v49 = vadd.f32 %v15538_v47, %v15536_v46  ;;  %v15544_v50 = vld [vmem:[#allocation2 + $0x60] sm:$0xff]  ;;  %v15546_v51 = vld [vmem:[#allocation2 + $0x68] sm:$0xff]  ;;  %v15572_v0 = vld [vmem:[#allocation2 + $0xb8] sm:$0xff] }
 0x1f2   : > { %967 = vadd.xlane.f32.xlu0 %v966_v42  ;;  %v15548_v52 = vld [vmem:[#allocation2 + $0x70] sm:$0xff]  ;;  %v15550_v53 = vld [vmem:[#allocation2 + $0x78] sm:$0xff]  ;;  %v981_v56 = vadd.f32 %v15546_v51, %v15544_v50  ;;  %v15566_v61 = vld [vmem:[#allocation2 + $0xa8] sm:$0xff]  ;;  %v996_v7 = vadd.f32 %v15572_v0, %v15570_v63  ;;  %p12166_p3 = scmp.ne.s32.totalorder %s20935_s8, 3 }
 0x1f3   : > { %v984_v59 = vadd.f32 %v15550_v53, %v15548_v52  ;;  %v15576_v2 = vld [vmem:[#allocation2 + $0xc0] sm:$0xff]  ;;  %v15578_v3 = vld [vmem:[#allocation2 + $0xc8] sm:$0xff]  ;;  %v993_v4 = vadd.f32 %v15566_v61, %v15564_v60  ;;  %v15582_v5 = vld [vmem:[#allocation2 + $0xd0] sm:$0xff] }
 0x1f4   : > { %973 = vadd.xlane.f32.xlu1 %v972_v43  ;;  %v15584_v6 = vld [vmem:[#allocation2 + $0xd8] sm:$0xff]  ;;  %v15588_v8 = vld [vmem:[#allocation2 + $0xe0] sm:$0xff]  ;;  %v15590_v9 = vld [vmem:[#allocation2 + $0xe8] sm:$0xff]  ;;  %v999_v10 = vadd.f32 %v15578_v3, %v15576_v2 }
 0x1f5   : > { %v15594_v11 = vld [vmem:[#allocation2 + $0xf0] sm:$0xff]  ;;  %v15596_v12 = vld [vmem:[#allocation2 + $0xf8] sm:$0xff]  ;;  %v1002_v13 = vadd.f32 %v15584_v6, %v15582_v5  ;;  %v1005_v14 = vadd.f32 %v15590_v9, %v15588_v8 }
 0x1f6   : > { %976 = vadd.xlane.f32.xlu0 %v975_v48  ;;  %v1008_v15 = vadd.f32 %v15596_v12, %v15594_v11  ;;  %v13068_v16 = vld [vmem:[%s15416_s26 + $0x4] ss:$24 sps:$4 sm:$0xff]   ;;  %v13070_v17 = vld [vmem:[%s15416_s26] ss:$24 sps:$4 sm:$0xff]   ;;  %v13071_v18 = vld [vmem:[%s15416_s26 + $0x34] ss:$24 sps:$4 sm:$0xff]  }
 0x1f7   : > { %1945 = vmatprep.subr.bf16.mxu0 %v13068_v16  ;;  %v13073_v19 = vld [vmem:[%s15416_s26 + $0x30] ss:$24 sps:$4 sm:$0xff]   ;;  %v13074_v20 = vld [vmem:[%s15416_s26 + $0x64] ss:$24 sps:$4 sm:$0xff]   ;;  %v13076_v21 = vld [vmem:[%s15416_s26 + $0x60] ss:$24 sps:$4 sm:$0xff]  }
 0x1f8   : > { %979 = vadd.xlane.f32.xlu1 %v978_v49  ;;  %1946 = vmatpush1.bf16.msra.mxu0 %v13070_v17  ;;  %v13077_v22 = vld [vmem:[%s15416_s26 + $0x94] ss:$24 sps:$4 sm:$0xff]   ;;  %v13079_v23 = vld [vmem:[%s15416_s26 + $0x90] ss:$24 sps:$4 sm:$0xff]   ;;  %v13080_v24 = vld [vmem:[%s15416_s26 + $0xc4] ss:$24 sps:$4 sm:$0xff]  }
 0x1f9   : > { %1947 = vmatprep.subr.bf16.mxu0 %v13071_v18  ;;  %v13082_v25 = vld [vmem:[%s15416_s26 + $0xc0] ss:$24 sps:$4 sm:$0xff]   ;;  %v13083_v26 = vld [vmem:[%s15416_s26 + $0xf4] ss:$24 sps:$4 sm:$0xff]   ;;  %v13085_v27 = vld [vmem:[%s15416_s26 + $0xf0] ss:$24 sps:$4 sm:$0xff]  }
 0x1fa   : > { %982 = vadd.xlane.f32.xlu0 %v981_v56  ;;  %v13086_v28 = vld [vmem:[%s15416_s26 + $0x124] ss:$24 sps:$4 sm:$0xff]   ;;  %v13088_v29 = vld [vmem:[%s15416_s26 + $0x120] ss:$24 sps:$4 sm:$0xff]   ;;  %v13089_v30 = vld [vmem:[%s15416_s26 + $0x154] ss:$24 sps:$4 sm:$0xff]  }
 0x1fb   : > { %v13091_v31 = vld [vmem:[%s15416_s26 + $0x150] ss:$24 sps:$4 sm:$0xff]   ;;  %v13092_v35 = vld [vmem:[%s15416_s26 + $0x184] ss:$24 sps:$4 sm:$0xff]   ;;  %v13094_v39 = vld [vmem:[%s15416_s26 + $0x180] ss:$24 sps:$4 sm:$0xff]  }
 0x1fc   : > { %985 = vadd.xlane.f32.xlu1 %v984_v59  ;;  %1948 = vmatpush1.bf16.msra.mxu0 %v13073_v19 }
 0x1fd   : > { %1949 = vmatprep.subr.bf16.mxu0 %v13074_v20 }
 0x1fe   : > { %988 = vadd.xlane.f32.xlu0 %v987_v62 }
 0x200   : > { %991 = vadd.xlane.f32.xlu1 %v990_v1  ;;  %1950 = vmatpush1.bf16.msra.mxu0 %v13076_v21 }
 0x201   : > { %1951 = vmatprep.subr.bf16.mxu0 %v13077_v22 }
 0x202   : > { %994 = vadd.xlane.f32.xlu0 %v993_v4 }
 0x204   : > { %997 = vadd.xlane.f32.xlu1 %v996_v7  ;;  %1952 = vmatpush1.bf16.msra.mxu0 %v13079_v23 }
 0x205   : > { %1953 = vmatprep.subr.bf16.mxu0 %v13080_v24 }
 0x206   : > { %1000 = vadd.xlane.f32.xlu0 %v999_v10 }
 0x208   : > { %1003 = vadd.xlane.f32.xlu1 %v1002_v13  ;;  %1954 = vmatpush1.bf16.msra.mxu0 %v13082_v25 }
 0x209   : > { %1955 = vmatprep.subr.bf16.mxu0 %v13083_v26 }
 0x20a   : > { %1006 = vadd.xlane.f32.xlu0 %v1005_v14 }
 0x20c   : > { %1009 = vadd.xlane.f32.xlu1 %v1008_v15  ;;  %1956 = vmatpush1.bf16.msra.mxu0 %v13085_v27 }
 0x20d   : > { %1957 = vmatprep.subr.bf16.mxu0 %v13086_v28 }
 0x210   : > { %1958 = vmatpush1.bf16.msra.mxu0 %v13088_v29 }
 0x211   : > { %1959 = vmatprep.subr.bf16.mxu0 %v13089_v30 }
 0x214   : > { %1960 = vmatpush1.bf16.msra.mxu0 %v13091_v31 }
 0x215   : > { %1961 = vmatprep.subr.bf16.mxu0 %v13092_v35 }
 0x218   : > { %1962 = vmatpush1.bf16.msra.mxu0 %v13094_v39 }
 0x27b   : > { %v965_v42 = vpop.xlane.xlu0 %964 }
 0x27c   : > { %v1012_v43 = vmul.f32 0.00390625, %v965_v42 }
 0x27d   : > { %v971_v48 = vpop.xlane.xlu1 %970 }
 0x27e   : > { %v1014_v49 = vmul.f32 0.00390625, %v971_v48  ;;  %v15623_v56 = vsub.f32 %v15508_v32, %v1012_v43  ;;  %v15626_v59 = vsub.f32 %v15510_v33, %v1012_v43 }
 0x27f   : > { %v968_v4 = vpop.xlane.xlu0 %967 }
 0x280   : > { %v15629_v62 = vsub.f32 %v15512_v34, %v1014_v49  ;;  %v15632_v1 = vsub.f32 %v15516_v36, %v1014_v49  ;;  %v1013_v7 = vmul.f32 0.00390625, %v968_v4  ;;  %v1060_v13 = vmul.f32 %v15623_v56, %v15623_v56 }
 0x281   : > { %v974_v10 = vpop.xlane.xlu1 %973  ;;  %v1061_v14 = vmul.f32 %v15626_v59, %v15626_v59 }
 0x282   : > { %v1015_v32 = vmul.f32 0.00390625, %v974_v10  ;;  %v1064_v33 = vmul.f32 %v15629_v62, %v15629_v62  ;;  %v1065_v34 = vmul.f32 %v15632_v1, %v15632_v1  ;;  %v15643_v15 = vsub.f32 %v15518_v37, %v1013_v7 }
 0x283   : > { %v15646_v36 = vsub.f32 %v15520_v38, %v1013_v7  ;;  %v1092_v16 = vadd.f32 %v1061_v14, %v1060_v13  ;;  %v977_v19 = vpop.xlane.xlu0 %976 }
 0x284   : > { %v15649_v17 = vsub.f32 %v15524_v40, %v1015_v32  ;;  %v15652_v18 = vsub.f32 %v15526_v41, %v1015_v32  ;;  %v1016_v20 = vmul.f32 0.00390625, %v977_v19  ;;  %v1098_v22 = vadd.f32 %v1065_v34, %v1064_v33 }
 0x285   : > { %1093 = vadd.xlane.f32.xlu0 %v1092_v16  ;;  %v980_v21 = vpop.xlane.xlu1 %979  ;;  %v1062_v23 = vmul.f32 %v15643_v15, %v15643_v15  ;;  %v1063_v37 = vmul.f32 %v15646_v36, %v15646_v36 }
 0x286   : > { %v1017_v38 = vmul.f32 0.00390625, %v980_v21  ;;  %v1066_v24 = vmul.f32 %v15649_v17, %v15649_v17  ;;  %v1067_v40 = vmul.f32 %v15652_v18, %v15652_v18  ;;  %v15663_v41 = vsub.f32 %v15532_v44, %v1016_v20 }
 0x287   : > { %v15666_v25 = vsub.f32 %v15534_v45, %v1016_v20  ;;  %v1095_v26 = vadd.f32 %v1063_v37, %v1062_v23  ;;  %v983_v29 = vpop.xlane.xlu0 %982 }
 0x288   : > { %v15669_v27 = vsub.f32 %v15536_v46, %v1017_v38  ;;  %v15672_v28 = vsub.f32 %v15538_v47, %v1017_v38  ;;  %v1018_v30 = vmul.f32 0.00390625, %v983_v29  ;;  %v1101_v35 = vadd.f32 %v1067_v40, %v1066_v24  ;;  %v13095_v38 = vld [vmem:[%s15416_s26 + $0x1b4] ss:$24 sps:$4 sm:$0xff]   ;;  %v13097_v40 = vld [vmem:[%s15416_s26 + $0x1b0] ss:$24 sps:$4 sm:$0xff]  }
 0x289   : > { %1099 = vadd.xlane.f32.xlu0 %v1098_v22  ;;  %1096 = vadd.xlane.f32.xlu1 %v1095_v26  ;;  %v986_v31 = vpop.xlane.xlu1 %985  ;;  %v1068_v44 = vmul.f32 %v15663_v41, %v15663_v41  ;;  %v1069_v45 = vmul.f32 %v15666_v25, %v15666_v25 }
 0x28a   : > { %v1019_v39 = vmul.f32 0.00390625, %v986_v31  ;;  %v1070_v46 = vmul.f32 %v15669_v27, %v15669_v27  ;;  %v1071_v47 = vmul.f32 %v15672_v28, %v15672_v28  ;;  %v15683_v42 = vsub.f32 %v15544_v50, %v1018_v30  ;;  %1963 = vmatprep.subr.bf16.mxu0 %v13095_v38 }
 0x28b   : > { %v15686_v43 = vsub.f32 %v15546_v51, %v1018_v30  ;;  %v1104_v48 = vadd.f32 %v1069_v45, %v1068_v44  ;;  %v989_v7 = vpop.xlane.xlu0 %988  ;;  %1964 = vmatpush1.bf16.msra.mxu0 %v13097_v40 }
 0x28c   : > { %v15689_v49 = vsub.f32 %v15548_v52, %v1019_v39  ;;  %v15692_v4 = vsub.f32 %v15550_v53, %v1019_v39  ;;  %v1020_v10 = vmul.f32 0.00390625, %v989_v7  ;;  %v1107_v14 = vadd.f32 %v1071_v47, %v1070_v46 }
 0x28d   : > { %1102 = vadd.xlane.f32.xlu1 %v1101_v35  ;;  %1105 = vadd.xlane.f32.xlu0 %v1104_v48  ;;  %v992_v13 = vpop.xlane.xlu1 %991  ;;  %v1072_v50 = vmul.f32 %v15683_v42, %v15683_v42  ;;  %v1073_v51 = vmul.f32 %v15686_v43, %v15686_v43  ;;  %v13098_v48 = vld [vmem:[%s15416_s26 + $0x1e4] ss:$24 sps:$4 sm:$0xff]  }
 0x28e   : > { %v1021_v32 = vmul.f32 0.00390625, %v992_v13  ;;  %v1074_v52 = vmul.f32 %v15689_v49, %v15689_v49  ;;  %v1075_v53 = vmul.f32 %v15692_v4, %v15692_v4  ;;  %v15703_v33 = vsub.f32 %v15552_v54, %v1020_v10  ;;  %1965 = vmatprep.subr.bf16.mxu0 %v13098_v48 }
 0x28f   : > { %v15706_v34 = vsub.f32 %v15554_v55, %v1020_v10  ;;  %v1110_v16 = vadd.f32 %v1073_v51, %v1072_v50  ;;  %v995_v21 = vpop.xlane.xlu0 %994 }
 0x290   : > { %v15709_v19 = vsub.f32 %v15558_v57, %v1021_v32  ;;  %v15712_v20 = vsub.f32 %v15560_v58, %v1021_v32  ;;  %v1022_v22 = vmul.f32 0.00390625, %v995_v21  ;;  %v1113_v37 = vadd.f32 %v1075_v53, %v1074_v52 }
 0x291   : > { %1108 = vadd.xlane.f32.xlu1 %v1107_v14  ;;  %1111 = vadd.xlane.f32.xlu0 %v1110_v16  ;;  %v998_v23 = vpop.xlane.xlu1 %997  ;;  %v1076_v54 = vmul.f32 %v15703_v33, %v15703_v33  ;;  %v1077_v55 = vmul.f32 %v15706_v34, %v15706_v34  ;;  %v13100_v14 = vld [vmem:[%s15416_s26 + $0x1e0] ss:$24 sps:$4 sm:$0xff]  }
 0x292   : > { %v1023_v24 = vmul.f32 0.00390625, %v998_v23  ;;  %v1078_v57 = vmul.f32 %v15709_v19, %v15709_v19  ;;  %v1079_v58 = vmul.f32 %v15712_v20, %v15712_v20  ;;  %v15725_v26 = vsub.f32 %v15564_v60, %v1022_v22  ;;  %1966 = vmatpush1.bf16.msra.mxu0 %v13100_v14 }
 0x293   : > { %v15728_v29 = vsub.f32 %v15566_v61, %v1022_v22  ;;  %v1116_v30 = vadd.f32 %v1077_v55, %v1076_v54  ;;  %v1001_v44 = vpop.xlane.xlu0 %1000  ;;  %v13101_v22 = vld [vmem:[%s15416_s26 + $0x214] ss:$24 sps:$4 sm:$0xff]   ;;  %v13103_v55 = vld [vmem:[%s15416_s26 + $0x210] ss:$24 sps:$4 sm:$0xff]  }
 0x294   : > { %v15731_v31 = vsub.f32 %v15570_v63, %v1023_v24  ;;  %v15734_v35 = vsub.f32 %v15572_v0, %v1023_v24  ;;  %v1024_v45 = vmul.f32 0.00390625, %v1001_v44  ;;  %v1119_v39 = vadd.f32 %v1079_v58, %v1078_v57  ;;  %1967 = vmatprep.subr.bf16.mxu0 %v13101_v22 }
 0x295   : > { %1114 = vadd.xlane.f32.xlu1 %v1113_v37  ;;  %1117 = vadd.xlane.f32.xlu0 %v1116_v30  ;;  %v1004_v60 = vpop.xlane.xlu1 %1003  ;;  %v1080_v61 = vmul.f32 %v15725_v26, %v15725_v26  ;;  %v1081_v46 = vmul.f32 %v15728_v29, %v15728_v29  ;;  %v13106_v30 = vld [vmem:[%s15416_s26 + $0x240] ss:$24 sps:$4 sm:$0xff]  }
 0x296   : > { %v1025_v47 = vmul.f32 0.00390625, %v1004_v60  ;;  %v1082_v63 = vmul.f32 %v15731_v31, %v15731_v31  ;;  %v1083_v0 = vmul.f32 %v15734_v35, %v15734_v35  ;;  %v15746_v7 = vsub.f32 %v15576_v2, %v1024_v45  ;;  %1968 = vmatpush1.bf16.msra.mxu0 %v13103_v55  ;;  %v13109_v60 = vld [vmem:[%s15416_s26 + $0x270] ss:$24 sps:$4 sm:$0xff]  }
 0x297   : > { %v15749_v10 = vsub.f32 %v15578_v3, %v1024_v45  ;;  %v1122_v13 = vadd.f32 %v1081_v46, %v1080_v61  ;;  %v1007_v32 = vpop.xlane.xlu0 %1006  ;;  %v13107_v45 = vld [vmem:[%s15416_s26 + $0x274] ss:$24 sps:$4 sm:$0xff]   ;;  %v13112_v61 = vld [vmem:[%s15416_s26 + $0x2a0] ss:$24 sps:$4 sm:$0xff]  }
 0x298   : > { %v15753_v50 = vsub.f32 %v15582_v5, %v1025_v47  ;;  %v15756_v51 = vsub.f32 %v15584_v6, %v1025_v47  ;;  %v1026_v52 = vmul.f32 0.00390625, %v1007_v32  ;;  %v1125_v53 = vadd.f32 %v1083_v0, %v1082_v63  ;;  %v13113_v46 = vld [vmem:[%s15416_s26 + $0x2d4] ss:$24 sps:$4 sm:$0xff]   ;;  %v13115_v47 = vld [vmem:[%s15416_s26 + $0x2d0] ss:$24 sps:$4 sm:$0xff]  }
 0x299   : > { %1120 = vadd.xlane.f32.xlu1 %v1119_v39  ;;  %1123 = vadd.xlane.f32.xlu0 %v1122_v13  ;;  %v1010_v2 = vpop.xlane.xlu1 %1009  ;;  %v1084_v3 = vmul.f32 %v15746_v7, %v15746_v7  ;;  %v1085_v16 = vmul.f32 %v15749_v10, %v15749_v10  ;;  %v13110_v39 = vld [vmem:[%s15416_s26 + $0x2a4] ss:$24 sps:$4 sm:$0xff]   ;;  %v20335_v0 = vlaneseq }
 0x29a   : > { %v1027_v21 = vmul.f32 0.00390625, %v1010_v2  ;;  %v1086_v5 = vmul.f32 %v15753_v50, %v15753_v50  ;;  %v1087_v6 = vmul.f32 %v15756_v51, %v15756_v51  ;;  %v15768_v23 = vsub.f32 %v15588_v8, %v1026_v52  ;;  %v13118_v63 = vld [vmem:[%s15416_s26 + $0xc] ss:$24 sps:$4 sm:$0xff]  }
 0x29b   : > { %v15771_v37 = vsub.f32 %v15590_v9, %v1026_v52  ;;  %v1128_v54 = vadd.f32 %v1085_v16, %v1084_v3  ;;  %v15798_v14 = vshrl.u32 %v20335_v0, 7 }
 0x29c   : > { %v15775_v38 = vsub.f32 %v15594_v11, %v1027_v21  ;;  %v15778_v24 = vsub.f32 %v15596_v12, %v1027_v21  ;;  %v1131_v57 = vadd.f32 %v1087_v6, %v1086_v5  ;;  %v1088_v8 = vmul.f32 %v15768_v23, %v15768_v23  ;;  %v13104_v12 = vld [vmem:[%s15416_s26 + $0x244] ss:$24 sps:$4 sm:$0xff]  }
 0x29d   : > { %1126 = vadd.xlane.f32.xlu1 %v1125_v53  ;;  %1129 = vadd.xlane.f32.xlu0 %v1128_v54  ;;  %v1089_v9 = vmul.f32 %v15771_v37, %v15771_v37  ;;  %20568 = vst [vmem:[#allocation44_spill] sm:$0xff] %v15798_v14  ;;  %v15801_v16 = vsub.s32 4, %v15798_v14  ;;  %v962_v6 = vld [vmem:[%s15434_s10] sm:$0xff]  ;;  %v15805_v22 = vsub.s32 0, %v15798_v14 }
 0x29e   : > { %v1090_v58 = vmul.f32 %v15775_v38, %v15775_v38  ;;  %v1091_v11 = vmul.f32 %v15778_v24, %v15778_v24  ;;  %1969 = vmatprep.subr.bf16.mxu0 %v13104_v12 }
 0x29f   : > { %v1134_v40 = vadd.f32 %v1089_v9, %v1088_v8  ;;  %1970 = vmatpush1.bf16.msra.mxu0 %v13106_v30  ;;  %20569 = vst [vmem:[#allocation45_spill] sm:$0xff] %v15801_v16  ;;  %20570 = vst [vmem:[#allocation46_spill] sm:$0xff] %v15805_v22  ;;  %v1228_v9 = vrot.slane %v962_v6, %v15801_v16  ;;  %v1224_v30 = vrot.slane %v962_v6, %v15805_v22 }
 0x2a0   : > { %v1137_v44 = vadd.f32 %v1091_v11, %v1090_v58  ;;  %1971 = vmatprep.subr.bf16.mxu0 %v13107_v45  ;;  %v15809_v58 = vsub.s32 5, %v15798_v14 }
 0x2a1   : > { %1132 = vadd.xlane.f32.xlu1 %v1131_v57  ;;  %1135 = vadd.xlane.f32.xlu0 %v1134_v40  ;;  %v15812_v40 = vsub.s32 1, %v15798_v14 }
 0x2a2   : > { %20571 = vst [vmem:[#allocation47_spill] sm:$0xff] %v15809_v58 }
 0x2a3   : > { %1972 = vmatpush1.bf16.msra.mxu0 %v13109_v60  ;;  %20572 = vst [vmem:[#allocation48_spill] sm:$0xff] %v15812_v40 }
 0x2a4   : > { %1973 = vmatprep.subr.bf16.mxu0 %v13110_v39 }
 0x2a5   : > { %1138 = vadd.xlane.f32.xlu1 %v1137_v44 }
 0x2a7   : > { %1974 = vmatpush1.bf16.msra.mxu0 %v13112_v61  ;;  %v15816_v61 = vrot.slane %v1228_v9, %v15805_v22 }
 0x2a8   : > { %1975 = vmatprep.subr.bf16.mxu0 %v13113_v46  ;;  %v1278_v46 = vrot.slane %v962_v6, %v15809_v58 }
 0x2ab   : > { %1976 = vmatpush1.bf16.msra.mxu0 %v13115_v47 }
 0x2ac   : > { %2058 = vmatprep.subr.bf16.mxu0 %v13118_v63 }
 0x312   : > { %v1094_v48 = vpop.xlane.xlu0 %1093 }
 0x313   : > { %v1140_v13 = vmul.f32 0.00390625, %v1094_v48  ;;  %v15820_v48 = vrot.slane %v1224_v30, %v15805_v22 }
 0x315   : > { %v1156_v32 = vadd.f32 1e-05, %v1140_v13  ;;  %v1274_v13 = vrot.slane %v962_v6, %v15812_v40 }
 0x316   : > { %v1097_v52 = vpop.xlane.xlu1 %1096  ;;  %v1100_v2 = vpop.xlane.xlu0 %1099 }
 0x317   : > { %13452 = vrsqrt.f32 %v1156_v32  ;;  %v1141_v53 = vmul.f32 0.00390625, %v1097_v52  ;;  %v1142_v3 = vmul.f32 0.00390625, %v1100_v2  ;;  %v15831_v6 = vrot.slane %v1274_v13, %v15812_v40 }
 0x319   : > { %v1157_v21 = vadd.f32 1e-05, %v1141_v53  ;;  %v1158_v5 = vadd.f32 1e-05, %v1142_v3 }
 0x31a   : > { %v1103_v54 = vpop.xlane.xlu1 %1102  ;;  %v1106_v55 = vpop.xlane.xlu0 %1105 }
 0x31b   : > { %13454 = vrsqrt.f32 %v1157_v21  ;;  %v1143_v57 = vmul.f32 0.00390625, %v1103_v54  ;;  %v1144_v8 = vmul.f32 0.00390625, %v1106_v55 }
 0x31c   : > { %13456 = vrsqrt.f32 %v1158_v5  ;;  %v15826_v5 = vrot.slane %v1278_v46, %v15812_v40 }
 0x31d   : > { %v1159_v11 = vadd.f32 1e-05, %v1143_v57  ;;  %v1160_v12 = vadd.f32 1e-05, %v1144_v8 }
 0x31e   : > { %v1109_v44 = vpop.xlane.xlu1 %1108  ;;  %v1112_v45 = vpop.xlane.xlu0 %1111 }
 0x31f   : > { %13458 = vrsqrt.f32 %v1159_v11  ;;  %v1145_v60 = vmul.f32 0.00390625, %v1109_v44  ;;  %v1146_v39 = vmul.f32 0.00390625, %v1112_v45 }
 0x320   : > { %13460 = vrsqrt.f32 %v1160_v12 }
 0x321   : > { %v13453_v47 = vpop.eup %13452  ;;  %v1161_v63 = vadd.f32 1e-05, %v1145_v60  ;;  %v1162_v32 = vadd.f32 1e-05, %v1146_v39 }
 0x322   : > { %v1115_v52 = vpop.xlane.xlu1 %1114  ;;  %v1189_v2 = vmul.f32 %v13453_v47, %v15626_v59  ;;  %v1188_v53 = vmul.f32 %v13453_v47, %v15623_v56  ;;  %v1118_v21 = vpop.xlane.xlu0 %1117 }
 0x323   : > { %13462 = vrsqrt.f32 %v1161_v63  ;;  %v1147_v3 = vmul.f32 0.00390625, %v1115_v52  ;;  %v1148_v12 = vmul.f32 0.00390625, %v1118_v21 }
 0x324   : > { %v1240_v57 = vmul.f32 %v15816_v61, %v1189_v2  ;;  %v1239_v8 = vmul.f32 %v15820_v48, %v1188_v53  ;;  %13464 = vrsqrt.f32 %v1162_v32 }
 0x325   : > { %v13455_v54 = vpop.eup %13454  ;;  %v1163_v55 = vadd.f32 1e-05, %v1147_v3  ;;  %v1164_v53 = vadd.f32 1e-05, %v1148_v12 }
 0x326   : > { %v13457_v9 = vpop.eup %13456  ;;  %v1121_v59 = vpop.xlane.xlu1 %1120  ;;  %v1191_v56 = vmul.f32 %v13455_v54, %v15646_v36  ;;  %v1190_v11 = vmul.f32 %v13455_v54, %v15643_v15  ;;  %v1290_v47 = vadd.f32 %v15826_v5, %v1240_v57  ;;  %v1289_v63 = vadd.f32 %v15831_v6, %v1239_v8  ;;  %v13116_v57 = vld [vmem:[%s15416_s26 + $0x8] ss:$24 sps:$4 sm:$0xff]  }
 0x327   : > { %13466 = vrsqrt.f32 %v1163_v55  ;;  %v1149_v30 = vmul.f32 0.00390625, %v1121_v59  ;;  %v1193_v44 = vmul.f32 %v13457_v9, %v15632_v1  ;;  %v1192_v3 = vmul.f32 %v13457_v9, %v15629_v62  ;;  %v1124_v21 = vpop.xlane.xlu0 %1123 }
 0x328   : > { %v1242_v45 = vmul.f32 %v15816_v61, %v1191_v56  ;;  %v1241_v60 = vmul.f32 %v15820_v48, %v1190_v11  ;;  %v13121_v11 = vld [vmem:[%s15416_s26 + $0x3c] ss:$24 sps:$4 sm:$0xff]  }
 0x329   : > { %v13459_v39 = vpop.eup %13458  ;;  %v1165_v46 = vadd.f32 1e-05, %v1149_v30  ;;  %v1244_v36 = vmul.f32 %v15816_v61, %v1193_v44  ;;  %v1150_v30 = vmul.f32 0.00390625, %v1124_v21  ;;  %v1243_v44 = vmul.f32 %v15820_v48, %v1192_v3  ;;  %v13122_v21 = vld [vmem:[%s15416_s26 + $0x68] ss:$24 sps:$4 sm:$0xff]  }
 0x32a   : > { %v1127_v13 = vpop.xlane.xlu1 %1126  ;;  %v1292_v15 = vadd.f32 %v15826_v5, %v1242_v45  ;;  %v1291_v32 = vadd.f32 %v15831_v6, %v1241_v60  ;;  %v1195_v1 = vmul.f32 %v13459_v39, %v15652_v18  ;;  %v1194_v52 = vmul.f32 %v13459_v39, %v15649_v17  ;;  %v13461_v2 = vpop.eup %13460  ;;  %v13119_v39 = vld [vmem:[%s15416_s26 + $0x38] ss:$24 sps:$4 sm:$0xff]  }
 0x32b   : > { %13468 = vrsqrt.f32 %v1165_v46  ;;  %v1151_v56 = vmul.f32 0.00390625, %v1127_v13  ;;  %v1294_v17 = vadd.f32 %v15826_v5, %v1244_v36  ;;  %v1197_v9 = vmul.f32 %v13461_v2, %v15666_v25  ;;  %v1130_v3 = vpop.xlane.xlu0 %1129 }
 0x32c   : > { %v15846_v54 = vpack.c.bf16 %v1292_v15, %v1290_v47  ;;  %v15848_v55 = vpack.c.bf16 %v1291_v32, %v1289_v63  ;;  %v1246_v8 = vmul.f32 %v15816_v61, %v1195_v1  ;;  %v1245_v18 = vmul.f32 %v15820_v48, %v1194_v52 }
 0x32d   : > { %v13463_v59 = vpop.eup %13462  ;;  %13470 = vrsqrt.f32 %v1164_v53  ;;  %v1248_v46 = vmul.f32 %v15816_v61, %v1197_v9  ;;  %v1167_v63 = vadd.f32 1e-05, %v1151_v56  ;;  %v1166_v32 = vadd.f32 1e-05, %v1150_v30 }
 0x32e   : > { %1977 = vmatprep.mubr.bf16.mxu0 %v15846_v54  ;;  %v1296_v62 = vadd.f32 %v15826_v5, %v1246_v8  ;;  %v1199_v12 = vmul.f32 %v13463_v59, %v15672_v28  ;;  %v13465_v45 = vpop.eup %13464  ;;  %v1295_v25 = vadd.f32 %v15831_v6, %v1245_v18  ;;  %v13124_v28 = vld [vmem:[%s15416_s26 + $0x6c] ss:$24 sps:$4 sm:$0xff]   ;;  %v1198_v13 = vmul.f32 %v13463_v59, %v15669_v27  ;;  %v1133_v15 = vpop.xlane.xlu1 %1132 }
 0x32f   : > { %1978 = vmatmul.mubr.bf16.vlgmr.msra.gmra.mrb[0].mxu0 %v15848_v55  ;;  %v1293_v1 = vadd.f32 %v15831_v6, %v1243_v44  ;;  %v1196_v53 = vmul.f32 %v13461_v2, %v15663_v41  ;;  %v1201_v8 = vmul.f32 %v13465_v45, %v15686_v43  ;;  %13472 = vrsqrt.f32 %v1167_v63 }
 0x330   : > { %2059 = vmatpush1.bf16.msra.mxu0 %v13116_v57  ;;  %v15861_v60 = vpack.c.bf16 %v1296_v62, %v1294_v17  ;;  %v1250_v36 = vmul.f32 %v15816_v61, %v1199_v12  ;;  %v1298_v57 = vadd.f32 %v15826_v5, %v1248_v46  ;;  %v1153_v59 = vmul.f32 0.00390625, %v1133_v15 }
 0x331   : > { %v13467_v47 = vpop.eup %13466  ;;  %2060 = vmatprep.subr.bf16.mxu0 %v13121_v11  ;;  %v15877_v56 = vpack.c.bf16 %v1295_v25, %v1293_v1  ;;  %v13127_v11 = vld [vmem:[%s15416_s26 + $0x9c] ss:$24 sps:$4 sm:$0xff]   ;;  %v1249_v18 = vmul.f32 %v15820_v48, %v1198_v13  ;;  %13474 = vrsqrt.f32 %v1166_v32  ;;  %v1152_v62 = vmul.f32 0.00390625, %v1130_v3  ;;  %v1136_v32 = vpop.xlane.xlu0 %1135  ;;  %v13128_v1 = vld [vmem:[%s15416_s26 + $0xc8] ss:$24 sps:$4 sm:$0xff]  }
 0x332   : > { %1987 = vmatprep.mubr.bf16.mxu0 %v15861_v60  ;;  %v1300_v52 = vadd.f32 %v15826_v5, %v1250_v36  ;;  %v1203_v27 = vmul.f32 %v13467_v47, %v15692_v4  ;;  %v1247_v43 = vmul.f32 %v15820_v48, %v1196_v53  ;;  %v13125_v4 = vld [vmem:[%s15416_s26 + $0x98] ss:$24 sps:$4 sm:$0xff]   ;;  %v1252_v9 = vmul.f32 %v15816_v61, %v1201_v8  ;;  %v1139_v63 = vpop.xlane.xlu1 %1138  ;;  %v13133_v3 = vld [vmem:[%s15416_s26 + $0xfc] ss:$24 sps:$4 sm:$0xff]  }
 0x333   : > { %v1169_v30 = vadd.f32 1e-05, %v1153_v59  ;;  %v1299_v44 = vadd.f32 %v15831_v6, %v1249_v18  ;;  %v1202_v46 = vmul.f32 %v13467_v47, %v15689_v49  ;;  %v1168_v36 = vadd.f32 1e-05, %v1152_v62  ;;  %v13131_v8 = vld [vmem:[%s15416_s26 + $0xf8] ss:$24 sps:$4 sm:$0xff]  }
 0x334   : > { %2061 = vmatpush1.bf16.msra.mxu0 %v13119_v39  ;;  %v15881_v41 = vpack.c.bf16 %v1300_v52, %v1298_v57  ;;  %v1254_v2 = vmul.f32 %v15816_v61, %v1203_v27  ;;  %v13130_v39 = vld [vmem:[%s15416_s26 + $0xcc] ss:$24 sps:$4 sm:$0xff]   ;;  %v1297_v13 = vadd.f32 %v15831_v6, %v1247_v43  ;;  %v1200_v15 = vmul.f32 %v13465_v45, %v15683_v42 }
 0x335   : > { %2062 = vmatprep.subr.bf16.mxu0 %v13124_v28  ;;  %v13469_v17 = vpop.eup %13468  ;;  %v1302_v52 = vadd.f32 %v15826_v5, %v1252_v9  ;;  %13476 = vrsqrt.f32 %v1169_v30  ;;  %v1155_v49 = vmul.f32 0.00390625, %v1139_v63  ;;  %v1154_v57 = vmul.f32 0.00390625, %v1136_v32  ;;  %v13142_v32 = vld [vmem:[%s15416_s26 + $0x18c] ss:$24 sps:$4 sm:$0xff]  }
 0x336   : > { %v1304_v25 = vadd.f32 %v15826_v5, %v1254_v2  ;;  %v1207_v28 = vmul.f32 %v13469_v17, %v15712_v20  ;;  %v15899_v47 = vpack.c.bf16 %v1299_v44, %v1297_v13  ;;  %v1253_v20 = vmul.f32 %v15820_v48, %v1202_v46  ;;  %v13136_v2 = vld [vmem:[%s15416_s26 + $0x12c] ss:$24 sps:$4 sm:$0xff]  }
 0x337   : > { %1988 = vmatmul.mubr.bf16.gmra.mrb[4].mxu0 %v15877_v56  ;;  %v13471_v12 = vpop.eup %13470  ;;  %13478 = vrsqrt.f32 %v1168_v36  ;;  %v1206_v62 = vmul.f32 %v13469_v17, %v15709_v19  ;;  %v1170_v9 = vadd.f32 1e-05, %v1154_v57  ;;  %v13139_v19 = vld [vmem:[%s15416_s26 + $0x15c] ss:$24 sps:$4 sm:$0xff]  }
 0x338   : > { %1997 = vmatprep.mubr.bf16.mxu0 %v15881_v41  ;;  %2063 = vmatpush1.bf16.msra.mxu0 %v13122_v21  ;;  %v1205_v53 = vmul.f32 %v13471_v12, %v15706_v34  ;;  %v15903_v21 = vpack.c.bf16 %v1304_v25, %v1302_v52  ;;  %v1258_v42 = vmul.f32 %v15816_v61, %v1207_v28 }
 0x339   : > { %2064 = vmatprep.subr.bf16.mxu0 %v13127_v11  ;;  %v13473_v45 = vpop.eup %13472  ;;  %v1251_v34 = vmul.f32 %v15820_v48, %v1200_v15  ;;  %v1171_v11 = vadd.f32 1e-05, %v1155_v49  ;;  %v1303_v18 = vadd.f32 %v15831_v6, %v1253_v20  ;;  %v1204_v44 = vmul.f32 %v13471_v12, %v15703_v33  ;;  %v13140_v20 = vld [vmem:[%s15416_s26 + $0x188] ss:$24 sps:$4 sm:$0xff]  }
 0x33a   : > { %v1256_v27 = vmul.f32 %v15816_v61, %v1205_v53  ;;  %v1308_v43 = vadd.f32 %v15826_v5, %v1258_v42 }
 0x33b   : > { %v13475_v59 = vpop.eup %13474  ;;  %v1301_v30 = vadd.f32 %v15831_v6, %v1251_v34  ;;  %13480 = vrsqrt.f32 %v1171_v11  ;;  %v1255_v12 = vmul.f32 %v15820_v48, %v1204_v44  ;;  %v13146_v44 = vld [vmem:[%s15416_s26 + $0x1e8] ss:$24 sps:$4 sm:$0xff]  }
 0x33c   : > { %2065 = vmatpush1.bf16.msra.mxu0 %v13125_v4  ;;  %v1211_v4 = vmul.f32 %v13473_v45, %v15734_v35  ;;  %v1306_v46 = vadd.f32 %v15826_v5, %v1256_v27  ;;  %v1209_v63 = vmul.f32 %v13475_v59, %v15728_v29  ;;  %v1257_v35 = vmul.f32 %v15820_v48, %v1206_v62  ;;  %v13137_v29 = vld [vmem:[%s15416_s26 + $0x158] ss:$24 sps:$4 sm:$0xff]  }
 0x33d   : > { %2066 = vmatprep.subr.bf16.mxu0 %v13130_v39  ;;  %v13134_v39 = vld [vmem:[%s15416_s26 + $0x128] ss:$24 sps:$4 sm:$0xff]   ;;  %v15921_v25 = vpack.c.bf16 %v1303_v18, %v1301_v30  ;;  %13482 = vrsqrt.f32 %v1170_v9  ;;  %v1305_v49 = vadd.f32 %v15831_v6, %v1255_v12  ;;  %v13154_v12 = vld [vmem:[%s15416_s26 + $0x24c] ss:$24 sps:$4 sm:$0xff]  }
 0x33e   : > { %v15925_v17 = vpack.c.bf16 %v1308_v43, %v1306_v46  ;;  %v1262_v28 = vmul.f32 %v15816_v61, %v1211_v4  ;;  %v1260_v36 = vmul.f32 %v15816_v61, %v1209_v63  ;;  %v1307_v15 = vadd.f32 %v15831_v6, %v1257_v35 }
 0x33f   : > { %1998 = vmatmul.mubr.bf16.gmra.mrb[8].mxu0 %v15899_v47  ;;  %v13477_v33 = vpop.eup %13476 }
 0x340   : > { %2007 = vmatprep.mubr.bf16.mxu0 %v15903_v21  ;;  %2067 = vmatpush1.bf16.msra.mxu0 %v13128_v1  ;;  %v1210_v1 = vmul.f32 %v13473_v45, %v15731_v31  ;;  %v1312_v52 = vadd.f32 %v15826_v5, %v1262_v28  ;;  %v1215_v53 = vmul.f32 %v13477_v33, %v15756_v51  ;;  %v13145_v31 = vld [vmem:[%s15416_s26 + $0x1bc] ss:$24 sps:$4 sm:$0xff]  }
 0x341   : > { %2068 = vmatprep.subr.bf16.mxu0 %v13133_v3  ;;  %v13479_v13 = vpop.eup %13478  ;;  %v1208_v3 = vmul.f32 %v13475_v59, %v15725_v26  ;;  %v1310_v42 = vadd.f32 %v15826_v5, %v1260_v36  ;;  %v15943_v34 = vpack.c.bf16 %v1307_v15, %v1305_v49  ;;  %v1214_v62 = vmul.f32 %v13477_v33, %v15753_v50  ;;  %v13151_v50 = vld [vmem:[%s15416_s26 + $0x21c] ss:$24 sps:$4 sm:$0xff]  }
 0x342   : > { %v1213_v57 = vmul.f32 %v13479_v13, %v15749_v10  ;;  %v1261_v45 = vmul.f32 %v15820_v48, %v1210_v1  ;;  %v1266_v51 = vmul.f32 %v15816_v61, %v1215_v53  ;;  %v13143_v10 = vld [vmem:[%s15416_s26 + $0x1b8] ss:$24 sps:$4 sm:$0xff]   ;;  %v1212_v30 = vmul.f32 %v13479_v13, %v15746_v7 }
 0x343   : > { %v1259_v26 = vmul.f32 %v15820_v48, %v1208_v3  ;;  %v13160_v3 = vld [vmem:[%s15416_s26 + $0x2ac] ss:$24 sps:$4 sm:$0xff]  }
 0x344   : > { %2069 = vmatpush1.bf16.msra.mxu0 %v13131_v8  ;;  %v15947_v8 = vpack.c.bf16 %v1312_v52, %v1310_v42  ;;  %v1264_v59 = vmul.f32 %v15816_v61, %v1213_v57  ;;  %v1311_v18 = vadd.f32 %v15831_v6, %v1261_v45  ;;  %v1316_v43 = vadd.f32 %v15826_v5, %v1266_v51  ;;  %v13157_v52 = vld [vmem:[%s15416_s26 + $0x27c] ss:$24 sps:$4 sm:$0xff]   ;;  %v13158_v42 = vld [vmem:[%s15416_s26 + $0x2a8] ss:$24 sps:$4 sm:$0xff]  }
 0x345   : > { %2070 = vmatprep.subr.bf16.mxu0 %v13136_v2  ;;  %v13481_v27 = vpop.eup %13480  ;;  %v13148_v2 = vld [vmem:[%s15416_s26 + $0x1ec] ss:$24 sps:$4 sm:$0xff]   ;;  %v1309_v9 = vadd.f32 %v15831_v6, %v1259_v26  ;;  %v1263_v7 = vmul.f32 %v15820_v48, %v1212_v30 }
 0x346   : > { %v1219_v4 = vmul.f32 %v13481_v27, %v15778_v24  ;;  %v13166_v45 = vld [vmem:[%s15416_s26 + $0x14] ss:$24 sps:$4 sm:$0xff]   ;;  %v13169_v51 = vld [vmem:[%s15416_s26 + $0x44] ss:$24 sps:$4 sm:$0xff]  }
 0x347   : > { %2008 = vmatmul.mubr.bf16.gmra.mrb[12].mxu0 %v15921_v25  ;;  %v13483_v11 = vpop.eup %13482  ;;  %v15965_v63 = vpack.c.bf16 %v1311_v18, %v1309_v9  ;;  %v1313_v13 = vadd.f32 %v15831_v6, %v1263_v7  ;;  %v13172_v26 = vld [vmem:[%s15416_s26 + $0x74] ss:$24 sps:$4 sm:$0xff]   ;;  %v13182_v9 = vld [vmem:[%s15416_s26 + $0x130] ss:$24 sps:$4 sm:$0xff]   ;;  %v13187_v30 = vld [vmem:[%s15416_s26 + $0x164] ss:$24 sps:$4 sm:$0xff]  }
 0x348   : > { %2017 = vmatprep.mubr.bf16.mxu0 %v15925_v17  ;;  %2071 = vmatpush1.bf16.msra.mxu0 %v13134_v39  ;;  %v1314_v39 = vadd.f32 %v15826_v5, %v1264_v59  ;;  %v1217_v46 = vmul.f32 %v13483_v11, %v15771_v37  ;;  %v1270_v24 = vmul.f32 %v15816_v61, %v1219_v4  ;;  %v13149_v37 = vld [vmem:[%s15416_s26 + $0x218] ss:$24 sps:$4 sm:$0xff]   ;;  %v13175_v59 = vld [vmem:[%s15416_s26 + $0xa4] ss:$24 sps:$4 sm:$0xff]   ;;  %v13178_v18 = vld [vmem:[%s15416_s26 + $0xd4] ss:$24 sps:$4 sm:$0xff]  }
 0x349   : > { %2072 = vmatprep.subr.bf16.mxu0 %v13139_v19  ;;  %v1265_v19 = vmul.f32 %v15820_v48, %v1214_v62  ;;  %v1216_v15 = vmul.f32 %v13483_v11, %v15768_v23  ;;  %v13155_v23 = vld [vmem:[%s15416_s26 + $0x278] ss:$24 sps:$4 sm:$0xff]   ;;  %v13181_v62 = vld [vmem:[%s15416_s26 + $0x104] ss:$24 sps:$4 sm:$0xff]   ;;  %v13184_v4 = vld [vmem:[%s15416_s26 + $0x134] ss:$24 sps:$4 sm:$0xff]  }
 0x34a   : > { %v15969_v35 = vpack.c.bf16 %v1316_v43, %v1314_v39  ;;  %v1268_v28 = vmul.f32 %v15816_v61, %v1217_v46  ;;  %v1320_v36 = vadd.f32 %v15826_v5, %v1270_v24  ;;  %v13173_v11 = vld [vmem:[%s15416_s26 + $0xa0] ss:$24 sps:$4 sm:$0xff]   ;;  %v13190_v39 = vld [vmem:[%s15416_s26 + $0x194] ss:$24 sps:$4 sm:$0xff]   ;;  %v13188_v46 = vld [vmem:[%s15416_s26 + $0x190] ss:$24 sps:$4 sm:$0xff]  }
 0x34b   : > { %v1315_v33 = vadd.f32 %v15831_v6, %v1265_v19  ;;  %v1267_v49 = vmul.f32 %v15820_v48, %v1216_v15  ;;  %v13179_v43 = vld [vmem:[%s15416_s26 + $0x100] ss:$24 sps:$4 sm:$0xff]   ;;  %v13196_v24 = vld [vmem:[%s15416_s26 + $0x1f4] ss:$24 sps:$4 sm:$0xff]   ;;  %v13194_v7 = vld [vmem:[%s15416_s26 + $0x1f0] ss:$24 sps:$4 sm:$0xff]  }
 0x34c   : > { %2073 = vmatpush1.bf16.msra.mxu0 %v13137_v29  ;;  %v1218_v29 = vmul.f32 %v13481_v27, %v15775_v38  ;;  %v1318_v1 = vadd.f32 %v15826_v5, %v1268_v28  ;;  %v13167_v27 = vld [vmem:[%s15416_s26 + $0x40] ss:$24 sps:$4 sm:$0xff]   ;;  %v13206_v15 = vld [vmem:[%s15416_s26 + $0x2b0] ss:$24 sps:$4 sm:$0xff]  }
 0x34d   : > { %2074 = vmatprep.subr.bf16.mxu0 %v13142_v32  ;;  %v13152_v32 = vld [vmem:[%s15416_s26 + $0x248] ss:$24 sps:$4 sm:$0xff]   ;;  %v15985_v61 = vpack.c.bf16 %v1315_v33, %v1313_v13  ;;  %v13202_v33 = vld [vmem:[%s15416_s26 + $0x254] ss:$24 sps:$4 sm:$0xff]  }
 0x34e   : > { %v1269_v38 = vmul.f32 %v15820_v48, %v1218_v29  ;;  %v15989_v53 = vpack.c.bf16 %v1320_v36, %v1318_v1  ;;  %v13163_v48 = vld [vmem:[%s15416_s26 + $0x2dc] ss:$24 sps:$4 sm:$0xff]   ;;  %v13191_v19 = vld [vmem:[%s15416_s26 + $0x1c0] ss:$24 sps:$4 sm:$0xff]  }
 0x34f   : > { %2018 = vmatmul.mubr.bf16.gmra.mrb[16].mxu0 %v15943_v34  ;;  %v13197_v28 = vld [vmem:[%s15416_s26 + $0x220] ss:$24 sps:$4 sm:$0xff]   ;;  %v13205_v29 = vld [vmem:[%s15416_s26 + $0x284] ss:$24 sps:$4 sm:$0xff]   ;;  %v13208_v13 = vld [vmem:[%s15416_s26 + $0x2b4] ss:$24 sps:$4 sm:$0xff]  }
 0x350   : > { %2027 = vmatprep.mubr.bf16.mxu0 %v15947_v8  ;;  %2075 = vmatpush1.bf16.msra.mxu0 %v13140_v20  ;;  %v1319_v5 = vadd.f32 %v15831_v6, %v1269_v38  ;;  %v1317_v20 = vadd.f32 %v15831_v6, %v1267_v49  ;;  %v13164_v6 = vld [vmem:[%s15416_s26 + $0x10] ss:$24 sps:$4 sm:$0xff]   ;;  %v13203_v36 = vld [vmem:[%s15416_s26 + $0x280] ss:$24 sps:$4 sm:$0xff]  }
 0x351   : > { %2076 = vmatprep.subr.bf16.mxu0 %v13145_v31  ;;  %v13161_v31 = vld [vmem:[%s15416_s26 + $0x2d8] ss:$24 sps:$4 sm:$0xff]   ;;  %v16103_v49 = vld [vmem:[%s15422_s14] sm:$0x3f] }
 0x352   : > { %v15999_v57 = vpack.c.bf16 %v1319_v5, %v1317_v20  ;;  %v13209_v1 = vld [vmem:[%s15416_s26 + $0x2e0] ss:$24 sps:$4 sm:$0xff]   ;;  %v16109_v5 = vrot.slane %v16103_v49, %v15805_v22  ;;  %v16115_v20 = vrot.slane %v16103_v49, %v15812_v40 }
 0x354   : > { %2077 = vmatpush1.bf16.msra.mxu0 %v13143_v10  ;;  %v13170_v10 = vld [vmem:[%s15416_s26 + $0x70] ss:$24 sps:$4 sm:$0xff]  }
 0x355   : > { %2078 = vmatprep.subr.bf16.mxu0 %v13148_v2  ;;  %v13176_v2 = vld [vmem:[%s15416_s26 + $0xd0] ss:$24 sps:$4 sm:$0xff]  }
 0x357   : > { %2028 = vmatmul.mubr.bf16.gmra.mrb[20].mxu0 %v15965_v63 }
 0x358   : > { %2037 = vmatprep.mubr.bf16.mxu0 %v15969_v35  ;;  %2079 = vmatpush1.bf16.msra.mxu0 %v13146_v44  ;;  %v13185_v44 = vld [vmem:[%s15416_s26 + $0x160] ss:$24 sps:$4 sm:$0xff]  }
 0x359   : > { %2080 = vmatprep.subr.bf16.mxu0 %v13151_v50  ;;  %v13193_v50 = vld [vmem:[%s15416_s26 + $0x1c4] ss:$24 sps:$4 sm:$0xff]  }
 0x35c   : > { %2081 = vmatpush1.bf16.msra.mxu0 %v13149_v37  ;;  %v13199_v37 = vld [vmem:[%s15416_s26 + $0x224] ss:$24 sps:$4 sm:$0xff]  }
 0x35d   : > { %2082 = vmatprep.subr.bf16.mxu0 %v13154_v12  ;;  %v13200_v12 = vld [vmem:[%s15416_s26 + $0x250] ss:$24 sps:$4 sm:$0xff]  }
 0x35f   : > { %2038 = vmatmul.mubr.bf16.gmra.mrb[24].mxu0 %v15985_v61 }
 0x360   : > { %2047 = vmatprep.mubr.bf16.mxu0 %v15989_v53  ;;  %2083 = vmatpush1.bf16.msra.mxu0 %v13152_v32  ;;  %v13211_v32 = vld [vmem:[%s15416_s26 + $0x2e4] ss:$24 sps:$4 sm:$0xff]  }
 0x361   : > { %2084 = vmatprep.subr.bf16.mxu0 %v13157_v52 }
 0x364   : > { %2085 = vmatpush1.bf16.msra.mxu0 %v13155_v23 }
 0x365   : > { %2086 = vmatprep.subr.bf16.mxu0 %v13160_v3 }
 0x367   : > { %2048 = vmatmul.mubr.bf16.gmra.mrb[28].mxu0 %v15999_v57 }
 0x368   : > { %2087 = vmatpush1.bf16.msra.mxu0 %v13158_v42  ;;  %2090 = vmatprep.mubr.bf16.mxu0 %v15846_v54 }
 0x369   : > { %2088 = vmatprep.subr.bf16.mxu0 %v13163_v48 }
 0x36c   : > { %2089 = vmatpush1.bf16.msra.mxu0 %v13161_v31 }
 0x36d   : > { %2171 = vmatprep.subr.bf16.mxu0 %v13166_v45 }
 0x36f   : > { %2091 = vmatmul.mubr.bf16.vlgmr.msra.gmra.mrb[32].mxu0 %v15848_v55 }
 0x370   : > { %2100 = vmatprep.mubr.bf16.mxu0 %v15861_v60  ;;  %2172 = vmatpush1.bf16.msra.mxu0 %v13164_v6 }
 0x371   : > { %2173 = vmatprep.subr.bf16.mxu0 %v13169_v51 }
 0x374   : > { %2174 = vmatpush1.bf16.msra.mxu0 %v13167_v27 }
 0x375   : > { %2175 = vmatprep.subr.bf16.mxu0 %v13172_v26 }
 0x377   : > { %2101 = vmatmul.mubr.bf16.gmra.mrb[36].mxu0 %v15877_v56 }
 0x378   : > { %2110 = vmatprep.mubr.bf16.mxu0 %v15881_v41  ;;  %2176 = vmatpush1.bf16.msra.mxu0 %v13170_v10 }
 0x379   : > { %2177 = vmatprep.subr.bf16.mxu0 %v13175_v59 }
 0x37c   : > { %2178 = vmatpush1.bf16.msra.mxu0 %v13173_v11 }
 0x37d   : > { %2179 = vmatprep.subr.bf16.mxu0 %v13178_v18 }
 0x37f   : > { %2111 = vmatmul.mubr.bf16.gmra.mrb[40].mxu0 %v15899_v47 }
 0x380   : > { %2120 = vmatprep.mubr.bf16.mxu0 %v15903_v21  ;;  %2180 = vmatpush1.bf16.msra.mxu0 %v13176_v2 }
 0x381   : > { %2181 = vmatprep.subr.bf16.mxu0 %v13181_v62 }
 0x384   : > { %2182 = vmatpush1.bf16.msra.mxu0 %v13179_v43 }
 0x385   : > { %2183 = vmatprep.subr.bf16.mxu0 %v13184_v4 }
 0x387   : > { %2121 = vmatmul.mubr.bf16.gmra.mrb[44].mxu0 %v15921_v25 }
 0x388   : > { %2130 = vmatprep.mubr.bf16.mxu0 %v15925_v17  ;;  %2184 = vmatpush1.bf16.msra.mxu0 %v13182_v9 }
 0x389   : > { %2185 = vmatprep.subr.bf16.mxu0 %v13187_v30  ;;  %v16148_v30 = vsub.s32 2, %v15798_v14 }
 0x38b   : > { %20573 = vst [vmem:[#allocation49_spill] sm:$0xff] %v16148_v30 }
 0x38c   : > { %2186 = vmatpush1.bf16.msra.mxu0 %v13185_v44 }
 0x38d   : > { %2187 = vmatprep.subr.bf16.mxu0 %v13190_v39 }
 0x38f   : > { %2131 = vmatmul.mubr.bf16.gmra.mrb[48].mxu0 %v15943_v34 }
 0x390   : > { %2140 = vmatprep.mubr.bf16.mxu0 %v15947_v8  ;;  %2188 = vmatpush1.bf16.msra.mxu0 %v13188_v46 }
 0x391   : > { %2189 = vmatprep.subr.bf16.mxu0 %v13193_v50 }
 0x394   : > { %2190 = vmatpush1.bf16.msra.mxu0 %v13191_v19  ;;  %v16158_v19 = vrot.slane %v16103_v49, %v16148_v30 }
 0x395   : > { %2191 = vmatprep.subr.bf16.mxu0 %v13196_v24 }
 0x397   : > { %2141 = vmatmul.mubr.bf16.gmra.mrb[52].mxu0 %v15965_v63 }
 0x398   : > { %2150 = vmatprep.mubr.bf16.mxu0 %v15969_v35  ;;  %2192 = vmatpush1.bf16.msra.mxu0 %v13194_v7 }
 0x399   : > { %2193 = vmatprep.subr.bf16.mxu0 %v13199_v37 }
 0x39c   : > { %2194 = vmatpush1.bf16.msra.mxu0 %v13197_v28 }
 0x39d   : > { %2195 = vmatprep.subr.bf16.mxu0 %v13202_v33 }
 0x39f   : > { %2151 = vmatmul.mubr.bf16.gmra.mrb[56].mxu0 %v15985_v61 }
 0x3a0   : > { %2160 = vmatprep.mubr.bf16.mxu0 %v15989_v53  ;;  %2196 = vmatpush1.bf16.msra.mxu0 %v13200_v12 }
 0x3a1   : > { %2197 = vmatprep.subr.bf16.mxu0 %v13205_v29 }
 0x3a4   : > { %2198 = vmatpush1.bf16.msra.mxu0 %v13203_v36 }
 0x3a5   : > { %2199 = vmatprep.subr.bf16.mxu0 %v13208_v13 }
 0x3a7   : > { %2161 = vmatmul.mubr.bf16.gmra.mrb[60].mxu0 %v15999_v57 }
 0x3a8   : > { %2200 = vmatpush1.bf16.msra.mxu0 %v13206_v15  ;;  %2203 = vmatprep.mubr.bf16.mxu0 %v15846_v54  ;;  %v20336_v54 = vmov 0.0  }
 0x3a9   : > { %2201 = vmatprep.subr.bf16.mxu0 %v13211_v32  ;;  %12364 = vmatprep.subr.bf16.mxu1 %v20336_v54 }
 0x3aa   : > { %12366 = vmatprep.mubr.msk.bf16.mxu1 %vm14785_vm0, %v20336_v54 }
 0x3ac   : > { %2202 = vmatpush1.bf16.msra.mxu0 %v13209_v1 }
 0x3ad   : > { %12412 = vmatprep.subr.bf16.mxu0 %v20336_v54 }
 0x3af   : > { %2204 = vmatmul.mubr.bf16.vlgmr.msra.gmra.mrb[64].mxu0 %v15848_v55 }
 0x3b0   : > { %2213 = vmatprep.mubr.bf16.mxu0 %v15861_v60 }
 0x3b7   : > { %2214 = vmatmul.mubr.bf16.gmra.mrb[68].mxu0 %v15877_v56 }
 0x3b8   : > { %2223 = vmatprep.mubr.bf16.mxu0 %v15881_v41 }
 0x3bf   : > { %2224 = vmatmul.mubr.bf16.gmra.mrb[72].mxu0 %v15899_v47 }
 0x3c0   : > { %2233 = vmatprep.mubr.bf16.mxu0 %v15903_v21 }
 0x3c7   : > { %2234 = vmatmul.mubr.bf16.gmra.mrb[76].mxu0 %v15921_v25 }
 0x3c8   : > { %2243 = vmatprep.mubr.bf16.mxu0 %v15925_v17 }
 0x3cf   : > { %2244 = vmatmul.mubr.bf16.gmra.mrb[80].mxu0 %v15943_v34 }
 0x3d0   : > { %2253 = vmatprep.mubr.bf16.mxu0 %v15947_v8 }
 0x3d7   : > { %2254 = vmatmul.mubr.bf16.gmra.mrb[84].mxu0 %v15965_v63 }
 0x3d8   : > { %2263 = vmatprep.mubr.bf16.mxu0 %v15969_v35 }
 0x3df   : > { %2264 = vmatmul.mubr.bf16.gmra.mrb[88].mxu0 %v15985_v61 }
 0x3e0   : > { %2273 = vmatprep.mubr.bf16.mxu0 %v15989_v53 }
 0x3e7   : > { %2274 = vmatmul.mubr.bf16.gmra.mrb[92].mxu0 %v15999_v57 }
 0x3e8   : > { %12414 = vmatprep.mubr.msk.bf16.mxu0 %vm14785_vm0, %v20336_v54 }
 0x402   : > { %v1979_v55 = vpop.f32.mrb[0].mxu0 }
 0x403   : > { %v16074_v60 = vpop.f32.mrb[1].mxu0  ;;  %v1980_v28 = vadd.f32 %v1979_v55, %v16109_v5 }
 0x404   : > { %v1983_v56 = vpop.f32.mrb[2].mxu0 }
 0x405   : > { %v16076_v41 = vpop.f32.mrb[3].mxu0  ;;  %v2284_v36 = vmul.f32 0.088388346, %v1980_v28  ;;  %v1984_v1 = vadd.f32 %v1983_v56, %v16109_v5 }
 0x407   : > { %v2286_v55 = vmul.f32 0.088388346, %v1984_v1 }
 0x40a   : > { %v16078_v47 = vpop.f32.mrb[4].mxu0 }
 0x40b   : > { %v16080_v21 = vpop.f32.mrb[5].mxu0  ;;  %v1990_v56 = vadd.f32 %v16078_v47, %v16109_v5 }
 0x40c   : > { %v16082_v25 = vpop.f32.mrb[6].mxu0 }
 0x40d   : > { %v16084_v17 = vpop.f32.mrb[7].mxu0  ;;  %v1994_v47 = vadd.f32 %v16082_v25, %v16109_v5 }
 0x412   : > { %v16086_v34 = vpop.f32.mrb[8].mxu0 }
 0x413   : > { %v16088_v8 = vpop.f32.mrb[9].mxu0 }
 0x414   : > { %v16090_v63 = vpop.f32.mrb[10].mxu0 }
 0x415   : > { %v16092_v35 = vpop.f32.mrb[11].mxu0 }
 0x41a   : > { %v16094_v61 = vpop.f32.mrb[12].mxu0 }
 0x41b   : > { %v16096_v52 = vpop.f32.mrb[13].mxu0 }
 0x41c   : > { %v16098_v38 = vpop.f32.mrb[14].mxu0 }
 0x41d   : > { %v16100_v53 = vpop.f32.mrb[15].mxu0 }
 0x422   : > { %v16105_v23 = vpop.f32.mrb[16].mxu0 }
 0x423   : > { %v16111_v3 = vpop.f32.mrb[17].mxu0 }
 0x424   : > { %v2023_v42 = vpop.f32.mrb[18].mxu0 }
 0x425   : > { %v16118_v57 = vadd.f32 %v2023_v42, %v16109_v5  ;;  %v2025_v48 = vpop.f32.mrb[19].mxu0 }
 0x426   : > { %v16121_v31 = vadd.f32 %v2025_v48, %v16115_v20  ;;  %v2316_v48 = vpack.c.bf16 %v2284_v36, %v2284_v36 }
 0x42a   : > { %v16123_v45 = vpop.f32.mrb[20].mxu0 }
 0x42b   : > { %v16125_v6 = vpop.f32.mrb[21].mxu0 }
 0x42c   : > { %v2033_v51 = vpop.f32.mrb[22].mxu0 }
 0x42d   : > { %v16128_v27 = vadd.f32 %v2033_v51, %v16109_v5  ;;  %v2035_v26 = vpop.f32.mrb[23].mxu0 }
 0x42e   : > { %v16131_v10 = vadd.f32 %v2035_v26, %v16115_v20 }
 0x432   : > { %v16133_v59 = vpop.f32.mrb[24].mxu0 }
 0x433   : > { %v16135_v11 = vpop.f32.mrb[25].mxu0 }
 0x434   : > { %v2043_v18 = vpop.f32.mrb[26].mxu0 }
 0x435   : > { %v16138_v2 = vadd.f32 %v2043_v18, %v16109_v5  ;;  %v2045_v62 = vpop.f32.mrb[27].mxu0 }
 0x436   : > { %v16141_v43 = vadd.f32 %v2045_v62, %v16115_v20 }
 0x43a   : > { %v16143_v4 = vpop.f32.mrb[28].mxu0 }
 0x43b   : > { %v16145_v9 = vpop.f32.mrb[29].mxu0 }
 0x43c   : > { %v2053_v44 = vpop.f32.mrb[30].mxu0 }
 0x43d   : > { %v16151_v39 = vadd.f32 %v2053_v44, %v16109_v5  ;;  %v2055_v46 = vpop.f32.mrb[31].mxu0 }
 0x43e   : > { %v16154_v50 = vadd.f32 %v2055_v46, %v16115_v20  ;;  %v2317_v46 = vpack.c.bf16 %v2286_v55, %v2286_v55  ;;  %v2290_v55 = vmul.f32 0.088388346, %v1994_v47 }
 0x442   : > { %v2092_v24 = vpop.f32.mrb[32].mxu0 }
 0x443   : > { %v16160_v7 = vpop.f32.mrb[33].mxu0  ;;  %v2093_v37 = vadd.f32 %v2092_v24, %v16158_v19 }
 0x444   : > { %v2096_v33 = vpop.f32.mrb[34].mxu0 }
 0x445   : > { %v16164_v12 = vpop.f32.mrb[35].mxu0  ;;  %v2348_v29 = vpack.c.bf16 %v2093_v37, %v2093_v37  ;;  %v2097_v13 = vadd.f32 %v2096_v33, %v16158_v19  ;;  %v2288_v33 = vmul.f32 0.088388346, %v1990_v56 }
 0x447   : > { %12365 = vmatpush3.bf16.xpose.msra.mxu1 %v2348_v29  ;;  %v2349_v51 = vpack.c.bf16 %v2097_v13, %v2097_v13 }
 0x448   : > { %12370 = vmatprep.subr.bf16.mxu1 %v20336_v54 }
 0x44a   : > { %v2102_v15 = vpop.f32.mrb[36].mxu0 }
 0x44b   : > { %v16168_v32 = vpop.f32.mrb[37].mxu0  ;;  %v2103_v18 = vadd.f32 %v2102_v15, %v16158_v19  ;;  %v2318_v15 = vpack.c.bf16 %v2288_v33, %v2288_v33  ;;  %v2000_v33 = vadd.f32 %v16086_v34, %v16109_v5 }
 0x44c   : > { %v2106_v42 = vpop.f32.mrb[38].mxu0 }
 0x44d   : > { %v16171_v26 = vpop.f32.mrb[39].mxu0  ;;  %v2350_v37 = vpack.c.bf16 %v2103_v18, %v2103_v18  ;;  %v2107_v29 = vadd.f32 %v2106_v42, %v16158_v19  ;;  %v16198_v42 = vsub.s32 3, %v15798_v14  ;;  %v2292_v34 = vmul.f32 0.088388346, %v2000_v33 }
 0x44e   : > { %12367 = vmatmul.mubr.bf16.vlgmr.msra.gmra.mrb[0].mxu1 %v2316_v48  ;;  %v2030_v33 = vadd.f32 %v16123_v45, %v16109_v5 }
 0x44f   : > { %12371 = vmatpush3.bf16.xpose.msra.mxu1 %v2349_v51  ;;  %12372 = vmatprep.mubr.msk.bf16.mxu1 %vm14785_vm0, %v20336_v54  ;;  %v2351_v48 = vpack.c.bf16 %v2107_v29, %v2107_v29  ;;  %20574 = vst [vmem:[#allocation50_spill] sm:$0xff] %v16198_v42  ;;  %v2020_v29 = vadd.f32 %v16105_v23, %v16109_v5  ;;  %v20575_v23 = vmov 0.0  }
 0x450   : > { %12376 = vmatprep.subr.bf16.mxu1 %v20336_v54 }
 0x452   : > { %v2112_v62 = vpop.f32.mrb[40].mxu0 }
 0x453   : > { %v16177_v44 = vpop.f32.mrb[41].mxu0  ;;  %v2113_v18 = vadd.f32 %v2112_v62, %v16158_v19 }
 0x454   : > { %v2116_v24 = vpop.f32.mrb[42].mxu0 }
 0x455   : > { %v16181_v28 = vpop.f32.mrb[43].mxu0 }
 0x456   : > { %12373 = vmatmul.mubr.bf16.vlgmr.msra.gmra.mrb[4].mxu1 %v2317_v46 }
 0x457   : > { %12377 = vmatpush3.bf16.xpose.msra.mxu1 %v2350_v37  ;;  %12378 = vmatprep.mubr.msk.bf16.mxu1 %vm14785_vm0, %v20336_v54  ;;  %v2319_v37 = vpack.c.bf16 %v2290_v55, %v2290_v55  ;;  %v2300_v55 = vmul.f32 0.088388346, %v2020_v29 }
 0x458   : > { %12382 = vmatprep.subr.bf16.mxu1 %v20336_v54 }
 0x45a   : > { %v2122_v36 = vpop.f32.mrb[44].mxu0 }
 0x45b   : > { %v16187_v13 = vpop.f32.mrb[45].mxu0  ;;  %v2123_v45 = vadd.f32 %v2122_v36, %v16158_v19 }
 0x45c   : > { %v16191_v1 = vpop.f32.mrb[46].mxu0 }
 0x45d   : > { %v16193_v51 = vpop.f32.mrb[47].mxu0 }
 0x45e   : > { %12379 = vmatmul.mubr.bf16.vlgmr.msra.gmra.mrb[8].mxu1 %v2318_v15  ;;  %v16211_v15 = vrot.slane %v16103_v49, %v16198_v42 }
 0x45f   : > { %12383 = vmatpush3.bf16.xpose.msra.mxu1 %v2351_v48  ;;  %12384 = vmatprep.mubr.msk.bf16.mxu1 %vm14785_vm0, %v20336_v54  ;;  %v2352_v48 = vpack.c.bf16 %v2113_v18, %v2113_v18  ;;  %v2117_v18 = vadd.f32 %v2116_v24, %v16158_v19 }
 0x460   : > { %12388 = vmatprep.subr.bf16.mxu1 %v20336_v54 }
 0x462   : > { %v2132_v46 = vpop.f32.mrb[48].mxu0 }
 0x463   : > { %v2133_v25 = vadd.f32 %v2132_v46, %v16158_v19  ;;  %v16203_v56 = vpop.f32.mrb[49].mxu0 }
 0x464   : > { %v2136_v47 = vpop.f32.mrb[50].mxu0 }
 0x465   : > { %v2356_v0 = vpack.c.bf16 %v2133_v25, %v2133_v25  ;;  %v16214_v62 = vadd.f32 %v2136_v47, %v16158_v19  ;;  %v2138_v46 = vpop.f32.mrb[51].mxu0 }
 0x466   : > { %v16217_v54 = vadd.f32 %v2138_v46, %v16211_v15  ;;  %12385 = vmatmul.mubr.bf16.vlgmr.msra.gmra.mrb[12].mxu1 %v2319_v37  ;;  %v2320_v46 = vpack.c.bf16 %v2292_v34, %v2292_v34  ;;  %v2324_v37 = vpack.c.bf16 %v2300_v55, %v2300_v55 }
 0x467   : > { %12389 = vmatpush3.bf16.xpose.msra.mxu1 %v2352_v48  ;;  %12413 = vmatpush3.bf16.xpose.msra.mxu0 %v2356_v0  ;;  %v2004_v0 = vadd.f32 %v16090_v63, %v16109_v5  ;;  %v2353_v48 = vpack.c.bf16 %v2117_v18, %v2117_v18  ;;  %v2304_v63 = vmul.f32 0.088388346, %v2030_v33 }
 0x468   : > { %12390 = vmatprep.mubr.msk.bf16.mxu1 %vm14785_vm0, %v20575_v23  ;;  %12394 = vmatprep.subr.bf16.mxu1 %v20575_v23 }
 0x469   : > { %12424 = vmatprep.subr.bf16.mxu0 %v20575_v23  ;;  %v2294_v34 = vmul.f32 0.088388346, %v2004_v0 }
 0x46a   : > { %v2142_v25 = vpop.f32.mrb[52].mxu0 }
 0x46b   : > { %v2143_v47 = vadd.f32 %v2142_v25, %v16158_v19  ;;  %v16225_v42 = vpop.f32.mrb[53].mxu0  ;;  %v2010_v25 = vadd.f32 %v16094_v61, %v16109_v5 }
 0x46c   : > { %v2146_v29 = vpop.f32.mrb[54].mxu0 }
 0x46d   : > { %v2358_v30 = vpack.c.bf16 %v2143_v47, %v2143_v47  ;;  %v16232_v24 = vadd.f32 %v2146_v29, %v16158_v19  ;;  %v2148_v40 = vpop.f32.mrb[55].mxu0  ;;  %v2326_v47 = vpack.c.bf16 %v2304_v63, %v2304_v63 }
 0x46e   : > { %v16235_v22 = vadd.f32 %v2148_v40, %v16211_v15  ;;  %12391 = vmatmul.mubr.bf16.vlgmr.msra.gmra.mrb[16].mxu1 %v2320_v46  ;;  %12415 = vmatmul.mubr.bf16.vlgmr.msra.gmra.mrb[96].mxu0 %v2324_v37  ;;  %v2040_v46 = vadd.f32 %v16133_v59, %v16109_v5  ;;  %v2354_v37 = vpack.c.bf16 %v2123_v45, %v2123_v45 }
 0x46f   : > { %12395 = vmatpush3.bf16.xpose.msra.mxu1 %v2353_v48  ;;  %12425 = vmatpush3.bf16.xpose.msra.mxu0 %v2358_v30  ;;  %v2321_v30 = vpack.c.bf16 %v2294_v34, %v2294_v34  ;;  %v2296_v34 = vmul.f32 0.088388346, %v2010_v25  ;;  %v2127_v59 = vadd.f32 %v16191_v1, %v16158_v19 }
 0x470   : > { %12396 = vmatprep.mubr.msk.bf16.mxu1 %vm14785_vm0, %v20575_v23  ;;  %12426 = vmatprep.mubr.msk.bf16.mxu0 %vm14785_vm0, %v20575_v23  ;;  %v2308_v61 = vmul.f32 0.088388346, %v2040_v46 }
 0x471   : > { %12400 = vmatprep.subr.bf16.mxu1 %v20575_v23  ;;  %12436 = vmatprep.subr.bf16.mxu0 %v20575_v23 }
 0x472   : > { %v2152_v40 = vpop.f32.mrb[56].mxu0  ;;  %v2328_v25 = vpack.c.bf16 %v2308_v61, %v2308_v61  ;;  %v16280_v61 = vrot.slane %v16103_v49, %v15809_v58 }
 0x473   : > { %v2153_v55 = vadd.f32 %v2152_v40, %v16158_v19  ;;  %v16245_v18 = vpop.f32.mrb[57].mxu0 }
 0x474   : > { %v2156_v0 = vpop.f32.mrb[58].mxu0 }
 0x475   : > { %v2360_v36 = vpack.c.bf16 %v2153_v55, %v2153_v55  ;;  %v16252_v33 = vadd.f32 %v2156_v0, %v16158_v19  ;;  %v2158_v29 = vpop.f32.mrb[59].mxu0  ;;  %v2322_v55 = vpack.c.bf16 %v2296_v34, %v2296_v34  ;;  %v2355_v0 = vpack.c.bf16 %v2127_v59, %v2127_v59 }
 0x476   : > { %v16255_v48 = vadd.f32 %v2158_v29, %v16211_v15  ;;  %12397 = vmatmul.mubr.bf16.vlgmr.msra.gmra.mrb[20].mxu1 %v2321_v30  ;;  %12427 = vmatmul.mubr.bf16.vlgmr.msra.gmra.mrb[100].mxu0 %v2326_v47  ;;  %v2014_v30 = vadd.f32 %v16098_v38, %v16109_v5  ;;  %v2050_v47 = vadd.f32 %v16143_v4, %v16109_v5 }
 0x477   : > { %12401 = vmatpush3.bf16.xpose.msra.mxu1 %v2354_v37  ;;  %12437 = vmatpush3.bf16.xpose.msra.mxu0 %v2360_v36  ;;  %v2095_v5 = vadd.f32 %v16160_v7, %v16211_v15  ;;  %v1982_v59 = vadd.f32 %v16074_v60, %v16115_v20  ;;  %v2357_v7 = vpack.c.bf16 %v16214_v62, %v16214_v62 }
 0x478   : > { %12402 = vmatprep.mubr.msk.bf16.mxu1 %vm14785_vm0, %v20575_v23  ;;  %12438 = vmatprep.mubr.msk.bf16.mxu0 %vm14785_vm0, %v20575_v23  ;;  %v2298_v34 = vmul.f32 0.088388346, %v2014_v30  ;;  %v2312_v38 = vmul.f32 0.088388346, %v2050_v47  ;;  %v2105_v62 = vadd.f32 %v16168_v32, %v16211_v15 }
 0x479   : > { %12406 = vmatprep.subr.bf16.mxu1 %v20575_v23  ;;  %12448 = vmatprep.subr.bf16.mxu0 %v20575_v23  ;;  %v2285_v60 = vmul.f32 0.088388346, %v1982_v59 }
 0x47a   : > { %v2162_v63 = vpop.f32.mrb[60].mxu0 }
 0x47b   : > { %v2163_v45 = vadd.f32 %v2162_v63, %v16158_v19  ;;  %v16266_v40 = vpop.f32.mrb[61].mxu0  ;;  %v2323_v63 = vpack.c.bf16 %v2298_v34, %v2298_v34 }
 0x47c   : > { %v2166_v46 = vpop.f32.mrb[62].mxu0 }
 0x47d   : > { %v2362_v1 = vpack.c.bf16 %v2163_v45, %v2163_v45  ;;  %v16273_v37 = vadd.f32 %v2166_v46, %v16158_v19  ;;  %v2168_v36 = vpop.f32.mrb[63].mxu0  ;;  %v2330_v45 = vpack.c.bf16 %v2312_v38, %v2312_v38  ;;  %v16312_v38 = vrot.slane %v16103_v49, %v15801_v16 }
 0x47e   : > { %v16276_v29 = vadd.f32 %v2168_v36, %v16211_v15  ;;  %12403 = vmatmul.mubr.bf16.vlgmr.msra.gmra.mrb[24].mxu1 %v2322_v55  ;;  %12439 = vmatmul.mubr.bf16.vlgmr.msra.gmra.mrb[104].mxu0 %v2328_v25  ;;  %v2364_v25 = vpack.c.bf16 %v2095_v5, %v2095_v5 }
 0x47f   : > { %12407 = vmatpush3.bf16.xpose.msra.mxu1 %v2355_v0  ;;  %12449 = vmatpush3.bf16.xpose.msra.mxu0 %v2362_v1  ;;  %v2302_v1 = vmul.f32 0.088388346, %v16118_v57 }
 0x480   : > { %12408 = vmatprep.mubr.msk.bf16.mxu1 %vm14785_vm0, %v20575_v23  ;;  %12450 = vmatprep.mubr.msk.bf16.mxu0 %vm14785_vm0, %v20575_v23 }
 0x481   : > { %12418 = vmatprep.subr.bf16.mxu1 %v20575_v23  ;;  %12460 = vmatprep.subr.bf16.mxu0 %v20575_v23  ;;  %v2325_v32 = vpack.c.bf16 %v2302_v1, %v2302_v1 }
 0x482   : > { %v16290_v4 = vpop.f32.mrb[64].mxu0 }
 0x483   : > { %v2207_v19 = vpop.f32.mrb[65].mxu0 }
 0x484   : > { %v2208_v55 = vadd.f32 %v2207_v19, %v16280_v61  ;;  %v16295_v30 = vpop.f32.mrb[66].mxu0 }
 0x485   : > { %v2211_v47 = vpop.f32.mrb[67].mxu0 }
 0x486   : > { %v2396_v46 = vpack.c.bf16 %v2208_v55, %v2208_v55  ;;  %v2212_v0 = vadd.f32 %v2211_v47, %v16280_v61  ;;  %12409 = vmatmul.mubr.bf16.vlgmr.msra.gmra.mrb[28].mxu1 %v2323_v63  ;;  %12451 = vmatmul.mubr.bf16.vlgmr.msra.gmra.mrb[108].mxu0 %v2330_v45  ;;  %v2332_v63 = vpack.c.bf16 %v2285_v60, %v2285_v60 }
 0x487   : > { %12419 = vmatpush3.bf16.xpose.msra.mxu1 %v2357_v7  ;;  %12461 = vmatpush3.bf16.xpose.msra.mxu0 %v2364_v25  ;;  %v1992_v45 = vadd.f32 %v16080_v21, %v16115_v20  ;;  %v2366_v25 = vpack.c.bf16 %v2105_v62, %v2105_v62  ;;  %v2359_v7 = vpack.c.bf16 %v16232_v24, %v16232_v24  ;;  %v2306_v62 = vmul.f32 0.088388346, %v16128_v27 }
 0x488   : > { %v16302_v36 = vsel %vm4086_vm1, %v2396_v46, 0  ;;  %v2397_v34 = vpack.c.bf16 %v2212_v0, %v2212_v0  ;;  %12420 = vmatprep.mubr.msk.bf16.mxu1 %vm14785_vm0, %v20575_v23  ;;  %12462 = vmatprep.mubr.msk.bf16.mxu0 %vm14785_vm0, %v20575_v23 }
 0x489   : > { %12430 = vmatprep.subr.bf16.mxu1 %v20575_v23  ;;  %12472 = vmatprep.subr.bf16.mxu0 %v20575_v23  ;;  %v2289_v1 = vmul.f32 0.088388346, %v1992_v45 }
 0x48a   : > { %v16317_v57 = vsel %vm4086_vm1, %v2397_v34, 0  ;;  %v2215_v5 = vpop.f32.mrb[68].mxu0 }
 0x48b   : > { %v2216_v19 = vadd.f32 %v2215_v5, %v16312_v38  ;;  %v2217_v59 = vpop.f32.mrb[69].mxu0 }
 0x48c   : > { %v2218_v55 = vadd.f32 %v2217_v59, %v16280_v61  ;;  %v2219_v49 = vpop.f32.mrb[70].mxu0  ;;  %v2115_v59 = vadd.f32 %v16177_v44, %v16211_v15 }
 0x48d   : > { %v2382_v47 = vpack.c.bf16 %v2216_v19, %v2216_v19  ;;  %v2220_v46 = vadd.f32 %v2219_v49, %v16312_v38  ;;  %v2221_v0 = vpop.f32.mrb[71].mxu0  ;;  %v2334_v49 = vpack.c.bf16 %v2289_v1, %v2289_v1 }
 0x48e   : > { %v2398_v34 = vpack.c.bf16 %v2218_v55, %v2218_v55  ;;  %v2222_v5 = vadd.f32 %v2221_v0, %v16280_v61  ;;  %12421 = vmatmul.mubr.bf16.vlgmr.msra.gmra.mrb[32].mxu1 %v2325_v32  ;;  %12463 = vmatmul.mubr.bf16.vlgmr.msra.gmra.mrb[112].mxu0 %v2332_v63  ;;  %v2361_v0 = vpack.c.bf16 %v16252_v33, %v16252_v33 }
 0x48f   : > { %v16328_v60 = vsel %vm4086_vm1, %v2382_v47, 0  ;;  %v2383_v21 = vpack.c.bf16 %v2220_v46, %v2220_v46  ;;  %12431 = vmatpush3.bf16.xpose.msra.mxu1 %v2359_v7  ;;  %12473 = vmatpush3.bf16.xpose.msra.mxu0 %v2366_v25  ;;  %v2002_v25 = vadd.f32 %v16088_v8, %v16115_v20  ;;  %v2327_v7 = vpack.c.bf16 %v2306_v62, %v2306_v62 }
 0x490   : > { %v16332_v24 = vsel %vm4086_vm1, %v2398_v34, 0  ;;  %v2399_v19 = vpack.c.bf16 %v2222_v5, %v2222_v5  ;;  %12432 = vmatprep.mubr.msk.bf16.mxu1 %vm14785_vm0, %v20575_v23  ;;  %12474 = vmatprep.mubr.msk.bf16.mxu0 %vm14785_vm0, %v20575_v23  ;;  %v2368_v46 = vpack.c.bf16 %v2115_v59, %v2115_v59  ;;  %v2310_v59 = vmul.f32 0.088388346, %v16138_v2 }
 0x491   : > { %v16341_v63 = vsel %vm4086_vm1, %v2383_v21, 0  ;;  %12442 = vmatprep.subr.bf16.mxu1 %v20575_v23  ;;  %12484 = vmatprep.subr.bf16.mxu0 %v20575_v23  ;;  %v2293_v62 = vmul.f32 0.088388346, %v2002_v25 }
 0x492   : > { %v16346_v27 = vsel %vm4086_vm1, %v2399_v19, 0  ;;  %v2225_v45 = vpop.f32.mrb[72].mxu0 }
 0x493   : > { %20576 = vst [vmem:[#allocation51_spill] sm:$0xff] %v16346_v27  ;;  %v2226_v32 = vadd.f32 %v2225_v45, %v16312_v38  ;;  %v2227_v55 = vpop.f32.mrb[73].mxu0 }
 0x494   : > { %v2228_v44 = vadd.f32 %v2227_v55, %v16280_v61  ;;  %v2229_v47 = vpop.f32.mrb[74].mxu0  ;;  %v2125_v55 = vadd.f32 %v16187_v13, %v16211_v15 }
 0x495   : > { %v2384_v34 = vpack.c.bf16 %v2226_v32, %v2226_v32  ;;  %v2230_v5 = vadd.f32 %v2229_v47, %v16312_v38  ;;  %v2231_v21 = vpop.f32.mrb[75].mxu0  ;;  %v2336_v47 = vpack.c.bf16 %v2293_v62, %v2293_v62 }
 0x496   : > { %v2400_v19 = vpack.c.bf16 %v2228_v44, %v2228_v44  ;;  %v2232_v45 = vadd.f32 %v2231_v21, %v16280_v61  ;;  %12433 = vmatmul.mubr.bf16.vlgmr.msra.gmra.mrb[36].mxu1 %v2327_v7  ;;  %12475 = vmatmul.mubr.bf16.vlgmr.msra.gmra.mrb[116].mxu0 %v2334_v49  ;;  %v2363_v21 = vpack.c.bf16 %v16273_v37, %v16273_v37 }
 0x497   : > { %v16357_v1 = vsel %vm4086_vm1, %v2384_v34, 0  ;;  %v2385_v8 = vpack.c.bf16 %v2230_v5, %v2230_v5  ;;  %12443 = vmatpush3.bf16.xpose.msra.mxu1 %v2361_v0  ;;  %12485 = vmatpush3.bf16.xpose.msra.mxu0 %v2368_v46  ;;  %v2012_v46 = vadd.f32 %v16096_v52, %v16115_v20  ;;  %v2329_v0 = vpack.c.bf16 %v2310_v59, %v2310_v59 }
 0x498   : > { %v16361_v33 = vsel %vm4086_vm1, %v2400_v19, 0  ;;  %v2401_v32 = vpack.c.bf16 %v2232_v45, %v2232_v45  ;;  %12444 = vmatprep.mubr.msk.bf16.mxu1 %vm14785_vm0, %v20575_v23  ;;  %12486 = vmatprep.mubr.msk.bf16.mxu0 %vm14785_vm0, %v20575_v23  ;;  %v2370_v5 = vpack.c.bf16 %v2125_v55, %v2125_v55  ;;  %v2314_v55 = vmul.f32 0.088388346, %v16151_v39 }
 0x499   : > { %20577 = vst [vmem:[#allocation52_spill] sm:$0xff] %v16361_v33  ;;  %v16370_v49 = vsel %vm4086_vm1, %v2385_v8, 0  ;;  %12454 = vmatprep.subr.bf16.mxu1 %v20575_v23  ;;  %12496 = vmatprep.subr.bf16.mxu0 %v20575_v23  ;;  %v2297_v59 = vmul.f32 0.088388346, %v2012_v46 }
 0x49a   : > { %v16375_v2 = vsel %vm4086_vm1, %v2401_v32, 0  ;;  %v2235_v25 = vpop.f32.mrb[76].mxu0 }
 0x49b   : > { %20578 = vst [vmem:[#allocation53_spill] sm:$0xff] %v16375_v2  ;;  %v2236_v7 = vadd.f32 %v2235_v25, %v16312_v38  ;;  %v2237_v44 = vpop.f32.mrb[77].mxu0 }
 0x49c   : > { %v2238_v13 = vadd.f32 %v2237_v44, %v16280_v61  ;;  %v2239_v34 = vpop.f32.mrb[78].mxu0  ;;  %v2099_v44 = vadd.f32 %v16164_v12, %v16211_v15 }
 0x49d   : > { %v2386_v19 = vpack.c.bf16 %v2236_v7, %v2236_v7  ;;  %v2240_v45 = vadd.f32 %v2239_v34, %v16312_v38  ;;  %v2241_v8 = vpop.f32.mrb[79].mxu0 }
 0x49e   : > { %v2402_v32 = vpack.c.bf16 %v2238_v13, %v2238_v13  ;;  %v2242_v25 = vadd.f32 %v2241_v8, %v16280_v61  ;;  %12445 = vmatmul.mubr.bf16.vlgmr.msra.gmra.mrb[40].mxu1 %v2329_v0  ;;  %12487 = vmatmul.mubr.bf16.vlgmr.msra.gmra.mrb[120].mxu0 %v2336_v47  ;;  %v2135_v47 = vadd.f32 %v16203_v56, %v16211_v15 }
 0x49f   : > { %v16386_v62 = vsel %vm4086_vm1, %v2386_v19, 0  ;;  %v2387_v52 = vpack.c.bf16 %v2240_v45, %v2240_v45  ;;  %12455 = vmatpush3.bf16.xpose.msra.mxu1 %v2363_v21  ;;  %12497 = vmatpush3.bf16.xpose.msra.mxu0 %v2370_v5  ;;  %v1986_v13 = vadd.f32 %v16076_v41, %v16115_v20  ;;  %v2338_v5 = vpack.c.bf16 %v2297_v59, %v2297_v59 }
 0x4a0   : > { %v16390_v37 = vsel %vm4086_vm1, %v2402_v32, 0  ;;  %v2403_v7 = vpack.c.bf16 %v2242_v25, %v2242_v25  ;;  %12456 = vmatprep.mubr.msk.bf16.mxu1 %vm14785_vm0, %v20575_v23  ;;  %12498 = vmatprep.mubr.msk.bf16.mxu0 %vm14785_vm0, %v20575_v23  ;;  %v2022_v56 = vadd.f32 %v16111_v3, %v16115_v20  ;;  %v2331_v21 = vpack.c.bf16 %v2314_v55, %v2314_v55 }
 0x4a1   : > { %20579 = vst [vmem:[#allocation54_spill] sm:$0xff] %v16390_v37  ;;  %v16401_v46 = vsel %vm4086_vm1, %v2387_v52, 0  ;;  %12466 = vmatprep.subr.bf16.mxu1 %v20575_v23  ;;  %12508 = vmatprep.subr.bf16.mxu0 %v20575_v23  ;;  %v2365_v8 = vpack.c.bf16 %v2099_v44, %v2099_v44  ;;  %v2372_v32 = vpack.c.bf16 %v2135_v47, %v2135_v47 }
 0x4a2   : > { %v16406_v39 = vsel %vm4086_vm1, %v2403_v7, 0  ;;  %v2245_v0 = vpop.f32.mrb[80].mxu0  ;;  %v2301_v55 = vmul.f32 0.088388346, %v2022_v56 }
 0x4a3   : > { %20580 = vst [vmem:[#allocation55_spill] sm:$0xff] %v16406_v39  ;;  %v2246_v34 = vadd.f32 %v2245_v0, %v16312_v38  ;;  %v2247_v12 = vpop.f32.mrb[81].mxu0  ;;  %v2287_v0 = vmul.f32 0.088388346, %v1986_v13  ;;  %v2109_v13 = vadd.f32 %v16171_v26, %v16211_v15  ;;  %v1996_v26 = vadd.f32 %v16084_v17, %v16115_v20 }
 0x4a4   : > { %v2248_v19 = vadd.f32 %v2247_v12, %v16280_v61  ;;  %v2249_v45 = vpop.f32.mrb[82].mxu0 }
 0x4a5   : > { %v2388_v25 = vpack.c.bf16 %v2246_v34, %v2246_v34  ;;  %v2250_v52 = vadd.f32 %v2249_v45, %v16312_v38  ;;  %v2251_v7 = vpop.f32.mrb[83].mxu0  ;;  %v2145_v34 = vadd.f32 %v16225_v42, %v16211_v15  ;;  %v2333_v56 = vpack.c.bf16 %v2287_v0, %v2287_v0 }
 0x4a6   : > { %v2404_v58 = vpack.c.bf16 %v2248_v19, %v2248_v19  ;;  %v2252_v41 = vadd.f32 %v2251_v7, %v16280_v61  ;;  %12457 = vmatmul.mubr.bf16.vlgmr.msra.gmra.mrb[44].mxu1 %v2331_v21  ;;  %12499 = vmatmul.mubr.bf16.vlgmr.msra.gmra.mrb[124].mxu0 %v2338_v5  ;;  %v2340_v45 = vpack.c.bf16 %v2301_v55, %v2301_v55 }
 0x4a7   : > { %v16417_v59 = vsel %vm4086_vm1, %v2388_v25, 0  ;;  %v2389_v3 = vpack.c.bf16 %v2250_v52, %v2250_v52  ;;  %12467 = vmatpush3.bf16.xpose.msra.mxu1 %v2365_v8  ;;  %12509 = vmatpush3.bf16.xpose.msra.mxu0 %v2372_v32  ;;  %v2032_v42 = vadd.f32 %v16125_v6, %v16115_v20  ;;  %v2367_v25 = vpack.c.bf16 %v2109_v13, %v2109_v13 }
 0x4a8   : > { %v16420_v44 = vsel %vm4086_vm1, %v2404_v58, 0  ;;  %v2405_v47 = vpack.c.bf16 %v2252_v41, %v2252_v41  ;;  %12468 = vmatprep.mubr.msk.bf16.mxu1 %vm14785_vm0, %v20575_v23  ;;  %12510 = vmatprep.mubr.msk.bf16.mxu0 %vm14785_vm0, %v20575_v23  ;;  %v2374_v52 = vpack.c.bf16 %v2145_v34, %v2145_v34  ;;  %v2291_v6 = vmul.f32 0.088388346, %v1996_v26 }
 0x4a9   : > { %20581 = vst [vmem:[#allocation56_spill] sm:$0xff] %v16420_v44  ;;  %v16431_v12 = vsel %vm4086_vm1, %v2389_v3, 0  ;;  %12478 = vmatprep.subr.bf16.mxu1 %v20575_v23  ;;  %12520 = vmatprep.subr.bf16.mxu0 %v20575_v23 }
 0x4aa   : > { %v16436_v58 = vsel %vm4086_vm1, %v2405_v47, 0  ;;  %v2255_v5 = vpop.f32.mrb[84].mxu0 }
 0x4ab   : > { %20582 = vst [vmem:[#allocation57_spill] sm:$0xff] %v16436_v58  ;;  %v2256_v21 = vadd.f32 %v2255_v5, %v16312_v38  ;;  %v2257_v19 = vpop.f32.mrb[85].mxu0  ;;  %v2305_v5 = vmul.f32 0.088388346, %v2032_v42  ;;  %v2006_v42 = vadd.f32 %v16092_v35, %v16115_v20 }
 0x4ac   : > { %v2258_v8 = vadd.f32 %v2257_v19, %v16280_v61  ;;  %v2259_v32 = vpop.f32.mrb[86].mxu0 }
 0x4ad   : > { %v2390_v7 = vpack.c.bf16 %v2256_v21, %v2256_v21  ;;  %v2260_v41 = vadd.f32 %v2259_v32, %v16312_v38  ;;  %v2261_v3 = vpop.f32.mrb[87].mxu0  ;;  %v2155_v21 = vadd.f32 %v16245_v18, %v16211_v15  ;;  %v2335_v32 = vpack.c.bf16 %v2291_v6, %v2291_v6 }
 0x4ae   : > { %v2406_v0 = vpack.c.bf16 %v2258_v8, %v2258_v8  ;;  %v2262_v47 = vadd.f32 %v2261_v3, %v16280_v61  ;;  %12469 = vmatmul.mubr.bf16.vlgmr.msra.gmra.mrb[48].mxu1 %v2333_v56  ;;  %12511 = vmatmul.mubr.bf16.vlgmr.msra.gmra.mrb[128].mxu0 %v2340_v45  ;;  %v2119_v56 = vadd.f32 %v16181_v28, %v16211_v15 }
 0x4af   : > { %v16447_v17 = vsel %vm4086_vm1, %v2390_v7, 0  ;;  %v2391_v55 = vpack.c.bf16 %v2260_v41, %v2260_v41  ;;  %12479 = vmatpush3.bf16.xpose.msra.mxu1 %v2367_v25  ;;  %12521 = vmatpush3.bf16.xpose.msra.mxu0 %v2374_v52  ;;  %v2342_v25 = vpack.c.bf16 %v2305_v5, %v2305_v5  ;;  %v2042_v18 = vadd.f32 %v16135_v11, %v16115_v20 }
 0x4b0   : > { %v16450_v13 = vsel %vm4086_vm1, %v2406_v0, 0  ;;  %v2407_v34 = vpack.c.bf16 %v2262_v47, %v2262_v47  ;;  %12480 = vmatprep.mubr.msk.bf16.mxu1 %vm14785_vm0, %v20575_v23  ;;  %12522 = vmatprep.mubr.msk.bf16.mxu0 %vm14785_vm0, %v20575_v23  ;;  %v2369_v41 = vpack.c.bf16 %v2119_v56, %v2119_v56  ;;  %v2376_v3 = vpack.c.bf16 %v2155_v21, %v2155_v21 }
 0x4b1   : > { %20583 = vst [vmem:[#allocation58_spill] sm:$0xff] %v16450_v13  ;;  %v16461_v19 = vsel %vm4086_vm1, %v2391_v55, 0  ;;  %12490 = vmatprep.subr.bf16.mxu1 %v20575_v23  ;;  %12532 = vmatprep.subr.bf16.mxu0 %v20575_v23  ;;  %v2309_v11 = vmul.f32 0.088388346, %v2042_v18 }
 0x4b2   : > { %v16466_v26 = vsel %vm4086_vm1, %v2407_v34, 0  ;;  %v2265_v45 = vpop.f32.mrb[88].mxu0 }
 0x4b3   : > { %20584 = vst [vmem:[#allocation59_spill] sm:$0xff] %v16466_v26  ;;  %v2266_v8 = vadd.f32 %v2265_v45, %v16312_v38  ;;  %v2267_v28 = vpop.f32.mrb[89].mxu0  ;;  %v2295_v45 = vmul.f32 0.088388346, %v2006_v42  ;;  %v2129_v42 = vadd.f32 %v16193_v51, %v16211_v15  ;;  %v2016_v51 = vadd.f32 %v16100_v53, %v16115_v20 }
 0x4b4   : > { %v2268_v52 = vadd.f32 %v2267_v28, %v16280_v61  ;;  %v2269_v7 = vpop.f32.mrb[90].mxu0 }
 0x4b5   : > { %v2392_v0 = vpack.c.bf16 %v2266_v8, %v2266_v8  ;;  %v2270_v47 = vadd.f32 %v2269_v7, %v16312_v38  ;;  %v2271_v55 = vpop.f32.mrb[91].mxu0  ;;  %v2165_v8 = vadd.f32 %v16266_v40, %v16211_v15  ;;  %v2337_v18 = vpack.c.bf16 %v2295_v45, %v2295_v45 }
 0x4b6   : > { %v2408_v34 = vpack.c.bf16 %v2268_v52, %v2268_v52  ;;  %v2272_v35 = vadd.f32 %v2271_v55, %v16280_v61  ;;  %12481 = vmatmul.mubr.bf16.vlgmr.msra.gmra.mrb[52].mxu1 %v2335_v32  ;;  %12523 = vmatmul.mubr.bf16.vlgmr.msra.gmra.mrb[132].mxu0 %v2342_v25  ;;  %v2052_v15 = vadd.f32 %v16145_v9, %v16115_v20  ;;  %v2299_v9 = vmul.f32 0.088388346, %v2016_v51 }
 0x4b7   : > { %v16477_v6 = vsel %vm4086_vm1, %v2392_v0, 0  ;;  %v2393_v5 = vpack.c.bf16 %v2270_v47, %v2270_v47  ;;  %12491 = vmatpush3.bf16.xpose.msra.mxu1 %v2369_v41  ;;  %12533 = vmatpush3.bf16.xpose.msra.mxu0 %v2376_v3  ;;  %v2344_v41 = vpack.c.bf16 %v2309_v11, %v2309_v11  ;;  %v2371_v0 = vpack.c.bf16 %v2129_v42, %v2129_v42 }
 0x4b8   : > { %v16480_v56 = vsel %vm4086_vm1, %v2408_v34, 0  ;;  %v2409_v21 = vpack.c.bf16 %v2272_v35, %v2272_v35  ;;  %12492 = vmatprep.mubr.msk.bf16.mxu1 %vm14785_vm0, %v20575_v23  ;;  %12534 = vmatprep.mubr.msk.bf16.mxu0 %vm14785_vm0, %v20575_v23  ;;  %v2378_v47 = vpack.c.bf16 %v2165_v8, %v2165_v8  ;;  %v2206_v45 = vadd.f32 %v16290_v4, %v16312_v38 }
 0x4b9   : > { %20585 = vst [vmem:[#allocation60_spill] sm:$0xff] %v16480_v56  ;;  %v16491_v28 = vsel %vm4086_vm1, %v2393_v5, 0  ;;  %12502 = vmatprep.subr.bf16.mxu1 %v20575_v23  ;;  %12544 = vmatprep.subr.bf16.mxu0 %v20575_v23  ;;  %v2313_v11 = vmul.f32 0.088388346, %v2052_v15 }
 0x4ba   : > { %v16496_v32 = vsel %vm4086_vm1, %v2409_v21, 0  ;;  %v2275_v25 = vpop.f32.mrb[92].mxu0  ;;  %v2380_v4 = vpack.c.bf16 %v2206_v45, %v2206_v45 }
 0x4bb   : > { %20586 = vst [vmem:[#allocation61_spill] sm:$0xff] %v16496_v32  ;;  %v2276_v52 = vadd.f32 %v2275_v25, %v16312_v38  ;;  %v2277_v7 = vpop.f32.mrb[93].mxu0 }
 0x4bc   : > { %v2278_v40 = vadd.f32 %v2277_v7, %v16280_v61  ;;  %v2279_v3 = vpop.f32.mrb[94].mxu0  ;;  %v2373_v7 = vpack.c.bf16 %v16217_v54, %v16217_v54  ;;  %v4088_v51 = vsel %vm4086_vm1, %v2380_v4, 0  ;;  %v2375_v54 = vpack.c.bf16 %v16235_v22, %v16235_v22 }
 0x4bd   : > { %v2394_v55 = vpack.c.bf16 %v2276_v52, %v2276_v52  ;;  %v2280_v34 = vadd.f32 %v2279_v3, %v16312_v38  ;;  %v2281_v35 = vpop.f32.mrb[95].mxu0  ;;  %v2346_v52 = vpack.c.bf16 %v2313_v11, %v2313_v11  ;;  %v2377_v3 = vpack.c.bf16 %v16255_v48, %v16255_v48 }
 0x4be   : > { %v2410_v5 = vpack.c.bf16 %v2278_v40, %v2278_v40  ;;  %v2282_v21 = vadd.f32 %v2281_v35, %v16280_v61  ;;  %12493 = vmatmul.mubr.bf16.vlgmr.msra.gmra.mrb[56].mxu1 %v2337_v18  ;;  %12535 = vmatmul.mubr.bf16.vlgmr.msra.gmra.mrb[136].mxu0 %v2344_v41  ;;  %v2339_v18 = vpack.c.bf16 %v2299_v9, %v2299_v9  ;;  %v2303_v41 = vmul.f32 0.088388346, %v16121_v31 }
 0x4bf   : > { %v16509_v53 = vsel %vm4086_vm1, %v2394_v55, 0  ;;  %v2395_v20 = vpack.c.bf16 %v2280_v34, %v2280_v34  ;;  %12503 = vmatpush3.bf16.xpose.msra.mxu1 %v2371_v0  ;;  %12545 = vmatpush3.bf16.xpose.msra.mxu0 %v2378_v47  ;;  %v2307_v31 = vmul.f32 0.088388346, %v16131_v10  ;;  %v2311_v22 = vmul.f32 0.088388346, %v16141_v43 }
 0x4c0   : > { %v16512_v42 = vsel %vm4086_vm1, %v2410_v5, 0  ;;  %v2411_v8 = vpack.c.bf16 %v2282_v21, %v2282_v21  ;;  %12504 = vmatprep.mubr.msk.bf16.mxu1 %vm14785_vm0, %v20575_v23  ;;  %12546 = vmatprep.mubr.msk.bf16.mxu0 %vm14785_vm0, %v20575_v23  ;;  %v2341_v15 = vpack.c.bf16 %v2303_v41, %v2303_v41  ;;  %v2379_v47 = vpack.c.bf16 %v16276_v29, %v16276_v29 }
 0x4c1   : > { %20587 = vst [vmem:[#allocation62_spill] sm:$0xff] %v16512_v42  ;;  %v16519_v61 = vsel %vm4086_vm1, %v2395_v20, 0  ;;  %12514 = vmatprep.subr.bf16.mxu1 %v20575_v23  ;;  %12556 = vmatprep.subr.bf16.mxu0 %v20575_v23  ;;  %v2343_v40 = vpack.c.bf16 %v2307_v31, %v2307_v31  ;;  %v2345_v0 = vpack.c.bf16 %v2311_v22, %v2311_v22  ;;  %v2315_v48 = vmul.f32 0.088388346, %v16154_v50 }
 0x4c2   : > { %v16524_v25 = vsel %vm4086_vm1, %v2411_v8, 0  ;;  %v2210_v10 = vadd.f32 %v16295_v30, %v16312_v38  ;;  %v20589_v29 = vlaneseq  ;;  %v14786_v38 = vmov -1e+09  }
 0x4c3   : > { %20588 = vst [vmem:[#allocation63_spill] sm:$0xff] %v16524_v25  ;;  %v2347_v43 = vpack.c.bf16 %v2315_v48, %v2315_v48 }
 0x4c4   : > { %v2381_v55 = vpack.c.bf16 %v2210_v10, %v2210_v10  ;;  %v2415_v30 = vand.u32 127, %v20589_v29 }
 0x4c6   : > { %12505 = vmatmul.mubr.bf16.vlgmr.msra.gmra.mrb[60].mxu1 %v2339_v18  ;;  %12547 = vmatmul.mubr.bf16.vlgmr.msra.gmra.mrb[140].mxu0 %v2346_v52  ;;  %v4134_v34 = vsel %vm4086_vm1, %v2381_v55, 0  ;;  %vm2416_vm2 = vcmp.ge.s32.totalorder %v15798_v14, %v2415_v30 }
 0x4c7   : > { %12515 = vmatpush3.bf16.xpose.msra.mxu1 %v2373_v7  ;;  %12557 = vmatpush3.bf16.msra.mxu0 %v4088_v51  ;;  %v16562_v35 = vsel %vm2416_vm2, 0.0, %v14786_v38 }
 0x4c8   : > { %12516 = vmatprep.mubr.msk.bf16.mxu1 %vm14785_vm0, %v20575_v23  ;;  %12526 = vmatprep.subr.bf16.mxu1 %v20575_v23 }
 0x4c9   : > { %12558 = vmatprep.mubr.msk.bf16.mxu0 %vm14785_vm0, %v20575_v23  ;;  %12568 = vmatprep.subr.bf16.mxu0 %v20575_v23 }
 0x4ce   : > { %12517 = vmatmul.mubr.bf16.vlgmr.msra.gmra.mrb[64].mxu1 %v2341_v15 }
 0x4cf   : > { %12527 = vmatpush3.bf16.xpose.msra.mxu1 %v2375_v54  ;;  %12528 = vmatprep.mubr.msk.bf16.mxu1 %vm14785_vm0, %v20575_v23 }
 0x4d0   : > { %12538 = vmatprep.subr.bf16.mxu1 %v20575_v23 }
 0x4d6   : > { %12529 = vmatmul.mubr.bf16.vlgmr.msra.gmra.mrb[68].mxu1 %v2343_v40 }
 0x4d7   : > { %12539 = vmatpush3.bf16.xpose.msra.mxu1 %v2377_v3  ;;  %12540 = vmatprep.mubr.msk.bf16.mxu1 %vm14785_vm0, %v20575_v23 }
 0x4d8   : > { %12550 = vmatprep.subr.bf16.mxu1 %v20575_v23 }
 0x4de   : > { %12541 = vmatmul.mubr.bf16.vlgmr.msra.gmra.mrb[72].mxu1 %v2345_v0 }
 0x4df   : > { %12551 = vmatpush3.bf16.xpose.msra.mxu1 %v2379_v47  ;;  %12552 = vmatprep.mubr.msk.bf16.mxu1 %vm14785_vm0, %v20575_v23 }
 0x4e0   : > { %12562 = vmatprep.subr.bf16.mxu1 %v20575_v23 }
 0x4e6   : > { %12553 = vmatmul.mubr.bf16.vlgmr.msra.gmra.mrb[76].mxu1 %v2347_v43 }
 0x4e7   : > { %12563 = vmatpush3.bf16.msra.mxu1 %v4134_v34  ;;  %12564 = vmatprep.mubr.msk.bf16.mxu1 %vm14785_vm0, %v20575_v23 }
 0x4e8   : > { %12574 = vmatprep.subr.bf16.mxu1 %v20575_v23 }
 0x521   : > { %v2452_v50 = vpop.f32.mrb[0].mxu1 }
 0x522   : > { %v16565_v45 = vadd.f32 %v2452_v50, %v16562_v35  ;;  %v12368_v5 = vpop.f32.mrb[1].mxu1 }
 0x523   : > { %v2455_v21 = vpop.f32.mrb[2].mxu1 }
 0x524   : > { %v12369_v20 = vpop.f32.mrb[3].mxu1  ;;  %v3699_v9 = vsel %vm3698_vm3, %v16565_v45, -inf }
 0x525   : > { %3700 = vmax.xlane.f32.xlu0 %v3699_v9 }
 0x529   : > { %v2492_v11 = vpop.f32.mrb[4].mxu1 }
 0x52a   : > { %v16570_v8 = vadd.f32 %v2492_v11, %v16562_v35  ;;  %v12374_v4 = vpop.f32.mrb[5].mxu1 }
 0x52b   : > { %v2495_v18 = vpop.f32.mrb[6].mxu1 }
 0x52c   : > { %v12375_v52 = vpop.f32.mrb[7].mxu1  ;;  %v3702_v7 = vsel %vm3698_vm3, %v16570_v8, -inf }
 0x52d   : > { %3703 = vmax.xlane.f32.xlu1 %v3702_v7 }
 0x531   : > { %v2532_v51 = vpop.f32.mrb[8].mxu1 }
 0x532   : > { %v16575_v41 = vadd.f32 %v2532_v51, %v16562_v35  ;;  %v12380_v15 = vpop.f32.mrb[9].mxu1 }
 0x533   : > { %v2535_v54 = vpop.f32.mrb[10].mxu1 }
 0x534   : > { %v12381_v31 = vpop.f32.mrb[11].mxu1  ;;  %v3705_v40 = vsel %vm3698_vm3, %v16575_v41, -inf }
 0x535   : > { %3706 = vmax.xlane.f32.xlu0 %v3705_v40 }
 0x539   : > { %v2572_v3 = vpop.f32.mrb[12].mxu1 }
 0x53a   : > { %v16580_v22 = vadd.f32 %v2572_v3, %v16562_v35  ;;  %v12386_v0 = vpop.f32.mrb[13].mxu1 }
 0x53b   : > { %v2575_v47 = vpop.f32.mrb[14].mxu1 }
 0x53c   : > { %v12387_v10 = vpop.f32.mrb[15].mxu1  ;;  %v3708_v48 = vsel %vm3698_vm3, %v16580_v22, -inf }
 0x53d   : > { %3709 = vmax.xlane.f32.xlu1 %v3708_v48 }
 0x541   : > { %v2612_v55 = vpop.f32.mrb[16].mxu1  ;;  %v2772_v43 = vpop.f32.mrb[96].mxu0 }
 0x542   : > { %v16585_v34 = vadd.f32 %v2612_v55, %v16562_v35  ;;  %v12392_v29 = vpop.f32.mrb[17].mxu1  ;;  %v12416_v30 = vpop.f32.mrb[97].mxu0 }
 0x543   : > { %v2615_v38 = vpop.f32.mrb[18].mxu1  ;;  %v2775_v50 = vpop.f32.mrb[98].mxu0  ;;  %v16598_v29 = vadd.f32 %v2772_v43, %v16562_v35 }
 0x544   : > { %v12393_v5 = vpop.f32.mrb[19].mxu1  ;;  %v12417_v21 = vpop.f32.mrb[99].mxu0  ;;  %v3711_v20 = vsel %vm3698_vm3, %v16585_v34, -inf }
 0x545   : > { %3712 = vmax.xlane.f32.xlu0 %v3711_v20  ;;  %v3723_v21 = vsel %vm3698_vm3, %v16598_v29, -inf }
 0x549   : > { %v2652_v9 = vpop.f32.mrb[20].mxu1  ;;  %v2852_v11 = vpop.f32.mrb[100].mxu0 }
 0x54a   : > { %v16590_v4 = vadd.f32 %v2652_v9, %v16562_v35  ;;  %v12398_v18 = vpop.f32.mrb[21].mxu1  ;;  %v12428_v52 = vpop.f32.mrb[101].mxu0  ;;  %v16603_v5 = vadd.f32 %v2852_v11, %v16562_v35 }
 0x54b   : > { %v2655_v7 = vpop.f32.mrb[22].mxu1  ;;  %v2855_v51 = vpop.f32.mrb[102].mxu0 }
 0x54c   : > { %v12399_v15 = vpop.f32.mrb[23].mxu1  ;;  %v12429_v54 = vpop.f32.mrb[103].mxu0  ;;  %v3714_v31 = vsel %vm3698_vm3, %v16590_v4, -inf  ;;  %v3729_v11 = vsel %vm3698_vm3, %v16603_v5, -inf }
 0x54d   : > { %3715 = vmax.xlane.f32.xlu1 %v3714_v31 }
 0x551   : > { %v2692_v40 = vpop.f32.mrb[24].mxu1  ;;  %v2932_v3 = vpop.f32.mrb[104].mxu0 }
 0x552   : > { %v16595_v0 = vadd.f32 %v2692_v40, %v16562_v35  ;;  %v12404_v47 = vpop.f32.mrb[25].mxu1  ;;  %v12440_v10 = vpop.f32.mrb[105].mxu0  ;;  %v16611_v15 = vadd.f32 %v2932_v3, %v16562_v35 }
 0x553   : > { %v2695_v48 = vpop.f32.mrb[26].mxu1  ;;  %v2935_v55 = vpop.f32.mrb[106].mxu0 }
 0x554   : > { %v12405_v30 = vpop.f32.mrb[27].mxu1  ;;  %v12441_v38 = vpop.f32.mrb[107].mxu0  ;;  %v3717_v50 = vsel %vm3698_vm3, %v16595_v0, -inf  ;;  %v3735_v10 = vsel %vm3698_vm3, %v16611_v15, -inf }
 0x555   : > { %3718 = vmax.xlane.f32.xlu0 %v3717_v50 }
 0x559   : > { %3724 = vmax.xlane.f32.xlu0 %v3723_v21  ;;  %v2732_v20 = vpop.f32.mrb[28].mxu1  ;;  %v3012_v9 = vpop.f32.mrb[108].mxu0 }
 0x55a   : > { %v16608_v18 = vadd.f32 %v2732_v20, %v16562_v35  ;;  %v12410_v43 = vpop.f32.mrb[29].mxu1  ;;  %v12452_v52 = vpop.f32.mrb[109].mxu0  ;;  %v16618_v47 = vadd.f32 %v3012_v9, %v16562_v35 }
 0x55b   : > { %v2735_v7 = vpop.f32.mrb[30].mxu1  ;;  %v3015_v51 = vpop.f32.mrb[110].mxu0 }
 0x55c   : > { %v12411_v54 = vpop.f32.mrb[31].mxu1  ;;  %v12453_v31 = vpop.f32.mrb[111].mxu0  ;;  %v3720_v40 = vsel %vm3698_vm3, %v16608_v18, -inf  ;;  %v3741_v7 = vsel %vm3698_vm3, %v16618_v47, -inf }
 0x55d   : > { %3730 = vmax.xlane.f32.xlu0 %v3729_v11  ;;  %3721 = vmax.xlane.f32.xlu1 %v3720_v40 }
 0x561   : > { %3736 = vmax.xlane.f32.xlu0 %v3735_v10  ;;  %v2812_v48 = vpop.f32.mrb[32].mxu1  ;;  %v3092_v3 = vpop.f32.mrb[112].mxu0 }
 0x562   : > { %v16623_v55 = vadd.f32 %v2812_v48, %v16562_v35  ;;  %v12422_v30 = vpop.f32.mrb[33].mxu1  ;;  %v12464_v38 = vpop.f32.mrb[113].mxu0  ;;  %v16626_v20 = vadd.f32 %v3092_v3, %v16562_v35 }
 0x563   : > { %v2815_v50 = vpop.f32.mrb[34].mxu1  ;;  %v3095_v21 = vpop.f32.mrb[114].mxu0 }
 0x564   : > { %v12423_v43 = vpop.f32.mrb[35].mxu1  ;;  %v12465_v52 = vpop.f32.mrb[115].mxu0  ;;  %v3726_v9 = vsel %vm3698_vm3, %v16623_v55, -inf  ;;  %v3747_v51 = vsel %vm3698_vm3, %v16626_v20, -inf }
 0x565   : > { %3727 = vmax.xlane.f32.xlu1 %v3726_v9  ;;  %3742 = vmax.xlane.f32.xlu0 %v3741_v7 }
 0x569   : > { %v2892_v54 = vpop.f32.mrb[36].mxu1  ;;  %3748 = vmax.xlane.f32.xlu0 %v3747_v51  ;;  %v3172_v31 = vpop.f32.mrb[116].mxu0 }
 0x56a   : > { %v16635_v11 = vadd.f32 %v2892_v54, %v16562_v35  ;;  %v16638_v40 = vadd.f32 %v3172_v31, %v16562_v35  ;;  %v12434_v10 = vpop.f32.mrb[37].mxu1  ;;  %v12476_v48 = vpop.f32.mrb[117].mxu0 }
 0x56b   : > { %v2895_v3 = vpop.f32.mrb[38].mxu1  ;;  %v3175_v30 = vpop.f32.mrb[118].mxu0 }
 0x56c   : > { %v12435_v38 = vpop.f32.mrb[39].mxu1  ;;  %v12477_v50 = vpop.f32.mrb[119].mxu0  ;;  %v3732_v21 = vsel %vm3698_vm3, %v16635_v11, -inf  ;;  %v3753_v43 = vsel %vm3698_vm3, %v16638_v40, -inf }
 0x56d   : > { %3733 = vmax.xlane.f32.xlu1 %v3732_v21  ;;  %3754 = vmax.xlane.f32.xlu0 %v3753_v43 }
 0x571   : > { %v2972_v52 = vpop.f32.mrb[40].mxu1  ;;  %v3252_v9 = vpop.f32.mrb[120].mxu0 }
 0x572   : > { %v16645_v7 = vadd.f32 %v2972_v52, %v16562_v35  ;;  %v16648_v51 = vadd.f32 %v3252_v9, %v16562_v35  ;;  %v12446_v54 = vpop.f32.mrb[41].mxu1  ;;  %v12488_v31 = vpop.f32.mrb[121].mxu0 }
 0x573   : > { %v2975_v10 = vpop.f32.mrb[42].mxu1  ;;  %v3255_v48 = vpop.f32.mrb[122].mxu0 }
 0x574   : > { %v12447_v3 = vpop.f32.mrb[43].mxu1  ;;  %v12489_v30 = vpop.f32.mrb[123].mxu0  ;;  %v3738_v38 = vsel %vm3698_vm3, %v16645_v7, -inf  ;;  %v3759_v50 = vsel %vm3698_vm3, %v16648_v51, -inf }
 0x575   : > { %3739 = vmax.xlane.f32.xlu1 %v3738_v38  ;;  %3760 = vmax.xlane.f32.xlu0 %v3759_v50 }
 0x579   : > { %v3052_v21 = vpop.f32.mrb[44].mxu1  ;;  %v3332_v43 = vpop.f32.mrb[124].mxu0 }
 0x57a   : > { %v16655_v52 = vadd.f32 %v3052_v21, %v16562_v35  ;;  %v16658_v9 = vadd.f32 %v3332_v43, %v16562_v35  ;;  %v12458_v54 = vpop.f32.mrb[45].mxu1  ;;  %v12500_v31 = vpop.f32.mrb[125].mxu0 }
 0x57b   : > { %v3055_v10 = vpop.f32.mrb[46].mxu1  ;;  %v3335_v48 = vpop.f32.mrb[126].mxu0 }
 0x57c   : > { %v12459_v3 = vpop.f32.mrb[47].mxu1  ;;  %v12501_v30 = vpop.f32.mrb[127].mxu0  ;;  %v3744_v16 = vsel %vm3698_vm3, %v16655_v52, -inf  ;;  %v3765_v38 = vsel %vm3698_vm3, %v16658_v9, -inf }
 0x57d   : > { %3745 = vmax.xlane.f32.xlu1 %v3744_v16  ;;  %3766 = vmax.xlane.f32.xlu0 %v3765_v38 }
 0x581   : > { %v3132_v50 = vpop.f32.mrb[48].mxu1  ;;  %v16664_v21 = vpop.f32.mrb[128].mxu0 }
 0x582   : > { %v16667_v43 = vadd.f32 %v3132_v50, %v16562_v35  ;;  %v12470_v54 = vpop.f32.mrb[49].mxu1  ;;  %v12512_v31 = vpop.f32.mrb[129].mxu0 }
 0x583   : > { %v3135_v10 = vpop.f32.mrb[50].mxu1  ;;  %v3415_v48 = vpop.f32.mrb[130].mxu0 }
 0x584   : > { %v12471_v3 = vpop.f32.mrb[51].mxu1  ;;  %v12513_v30 = vpop.f32.mrb[131].mxu0  ;;  %v3750_v14 = vsel %vm3698_vm3, %v16667_v43, -inf }
 0x585   : > { %3751 = vmax.xlane.f32.xlu1 %v3750_v14 }
 0x589   : > { %v3212_v25 = vpop.f32.mrb[52].mxu1  ;;  %v16671_v42 = vpop.f32.mrb[132].mxu0 }
 0x58a   : > { %v16674_v16 = vadd.f32 %v3212_v25, %v16562_v35  ;;  %v12482_v38 = vpop.f32.mrb[53].mxu1  ;;  %v12524_v32 = vpop.f32.mrb[133].mxu0 }
 0x58b   : > { %v3215_v50 = vpop.f32.mrb[54].mxu1  ;;  %v3495_v56 = vpop.f32.mrb[134].mxu0 }
 0x58c   : > { %v12483_v54 = vpop.f32.mrb[55].mxu1  ;;  %v12525_v31 = vpop.f32.mrb[135].mxu0  ;;  %v3756_v10 = vsel %vm3698_vm3, %v16674_v16, -inf }
 0x58d   : > { %3757 = vmax.xlane.f32.xlu1 %v3756_v10 }
 0x591   : > { %v3292_v48 = vpop.f32.mrb[56].mxu1  ;;  %v16678_v3 = vpop.f32.mrb[136].mxu0 }
 0x592   : > { %v16681_v14 = vadd.f32 %v3292_v48, %v16562_v35  ;;  %v12494_v30 = vpop.f32.mrb[57].mxu1  ;;  %v12536_v26 = vpop.f32.mrb[137].mxu0 }
 0x593   : > { %v3295_v25 = vpop.f32.mrb[58].mxu1  ;;  %v3575_v13 = vpop.f32.mrb[138].mxu0 }
 0x594   : > { %v12495_v38 = vpop.f32.mrb[59].mxu1  ;;  %v12537_v32 = vpop.f32.mrb[139].mxu0  ;;  %v3762_v56 = vsel %vm3698_vm3, %v16681_v14, -inf }
 0x595   : > { %3763 = vmax.xlane.f32.xlu1 %v3762_v56 }
 0x599   : > { %v3372_v50 = vpop.f32.mrb[60].mxu1  ;;  %v16685_v54 = vpop.f32.mrb[140].mxu0 }
 0x59a   : > { %v16688_v31 = vadd.f32 %v3372_v50, %v16562_v35  ;;  %v12506_v10 = vpop.f32.mrb[61].mxu1  ;;  %v12548_v58 = vpop.f32.mrb[141].mxu0 }
 0x59b   : > { %v3375_v48 = vpop.f32.mrb[62].mxu1  ;;  %v3655_v44 = vpop.f32.mrb[142].mxu0 }
 0x59c   : > { %v12507_v30 = vpop.f32.mrb[63].mxu1  ;;  %v12549_v26 = vpop.f32.mrb[143].mxu0  ;;  %v3768_v13 = vsel %vm3698_vm3, %v16688_v31, -inf }
 0x59d   : > { %3769 = vmax.xlane.f32.xlu1 %v3768_v13 }
 0x5a1   : > { %v3452_v25 = vpop.f32.mrb[64].mxu1 }
 0x5a2   : > { %v12518_v38 = vpop.f32.mrb[65].mxu1 }
 0x5a3   : > { %v3455_v32 = vpop.f32.mrb[66].mxu1 }
 0x5a4   : > { %v12519_v56 = vpop.f32.mrb[67].mxu1 }
 0x5a9   : > { %v3532_v39 = vpop.f32.mrb[68].mxu1 }
 0x5aa   : > { %v12530_v37 = vpop.f32.mrb[69].mxu1 }
 0x5ab   : > { %v3535_v2 = vpop.f32.mrb[70].mxu1 }
 0x5ac   : > { %v12531_v33 = vpop.f32.mrb[71].mxu1 }
 0x5b1   : > { %v16692_v50 = vpop.f32.mrb[72].mxu1 }
 0x5b2   : > { %v3701_v10 = vpop.xlane.xlu0 %3700  ;;  %v12542_v58 = vpop.f32.mrb[73].mxu1 }
 0x5b3   : > { %v3795_v44 = vsub.f32 %v16565_v45, %v3701_v10  ;;  %v3615_v48 = vpop.f32.mrb[74].mxu1  ;;  %v16702_v58 = vadd.f32 %v16664_v21, %v16562_v35 }
 0x5b4   : > { %v12543_v30 = vpop.f32.mrb[75].mxu1 }
 0x5b5   : > { %v3827_v26 = vmul.f32 1.442695, %v3795_v44 }
 0x5b7   : > { %13484 = vpow2.f32 %v3827_v26  ;;  %v16712_v26 = vadd.f32 %v3452_v25, %v16562_v35 }
 0x5b9   : > { %v16695_v27 = vpop.f32.mrb[76].mxu1 }
 0x5ba   : > { %v3704_v13 = vpop.xlane.xlu1 %3703  ;;  %v12554_v38 = vpop.f32.mrb[77].mxu1 }
 0x5bb   : > { %v3796_v32 = vsub.f32 %v16570_v8, %v3704_v13  ;;  %v3695_v56 = vpop.f32.mrb[78].mxu1  ;;  %v3771_v8 = vsel %vm3698_vm3, %v16702_v58, -inf }
 0x5bc   : > { %v12555_v37 = vpop.f32.mrb[79].mxu1 }
 0x5bd   : > { %v3829_v2 = vmul.f32 1.442695, %v3796_v32  ;;  %v3774_v32 = vsel %vm3698_vm3, %v16712_v26, -inf  ;;  %v16723_v37 = vadd.f32 %v16671_v42, %v16562_v35 }
 0x5bf   : > { %13486 = vpow2.f32 %v3829_v2 }
 0x5c1   : > { %v16698_v33 = vpop.eup %13484 }
 0x5c2   : > { %v3707_v45 = vpop.xlane.xlu0 %3706  ;;  %v3891_v10 = vsel %vm3698_vm3, %v16698_v33, 0.0 }
 0x5c3   : > { %v3797_v44 = vsub.f32 %v16575_v41, %v3707_v45  ;;  %3892 = vadd.xlane.f32.xlu0 %v3891_v10  ;;  %v3777_v10 = vsel %vm3698_vm3, %v16723_v37, -inf }
 0x5c5   : > { %v3831_v48 = vmul.f32 1.442695, %v3797_v44 }
 0x5c7   : > { %13488 = vpow2.f32 %v3831_v48  ;;  %3772 = vmax.xlane.f32.xlu0 %v3771_v8  ;;  %v16733_v48 = vadd.f32 %v3532_v39, %v16562_v35 }
 0x5c9   : > { %v16709_v30 = vpop.eup %13486 }
 0x5ca   : > { %v3710_v21 = vpop.xlane.xlu1 %3709  ;;  %v3894_v13 = vsel %vm3698_vm3, %v16709_v30, 0.0 }
 0x5cb   : > { %v3798_v38 = vsub.f32 %v16580_v22, %v3710_v21  ;;  %3895 = vadd.xlane.f32.xlu1 %v3894_v13  ;;  %v3780_v13 = vsel %vm3698_vm3, %v16733_v48, -inf }
 0x5cd   : > { %v3833_v41 = vmul.f32 1.442695, %v3798_v38 }
 0x5cf   : > { %13490 = vpow2.f32 %v3833_v41  ;;  %3775 = vmax.xlane.f32.xlu1 %v3774_v32  ;;  %v16744_v41 = vadd.f32 %v16678_v3, %v16562_v35 }
 0x5d1   : > { %v16719_v56 = vpop.eup %13488 }
 0x5d2   : > { %v3713_v25 = vpop.xlane.xlu0 %3712  ;;  %v3897_v2 = vsel %vm3698_vm3, %v16719_v56, 0.0 }
 0x5d3   : > { %v3799_v45 = vsub.f32 %v16585_v34, %v3713_v25  ;;  %3898 = vadd.xlane.f32.xlu0 %v3897_v2 }
 0x5d5   : > { %v3835_v22 = vmul.f32 1.442695, %v3799_v45  ;;  %v3783_v45 = vsel %vm3698_vm3, %v16744_v41, -inf }
 0x5d7   : > { %13492 = vpow2.f32 %v3835_v22  ;;  %3778 = vmax.xlane.f32.xlu0 %v3777_v10 }
 0x5d9   : > { %v16730_v44 = vpop.eup %13490 }
 0x5da   : > { %v3716_v42 = vpop.xlane.xlu1 %3715  ;;  %v3900_v8 = vsel %vm3698_vm3, %v16730_v44, 0.0 }
 0x5db   : > { %v3800_v21 = vsub.f32 %v16590_v4, %v3716_v42  ;;  %3901 = vadd.xlane.f32.xlu1 %v3900_v8  ;;  %v16756_v42 = vadd.f32 %v16692_v50, %v16562_v35 }
 0x5dd   : > { %v3837_v34 = vmul.f32 1.442695, %v3800_v21 }
 0x5df   : > { %13494 = vpow2.f32 %v3837_v34  ;;  %3781 = vmax.xlane.f32.xlu1 %v3780_v13 }
 0x5e1   : > { %v16740_v38 = vpop.eup %13492 }
 0x5e2   : > { %v3719_v39 = vpop.xlane.xlu0 %3718  ;;  %v3903_v32 = vsel %vm3698_vm3, %v16740_v38, 0.0 }
 0x5e3   : > { %v3801_v25 = vsub.f32 %v16595_v0, %v3719_v39  ;;  %3904 = vadd.xlane.f32.xlu0 %v3903_v32 }
 0x5e5   : > { %v3839_v4 = vmul.f32 1.442695, %v3801_v25  ;;  %v3786_v25 = vsel %vm3698_vm3, %v16756_v42, -inf }
 0x5e6   : > { %v3725_v2 = vpop.xlane.xlu0 %3724 }
 0x5e7   : > { %13496 = vpow2.f32 %v3839_v4  ;;  %v3803_v22 = vsub.f32 %v16598_v29, %v3725_v2  ;;  %3784 = vmax.xlane.f32.xlu0 %v3783_v45 }
 0x5e9   : > { %v16752_v10 = vpop.eup %13494  ;;  %v3843_v3 = vmul.f32 1.442695, %v3803_v22 }
 0x5ea   : > { %v3731_v8 = vpop.xlane.xlu0 %3730  ;;  %v3722_v21 = vpop.xlane.xlu1 %3721  ;;  %v3906_v0 = vsel %vm3698_vm3, %v16752_v10, 0.0 }
 0x5eb   : > { %v3805_v34 = vsub.f32 %v16603_v5, %v3731_v8  ;;  %v3802_v13 = vsub.f32 %v16608_v18, %v3722_v21  ;;  %3907 = vadd.xlane.f32.xlu1 %v3906_v0  ;;  %13498 = vpow2.f32 %v3843_v3  ;;  %v16769_v5 = vadd.f32 %v16685_v54, %v16562_v35 }
 0x5ed   : > { %v3847_v29 = vmul.f32 1.442695, %v3805_v34  ;;  %v3841_v39 = vmul.f32 1.442695, %v3802_v13  ;;  %v3789_v34 = vsel %vm3698_vm3, %v16769_v5, -inf }
 0x5ee   : > { %v3737_v32 = vpop.xlane.xlu0 %3736 }
 0x5ef   : > { %v3807_v50 = vsub.f32 %v16611_v15, %v3737_v32  ;;  %3787 = vmax.xlane.f32.xlu1 %v3786_v25  ;;  %13500 = vpow2.f32 %v3841_v39 }
 0x5f0   : > { %13502 = vpow2.f32 %v3847_v29 }
 0x5f1   : > { %v16765_v4 = vpop.eup %13496  ;;  %v3851_v2 = vmul.f32 1.442695, %v3807_v50  ;;  %v16788_v50 = vadd.f32 %v16695_v27, %v16562_v35 }
 0x5f2   : > { %v3728_v18 = vpop.xlane.xlu1 %3727  ;;  %v3743_v45 = vpop.xlane.xlu0 %3742  ;;  %v3909_v22 = vsel %vm3698_vm3, %v16765_v4, 0.0 }
 0x5f3   : > { %v3804_v3 = vsub.f32 %v16623_v55, %v3728_v18  ;;  %v3809_v8 = vsub.f32 %v16618_v47, %v3743_v45  ;;  %3910 = vadd.xlane.f32.xlu0 %v3909_v22  ;;  %13504 = vpow2.f32 %v3851_v2  ;;  %v3792_v27 = vsel %vm3698_vm3, %v16788_v50, -inf }
 0x5f5   : > { %v3845_v15 = vmul.f32 1.442695, %v3804_v3  ;;  %v3855_v21 = vmul.f32 1.442695, %v3809_v8  ;;  %v16777_v13 = vpop.eup %13498 }
 0x5f6   : > { %v3749_v0 = vpop.xlane.xlu0 %3748  ;;  %v3915_v32 = vsel %vm3698_vm3, %v16777_v13, 0.0 }
 0x5f7   : > { %13506 = vpow2.f32 %v3845_v15  ;;  %v3811_v54 = vsub.f32 %v16626_v20, %v3749_v0  ;;  %3790 = vmax.xlane.f32.xlu0 %v3789_v34 }
 0x5f8   : > { %13508 = vpow2.f32 %v3855_v21 }
 0x5f9   : > { %v3859_v29 = vmul.f32 1.442695, %v3811_v54  ;;  %v16780_v39 = vpop.eup %13500 }
 0x5fa   : > { %v3734_v55 = vpop.xlane.xlu1 %3733  ;;  %v3755_v47 = vpop.xlane.xlu0 %3754  ;;  %v3912_v18 = vsel %vm3698_vm3, %v16780_v39, 0.0 }
 0x5fb   : > { %v16784_v25 = vpop.eup %13502  ;;  %v3806_v2 = vsub.f32 %v16635_v11, %v3734_v55  ;;  %v3813_v20 = vsub.f32 %v16638_v40, %v3755_v47  ;;  %3916 = vadd.xlane.f32.xlu0 %v3915_v32  ;;  %3913 = vadd.xlane.f32.xlu1 %v3912_v18  ;;  %13510 = vpow2.f32 %v3859_v29 }
 0x5fc   : > { %v3921_v3 = vsel %vm3698_vm3, %v16784_v25, 0.0 }
 0x5fd   : > { %v3849_v45 = vmul.f32 1.442695, %v3806_v2  ;;  %v3863_v22 = vmul.f32 1.442695, %v3813_v20  ;;  %v16796_v8 = vpop.eup %13504 }
 0x5fe   : > { %v3927_v21 = vsel %vm3698_vm3, %v16796_v8, 0.0 }
 0x5ff   : > { %13512 = vpow2.f32 %v3849_v45  ;;  %3922 = vadd.xlane.f32.xlu0 %v3921_v3  ;;  %3793 = vmax.xlane.f32.xlu1 %v3792_v27 }
 0x600   : > { %13514 = vpow2.f32 %v3863_v22 }
 0x601   : > { %v16800_v35 = vpop.eup %13506 }
 0x602   : > { %v3740_v11 = vpop.xlane.xlu1 %3739  ;;  %v3761_v40 = vpop.xlane.xlu0 %3760  ;;  %v3918_v15 = vsel %vm3698_vm3, %v16800_v35, 0.0 }
 0x603   : > { %v16806_v0 = vpop.eup %13508  ;;  %v3808_v34 = vsub.f32 %v16645_v7, %v3740_v11  ;;  %v3815_v54 = vsub.f32 %v16648_v51, %v3761_v40  ;;  %3928 = vadd.xlane.f32.xlu0 %v3927_v21  ;;  %3919 = vadd.xlane.f32.xlu1 %v3918_v15 }
 0x604   : > { %v3933_v47 = vsel %vm3698_vm3, %v16806_v0, 0.0 }
 0x605   : > { %v3853_v29 = vmul.f32 1.442695, %v3808_v34  ;;  %v3867_v55 = vmul.f32 1.442695, %v3815_v54  ;;  %v16812_v32 = vpop.eup %13510 }
 0x606   : > { %v3939_v51 = vsel %vm3698_vm3, %v16812_v32, 0.0 }
 0x607   : > { %13516 = vpow2.f32 %v3853_v29  ;;  %3934 = vadd.xlane.f32.xlu0 %v3933_v47 }
 0x608   : > { %13518 = vpow2.f32 %v3867_v55 }
 0x609   : > { %v16814_v2 = vpop.eup %13512 }
 0x60a   : > { %v3746_v20 = vpop.xlane.xlu1 %3745  ;;  %v3767_v18 = vpop.xlane.xlu0 %3766  ;;  %v3924_v7 = vsel %vm3698_vm3, %v16814_v2, 0.0 }
 0x60b   : > { %v16820_v45 = vpop.eup %13514  ;;  %v3810_v22 = vsub.f32 %v16655_v52, %v3746_v20  ;;  %v3817_v3 = vsub.f32 %v16658_v9, %v3767_v18  ;;  %3925 = vadd.xlane.f32.xlu1 %v3924_v7  ;;  %3940 = vadd.xlane.f32.xlu0 %v3939_v51 }
 0x60c   : > { %v3945_v40 = vsel %vm3698_vm3, %v16820_v45, 0.0 }
 0x60d   : > { %v3857_v27 = vmul.f32 1.442695, %v3810_v22  ;;  %v3871_v11 = vmul.f32 1.442695, %v3817_v3 }
 0x60f   : > { %13520 = vpow2.f32 %v3857_v27  ;;  %3946 = vadd.xlane.f32.xlu0 %v3945_v40 }
 0x610   : > { %13522 = vpow2.f32 %v3871_v11 }
 0x611   : > { %v16826_v15 = vpop.eup %13516 }
 0x612   : > { %v16828_v21 = vpop.eup %13518  ;;  %v3752_v34 = vpop.xlane.xlu1 %3751  ;;  %v3930_v52 = vsel %vm3698_vm3, %v16826_v15, 0.0 }
 0x613   : > { %v3812_v9 = vsub.f32 %v16667_v43, %v3752_v34  ;;  %3931 = vadd.xlane.f32.xlu1 %v3930_v52  ;;  %v3951_v54 = vsel %vm3698_vm3, %v16828_v21, 0.0 }
 0x614   : > { %3952 = vadd.xlane.f32.xlu0 %v3951_v54 }
 0x615   : > { %v3861_v29 = vmul.f32 1.442695, %v3812_v9 }
 0x617   : > { %13524 = vpow2.f32 %v3861_v29 }
 0x619   : > { %v16835_v55 = vpop.eup %13520 }
 0x61a   : > { %v16837_v47 = vpop.eup %13522  ;;  %v3758_v20 = vpop.xlane.xlu1 %3757  ;;  %v3936_v18 = vsel %vm3698_vm3, %v16835_v55, 0.0 }
 0x61b   : > { %v3814_v7 = vsub.f32 %v16674_v16, %v3758_v20  ;;  %3937 = vadd.xlane.f32.xlu1 %v3936_v18  ;;  %v3957_v43 = vsel %vm3698_vm3, %v16837_v47, 0.0 }
 0x61c   : > { %3958 = vadd.xlane.f32.xlu0 %v3957_v43 }
 0x61d   : > { %v3865_v51 = vmul.f32 1.442695, %v3814_v7 }
 0x61f   : > { %13526 = vpow2.f32 %v3865_v51 }
 0x621   : > { %v16844_v22 = vpop.eup %13524 }
 0x622   : > { %v3764_v3 = vpop.xlane.xlu1 %3763  ;;  %v3942_v27 = vsel %vm3698_vm3, %v16844_v22, 0.0 }
 0x623   : > { %v3816_v11 = vsub.f32 %v16681_v14, %v3764_v3  ;;  %3943 = vadd.xlane.f32.xlu1 %v3942_v27 }
 0x625   : > { %v3869_v40 = vmul.f32 1.442695, %v3816_v11 }
 0x627   : > { %13528 = vpow2.f32 %v3869_v40 }
 0x629   : > { %v16849_v34 = vpop.eup %13526 }
 0x62a   : > { %v3770_v16 = vpop.xlane.xlu1 %3769  ;;  %v3948_v52 = vsel %vm3698_vm3, %v16849_v34, 0.0 }
 0x62b   : > { %v3818_v9 = vsub.f32 %v16688_v31, %v3770_v16  ;;  %3949 = vadd.xlane.f32.xlu1 %v3948_v52 }
 0x62d   : > { %v3873_v54 = vmul.f32 1.442695, %v3818_v9 }
 0x62f   : > { %13530 = vpow2.f32 %v3873_v54 }
 0x631   : > { %v16854_v29 = vpop.eup %13528 }
 0x632   : > { %v3954_v20 = vsel %vm3698_vm3, %v16854_v29, 0.0 }
 0x633   : > { %3955 = vadd.xlane.f32.xlu1 %v3954_v20 }
 0x639   : > { %v16858_v14 = vpop.eup %13530 }
 0x63a   : > { %v3960_v18 = vsel %vm3698_vm3, %v16858_v14, 0.0 }
 0x63b   : > { %3961 = vadd.xlane.f32.xlu1 %v3960_v18 }
 0x650   : > { %v3893_v7 = vpop.xlane.xlu0 %3892 }
 0x651   : > { %13532 = vrcp.f32 %v3893_v7 }
 0x654   : > { %v3773_v43 = vpop.xlane.xlu0 %3772 }
 0x655   : > { %v3819_v31 = vsub.f32 %v16702_v58, %v3773_v43 }
 0x657   : > { %v3875_v51 = vmul.f32 1.442695, %v3819_v31 }
 0x658   : > { %v3896_v3 = vpop.xlane.xlu1 %3895 }
 0x659   : > { %13534 = vpow2.f32 %v3875_v51 }
 0x65a   : > { %13536 = vrcp.f32 %v3896_v3 }
 0x65b   : > { %v13533_v27 = vpop.eup %13532 }
 0x65c   : > { %v4019_v11 = vmul.f32 %v13533_v27, %v16698_v33  ;;  %v3776_v40 = vpop.xlane.xlu1 %3775 }
 0x65d   : > { %v3820_v16 = vsub.f32 %v16712_v26, %v3776_v40 }
 0x65e   : > { %v4051_v52 = vpack.c.bf16 %v4019_v11, %v4019_v11 }
 0x65f   : > { %v3877_v9 = vmul.f32 1.442695, %v3820_v16 }
 0x660   : > { %12559 = vmatmul.mubr.msk.bf16.vlgmr.msra.gmra.mrb[144].mxu0 %vm3698_vm3, %v4051_v52  ;;  %v3899_v54 = vpop.xlane.xlu0 %3898 }
 0x661   : > { %13538 = vpow2.f32 %v3877_v9  ;;  %12569 = vmatpush3.bf16.msra.mxu0 %v16328_v60  ;;  %12570 = vmatprep.mubr.msk.bf16.mxu0 %vm14785_vm0, %v20575_v23 }
 0x662   : > { %13540 = vrcp.f32 %v3899_v54  ;;  %12580 = vmatprep.subr.bf16.mxu0 %v20575_v23 }
 0x663   : > { %v16870_v58 = vpop.eup %13534 }
 0x664   : > { %v13537_v33 = vpop.eup %13536  ;;  %v3779_v20 = vpop.xlane.xlu0 %3778  ;;  %v3963_v26 = vsel %vm3698_vm3, %v16870_v58, 0.0 }
 0x665   : > { %v4020_v18 = vmul.f32 %v13537_v33, %v16709_v30  ;;  %v3821_v7 = vsub.f32 %v16723_v37, %v3779_v20  ;;  %3964 = vadd.xlane.f32.xlu0 %v3963_v26 }
 0x667   : > { %v3879_v43 = vmul.f32 1.442695, %v3821_v7  ;;  %v4052_v60 = vpack.c.bf16 %v4020_v18, %v4020_v18 }
 0x668   : > { %v3902_v31 = vpop.xlane.xlu1 %3901 }
 0x669   : > { %13542 = vpow2.f32 %v3879_v43  ;;  %12565 = vmatmul.mubr.msk.bf16.vlgmr.msra.gmra.mrb[80].mxu1 %vm3698_vm3, %v4052_v60 }
 0x66a   : > { %12575 = vmatpush3.bf16.msra.mxu1 %v16341_v63  ;;  %13544 = vrcp.f32 %v3902_v31  ;;  %12576 = vmatprep.mubr.msk.bf16.mxu1 %vm14785_vm0, %v20575_v23 }
 0x66b   : > { %v16880_v51 = vpop.eup %13538  ;;  %12586 = vmatprep.subr.bf16.mxu1 %v20575_v23 }
 0x66c   : > { %v13541_v30 = vpop.eup %13540  ;;  %v3782_v3 = vpop.xlane.xlu1 %3781  ;;  %v3966_v37 = vsel %vm3698_vm3, %v16880_v51, 0.0 }
 0x66d   : > { %v4021_v27 = vmul.f32 %v13541_v30, %v16719_v56  ;;  %v3822_v11 = vsub.f32 %v16733_v48, %v3782_v3  ;;  %3967 = vadd.xlane.f32.xlu1 %v3966_v37 }
 0x66f   : > { %v3881_v40 = vmul.f32 1.442695, %v3822_v11  ;;  %v4053_v63 = vpack.c.bf16 %v4021_v27, %v4021_v27 }
 0x670   : > { %v3905_v16 = vpop.xlane.xlu0 %3904 }
 0x671   : > { %13546 = vpow2.f32 %v3881_v40  ;;  %12571 = vmatmul.mubr.msk.bf16.vlgmr.msra.gmra.mrb[148].mxu0 %vm3698_vm3, %v4053_v63 }
 0x672   : > { %12581 = vmatpush3.bf16.msra.mxu0 %v16357_v1  ;;  %13548 = vrcp.f32 %v3905_v16  ;;  %12582 = vmatprep.mubr.msk.bf16.mxu0 %vm14785_vm0, %v20575_v23 }
 0x673   : > { %v16891_v52 = vpop.eup %13542  ;;  %12592 = vmatprep.subr.bf16.mxu0 %v20575_v23 }
 0x674   : > { %v13545_v56 = vpop.eup %13544  ;;  %v3785_v9 = vpop.xlane.xlu0 %3784  ;;  %v3969_v48 = vsel %vm3698_vm3, %v16891_v52, 0.0 }
 0x675   : > { %v4022_v54 = vmul.f32 %v13545_v56, %v16730_v44  ;;  %v3823_v33 = vsub.f32 %v16744_v41, %v3785_v9  ;;  %3970 = vadd.xlane.f32.xlu0 %v3969_v48 }
 0x677   : > { %v3883_v20 = vmul.f32 1.442695, %v3823_v33  ;;  %v4054_v1 = vpack.c.bf16 %v4022_v54, %v4022_v54 }
 0x678   : > { %v3908_v26 = vpop.xlane.xlu1 %3907 }
 0x679   : > { %13550 = vpow2.f32 %v3883_v20  ;;  %12577 = vmatmul.mubr.msk.bf16.vlgmr.msra.gmra.mrb[84].mxu1 %vm3698_vm3, %v4054_v1 }
 0x67a   : > { %12587 = vmatpush3.bf16.msra.mxu1 %v16370_v49  ;;  %13552 = vrcp.f32 %v3908_v26  ;;  %12588 = vmatprep.mubr.msk.bf16.mxu1 %vm14785_vm0, %v20575_v23 }
 0x67b   : > { %v16902_v18 = vpop.eup %13546  ;;  %12598 = vmatprep.subr.bf16.mxu1 %v20575_v23 }
 0x67c   : > { %v13549_v44 = vpop.eup %13548  ;;  %v3788_v7 = vpop.xlane.xlu1 %3787  ;;  %v3972_v41 = vsel %vm3698_vm3, %v16902_v18, 0.0 }
 0x67d   : > { %v4023_v43 = vmul.f32 %v13549_v44, %v16740_v38  ;;  %v3824_v60 = vsub.f32 %v16756_v42, %v3788_v7  ;;  %3973 = vadd.xlane.f32.xlu1 %v3972_v41 }
 0x67f   : > { %v3885_v31 = vmul.f32 1.442695, %v3824_v60  ;;  %v4055_v49 = vpack.c.bf16 %v4023_v43, %v4023_v43 }
 0x680   : > { %v3911_v30 = vpop.xlane.xlu0 %3910 }
 0x681   : > { %13554 = vpow2.f32 %v3885_v31  ;;  %12583 = vmatmul.mubr.msk.bf16.vlgmr.msra.gmra.mrb[152].mxu0 %vm3698_vm3, %v4055_v49 }
 0x682   : > { %12593 = vmatpush3.bf16.msra.mxu0 %v16386_v62  ;;  %13556 = vrcp.f32 %v3911_v30  ;;  %12594 = vmatprep.mubr.msk.bf16.mxu0 %vm14785_vm0, %v20575_v23 }
 0x683   : > { %v16913_v3 = vpop.eup %13550  ;;  %12604 = vmatprep.subr.bf16.mxu0 %v20575_v23 }
 0x684   : > { %v13553_v38 = vpop.eup %13552  ;;  %v3791_v37 = vpop.xlane.xlu0 %3790  ;;  %v3975_v42 = vsel %vm3698_vm3, %v16913_v3, 0.0 }
 0x685   : > { %v4024_v27 = vmul.f32 %v13553_v38, %v16752_v10  ;;  %v3825_v11 = vsub.f32 %v16769_v5, %v3791_v37  ;;  %3976 = vadd.xlane.f32.xlu0 %v3975_v42 }
 0x687   : > { %v3887_v40 = vmul.f32 1.442695, %v3825_v11  ;;  %v4056_v62 = vpack.c.bf16 %v4024_v27, %v4024_v27 }
 0x688   : > { %v3917_v63 = vpop.xlane.xlu0 %3916  ;;  %v3914_v16 = vpop.xlane.xlu1 %3913 }
 0x689   : > { %13558 = vpow2.f32 %v3887_v40  ;;  %12589 = vmatmul.mubr.msk.bf16.vlgmr.msra.gmra.mrb[88].mxu1 %vm3698_vm3, %v4056_v62 }
 0x68a   : > { %12599 = vmatpush3.bf16.msra.mxu1 %v16401_v46  ;;  %13560 = vrcp.f32 %v3914_v16  ;;  %12600 = vmatprep.mubr.msk.bf16.mxu1 %vm14785_vm0, %v20575_v23 }
 0x68b   : > { %v16924_v56 = vpop.eup %13554  ;;  %13562 = vrcp.f32 %v3917_v63  ;;  %12610 = vmatprep.subr.bf16.mxu1 %v20575_v23 }
 0x68c   : > { %v13557_v10 = vpop.eup %13556  ;;  %v3923_v5 = vpop.xlane.xlu0 %3922  ;;  %v3978_v9 = vsel %vm3698_vm3, %v16924_v56, 0.0 }
 0x68d   : > { %v4025_v48 = vmul.f32 %v13557_v10, %v16765_v4  ;;  %v3794_v54 = vpop.xlane.xlu1 %3793  ;;  %3979 = vadd.xlane.f32.xlu1 %v3978_v9  ;;  %13564 = vrcp.f32 %v3923_v5 }
 0x68e   : > { %v3826_v46 = vsub.f32 %v16788_v50, %v3794_v54 }
 0x68f   : > { %v4057_v33 = vpack.c.bf16 %v4025_v48, %v4025_v48 }
 0x690   : > { %v3889_v20 = vmul.f32 1.442695, %v3826_v46  ;;  %v3929_v44 = vpop.xlane.xlu0 %3928 }
 0x691   : > { %v3920_v1 = vpop.xlane.xlu1 %3919  ;;  %12595 = vmatmul.mubr.msk.bf16.vlgmr.msra.gmra.mrb[156].mxu0 %vm3698_vm3, %v4057_v33 }
 0x692   : > { %13566 = vpow2.f32 %v3889_v20  ;;  %12605 = vmatpush3.bf16.msra.mxu0 %v16417_v59  ;;  %12606 = vmatprep.mubr.msk.bf16.mxu0 %vm14785_vm0, %v20575_v23 }
 0x693   : > { %v16935_v26 = vpop.eup %13558  ;;  %13568 = vrcp.f32 %v3920_v1  ;;  %12616 = vmatprep.subr.bf16.mxu0 %v20575_v23 }
 0x694   : > { %v13561_v4 = vpop.eup %13560  ;;  %v3981_v50 = vsel %vm3698_vm3, %v16935_v26, 0.0  ;;  %13570 = vrcp.f32 %v3929_v44  ;;  %v3935_v30 = vpop.xlane.xlu0 %3934 }
 0x695   : > { %v13563_v7 = vpop.eup %13562  ;;  %v4026_v41 = vmul.f32 %v13561_v4, %v16780_v39  ;;  %3982 = vadd.xlane.f32.xlu0 %v3981_v50 }
 0x696   : > { %v4027_v43 = vmul.f32 %v13563_v7, %v16777_v13  ;;  %v20591_v7 = vld [vmem:[#allocation52_spill] sm:$0xff] }
 0x697   : > { %v4058_v59 = vpack.c.bf16 %v4026_v41, %v4026_v41  ;;  %v13565_v49 = vpop.eup %13564 }
 0x698   : > { %v3926_v60 = vpop.xlane.xlu1 %3925  ;;  %v4059_v31 = vpack.c.bf16 %v4027_v43, %v4027_v43  ;;  %v4029_v13 = vmul.f32 %v13565_v49, %v16784_v25  ;;  %v3941_v62 = vpop.xlane.xlu0 %3940 }
 0x699   : > { %12601 = vmatmul.mubr.msk.bf16.vlgmr.msra.gmra.mrb[92].mxu1 %vm3698_vm3, %v4058_v59  ;;  %13572 = vrcp.f32 %v3926_v60 }
 0x69a   : > { %12611 = vmatpush3.bf16.msra.mxu1 %v16431_v12  ;;  %12607 = vmatmul.mubr.msk.bf16.vlgmr.msra.gmra.mrb[160].mxu0 %vm3698_vm3, %v4059_v31  ;;  %13574 = vrcp.f32 %v3935_v30  ;;  %v4061_v27 = vpack.c.bf16 %v4029_v13, %v4029_v13  ;;  %v20593_v13 = vld [vmem:[#allocation54_spill] sm:$0xff] }
 0x69b   : > { %12617 = vmatpush3.bf16.msra.mxu0 %v16447_v17  ;;  %12612 = vmatprep.mubr.msk.bf16.mxu1 %vm14785_vm0, %v20575_v23 }
 0x69c   : > { %v16948_v39 = vpop.eup %13566  ;;  %12618 = vmatprep.mubr.msk.bf16.mxu0 %vm14785_vm0, %v20575_v23  ;;  %12622 = vmatprep.subr.bf16.mxu1 %v20575_v23  ;;  %v3947_v10 = vpop.xlane.xlu0 %3946 }
 0x69d   : > { %v13569_v38 = vpop.eup %13568  ;;  %v3984_v12 = vsel %vm3698_vm3, %v16948_v39, 0.0  ;;  %12628 = vmatprep.subr.bf16.mxu0 %v20575_v23 }
 0x69e   : > { %v4028_v17 = vmul.f32 %v13569_v38, %v16800_v35  ;;  %3985 = vadd.xlane.f32.xlu1 %v3984_v12  ;;  %v13571_v25 = vpop.eup %13570 }
 0x69f   : > { %v4031_v40 = vmul.f32 %v13571_v25, %v16796_v8  ;;  %v20596_v25 = vld [vmem:[#allocation57_spill] sm:$0xff] }
 0x6a0   : > { %v4060_v37 = vpack.c.bf16 %v4028_v17, %v4028_v17  ;;  %v3932_v42 = vpop.xlane.xlu1 %3931 }
 0x6a1   : > { %13576 = vrcp.f32 %v3932_v42  ;;  %v4063_v16 = vpack.c.bf16 %v4031_v40, %v4031_v40  ;;  %v3953_v54 = vpop.xlane.xlu0 %3952 }
 0x6a2   : > { %12613 = vmatmul.mubr.msk.bf16.vlgmr.msra.gmra.mrb[96].mxu1 %vm3698_vm3, %v4060_v37  ;;  %12619 = vmatmul.mubr.msk.bf16.vlgmr.msra.gmra.mrb[164].mxu0 %vm3698_vm3, %v4061_v27  ;;  %13578 = vrcp.f32 %v3941_v62 }
 0x6a3   : > { %v13573_v11 = vpop.eup %13572  ;;  %12623 = vmatpush3.bf16.msra.mxu1 %v16461_v19  ;;  %12629 = vmatpush3.bf16.msra.mxu0 %v16477_v6 }
 0x6a4   : > { %v4030_v35 = vmul.f32 %v13573_v11, %v16814_v2  ;;  %12624 = vmatprep.mubr.msk.bf16.mxu1 %vm14785_vm0, %v20575_v23  ;;  %12630 = vmatprep.mubr.msk.bf16.mxu0 %vm14785_vm0, %v20575_v23  ;;  %v13575_v6 = vpop.eup %13574 }
 0x6a5   : > { %12634 = vmatprep.subr.bf16.mxu1 %v20575_v23  ;;  %12640 = vmatprep.subr.bf16.mxu0 %v20575_v23  ;;  %v4033_v2 = vmul.f32 %v13575_v6, %v16806_v0 }
 0x6a6   : > { %v4062_v63 = vpack.c.bf16 %v4030_v35, %v4030_v35 }
 0x6a7   : > { %v4065_v48 = vpack.c.bf16 %v4033_v2, %v4033_v2 }
 0x6a8   : > { %v3938_v19 = vpop.xlane.xlu1 %3937 }
 0x6a9   : > { %13580 = vrcp.f32 %v3938_v19  ;;  %v3959_v1 = vpop.xlane.xlu0 %3958  ;;  %v20597_v19 = vld [vmem:[#allocation58_spill] sm:$0xff] }
 0x6aa   : > { %12625 = vmatmul.mubr.msk.bf16.vlgmr.msra.gmra.mrb[100].mxu1 %vm3698_vm3, %v4062_v63  ;;  %12631 = vmatmul.mubr.msk.bf16.vlgmr.msra.gmra.mrb[168].mxu0 %vm3698_vm3, %v4063_v16  ;;  %13582 = vrcp.f32 %v3947_v10 }
 0x6ab   : > { %v13577_v8 = vpop.eup %13576  ;;  %12635 = vmatpush3.bf16.msra.mxu1 %v16491_v28  ;;  %12641 = vmatpush3.bf16.msra.mxu0 %v16509_v53 }
 0x6ac   : > { %v4032_v5 = vmul.f32 %v13577_v8, %v16826_v15  ;;  %12636 = vmatprep.mubr.msk.bf16.mxu1 %vm14785_vm0, %v20575_v23  ;;  %12642 = vmatprep.mubr.msk.bf16.mxu0 %vm14785_vm0, %v20575_v23  ;;  %v13579_v53 = vpop.eup %13578 }
 0x6ad   : > { %12646 = vmatprep.subr.bf16.mxu1 %v20575_v23  ;;  %12652 = vmatprep.subr.bf16.mxu0 %v20575_v23  ;;  %v4035_v15 = vmul.f32 %v13579_v53, %v16812_v32 }
 0x6ae   : > { %v4064_v9 = vpack.c.bf16 %v4032_v5, %v4032_v5 }
 0x6af   : > { %v4067_v20 = vpack.c.bf16 %v4035_v15, %v4035_v15  ;;  %v20600_v15 = vld [vmem:[#allocation61_spill] sm:$0xff] }
 0x6b0   : > { %v3944_v28 = vpop.xlane.xlu1 %3943 }
 0x6b1   : > { %13584 = vrcp.f32 %v3944_v28 }
 0x6b2   : > { %12637 = vmatmul.mubr.msk.bf16.vlgmr.msra.gmra.mrb[104].mxu1 %vm3698_vm3, %v4064_v9  ;;  %12643 = vmatmul.mubr.msk.bf16.vlgmr.msra.gmra.mrb[172].mxu0 %vm3698_vm3, %v4065_v48  ;;  %13586 = vrcp.f32 %v3953_v54 }
 0x6b3   : > { %v13581_v0 = vpop.eup %13580  ;;  %12647 = vmatpush3.bf16.msra.mxu1 %v16519_v61  ;;  %12653 = vmatpush3.bf16.msra.mxu0 %v16302_v36 }
 0x6b4   : > { %v4034_v46 = vmul.f32 %v13581_v0, %v16835_v55  ;;  %12648 = vmatprep.mubr.msk.bf16.mxu1 %vm14785_vm0, %v20575_v23  ;;  %12654 = vmatprep.mubr.msk.bf16.mxu0 %vm14785_vm0, %v20575_v23  ;;  %v13583_v36 = vpop.eup %13582 }
 0x6b5   : > { %12658 = vmatprep.subr.bf16.mxu1 %v20575_v23  ;;  %12664 = vmatprep.subr.bf16.mxu0 %v20575_v23  ;;  %v4037_v55 = vmul.f32 %v13583_v36, %v16820_v45 }
 0x6b6   : > { %v4066_v33 = vpack.c.bf16 %v4034_v46, %v4034_v46 }
 0x6b7   : > { %v4069_v50 = vpack.c.bf16 %v4037_v55, %v4037_v55 }
 0x6b8   : > { %v3950_v61 = vpop.xlane.xlu1 %3949 }
 0x6b9   : > { %13588 = vrcp.f32 %v3950_v61  ;;  %v13214_v61 = vld [vmem:[%s15425_s13 + $0x4] ss:$8 sps:$4 sm:$0xff]  }
 0x6ba   : > { %12649 = vmatmul.mubr.msk.bf16.vlgmr.msra.gmra.mrb[108].mxu1 %vm3698_vm3, %v4066_v33  ;;  %12655 = vmatmul.mubr.msk.bf16.vlgmr.msra.gmra.mrb[176].mxu0 %vm3698_vm3, %v4067_v20  ;;  %13590 = vrcp.f32 %v3959_v1  ;;  %v20601_v20 = vld [vmem:[#allocation62_spill] sm:$0xff] }
 0x6bb   : > { %v13585_v32 = vpop.eup %13584  ;;  %12659 = vmatpush3.bf16.msra.mxu1 %v16317_v57  ;;  %12665 = vmatpush3.bf16.msra.mxu0 %v16332_v24 }
 0x6bc   : > { %v4036_v4 = vmul.f32 %v13585_v32, %v16844_v22  ;;  %12660 = vmatprep.mubr.msk.bf16.mxu1 %vm14785_vm0, %v20575_v23  ;;  %12666 = vmatprep.mubr.msk.bf16.mxu0 %vm14785_vm0, %v20575_v23  ;;  %v13587_v24 = vpop.eup %13586  ;;  %v20590_v22 = vld [vmem:[#allocation51_spill] sm:$0xff] }
 0x6bd   : > { %12670 = vmatprep.subr.bf16.mxu1 %v20575_v23  ;;  %12676 = vmatprep.subr.bf16.mxu0 %v20575_v23  ;;  %v4039_v41 = vmul.f32 %v13587_v24, %v16828_v21  ;;  %v13217_v24 = vld [vmem:[%s15425_s13 + $0x14] ss:$8 sps:$4 sm:$0xff]  }
 0x6be   : > { %v4068_v44 = vpack.c.bf16 %v4036_v4, %v4036_v4 }
 0x6bf   : > { %v4071_v31 = vpack.c.bf16 %v4039_v41, %v4039_v41 }
 0x6c0   : > { %v3956_v57 = vpop.xlane.xlu1 %3955 }
 0x6c1   : > { %13592 = vrcp.f32 %v3956_v57  ;;  %v13212_v57 = vld [vmem:[%s15425_s13] ss:$8 sps:$4 sm:$0xff]  }
 0x6c2   : > { %12661 = vmatmul.mubr.msk.bf16.vlgmr.msra.gmra.mrb[112].mxu1 %vm3698_vm3, %v4068_v44  ;;  %12667 = vmatmul.mubr.msk.bf16.vlgmr.msra.gmra.mrb[180].mxu0 %vm3698_vm3, %v4069_v50 }
 0x6c3   : > { %v13589_v45 = vpop.eup %13588  ;;  %12671 = vmatpush3.bf16.msra.mxu1 %v20590_v22  ;;  %12677 = vmatpush3.bf16.msra.mxu0 %v20591_v7 }
 0x6c4   : > { %v4038_v43 = vmul.f32 %v13589_v45, %v16849_v34  ;;  %12672 = vmatprep.mubr.msk.bf16.mxu1 %vm14785_vm0, %v20575_v23  ;;  %12678 = vmatprep.mubr.msk.bf16.mxu0 %vm14785_vm0, %v20575_v23  ;;  %v13591_v49 = vpop.eup %13590  ;;  %v20592_v34 = vld [vmem:[#allocation53_spill] sm:$0xff] }
 0x6c5   : > { %12682 = vmatprep.subr.bf16.mxu1 %v20575_v23  ;;  %12688 = vmatprep.subr.bf16.mxu0 %v20575_v23  ;;  %v4041_v30 = vmul.f32 %v13591_v49, %v16837_v47  ;;  %v20594_v47 = vld [vmem:[#allocation55_spill] sm:$0xff]  ;;  %v13215_v45 = vld [vmem:[%s15425_s13 + $0x10] ss:$8 sps:$4 sm:$0xff]  }
 0x6c6   : > { %v4070_v59 = vpack.c.bf16 %v4038_v43, %v4038_v43  ;;  %v13221_v49 = vld [vmem:[%s15425_s13 + $0x30] ss:$8 sps:$4 sm:$0xff]  }
 0x6c7   : > { %v4073_v17 = vpack.c.bf16 %v4041_v30, %v4041_v30 }
 0x6c8   : > { %v3962_v60 = vpop.xlane.xlu1 %3961 }
 0x6c9   : > { %13594 = vrcp.f32 %v3962_v60  ;;  %v13223_v60 = vld [vmem:[%s15425_s13 + $0x34] ss:$8 sps:$4 sm:$0xff]  }
 0x6ca   : > { %12673 = vmatmul.mubr.msk.bf16.vlgmr.msra.gmra.mrb[116].mxu1 %vm3698_vm3, %v4070_v59  ;;  %12679 = vmatmul.mubr.msk.bf16.vlgmr.msra.gmra.mrb[184].mxu0 %vm3698_vm3, %v4071_v31  ;;  %v13218_v59 = vld [vmem:[%s15425_s13 + $0x20] ss:$8 sps:$4 sm:$0xff]  }
 0x6cb   : > { %v13593_v21 = vpop.eup %13592  ;;  %12683 = vmatpush3.bf16.msra.mxu1 %v20592_v34  ;;  %12689 = vmatpush3.bf16.msra.mxu0 %v20593_v13  ;;  %v13226_v34 = vld [vmem:[%s15425_s13 + $0x44] ss:$8 sps:$4 sm:$0xff]  }
 0x6cc   : > { %v4040_v38 = vmul.f32 %v13593_v21, %v16854_v29  ;;  %12684 = vmatprep.mubr.msk.bf16.mxu1 %vm14785_vm0, %v20575_v23  ;;  %12690 = vmatprep.mubr.msk.bf16.mxu0 %vm14785_vm0, %v20575_v23  ;;  %v20595_v29 = vld [vmem:[#allocation56_spill] sm:$0xff] }
 0x6cd   : > { %12694 = vmatprep.subr.bf16.mxu1 %v20575_v23  ;;  %12700 = vmatprep.subr.bf16.mxu0 %v20575_v23 }
 0x6ce   : > { %v4072_v12 = vpack.c.bf16 %v4040_v38, %v4040_v38 }
 0x6d2   : > { %12685 = vmatmul.mubr.msk.bf16.vlgmr.msra.gmra.mrb[120].mxu1 %vm3698_vm3, %v4072_v12  ;;  %12691 = vmatmul.mubr.msk.bf16.vlgmr.msra.gmra.mrb[188].mxu0 %vm3698_vm3, %v4073_v17  ;;  %v13224_v12 = vld [vmem:[%s15425_s13 + $0x40] ss:$8 sps:$4 sm:$0xff]   ;;  %v13229_v17 = vld [vmem:[%s15425_s13 + $0x54] ss:$8 sps:$4 sm:$0xff]  }
 0x6d3   : > { %v13595_v37 = vpop.eup %13594  ;;  %12695 = vmatpush3.bf16.msra.mxu1 %v20594_v47  ;;  %12701 = vmatpush3.bf16.msra.mxu0 %v20595_v29  ;;  %v13232_v29 = vld [vmem:[%s15425_s13 + $0x64] ss:$8 sps:$4 sm:$0xff]  }
 0x6d4   : > { %v4042_v42 = vmul.f32 %v13595_v37, %v16858_v14  ;;  %12696 = vmatprep.mubr.msk.bf16.mxu1 %vm14785_vm0, %v20575_v23  ;;  %12706 = vmatprep.subr.bf16.mxu1 %v20575_v23  ;;  %v13227_v37 = vld [vmem:[%s15425_s13 + $0x50] ss:$8 sps:$4 sm:$0xff]  }
 0x6d5   : > { %12702 = vmatprep.mubr.msk.bf16.mxu0 %vm14785_vm0, %v20575_v23  ;;  %12712 = vmatprep.subr.bf16.mxu0 %v20575_v23 }
 0x6d6   : > { %v4074_v27 = vpack.c.bf16 %v4042_v42, %v4042_v42 }
 0x6da   : > { %12697 = vmatmul.mubr.msk.bf16.vlgmr.msra.gmra.mrb[124].mxu1 %vm3698_vm3, %v4074_v27 }
 0x6db   : > { %12707 = vmatpush3.bf16.msra.mxu1 %v20596_v25  ;;  %12708 = vmatprep.mubr.msk.bf16.mxu1 %vm14785_vm0, %v20575_v23 }
 0x6dc   : > { %12718 = vmatprep.subr.bf16.mxu1 %v20575_v23 }
 0x6f2   : > { %v3965_v14 = vpop.xlane.xlu0 %3964 }
 0x6f3   : > { %13596 = vrcp.f32 %v3965_v14  ;;  %v13230_v14 = vld [vmem:[%s15425_s13 + $0x60] ss:$8 sps:$4 sm:$0xff]  }
 0x6fa   : > { %v3968_v11 = vpop.xlane.xlu1 %3967 }
 0x6fb   : > { %13598 = vrcp.f32 %v3968_v11  ;;  %v13235_v11 = vld [vmem:[%s15425_s13 + $0x74] ss:$8 sps:$4 sm:$0xff]  }
 0x6fd   : > { %v13597_v40 = vpop.eup %13596 }
 0x6fe   : > { %v4043_v35 = vmul.f32 %v13597_v40, %v16870_v58  ;;  %v20598_v58 = vld [vmem:[#allocation59_spill] sm:$0xff]  ;;  %v13233_v40 = vld [vmem:[%s15425_s13 + $0x70] ss:$8 sps:$4 sm:$0xff]  }
 0x700   : > { %v4075_v62 = vpack.c.bf16 %v4043_v35, %v4043_v35 }
 0x702   : > { %12703 = vmatmul.mubr.msk.bf16.vlgmr.msra.gmra.mrb[192].mxu0 %vm3698_vm3, %v4075_v62  ;;  %v3971_v63 = vpop.xlane.xlu0 %3970  ;;  %v13238_v62 = vld [vmem:[%s15425_s13 + $0x84] ss:$8 sps:$4 sm:$0xff]  }
 0x703   : > { %12713 = vmatpush3.bf16.msra.mxu0 %v20597_v19  ;;  %13600 = vrcp.f32 %v3971_v63  ;;  %12714 = vmatprep.mubr.msk.bf16.mxu0 %vm14785_vm0, %v20575_v23 }
 0x704   : > { %12724 = vmatprep.subr.bf16.mxu0 %v20575_v23 }
 0x705   : > { %v13599_v16 = vpop.eup %13598 }
 0x706   : > { %v4044_v6 = vmul.f32 %v13599_v16, %v16880_v51  ;;  %v20599_v51 = vld [vmem:[#allocation60_spill] sm:$0xff] }
 0x708   : > { %v4076_v8 = vpack.c.bf16 %v4044_v6, %v4044_v6 }
 0x70a   : > { %12709 = vmatmul.mubr.msk.bf16.vlgmr.msra.gmra.mrb[128].mxu1 %vm3698_vm3, %v4076_v8  ;;  %v3974_v2 = vpop.xlane.xlu1 %3973  ;;  %v13236_v8 = vld [vmem:[%s15425_s13 + $0x80] ss:$8 sps:$4 sm:$0xff]  }
 0x70b   : > { %12719 = vmatpush3.bf16.msra.mxu1 %v20598_v58  ;;  %13602 = vrcp.f32 %v3974_v2  ;;  %12720 = vmatprep.mubr.msk.bf16.mxu1 %vm14785_vm0, %v20575_v23  ;;  %v13241_v2 = vld [vmem:[%s15425_s13 + $0x94] ss:$8 sps:$4 sm:$0xff]   ;;  %v13239_v58 = vld [vmem:[%s15425_s13 + $0x90] ss:$8 sps:$4 sm:$0xff]  }
 0x70c   : > { %12730 = vmatprep.subr.bf16.mxu1 %v20575_v23 }
 0x70d   : > { %v13601_v10 = vpop.eup %13600 }
 0x70e   : > { %v4045_v5 = vmul.f32 %v13601_v10, %v16891_v52 }
 0x710   : > { %v4077_v9 = vpack.c.bf16 %v4045_v5, %v4045_v5  ;;  %v13244_v5 = vld [vmem:[%s15425_s13 + $0xa4] ss:$8 sps:$4 sm:$0xff]  }
 0x712   : > { %12715 = vmatmul.mubr.msk.bf16.vlgmr.msra.gmra.mrb[196].mxu0 %vm3698_vm3, %v4077_v9  ;;  %v3977_v28 = vpop.xlane.xlu0 %3976 }
 0x713   : > { %12725 = vmatpush3.bf16.msra.mxu0 %v20599_v51  ;;  %13604 = vrcp.f32 %v3977_v28  ;;  %12726 = vmatprep.mubr.msk.bf16.mxu0 %vm14785_vm0, %v20575_v23 }
 0x714   : > { %12736 = vmatprep.subr.bf16.mxu0 %v20575_v23 }
 0x715   : > { %v13603_v48 = vpop.eup %13602 }
 0x716   : > { %v4046_v53 = vmul.f32 %v13603_v48, %v16902_v18  ;;  %v13242_v48 = vld [vmem:[%s15425_s13 + $0xa0] ss:$8 sps:$4 sm:$0xff]  }
 0x718   : > { %v4078_v0 = vpack.c.bf16 %v4046_v53, %v4046_v53  ;;  %v13247_v53 = vld [vmem:[%s15425_s13 + $0xb4] ss:$8 sps:$4 sm:$0xff]  }
 0x71a   : > { %12721 = vmatmul.mubr.msk.bf16.vlgmr.msra.gmra.mrb[132].mxu1 %vm3698_vm3, %v4078_v0  ;;  %v3980_v52 = vpop.xlane.xlu1 %3979  ;;  %v13245_v0 = vld [vmem:[%s15425_s13 + $0xb0] ss:$8 sps:$4 sm:$0xff]  }
 0x71b   : > { %12731 = vmatpush3.bf16.msra.mxu1 %v20600_v15  ;;  %13606 = vrcp.f32 %v3980_v52  ;;  %12732 = vmatprep.mubr.msk.bf16.mxu1 %vm14785_vm0, %v20575_v23  ;;  %v13250_v15 = vld [vmem:[%s15425_s13 + $0xc4] ss:$8 sps:$4 sm:$0xff]  }
 0x71c   : > { %12742 = vmatprep.subr.bf16.mxu1 %v20575_v23 }
 0x71d   : > { %v13605_v54 = vpop.eup %13604 }
 0x71e   : > { %v4047_v46 = vmul.f32 %v13605_v54, %v16913_v3  ;;  %v20602_v3 = vld [vmem:[#allocation63_spill] sm:$0xff] }
 0x720   : > { %v4079_v33 = vpack.c.bf16 %v4047_v46, %v4047_v46 }
 0x722   : > { %12727 = vmatmul.mubr.msk.bf16.vlgmr.msra.gmra.mrb[200].mxu0 %vm3698_vm3, %v4079_v33  ;;  %v3983_v18 = vpop.xlane.xlu0 %3982 }
 0x723   : > { %12737 = vmatpush3.bf16.msra.mxu0 %v20601_v20  ;;  %13608 = vrcp.f32 %v3983_v18  ;;  %12738 = vmatprep.mubr.msk.bf16.mxu0 %vm14785_vm0, %v20575_v23  ;;  %v13248_v18 = vld [vmem:[%s15425_s13 + $0xc0] ss:$8 sps:$4 sm:$0xff]   ;;  %v13253_v20 = vld [vmem:[%s15425_s13 + $0xd4] ss:$8 sps:$4 sm:$0xff]  }
 0x724   : > { %5764 = vmatprep.subr.bf16.mxu0 %v13214_v61 }
 0x725   : > { %v13607_v36 = vpop.eup %13606 }
 0x726   : > { %v4048_v32 = vmul.f32 %v13607_v36, %v16924_v56  ;;  %v13251_v36 = vld [vmem:[%s15425_s13 + $0xd0] ss:$8 sps:$4 sm:$0xff]  }
 0x728   : > { %v4080_v55 = vpack.c.bf16 %v4048_v32, %v4048_v32 }
 0x72a   : > { %12733 = vmatmul.mubr.msk.bf16.vlgmr.msra.gmra.mrb[136].mxu1 %vm3698_vm3, %v4080_v55  ;;  %v13256_v55 = vld [vmem:[%s15425_s13 + $0xe4] ss:$8 sps:$4 sm:$0xff]  }
 0x72b   : > { %12743 = vmatpush3.bf16.msra.mxu1 %v20602_v3  ;;  %v3986_v1 = vpop.xlane.xlu1 %3985  ;;  %12744 = vmatprep.mubr.msk.bf16.mxu1 %vm14785_vm0, %v20575_v23  ;;  %v13220_v23 = vld [vmem:[%s15425_s13 + $0x24] ss:$8 sps:$4 sm:$0xff]  }
 0x72c   : > { %13610 = vrcp.f32 %v3986_v1 }
 0x72d   : > { %v13609_v4 = vpop.eup %13608 }
 0x72e   : > { %v4049_v44 = vmul.f32 %v13609_v4, %v16935_v26 }
 0x730   : > { %v4081_v50 = vpack.c.bf16 %v4049_v44, %v4049_v44  ;;  %v13254_v44 = vld [vmem:[%s15425_s13 + $0xe0] ss:$8 sps:$4 sm:$0xff]  }
 0x732   : > { %12739 = vmatmul.mubr.msk.bf16.vlgmr.msra.gmra.mrb[204].mxu0 %vm3698_vm3, %v4081_v50  ;;  %v13257_v50 = vld [vmem:[%s15425_s13 + $0xf0] ss:$8 sps:$4 sm:$0xff]  }
 0x733   : > { %v17085_v56 = vpop.f32.mrb[144].mxu0  ;;  %5765 = vmatpush1.bf16.msra.mxu0 %v13212_v57  ;;  %v13259_v57 = vld [vmem:[%s15425_s13 + $0xf4] ss:$8 sps:$4 sm:$0xff]  }
 0x734   : > { %v12560_v22 = vpop.f32.mrb[145].mxu0  ;;  %5766 = vmatprep.subr.bf16.mxu0 %v13217_v24 }
 0x735   : > { %v4127_v7 = vpop.f32.mrb[146].mxu0 }
 0x736   : > { %v13611_v41 = vpop.eup %13610  ;;  %v12561_v43 = vpop.f32.mrb[147].mxu0 }
 0x737   : > { %v4050_v26 = vmul.f32 %v13611_v41, %v16948_v39  ;;  %5767 = vmatpush1.bf16.msra.mxu0 %v13215_v45 }
 0x738   : > { %5768 = vmatprep.subr.bf16.mxu0 %v13220_v23 }
 0x739   : > { %v4082_v31 = vpack.c.bf16 %v4050_v26, %v4050_v26 }
 0x73b   : > { %12745 = vmatmul.mubr.msk.bf16.vlgmr.msra.gmra.mrb[140].mxu1 %vm3698_vm3, %v4082_v31  ;;  %5769 = vmatpush1.bf16.msra.mxu0 %v13218_v59 }
 0x73c   : > { %v17094_v21 = vpop.f32.mrb[80].mxu1  ;;  %5770 = vmatprep.subr.bf16.mxu0 %v13223_v60 }
 0x73d   : > { %v5588_v39 = vpack.c.bf16 %v17094_v21, %v17085_v56  ;;  %v12566_v13 = vpop.f32.mrb[81].mxu1 }
 0x73e   : > { %v4173_v30 = vpop.f32.mrb[82].mxu1 }
 0x73f   : > { %v12567_v38 = vpop.f32.mrb[83].mxu1  ;;  %5771 = vmatpush1.bf16.msra.mxu0 %v13221_v49 }
 0x740   : > { %5772 = vmatprep.subr.bf16.mxu0 %v13226_v34 }
 0x743   : > { %5773 = vmatpush1.bf16.msra.mxu0 %v13224_v12 }
 0x744   : > { %v17102_v47 = vpop.f32.mrb[148].mxu0  ;;  %5774 = vmatprep.subr.bf16.mxu0 %v13229_v17 }
 0x745   : > { %v12572_v42 = vpop.f32.mrb[149].mxu0 }
 0x746   : > { %v4219_v27 = vpop.f32.mrb[150].mxu0 }
 0x747   : > { %v12573_v25 = vpop.f32.mrb[151].mxu0  ;;  %5775 = vmatpush1.bf16.msra.mxu0 %v13227_v37 }
 0x748   : > { %5776 = vmatprep.subr.bf16.mxu0 %v13232_v29 }
 0x74b   : > { %5777 = vmatpush1.bf16.msra.mxu0 %v13230_v14 }
 0x74c   : > { %v17108_v35 = vpop.f32.mrb[84].mxu1  ;;  %5778 = vmatprep.subr.bf16.mxu0 %v13235_v11 }
 0x74d   : > { %v5590_v63 = vpack.c.bf16 %v17108_v35, %v17102_v47  ;;  %v12578_v19 = vpop.f32.mrb[85].mxu1 }
 0x74e   : > { %v4265_v16 = vpop.f32.mrb[86].mxu1 }
 0x74f   : > { %v12579_v6 = vpop.f32.mrb[87].mxu1  ;;  %5779 = vmatpush1.bf16.msra.mxu0 %v13233_v40 }
 0x750   : > { %5780 = vmatprep.subr.bf16.mxu0 %v13238_v62 }
 0x753   : > { %5781 = vmatpush1.bf16.msra.mxu0 %v13236_v8 }
 0x754   : > { %v17116_v10 = vpop.f32.mrb[152].mxu0  ;;  %5782 = vmatprep.subr.bf16.mxu0 %v13241_v2 }
 0x755   : > { %v12584_v9 = vpop.f32.mrb[153].mxu0 }
 0x756   : > { %v4311_v28 = vpop.f32.mrb[154].mxu0 }
 0x757   : > { %v12585_v51 = vpop.f32.mrb[155].mxu0  ;;  %5783 = vmatpush1.bf16.msra.mxu0 %v13239_v58 }
 0x758   : > { %5784 = vmatprep.subr.bf16.mxu0 %v13244_v5 }
 0x75b   : > { %5785 = vmatpush1.bf16.msra.mxu0 %v13242_v48 }
 0x75c   : > { %v17122_v52 = vpop.f32.mrb[88].mxu1  ;;  %5786 = vmatprep.subr.bf16.mxu0 %v13247_v53 }
 0x75d   : > { %v5592_v54 = vpack.c.bf16 %v17122_v52, %v17116_v10  ;;  %v12590_v46 = vpop.f32.mrb[89].mxu1 }
 0x75e   : > { %v4357_v33 = vpop.f32.mrb[90].mxu1 }
 0x75f   : > { %v12591_v61 = vpop.f32.mrb[91].mxu1  ;;  %5787 = vmatpush1.bf16.msra.mxu0 %v13245_v0 }
 0x760   : > { %5788 = vmatprep.subr.bf16.mxu0 %v13250_v15 }
 0x763   : > { %5789 = vmatpush1.bf16.msra.mxu0 %v13248_v18 }
 0x764   : > { %v17130_v32 = vpop.f32.mrb[156].mxu0  ;;  %5790 = vmatprep.subr.bf16.mxu0 %v13253_v20 }
 0x765   : > { %v12596_v3 = vpop.f32.mrb[157].mxu0 }
 0x766   : > { %v4403_v1 = vpop.f32.mrb[158].mxu0 }
 0x767   : > { %v12597_v4 = vpop.f32.mrb[159].mxu0  ;;  %5791 = vmatpush1.bf16.msra.mxu0 %v13251_v36 }
 0x768   : > { %5792 = vmatprep.subr.bf16.mxu0 %v13256_v55 }
 0x76b   : > { %5793 = vmatpush1.bf16.msra.mxu0 %v13254_v44 }
 0x76c   : > { %v17136_v24 = vpop.f32.mrb[92].mxu1  ;;  %5794 = vmatprep.subr.bf16.mxu0 %v13259_v57 }
 0x76d   : > { %v5594_v45 = vpack.c.bf16 %v17136_v24, %v17130_v32  ;;  %v17140_v22 = vpop.f32.mrb[160].mxu0  ;;  %v12602_v23 = vpop.f32.mrb[93].mxu1 }
 0x76e   : > { %v12608_v7 = vpop.f32.mrb[161].mxu0  ;;  %v4449_v41 = vpop.f32.mrb[94].mxu1 }
 0x76f   : > { %v4495_v43 = vpop.f32.mrb[162].mxu0  ;;  %v12603_v26 = vpop.f32.mrb[95].mxu1  ;;  %5795 = vmatpush1.bf16.msra.mxu0 %v13257_v50 }
 0x770   : > { %v12609_v59 = vpop.f32.mrb[163].mxu0 }
 0x775   : > { %v17142_v60 = vpop.f32.mrb[96].mxu1  ;;  %v17144_v31 = vpop.f32.mrb[164].mxu0 }
 0x776   : > { %v5596_v49 = vpack.c.bf16 %v17142_v60, %v17140_v22  ;;  %v12614_v34 = vpop.f32.mrb[97].mxu1  ;;  %v12620_v13 = vpop.f32.mrb[165].mxu0 }
 0x777   : > { %v4541_v30 = vpop.f32.mrb[98].mxu1  ;;  %v4587_v38 = vpop.f32.mrb[166].mxu0 }
 0x778   : > { %v12615_v12 = vpop.f32.mrb[99].mxu1  ;;  %v12621_v17 = vpop.f32.mrb[167].mxu0 }
 0x77d   : > { %v17148_v37 = vpop.f32.mrb[100].mxu1  ;;  %v17150_v29 = vpop.f32.mrb[168].mxu0 }
 0x77e   : > { %v5598_v42 = vpack.c.bf16 %v17148_v37, %v17144_v31  ;;  %v12626_v27 = vpop.f32.mrb[101].mxu1  ;;  %v12632_v25 = vpop.f32.mrb[169].mxu0 }
 0x77f   : > { %v4633_v14 = vpop.f32.mrb[102].mxu1  ;;  %v4679_v11 = vpop.f32.mrb[170].mxu0 }
 0x780   : > { %v12627_v40 = vpop.f32.mrb[103].mxu1  ;;  %v12633_v62 = vpop.f32.mrb[171].mxu0 }
 0x785   : > { %v17154_v19 = vpop.f32.mrb[104].mxu1  ;;  %v17156_v16 = vpop.f32.mrb[172].mxu0 }
 0x786   : > { %v5600_v6 = vpack.c.bf16 %v17154_v19, %v17150_v29  ;;  %v12638_v8 = vpop.f32.mrb[105].mxu1  ;;  %v12644_v2 = vpop.f32.mrb[173].mxu0  ;;  %v20604_v19 = vld [vmem:[#allocation48_spill] sm:$0xff] }
 0x787   : > { %v4725_v58 = vpop.f32.mrb[106].mxu1  ;;  %v4771_v5 = vpop.f32.mrb[174].mxu0 }
 0x788   : > { %v12639_v9 = vpop.f32.mrb[107].mxu1  ;;  %v12645_v28 = vpop.f32.mrb[175].mxu0 }
 0x78d   : > { %v17160_v51 = vpop.f32.mrb[108].mxu1  ;;  %v4860_v48 = vpop.f32.mrb[176].mxu0 }
 0x78e   : > { %v5602_v53 = vpack.c.bf16 %v17160_v51, %v17156_v16  ;;  %v12650_v0 = vpop.f32.mrb[109].mxu1  ;;  %v12656_v15 = vpop.f32.mrb[177].mxu0 }
 0x78f   : > { %v4817_v46 = vpop.f32.mrb[110].mxu1  ;;  %v4863_v33 = vpop.f32.mrb[178].mxu0 }
 0x790   : > { %v12651_v61 = vpop.f32.mrb[111].mxu1  ;;  %v12657_v18 = vpop.f32.mrb[179].mxu0 }
 0x795   : > { %v4906_v20 = vpop.f32.mrb[112].mxu1  ;;  %v4952_v36 = vpop.f32.mrb[180].mxu0 }
 0x796   : > { %v5589_v55 = vpack.c.bf16 %v4906_v20, %v4860_v48  ;;  %v12662_v3 = vpop.f32.mrb[113].mxu1  ;;  %v12668_v1 = vpop.f32.mrb[181].mxu0 }
 0x797   : > { %v4909_v4 = vpop.f32.mrb[114].mxu1  ;;  %v4955_v44 = vpop.f32.mrb[182].mxu0 }
 0x798   : > { %v12663_v57 = vpop.f32.mrb[115].mxu1  ;;  %v12669_v50 = vpop.f32.mrb[183].mxu0  ;;  %5796 = vmatprep.mubr.bf16.mxu0 %v5589_v55 }
 0x799   : > { %5797 = vmatmul.mubr.bf16.vlgmr.msra.gmra.mrb[208].mxu0 %v5588_v39 }
 0x79d   : > { %v4998_v23 = vpop.f32.mrb[116].mxu1  ;;  %v5044_v7 = vpop.f32.mrb[184].mxu0 }
 0x79e   : > { %v5591_v41 = vpack.c.bf16 %v4998_v23, %v4952_v36  ;;  %v12674_v43 = vpop.f32.mrb[117].mxu1  ;;  %v12680_v26 = vpop.f32.mrb[185].mxu0 }
 0x79f   : > { %v5001_v59 = vpop.f32.mrb[118].mxu1  ;;  %v5047_v34 = vpop.f32.mrb[186].mxu0  ;;  %v14156_v26 = vld [vmem:[#allocation2] sm:$0xff] }
 0x7a0   : > { %v12675_v13 = vpop.f32.mrb[119].mxu1  ;;  %v12681_v30 = vpop.f32.mrb[187].mxu0  ;;  %5806 = vmatprep.mubr.bf16.mxu0 %v5591_v41  ;;  %v20603_v41 = vld [vmem:[#allocation46_spill] sm:$0xff] }
 0x7a1   : > { %5807 = vmatmul.mubr.bf16.gmra.mrb[212].mxu0 %v5590_v63  ;;  %v14157_v13 = vld [vmem:[#allocation2 + $0x8] sm:$0xff] }
 0x7a5   : > { %v5090_v38 = vpop.f32.mrb[120].mxu1  ;;  %v5136_v12 = vpop.f32.mrb[188].mxu0 }
 0x7a6   : > { %v5593_v17 = vpack.c.bf16 %v5090_v38, %v5044_v7  ;;  %v12686_v27 = vpop.f32.mrb[121].mxu1  ;;  %v12692_v56 = vpop.f32.mrb[189].mxu0  ;;  %v5909_v7 = vld [vmem:[%s15431_s9] sm:$0x3] }
 0x7a7   : > { %v5093_v21 = vpop.f32.mrb[122].mxu1  ;;  %v5139_v39 = vpop.f32.mrb[190].mxu0  ;;  %v17190_v43 = vrot.slane %v5909_v7, %v20603_v41  ;;  %v14159_v27 = vld [vmem:[#allocation2 + $0x18] sm:$0xff] }
 0x7a8   : > { %v12687_v25 = vpop.f32.mrb[123].mxu1  ;;  %v12693_v14 = vpop.f32.mrb[191].mxu0  ;;  %5816 = vmatprep.mubr.bf16.mxu0 %v5593_v17  ;;  %v14158_v17 = vld [vmem:[#allocation2 + $0x10] sm:$0xff] }
 0x7a9   : > { %5817 = vmatmul.mubr.bf16.gmra.mrb[216].mxu0 %v5592_v54 }
 0x7ad   : > { %v5182_v11 = vpop.f32.mrb[124].mxu1 }
 0x7ae   : > { %v5595_v40 = vpack.c.bf16 %v5182_v11, %v5136_v12  ;;  %v12698_v62 = vpop.f32.mrb[125].mxu1 }
 0x7af   : > { %v5185_v8 = vpop.f32.mrb[126].mxu1 }
 0x7b0   : > { %v12699_v47 = vpop.f32.mrb[127].mxu1  ;;  %5826 = vmatprep.mubr.bf16.mxu0 %v5595_v40  ;;  %v14160_v40 = vld [vmem:[#allocation2 + $0x20] sm:$0xff] }
 0x7b1   : > { %5827 = vmatmul.mubr.bf16.gmra.mrb[220].mxu0 %v5594_v45  ;;  %v14161_v47 = vld [vmem:[#allocation2 + $0x28] sm:$0xff] }
 0x7d5   : > { %v5228_v35 = vpop.f32.mrb[192].mxu0 }
 0x7d6   : > { %v12704_v63 = vpop.f32.mrb[193].mxu0 }
 0x7d7   : > { %v5231_v2 = vpop.f32.mrb[194].mxu0 }
 0x7d8   : > { %v12705_v58 = vpop.f32.mrb[195].mxu0 }
 0x7d9   : > { %v14162_v58 = vld [vmem:[#allocation2 + $0x30] sm:$0xff] }
 0x7dd   : > { %v5274_v5 = vpop.f32.mrb[128].mxu1 }
 0x7de   : > { %v5597_v9 = vpack.c.bf16 %v5274_v5, %v5228_v35  ;;  %v12710_v28 = vpop.f32.mrb[129].mxu1 }
 0x7df   : > { %v5277_v48 = vpop.f32.mrb[130].mxu1 }
 0x7e0   : > { %v12711_v10 = vpop.f32.mrb[131].mxu1  ;;  %5836 = vmatprep.mubr.bf16.mxu0 %v5597_v9  ;;  %v14163_v48 = vld [vmem:[#allocation2 + $0x38] sm:$0xff] }
 0x7e1   : > { %5837 = vmatmul.mubr.bf16.gmra.mrb[224].mxu0 %v5596_v49 }
 0x7e5   : > { %v5320_v52 = vpop.f32.mrb[196].mxu0 }
 0x7e6   : > { %v12716_v54 = vpop.f32.mrb[197].mxu0 }
 0x7e7   : > { %v5323_v0 = vpop.f32.mrb[198].mxu0 }
 0x7e8   : > { %v12717_v15 = vpop.f32.mrb[199].mxu0 }
 0x7ed   : > { %v5366_v32 = vpop.f32.mrb[132].mxu1 }
 0x7ee   : > { %v5599_v24 = vpack.c.bf16 %v5366_v32, %v5320_v52  ;;  %v12722_v45 = vpop.f32.mrb[133].mxu1 }
 0x7ef   : > { %v5369_v46 = vpop.f32.mrb[134].mxu1 }
 0x7f0   : > { %v12723_v33 = vpop.f32.mrb[135].mxu1  ;;  %5846 = vmatprep.mubr.bf16.mxu0 %v5599_v24  ;;  %v14164_v24 = vld [vmem:[#allocation2 + $0x40] sm:$0xff] }
 0x7f1   : > { %5847 = vmatmul.mubr.bf16.gmra.mrb[228].mxu0 %v5598_v42  ;;  %v14165_v33 = vld [vmem:[#allocation2 + $0x48] sm:$0xff] }
 0x7f5   : > { %v5412_v61 = vpop.f32.mrb[200].mxu0 }
 0x7f6   : > { %v12728_v18 = vpop.f32.mrb[201].mxu0 }
 0x7f7   : > { %v5415_v20 = vpop.f32.mrb[202].mxu0 }
 0x7f8   : > { %v12729_v36 = vpop.f32.mrb[203].mxu0 }
 0x7f9   : > { %v14166_v36 = vld [vmem:[#allocation2 + $0x50] sm:$0xff] }
 0x7fd   : > { %v5458_v22 = vpop.f32.mrb[136].mxu1 }
 0x7fe   : > { %v5601_v60 = vpack.c.bf16 %v5458_v22, %v5412_v61  ;;  %v12734_v49 = vpop.f32.mrb[137].mxu1 }
 0x7ff   : > { %v5461_v55 = vpop.f32.mrb[138].mxu1 }
 0x800   : > { %v12735_v3 = vpop.f32.mrb[139].mxu1  ;;  %5856 = vmatprep.mubr.bf16.mxu0 %v5601_v60  ;;  %v14167_v55 = vld [vmem:[#allocation2 + $0x58] sm:$0xff] }
 0x801   : > { %5857 = vmatmul.mubr.bf16.gmra.mrb[232].mxu0 %v5600_v6  ;;  %v17193_v6 = vrot.slane %v5909_v7, %v20604_v19 }
 0x805   : > { %v5504_v1 = vpop.f32.mrb[204].mxu0 }
 0x806   : > { %v12740_v4 = vpop.f32.mrb[205].mxu0 }
 0x807   : > { %v5507_v44 = vpop.f32.mrb[206].mxu0 }
 0x808   : > { %v12741_v31 = vpop.f32.mrb[207].mxu0 }
 0x80e   : > { %v5550_v37 = vpop.f32.mrb[140].mxu1 }
 0x80f   : > { %v5603_v42 = vpack.c.bf16 %v5550_v37, %v5504_v1  ;;  %v12746_v57 = vpop.f32.mrb[141].mxu1 }
 0x810   : > { %v5553_v50 = vpop.f32.mrb[142].mxu1 }
 0x811   : > { %v12747_v23 = vpop.f32.mrb[143].mxu1  ;;  %5866 = vmatprep.mubr.bf16.mxu0 %v5603_v42  ;;  %v14168_v42 = vld [vmem:[#allocation2 + $0x60] sm:$0xff] }
 0x812   : > { %5867 = vmatmul.mubr.bf16.gmra.mrb[236].mxu0 %v5602_v53  ;;  %v14169_v23 = vld [vmem:[#allocation2 + $0x68] sm:$0xff] }
 0x86c   : > { %v5798_v29 = vpop.f32.mrb[208].mxu0 }
 0x86d   : > { %v5877_v59 = vadd.f32 %v14156_v26, %v5798_v29  ;;  %v5800_v34 = vpop.f32.mrb[209].mxu0 }
 0x86e   : > { %v5878_v30 = vadd.f32 %v14157_v13, %v5800_v34  ;;  %v5802_v38 = vpop.f32.mrb[210].mxu0 }
 0x86f   : > { %v17196_v12 = vadd.f32 %v17190_v43, %v5877_v59  ;;  %v5879_v16 = vadd.f32 %v14158_v17, %v5802_v38  ;;  %v5804_v51 = vpop.f32.mrb[211].mxu0  ;;  %v14170_v59 = vld [vmem:[#allocation2 + $0x70] sm:$0xff]  ;;  %v14171_v38 = vld [vmem:[#allocation2 + $0x78] sm:$0xff] }
 0x870   : > { %v17199_v53 = vadd.f32 %v17193_v6, %v5878_v30  ;;  %v5880_v56 = vadd.f32 %v14159_v27, %v5804_v51 }
 0x871   : > { %20605 = vst [vmem:[#allocation51_spill] sm:$0xff] %v17196_v12  ;;  %v17202_v21 = vadd.f32 %v17190_v43, %v5879_v16 }
 0x872   : > { %20606 = vst [vmem:[#allocation52_spill] sm:$0xff] %v17199_v53  ;;  %v17205_v39 = vadd.f32 %v17193_v6, %v5880_v56  ;;  %v5953_v25 = vadd.f32 %v17199_v53, %v17196_v12 }
 0x873   : > { %20607 = vst [vmem:[#allocation53_spill] sm:$0xff] %v17202_v21 }
 0x874   : > { %20608 = vst [vmem:[#allocation54_spill] sm:$0xff] %v17205_v39  ;;  %5954 = vadd.xlane.f32.xlu0 %v5953_v25  ;;  %v5808_v14 = vpop.f32.mrb[212].mxu0  ;;  %v5956_v11 = vadd.f32 %v17205_v39, %v17202_v21 }
 0x875   : > { %v5881_v62 = vadd.f32 %v14160_v40, %v5808_v14  ;;  %v5810_v8 = vpop.f32.mrb[213].mxu0  ;;  %v14172_v14 = vld [vmem:[#allocation2 + $0x80] sm:$0xff] }
 0x876   : > { %v5882_v35 = vadd.f32 %v14161_v47, %v5810_v8  ;;  %5957 = vadd.xlane.f32.xlu1 %v5956_v11  ;;  %v5812_v63 = vpop.f32.mrb[214].mxu0 }
 0x877   : > { %v17212_v2 = vadd.f32 %v17190_v43, %v5881_v62  ;;  %v5883_v5 = vadd.f32 %v14162_v58, %v5812_v63  ;;  %v5814_v9 = vpop.f32.mrb[215].mxu0  ;;  %v14173_v62 = vld [vmem:[#allocation2 + $0x88] sm:$0xff]  ;;  %v14174_v63 = vld [vmem:[#allocation2 + $0x90] sm:$0xff] }
 0x878   : > { %v17215_v28 = vadd.f32 %v17193_v6, %v5882_v35  ;;  %v5884_v10 = vadd.f32 %v14163_v48, %v5814_v9  ;;  %v14175_v48 = vld [vmem:[#allocation2 + $0x98] sm:$0xff] }
 0x879   : > { %20609 = vst [vmem:[#allocation55_spill] sm:$0xff] %v17212_v2  ;;  %v17218_v52 = vadd.f32 %v17190_v43, %v5883_v5 }
 0x87a   : > { %20610 = vst [vmem:[#allocation56_spill] sm:$0xff] %v17215_v28  ;;  %v17221_v54 = vadd.f32 %v17193_v6, %v5884_v10  ;;  %v5959_v0 = vadd.f32 %v17215_v28, %v17212_v2 }
 0x87b   : > { %20611 = vst [vmem:[#allocation57_spill] sm:$0xff] %v17218_v52 }
 0x87c   : > { %20612 = vst [vmem:[#allocation58_spill] sm:$0xff] %v17221_v54  ;;  %5960 = vadd.xlane.f32.xlu0 %v5959_v0  ;;  %v5818_v15 = vpop.f32.mrb[216].mxu0  ;;  %v5962_v32 = vadd.f32 %v17221_v54, %v17218_v52 }
 0x87d   : > { %v5885_v45 = vadd.f32 %v14164_v24, %v5818_v15  ;;  %v5820_v46 = vpop.f32.mrb[217].mxu0 }
 0x87e   : > { %v5886_v61 = vadd.f32 %v14165_v33, %v5820_v46  ;;  %5963 = vadd.xlane.f32.xlu1 %v5962_v32  ;;  %v5822_v18 = vpop.f32.mrb[218].mxu0  ;;  %v14176_v46 = vld [vmem:[#allocation2 + $0xa0] sm:$0xff] }
 0x87f   : > { %v17228_v20 = vadd.f32 %v17190_v43, %v5885_v45  ;;  %v5887_v22 = vadd.f32 %v14166_v36, %v5822_v18  ;;  %v5824_v60 = vpop.f32.mrb[219].mxu0  ;;  %v14177_v18 = vld [vmem:[#allocation2 + $0xa8] sm:$0xff] }
 0x880   : > { %v17231_v49 = vadd.f32 %v17193_v6, %v5886_v61  ;;  %v5888_v3 = vadd.f32 %v14167_v55, %v5824_v60  ;;  %v14178_v55 = vld [vmem:[#allocation2 + $0xb0] sm:$0xff] }
 0x881   : > { %20613 = vst [vmem:[#allocation59_spill] sm:$0xff] %v17228_v20  ;;  %v17234_v1 = vadd.f32 %v17190_v43, %v5887_v22 }
 0x882   : > { %20614 = vst [vmem:[#allocation60_spill] sm:$0xff] %v17231_v49  ;;  %v17237_v4 = vadd.f32 %v17193_v6, %v5888_v3  ;;  %v5965_v44 = vadd.f32 %v17231_v49, %v17228_v20 }
 0x883   : > { %20615 = vst [vmem:[#allocation61_spill] sm:$0xff] %v17234_v1 }
 0x884   : > { %20616 = vst [vmem:[#allocation62_spill] sm:$0xff] %v17237_v4  ;;  %5966 = vadd.xlane.f32.xlu0 %v5965_v44  ;;  %v5828_v31 = vpop.f32.mrb[220].mxu0  ;;  %v5968_v37 = vadd.f32 %v17237_v4, %v17234_v1 }
 0x885   : > { %v5889_v57 = vadd.f32 %v14168_v42, %v5828_v31  ;;  %v5830_v50 = vpop.f32.mrb[221].mxu0 }
 0x886   : > { %v5890_v7 = vadd.f32 %v14169_v23, %v5830_v50  ;;  %5969 = vadd.xlane.f32.xlu1 %v5968_v37  ;;  %v5832_v29 = vpop.f32.mrb[222].mxu0  ;;  %v14179_v37 = vld [vmem:[#allocation2 + $0xb8] sm:$0xff] }
 0x887   : > { %v17244_v26 = vadd.f32 %v17190_v43, %v5889_v57  ;;  %v5891_v34 = vadd.f32 %v14170_v59, %v5832_v29  ;;  %v5834_v13 = vpop.f32.mrb[223].mxu0  ;;  %v14180_v59 = vld [vmem:[#allocation2 + $0xc0] sm:$0xff] }
 0x888   : > { %v17247_v30 = vadd.f32 %v17193_v6, %v5890_v7  ;;  %v5892_v17 = vadd.f32 %v14171_v38, %v5834_v13  ;;  %v14181_v38 = vld [vmem:[#allocation2 + $0xc8] sm:$0xff] }
 0x889   : > { %20617 = vst [vmem:[#allocation63_spill] sm:$0xff] %v17244_v26  ;;  %v17250_v16 = vadd.f32 %v17190_v43, %v5891_v34 }
 0x88a   : > { %20618 = vst [vmem:[#allocation64_spill] sm:$0xff] %v17247_v30  ;;  %v17253_v51 = vadd.f32 %v17193_v6, %v5892_v17  ;;  %v5971_v27 = vadd.f32 %v17247_v30, %v17244_v26 }
 0x88b   : > { %20619 = vst [vmem:[#allocation65_spill] sm:$0xff] %v17250_v16 }
 0x88c   : > { %20620 = vst [vmem:[#allocation66_spill] sm:$0xff] %v17253_v51  ;;  %5972 = vadd.xlane.f32.xlu0 %v5971_v27  ;;  %v5974_v56 = vadd.f32 %v17253_v51, %v17250_v16 }
 0x88e   : > { %5975 = vadd.xlane.f32.xlu1 %v5974_v56 }
 0x8b4   : > { %v5838_v25 = vpop.f32.mrb[224].mxu0 }
 0x8b5   : > { %v5893_v11 = vadd.f32 %v14172_v14, %v5838_v25  ;;  %v5840_v40 = vpop.f32.mrb[225].mxu0  ;;  %v14182_v25 = vld [vmem:[#allocation2 + $0xd0] sm:$0xff] }
 0x8b6   : > { %v5894_v8 = vadd.f32 %v14173_v62, %v5840_v40  ;;  %v5842_v47 = vpop.f32.mrb[226].mxu0  ;;  %v14183_v62 = vld [vmem:[#allocation2 + $0xd8] sm:$0xff] }
 0x8b7   : > { %v17260_v35 = vadd.f32 %v17190_v43, %v5893_v11  ;;  %v5895_v58 = vadd.f32 %v14174_v63, %v5842_v47  ;;  %v5844_v5 = vpop.f32.mrb[227].mxu0 }
 0x8b8   : > { %v17263_v9 = vadd.f32 %v17193_v6, %v5894_v8  ;;  %v5896_v10 = vadd.f32 %v14175_v48, %v5844_v5 }
 0x8b9   : > { %20621 = vst [vmem:[#allocation67_spill] sm:$0xff] %v17260_v35  ;;  %v17266_v0 = vadd.f32 %v17190_v43, %v5895_v58 }
 0x8ba   : > { %20622 = vst [vmem:[#allocation68_spill] sm:$0xff] %v17263_v9  ;;  %v17269_v15 = vadd.f32 %v17193_v6, %v5896_v10  ;;  %v5977_v32 = vadd.f32 %v17263_v9, %v17260_v35  ;;  %v14184_v10 = vld [vmem:[#allocation2 + $0xe0] sm:$0xff] }
 0x8bb   : > { %20623 = vst [vmem:[#allocation69_spill] sm:$0xff] %v17266_v0 }
 0x8bc   : > { %20624 = vst [vmem:[#allocation70_spill] sm:$0xff] %v17269_v15  ;;  %5978 = vadd.xlane.f32.xlu0 %v5977_v32  ;;  %v5980_v24 = vadd.f32 %v17269_v15, %v17266_v0 }
 0x8be   : > { %5981 = vadd.xlane.f32.xlu1 %v5980_v24 }
 0x8c4   : > { %v5848_v45 = vpop.f32.mrb[228].mxu0 }
 0x8c5   : > { %v5897_v33 = vadd.f32 %v14176_v46, %v5848_v45  ;;  %v5850_v61 = vpop.f32.mrb[229].mxu0  ;;  %v14185_v45 = vld [vmem:[#allocation2 + $0xe8] sm:$0xff] }
 0x8c6   : > { %v5898_v36 = vadd.f32 %v14177_v18, %v5850_v61  ;;  %v5852_v22 = vpop.f32.mrb[230].mxu0  ;;  %v14186_v18 = vld [vmem:[#allocation2 + $0xf0] sm:$0xff] }
 0x8c7   : > { %v17276_v60 = vadd.f32 %v17190_v43, %v5897_v33  ;;  %v5899_v3 = vadd.f32 %v14178_v55, %v5852_v22  ;;  %v5854_v44 = vpop.f32.mrb[231].mxu0 }
 0x8c8   : > { %v17279_v31 = vadd.f32 %v17193_v6, %v5898_v36  ;;  %v5900_v42 = vadd.f32 %v14179_v37, %v5854_v44 }
 0x8c9   : > { %20625 = vst [vmem:[#allocation71_spill] sm:$0xff] %v17276_v60  ;;  %v17282_v57 = vadd.f32 %v17190_v43, %v5899_v3  ;;  %v14187_v3 = vld [vmem:[#allocation2 + $0xf8] sm:$0xff] }
 0x8ca   : > { %20626 = vst [vmem:[#allocation72_spill] sm:$0xff] %v17279_v31  ;;  %v17285_v50 = vadd.f32 %v17193_v6, %v5900_v42  ;;  %v5983_v23 = vadd.f32 %v17279_v31, %v17276_v60 }
 0x8cb   : > { %20627 = vst [vmem:[#allocation73_spill] sm:$0xff] %v17282_v57 }
 0x8cc   : > { %20628 = vst [vmem:[#allocation74_spill] sm:$0xff] %v17285_v50  ;;  %5984 = vadd.xlane.f32.xlu0 %v5983_v23  ;;  %v5986_v7 = vadd.f32 %v17285_v50, %v17282_v57 }
 0x8ce   : > { %5987 = vadd.xlane.f32.xlu1 %v5986_v7 }
 0x8d4   : > { %v5858_v29 = vpop.f32.mrb[232].mxu0 }
 0x8d5   : > { %v5901_v34 = vadd.f32 %v14180_v59, %v5858_v29  ;;  %v5860_v13 = vpop.f32.mrb[233].mxu0  ;;  %v6309_v29 = vld [vmem:[%s15440_s12] sm:$0xff] }
 0x8d6   : > { %v5902_v17 = vadd.f32 %v14181_v38, %v5860_v13  ;;  %v5862_v27 = vpop.f32.mrb[234].mxu0  ;;  %v6313_v59 = vld [vmem:[%s15440_s12 + $0x20] sm:$0xff]  ;;  %v6314_v38 = vld [vmem:[%s15440_s12 + $0x28] sm:$0xff] }
 0x8d7   : > { %v17292_v56 = vadd.f32 %v17190_v43, %v5901_v34  ;;  %v5903_v14 = vadd.f32 %v14182_v25, %v5862_v27  ;;  %v5864_v11 = vpop.f32.mrb[235].mxu0  ;;  %v6310_v34 = vld [vmem:[%s15440_s12 + $0x8] sm:$0xff]  ;;  %v11782_v13 = vcombine.low %v6309_v29, %v6313_v59  ;;  %v6317_v27 = vld [vmem:[%s15440_s12 + $0x40] sm:$0xff] }
 0x8d8   : > { %v17295_v40 = vadd.f32 %v17193_v6, %v5902_v17  ;;  %v5904_v8 = vadd.f32 %v14183_v62, %v5864_v11  ;;  %v11785_v17 = vcombine.high %v6310_v34, %v6314_v38  ;;  %v6321_v25 = vld [vmem:[%s15440_s12 + $0x60] sm:$0xff]  ;;  %v6322_v62 = vld [vmem:[%s15440_s12 + $0x68] sm:$0xff] }
 0x8d9   : > { %20629 = vst [vmem:[#allocation75_spill] sm:$0xff] %v17292_v56  ;;  %v17298_v47 = vadd.f32 %v17190_v43, %v5903_v14  ;;  %v6318_v14 = vld [vmem:[%s15440_s12 + $0x48] sm:$0xff]  ;;  %v11791_v11 = vcombine.high %v6317_v27, %v6321_v25 }
 0x8da   : > { %20630 = vst [vmem:[#allocation76_spill] sm:$0xff] %v17295_v40  ;;  %v17301_v63 = vadd.f32 %v17193_v6, %v5904_v8  ;;  %v5989_v58 = vadd.f32 %v17295_v40, %v17292_v56  ;;  %7248 = vmatprep.subr.bf16.mxu0 %v11785_v17  ;;  %v11790_v8 = vcombine.low %v6317_v27, %v6321_v25  ;;  %v6346_v17 = vld [vmem:[%s15440_s12 + $0x128] sm:$0xff] }
 0x8db   : > { %20631 = vst [vmem:[#allocation77_spill] sm:$0xff] %v17298_v47 }
 0x8dc   : > { %20632 = vst [vmem:[#allocation78_spill] sm:$0xff] %v17301_v63  ;;  %5990 = vadd.xlane.f32.xlu0 %v5989_v58  ;;  %v5992_v5 = vadd.f32 %v17301_v63, %v17298_v47  ;;  %v11793_v58 = vcombine.high %v6318_v14, %v6322_v62 }
 0x8de   : > { %5993 = vadd.xlane.f32.xlu1 %v5992_v5  ;;  %v6325_v5 = vld [vmem:[%s15440_s12 + $0x80] sm:$0xff] }
 0x8e5   : > { %v5868_v48 = vpop.f32.mrb[236].mxu0 }
 0x8e6   : > { %v5905_v32 = vadd.f32 %v14184_v10, %v5868_v48  ;;  %v5870_v24 = vpop.f32.mrb[237].mxu0  ;;  %v6329_v48 = vld [vmem:[%s15440_s12 + $0xa0] sm:$0xff]  ;;  %v6326_v10 = vld [vmem:[%s15440_s12 + $0x88] sm:$0xff] }
 0x8e7   : > { %v5906_v46 = vadd.f32 %v14185_v45, %v5870_v24  ;;  %v5872_v33 = vpop.f32.mrb[238].mxu0  ;;  %v11799_v24 = vcombine.high %v6325_v5, %v6329_v48  ;;  %v6330_v45 = vld [vmem:[%s15440_s12 + $0xa8] sm:$0xff] }
 0x8e8   : > { %v17308_v61 = vadd.f32 %v17190_v43, %v5905_v32  ;;  %v5907_v36 = vadd.f32 %v14186_v18, %v5872_v33  ;;  %v5874_v22 = vpop.f32.mrb[239].mxu0  ;;  %v11792_v32 = vcombine.low %v6318_v14, %v6322_v62  ;;  %v11798_v33 = vcombine.low %v6325_v5, %v6329_v48  ;;  %v6353_v62 = vld [vmem:[%s15440_s12 + $0x160] sm:$0xff] }
 0x8e9   : > { %v17311_v55 = vadd.f32 %v17193_v6, %v5906_v46  ;;  %v5908_v44 = vadd.f32 %v14187_v3, %v5874_v22  ;;  %v11801_v46 = vcombine.high %v6326_v10, %v6330_v45  ;;  %v11800_v18 = vcombine.low %v6326_v10, %v6330_v45  ;;  %v6337_v22 = vld [vmem:[%s15440_s12 + $0xe0] sm:$0xff]  ;;  %v6334_v3 = vld [vmem:[%s15440_s12 + $0xc8] sm:$0xff] }
 0x8ea   : > { %20633 = vst [vmem:[#allocation79_spill] sm:$0xff] %v17308_v61  ;;  %v17314_v37 = vadd.f32 %v17190_v43, %v5907_v36  ;;  %v11783_v43 = vcombine.high %v6309_v29, %v6313_v59  ;;  %v6333_v36 = vld [vmem:[%s15440_s12 + $0xc0] sm:$0xff]  ;;  %v6338_v29 = vld [vmem:[%s15440_s12 + $0xe8] sm:$0xff] }
 0x8eb   : > { %20634 = vst [vmem:[#allocation80_spill] sm:$0xff] %v17311_v55  ;;  %v17317_v42 = vadd.f32 %v17193_v6, %v5908_v44  ;;  %v5995_v23 = vadd.f32 %v17311_v55, %v17308_v61  ;;  %v11784_v6 = vcombine.low %v6310_v34, %v6314_v38  ;;  %v6341_v59 = vld [vmem:[%s15440_s12 + $0x100] sm:$0xff]  ;;  %v11809_v38 = vcombine.high %v6334_v3, %v6338_v29 }
 0x8ec   : > { %20635 = vst [vmem:[#allocation81_spill] sm:$0xff] %v17314_v37  ;;  %7135 = vmatprep.subr.bf16.mxu1 %v11783_v43  ;;  %v6345_v34 = vld [vmem:[%s15440_s12 + $0x120] sm:$0xff]  ;;  %v11808_v43 = vcombine.low %v6334_v3, %v6338_v29 }
 0x8ed   : > { %20636 = vst [vmem:[#allocation82_spill] sm:$0xff] %v17317_v42  ;;  %5996 = vadd.xlane.f32.xlu0 %v5995_v23  ;;  %v5998_v7 = vadd.f32 %v17317_v42, %v17314_v37  ;;  %7136 = vmatpush1.bf16.msra.mxu1 %v11782_v13  ;;  %v11806_v23 = vcombine.low %v6333_v36, %v6337_v22  ;;  %v6357_v3 = vld [vmem:[%s15440_s12 + $0x180] sm:$0xff] }
 0x8ee   : > { %7249 = vmatpush1.bf16.msra.mxu0 %v11784_v6  ;;  %7137 = vmatprep.subr.bf16.mxu1 %v11791_v11  ;;  %v6342_v6 = vld [vmem:[%s15440_s12 + $0x108] sm:$0xff]  ;;  %v11815_v25 = vcombine.high %v6341_v59, %v6345_v34  ;;  %v6349_v11 = vld [vmem:[%s15440_s12 + $0x140] sm:$0xff]  ;;  %v11814_v10 = vcombine.low %v6341_v59, %v6345_v34 }
 0x8ef   : > { %5999 = vadd.xlane.f32.xlu1 %v5998_v7  ;;  %7250 = vmatprep.subr.bf16.mxu0 %v11793_v58  ;;  %v11807_v7 = vcombine.high %v6333_v36, %v6337_v22  ;;  %v11817_v14 = vcombine.high %v6342_v6, %v6346_v17  ;;  %v11823_v45 = vcombine.high %v6349_v11, %v6353_v62 }
 0x8f1   : > { %7138 = vmatpush1.bf16.msra.mxu1 %v11790_v8  ;;  %v6350_v8 = vld [vmem:[%s15440_s12 + $0x148] sm:$0xff] }
 0x8f2   : > { %7251 = vmatpush1.bf16.msra.mxu0 %v11792_v32  ;;  %7139 = vmatprep.subr.bf16.mxu1 %v11799_v24  ;;  %v6354_v32 = vld [vmem:[%s15440_s12 + $0x168] sm:$0xff]  ;;  %v11816_v24 = vcombine.low %v6342_v6, %v6346_v17  ;;  %v6365_v17 = vld [vmem:[%s15440_s12 + $0x1c0] sm:$0xff] }
 0x8f3   : > { %7252 = vmatprep.subr.bf16.mxu0 %v11801_v46  ;;  %v11825_v46 = vcombine.high %v6350_v8, %v6354_v32 }
 0x8f5   : > { %7140 = vmatpush1.bf16.msra.mxu1 %v11798_v33 }
 0x8f6   : > { %7253 = vmatpush1.bf16.msra.mxu0 %v11800_v18  ;;  %7141 = vmatprep.subr.bf16.mxu1 %v11807_v7  ;;  %v6362_v7 = vld [vmem:[%s15440_s12 + $0x1a8] sm:$0xff] }
 0x8f7   : > { %7254 = vmatprep.subr.bf16.mxu0 %v11809_v38  ;;  %v11824_v38 = vcombine.low %v6350_v8, %v6354_v32 }
 0x8f9   : > { %7142 = vmatpush1.bf16.msra.mxu1 %v11806_v23  ;;  %v6358_v23 = vld [vmem:[%s15440_s12 + $0x188] sm:$0xff] }
 0x8fa   : > { %7255 = vmatpush1.bf16.msra.mxu0 %v11808_v43  ;;  %7143 = vmatprep.subr.bf16.mxu1 %v11815_v25 }
 0x8fb   : > { %7256 = vmatprep.subr.bf16.mxu0 %v11817_v14  ;;  %v11833_v14 = vcombine.high %v6358_v23, %v6362_v7 }
 0x8fd   : > { %7144 = vmatpush1.bf16.msra.mxu1 %v11814_v10  ;;  %v11832_v10 = vcombine.low %v6358_v23, %v6362_v7  ;;  %v6378_v23 = vld [vmem:[%s15440_s12 + $0x228] sm:$0xff] }
 0x8fe   : > { %7257 = vmatpush1.bf16.msra.mxu0 %v11816_v24  ;;  %7145 = vmatprep.subr.bf16.mxu1 %v11823_v45 }
 0x8ff   : > { %7258 = vmatprep.subr.bf16.mxu0 %v11825_v46 }
 0x901   : > { %v5955_v44 = vpop.xlane.xlu0 %5954 }
 0x902   : > { %v6001_v13 = vmul.f32 0.00390625, %v5955_v44  ;;  %v6361_v44 = vld [vmem:[%s15440_s12 + $0x1a0] sm:$0xff]  ;;  %7259 = vmatpush1.bf16.msra.mxu0 %v11824_v38 }
 0x903   : > { %v5958_v27 = vpop.xlane.xlu1 %5957  ;;  %v11831_v6 = vcombine.high %v6357_v3, %v6361_v44  ;;  %v11830_v8 = vcombine.low %v6357_v3, %v6361_v44  ;;  %7260 = vmatprep.subr.bf16.mxu0 %v11833_v14  ;;  %v6373_v3 = vld [vmem:[%s15440_s12 + $0x200] sm:$0xff] }
 0x904   : > { %v17347_v58 = vsub.f32 %v17196_v12, %v6001_v13  ;;  %v17350_v5 = vsub.f32 %v17199_v53, %v6001_v13  ;;  %v6002_v48 = vmul.f32 0.00390625, %v5958_v27  ;;  %v11822_v13 = vcombine.low %v6349_v11, %v6353_v62  ;;  %v6377_v44 = vld [vmem:[%s15440_s12 + $0x220] sm:$0xff] }
 0x906   : > { %v6049_v33 = vmul.f32 %v17347_v58, %v17347_v58  ;;  %v6050_v18 = vmul.f32 %v17350_v5, %v17350_v5  ;;  %v17358_v36 = vsub.f32 %v17202_v21, %v6002_v48  ;;  %v17361_v22 = vsub.f32 %v17205_v39, %v6002_v48  ;;  %v6369_v48 = vld [vmem:[%s15440_s12 + $0x1e0] sm:$0xff]  ;;  %v6366_v39 = vld [vmem:[%s15440_s12 + $0x1c8] sm:$0xff]  ;;  %7146 = vmatpush1.bf16.msra.mxu1 %v11822_v13 }
 0x907   : > { %v6370_v21 = vld [vmem:[%s15440_s12 + $0x1e8] sm:$0xff]  ;;  %7147 = vmatprep.subr.bf16.mxu1 %v11831_v6  ;;  %v11839_v32 = vcombine.high %v6365_v17, %v6369_v48  ;;  %v11838_v13 = vcombine.low %v6365_v17, %v6369_v48  ;;  %7261 = vmatpush1.bf16.msra.mxu0 %v11832_v10  ;;  %v11847_v6 = vcombine.high %v6373_v3, %v6377_v44 }
 0x908   : > { %v6051_v29 = vmul.f32 %v17358_v36, %v17358_v36  ;;  %v6052_v59 = vmul.f32 %v17361_v22, %v17361_v22  ;;  %v6081_v34 = vadd.f32 %v6050_v18, %v6049_v33  ;;  %v11841_v24 = vcombine.high %v6366_v39, %v6370_v21 }
 0x909   : > { %v5961_v43 = vpop.xlane.xlu0 %5960  ;;  %v11840_v38 = vcombine.low %v6366_v39, %v6370_v21  ;;  %v11846_v21 = vcombine.low %v6373_v3, %v6377_v44 }
 0x90a   : > { %v6003_v27 = vmul.f32 0.00390625, %v5961_v43  ;;  %6082 = vadd.xlane.f32.xlu0 %v6081_v34  ;;  %v6084_v25 = vadd.f32 %v6052_v59, %v6051_v29  ;;  %v6374_v29 = vld [vmem:[%s15440_s12 + $0x208] sm:$0xff]  ;;  %7148 = vmatpush1.bf16.msra.mxu1 %v11830_v8 }
 0x90b   : > { %v5964_v53 = vpop.xlane.xlu1 %5963  ;;  %7149 = vmatprep.subr.bf16.mxu1 %v11839_v32  ;;  %7262 = vmatprep.subr.bf16.mxu0 %v11841_v24  ;;  %v11848_v39 = vcombine.low %v6374_v29, %v6378_v23 }
 0x90c   : > { %v17376_v33 = vsub.f32 %v17212_v2, %v6003_v27  ;;  %v17379_v11 = vsub.f32 %v17215_v28, %v6003_v27  ;;  %v6004_v62 = vmul.f32 0.00390625, %v5964_v53  ;;  %6085 = vadd.xlane.f32.xlu1 %v6084_v25  ;;  %v6381_v27 = vld [vmem:[%s15440_s12 + $0x240] sm:$0xff]  ;;  %v6386_v28 = vld [vmem:[%s15440_s12 + $0x268] sm:$0xff]  ;;  %7263 = vmatpush1.bf16.msra.mxu0 %v11840_v38 }
 0x90e   : > { %v6053_v45 = vmul.f32 %v17376_v33, %v17376_v33  ;;  %v6054_v46 = vmul.f32 %v17379_v11, %v17379_v11  ;;  %v17386_v18 = vsub.f32 %v17218_v52, %v6004_v62  ;;  %v17389_v53 = vsub.f32 %v17221_v54, %v6004_v62  ;;  %v6385_v54 = vld [vmem:[%s15440_s12 + $0x260] sm:$0xff]  ;;  %v6382_v52 = vld [vmem:[%s15440_s12 + $0x248] sm:$0xff]  ;;  %7150 = vmatpush1.bf16.msra.mxu1 %v11838_v13 }
 0x90f   : > { %v11849_v62 = vcombine.high %v6374_v29, %v6378_v23  ;;  %7151 = vmatprep.subr.bf16.mxu1 %v11847_v6  ;;  %v11855_v8 = vcombine.high %v6381_v27, %v6385_v54  ;;  %v11857_v10 = vcombine.high %v6382_v52, %v6386_v28  ;;  %v11854_v29 = vcombine.low %v6381_v27, %v6385_v54  ;;  %v6389_v54 = vld [vmem:[%s15440_s12 + $0x280] sm:$0xff] }
 0x910   : > { %v6055_v7 = vmul.f32 %v17386_v18, %v17386_v18  ;;  %v6056_v59 = vmul.f32 %v17389_v53, %v17389_v53  ;;  %v6087_v34 = vadd.f32 %v6054_v46, %v6053_v45  ;;  %v6393_v27 = vld [vmem:[%s15440_s12 + $0x2a0] sm:$0xff] }
 0x911   : > { %v5967_v43 = vpop.xlane.xlu0 %5966  ;;  %7264 = vmatprep.subr.bf16.mxu0 %v11849_v62 }
 0x912   : > { %v6005_v25 = vmul.f32 0.00390625, %v5967_v43  ;;  %6088 = vadd.xlane.f32.xlu0 %v6087_v34  ;;  %v6090_v14 = vadd.f32 %v6056_v59, %v6055_v7  ;;  %7152 = vmatpush1.bf16.msra.mxu1 %v11846_v21  ;;  %v11856_v59 = vcombine.low %v6382_v52, %v6386_v28  ;;  %v11863_v28 = vcombine.high %v6389_v54, %v6393_v27  ;;  %v6394_v52 = vld [vmem:[%s15440_s12 + $0x2a8] sm:$0xff] }
 0x913   : > { %v5970_v2 = vpop.xlane.xlu1 %5969  ;;  %7265 = vmatpush1.bf16.msra.mxu0 %v11848_v39  ;;  %7153 = vmatprep.subr.bf16.mxu1 %v11855_v8  ;;  %v11862_v8 = vcombine.low %v6389_v54, %v6393_v27  ;;  %v6405_v27 = vld [vmem:[%s15440_s12 + $0x300] sm:$0xff] }
 0x914   : > { %v17404_v45 = vsub.f32 %v17228_v20, %v6005_v25  ;;  %v17407_v17 = vsub.f32 %v17231_v49, %v6005_v25  ;;  %v6006_v48 = vmul.f32 0.00390625, %v5970_v2  ;;  %6091 = vadd.xlane.f32.xlu1 %v6090_v14  ;;  %7266 = vmatprep.subr.bf16.mxu0 %v11857_v10  ;;  %v6390_v14 = vld [vmem:[%s15440_s12 + $0x288] sm:$0xff] }
 0x915   : > { %v11864_v10 = vcombine.low %v6390_v14, %v6394_v52 }
 0x916   : > { %v6057_v32 = vmul.f32 %v17404_v45, %v17404_v45  ;;  %v6058_v24 = vmul.f32 %v17407_v17, %v17407_v17  ;;  %v17414_v46 = vsub.f32 %v17234_v1, %v6006_v48  ;;  %v17417_v7 = vsub.f32 %v17237_v4, %v6006_v48  ;;  %7154 = vmatpush1.bf16.msra.mxu1 %v11854_v29  ;;  %v6401_v29 = vld [vmem:[%s15440_s12 + $0x2e0] sm:$0xff] }
 0x917   : > { %7267 = vmatpush1.bf16.msra.mxu0 %v11856_v59  ;;  %7155 = vmatprep.subr.bf16.mxu1 %v11863_v28  ;;  %v6406_v28 = vld [vmem:[%s15440_s12 + $0x308] sm:$0xff] }
 0x918   : > { %v6059_v2 = vmul.f32 %v17414_v46, %v17414_v46  ;;  %v6060_v3 = vmul.f32 %v17417_v7, %v17417_v7  ;;  %v6093_v44 = vadd.f32 %v6058_v24, %v6057_v32  ;;  %v11865_v32 = vcombine.high %v6390_v14, %v6394_v52  ;;  %v6409_v14 = vld [vmem:[%s15440_s12 + $0x320] sm:$0xff] }
 0x919   : > { %v5973_v23 = vpop.xlane.xlu0 %5972  ;;  %v11879_v52 = vcombine.high %v6405_v27, %v6409_v14 }
 0x91a   : > { %v6007_v34 = vmul.f32 0.00390625, %v5973_v23  ;;  %6094 = vadd.xlane.f32.xlu0 %v6093_v44  ;;  %v6096_v13 = vadd.f32 %v6060_v3, %v6059_v2  ;;  %v6397_v44 = vld [vmem:[%s15440_s12 + $0x2c0] sm:$0xff]  ;;  %v6398_v23 = vld [vmem:[%s15440_s12 + $0x2c8] sm:$0xff]  ;;  %7268 = vmatprep.subr.bf16.mxu0 %v11865_v32 }
 0x91b   : > { %v5976_v43 = vpop.xlane.xlu1 %5975  ;;  %7156 = vmatpush1.bf16.msra.mxu1 %v11862_v8  ;;  %v11871_v59 = vcombine.high %v6397_v44, %v6401_v29  ;;  %7269 = vmatpush1.bf16.msra.mxu0 %v11864_v10  ;;  %v6413_v32 = vld [vmem:[%s15440_s12 + $0x340] sm:$0xff] }
 0x91c   : > { %v17424_v38 = vsub.f32 %v17244_v26, %v6007_v34  ;;  %v17427_v6 = vsub.f32 %v17247_v30, %v6007_v34  ;;  %v6008_v25 = vmul.f32 0.00390625, %v5976_v43  ;;  %6097 = vadd.xlane.f32.xlu1 %v6096_v13  ;;  %v6402_v34 = vld [vmem:[%s15440_s12 + $0x2e8] sm:$0xff]  ;;  %v11870_v43 = vcombine.low %v6397_v44, %v6401_v29  ;;  %v17593_v30 = vld [vmem:[%s15440_s12 + $0x50] sm:$0xff] }
 0x91d   : > { %7157 = vmatprep.subr.bf16.mxu1 %v11871_v59  ;;  %v11873_v54 = vcombine.high %v6398_v23, %v6402_v34  ;;  %v6418_v44 = vld [vmem:[%s15440_s12 + $0x368] sm:$0xff]  ;;  %v6323_v26 = vld [vmem:[%s15440_s12 + $0x70] sm:$0xff] }
 0x91e   : > { %v6061_v62 = vmul.f32 %v17424_v38, %v17424_v38  ;;  %v6062_v48 = vmul.f32 %v17427_v6, %v17427_v6  ;;  %v17438_v21 = vsub.f32 %v17250_v16, %v6008_v25  ;;  %v17441_v39 = vsub.f32 %v17253_v51, %v6008_v25 }
 0x91f   : > { %v11872_v25 = vcombine.low %v6398_v23, %v6402_v34  ;;  %7270 = vmatprep.subr.bf16.mxu0 %v11873_v54  ;;  %7158 = vmatpush1.bf16.msra.mxu1 %v11870_v43  ;;  %v6421_v34 = vld [vmem:[%s15440_s12 + $0x380] sm:$0xff]  ;;  %v6422_v43 = vld [vmem:[%s15440_s12 + $0x388] sm:$0xff] }
 0x920   : > { %v6063_v24 = vmul.f32 %v17438_v21, %v17438_v21  ;;  %v6064_v2 = vmul.f32 %v17441_v39, %v17441_v39  ;;  %v6099_v3 = vadd.f32 %v6062_v48, %v6061_v62  ;;  %v6410_v62 = vld [vmem:[%s15440_s12 + $0x328] sm:$0xff]  ;;  %v11878_v48 = vcombine.low %v6405_v27, %v6409_v14  ;;  %7159 = vmatprep.subr.bf16.mxu1 %v11879_v52  ;;  %v6429_v52 = vld [vmem:[%s15440_s12 + $0x3c0] sm:$0xff] }
 0x921   : > { %7271 = vmatpush1.bf16.msra.mxu0 %v11872_v25  ;;  %v11880_v8 = vcombine.low %v6406_v28, %v6410_v62  ;;  %v11881_v10 = vcombine.high %v6406_v28, %v6410_v62  ;;  %v6426_v54 = vld [vmem:[%s15440_s12 + $0x3a8] sm:$0xff]  ;;  %v6433_v62 = vld [vmem:[%s15440_s12 + $0x3e0] sm:$0xff] }
 0x922   : > { %6100 = vadd.xlane.f32.xlu0 %v6099_v3  ;;  %v6102_v13 = vadd.f32 %v6064_v2, %v6063_v24  ;;  %v6417_v24 = vld [vmem:[%s15440_s12 + $0x360] sm:$0xff]  ;;  %v6414_v2 = vld [vmem:[%s15440_s12 + $0x348] sm:$0xff]  ;;  %v11896_v14 = vcombine.low %v6422_v43, %v6426_v54  ;;  %v11897_v28 = vcombine.high %v6422_v43, %v6426_v54 }
 0x923   : > { %7272 = vmatprep.subr.bf16.mxu0 %v11881_v10  ;;  %7160 = vmatpush1.bf16.msra.mxu1 %v11878_v48  ;;  %v11887_v3 = vcombine.high %v6413_v32, %v6417_v24  ;;  %v11886_v29 = vcombine.low %v6413_v32, %v6417_v24  ;;  %v11888_v23 = vcombine.low %v6414_v2, %v6418_v44  ;;  %v6430_v48 = vld [vmem:[%s15440_s12 + $0x3c8] sm:$0xff] }
 0x924   : > { %6103 = vadd.xlane.f32.xlu1 %v6102_v13  ;;  %v11889_v59 = vcombine.high %v6414_v2, %v6418_v44  ;;  %v6425_v13 = vld [vmem:[%s15440_s12 + $0x3a0] sm:$0xff]  ;;  %v6434_v10 = vld [vmem:[%s15440_s12 + $0x3e8] sm:$0xff]  ;;  %v11902_v32 = vcombine.low %v6429_v52, %v6433_v62 }
 0x925   : > { %7273 = vmatpush1.bf16.msra.mxu0 %v11880_v8  ;;  %7161 = vmatprep.subr.bf16.mxu1 %v11887_v3  ;;  %v11895_v25 = vcombine.high %v6421_v34, %v6425_v13  ;;  %v11894_v27 = vcombine.low %v6421_v34, %v6425_v13  ;;  %v11903_v8 = vcombine.high %v6429_v52, %v6433_v62 }
 0x926   : > { %7274 = vmatprep.subr.bf16.mxu0 %v11889_v59  ;;  %v11904_v24 = vcombine.low %v6430_v48, %v6434_v10  ;;  %v11905_v2 = vcombine.high %v6430_v48, %v6434_v10 }
 0x927   : > { %7162 = vmatpush1.bf16.msra.mxu1 %v11886_v29 }
 0x928   : > { %7163 = vmatprep.subr.bf16.mxu1 %v11895_v25 }
 0x929   : > { %7275 = vmatpush1.bf16.msra.mxu0 %v11888_v23 }
 0x92a   : > { %7276 = vmatprep.subr.bf16.mxu0 %v11897_v28 }
 0x92b   : > { %7164 = vmatpush1.bf16.msra.mxu1 %v11894_v27 }
 0x92c   : > { %7165 = vmatprep.subr.bf16.mxu1 %v11903_v8 }
 0x92d   : > { %7277 = vmatpush1.bf16.msra.mxu0 %v11896_v14 }
 0x92e   : > { %7278 = vmatprep.subr.bf16.mxu0 %v11905_v2 }
 0x92f   : > { %7166 = vmatpush1.bf16.msra.mxu1 %v11902_v32 }
 0x931   : > { %7279 = vmatpush1.bf16.msra.mxu0 %v11904_v24 }
 0x949   : > { %v5979_v3 = vpop.xlane.xlu0 %5978 }
 0x94a   : > { %v6009_v44 = vmul.f32 0.00390625, %v5979_v3 }
 0x94b   : > { %v5982_v29 = vpop.xlane.xlu1 %5981 }
 0x94c   : > { %v17468_v23 = vsub.f32 %v17260_v35, %v6009_v44  ;;  %v17471_v59 = vsub.f32 %v17263_v9, %v6009_v44  ;;  %v6010_v34 = vmul.f32 0.00390625, %v5982_v29 }
 0x94e   : > { %v6065_v13 = vmul.f32 %v17468_v23, %v17468_v23  ;;  %v6066_v43 = vmul.f32 %v17471_v59, %v17471_v59  ;;  %v17478_v25 = vsub.f32 %v17266_v0, %v6010_v34  ;;  %v17481_v54 = vsub.f32 %v17269_v15, %v6010_v34 }
 0x950   : > { %v6067_v27 = vmul.f32 %v17478_v25, %v17478_v25  ;;  %v6068_v14 = vmul.f32 %v17481_v54, %v17481_v54  ;;  %v6105_v28 = vadd.f32 %v6066_v43, %v6065_v13 }
 0x952   : > { %6106 = vadd.xlane.f32.xlu0 %v6105_v28  ;;  %v6108_v52 = vadd.f32 %v6068_v14, %v6067_v27 }
 0x954   : > { %6109 = vadd.xlane.f32.xlu1 %v6108_v52 }
 0x959   : > { %v5985_v62 = vpop.xlane.xlu0 %5984 }
 0x95a   : > { %v6011_v48 = vmul.f32 0.00390625, %v5985_v62 }
 0x95b   : > { %v5988_v8 = vpop.xlane.xlu1 %5987 }
 0x95c   : > { %v17488_v10 = vsub.f32 %v17276_v60, %v6011_v48  ;;  %v17491_v32 = vsub.f32 %v17279_v31, %v6011_v48  ;;  %v6012_v24 = vmul.f32 0.00390625, %v5988_v8 }
 0x95e   : > { %v6069_v2 = vmul.f32 %v17488_v10, %v17488_v10  ;;  %v6070_v3 = vmul.f32 %v17491_v32, %v17491_v32  ;;  %v17498_v44 = vsub.f32 %v17282_v57, %v6012_v24  ;;  %v17501_v29 = vsub.f32 %v17285_v50, %v6012_v24 }
 0x960   : > { %v6071_v34 = vmul.f32 %v17498_v44, %v17498_v44  ;;  %v6072_v13 = vmul.f32 %v17501_v29, %v17501_v29  ;;  %v6111_v43 = vadd.f32 %v6070_v3, %v6069_v2 }
 0x962   : > { %6112 = vadd.xlane.f32.xlu0 %v6111_v43  ;;  %v6114_v27 = vadd.f32 %v6072_v13, %v6071_v34 }
 0x964   : > { %6115 = vadd.xlane.f32.xlu1 %v6114_v27 }
 0x969   : > { %v5991_v14 = vpop.xlane.xlu0 %5990 }
 0x96a   : > { %v6013_v28 = vmul.f32 0.00390625, %v5991_v14 }
 0x96b   : > { %v5994_v52 = vpop.xlane.xlu1 %5993 }
 0x96c   : > { %v17508_v62 = vsub.f32 %v17292_v56, %v6013_v28  ;;  %v17511_v48 = vsub.f32 %v17295_v40, %v6013_v28  ;;  %v6014_v8 = vmul.f32 0.00390625, %v5994_v52  ;;  %v17528_v28 = vld [vmem:[%s15440_s12 + $0x10] sm:$0xff]  ;;  %v17534_v40 = vld [vmem:[%s15440_s12 + $0x18] sm:$0xff] }
 0x96d   : > { %v17531_v52 = vld [vmem:[%s15440_s12 + $0x30] sm:$0xff] }
 0x96e   : > { %v6073_v24 = vmul.f32 %v17508_v62, %v17508_v62  ;;  %v6074_v2 = vmul.f32 %v17511_v48, %v17511_v48  ;;  %v17518_v3 = vsub.f32 %v17298_v47, %v6014_v8  ;;  %v17521_v34 = vsub.f32 %v17301_v63, %v6014_v8  ;;  %v17539_v63 = vld [vmem:[%s15440_s12 + $0x38] sm:$0xff] }
 0x96f   : > { %v11787_v8 = vcombine.high %v17528_v28, %v17531_v52  ;;  %v11789_v47 = vcombine.high %v17534_v40, %v17539_v63 }
 0x970   : > { %v6075_v13 = vmul.f32 %v17518_v3, %v17518_v3  ;;  %v6076_v43 = vmul.f32 %v17521_v34, %v17521_v34  ;;  %v6117_v27 = vadd.f32 %v6074_v2, %v6073_v24 }
 0x971   : > { %7361 = vmatprep.subr.bf16.mxu1 %v11787_v8  ;;  %7474 = vmatprep.subr.bf16.mxu0 %v11789_v47 }
 0x972   : > { %6118 = vadd.xlane.f32.xlu0 %v6117_v27  ;;  %v6120_v14 = vadd.f32 %v6076_v43, %v6075_v13 }
 0x974   : > { %6121 = vadd.xlane.f32.xlu1 %v6120_v14 }
 0x97a   : > { %v5997_v56 = vpop.xlane.xlu0 %5996 }
 0x97b   : > { %v6015_v24 = vmul.f32 0.00390625, %v5997_v56 }
 0x97c   : > { %v6000_v2 = vpop.xlane.xlu1 %5999 }
 0x97d   : > { %v17544_v13 = vsub.f32 %v17308_v61, %v6015_v24  ;;  %v17547_v43 = vsub.f32 %v17311_v55, %v6015_v24  ;;  %v6016_v27 = vmul.f32 0.00390625, %v6000_v2 }
 0x97f   : > { %v6077_v14 = vmul.f32 %v17544_v13, %v17544_v13  ;;  %v6078_v50 = vmul.f32 %v17547_v43, %v17547_v43  ;;  %v17554_v57 = vsub.f32 %v17314_v37, %v6016_v27  ;;  %v17557_v47 = vsub.f32 %v17317_v42, %v6016_v27  ;;  %v20637_v27 = vld [vmem:[#allocation44_spill] sm:$0xff] }
 0x980   : > { %v20377_v42 = vsub.s32 6, %v20637_v27  ;;  %v20378_v35 = vsub.s32 7, %v20637_v27 }
 0x981   : > { %v6079_v56 = vmul.f32 %v17554_v57, %v17554_v57  ;;  %v6080_v8 = vmul.f32 %v17557_v47, %v17557_v47  ;;  %v6123_v24 = vadd.f32 %v6078_v50, %v6077_v14  ;;  %v14188_v50 = vld [vmem:[%s15434_s10] sm:$0xff] }
 0x982   : > { %v6216_v14 = vrot.slane %v14188_v50, %v20377_v42 }
 0x983   : > { %6124 = vadd.xlane.f32.xlu0 %v6123_v24  ;;  %v6126_v2 = vadd.f32 %v6080_v8, %v6079_v56  ;;  %v20638_v56 = vld [vmem:[#allocation49_spill] sm:$0xff] }
 0x984   : > { %v6212_v8 = vrot.slane %v14188_v50, %v20638_v56 }
 0x985   : > { %6127 = vadd.xlane.f32.xlu1 %v6126_v2 }
 0x997   : > { %v6083_v55 = vpop.xlane.xlu0 %6082 }
 0x998   : > { %v6129_v61 = vmul.f32 0.00390625, %v6083_v55 }
 0x999   : > { %v6086_v31 = vpop.xlane.xlu1 %6085 }
 0x99a   : > { %v6145_v60 = vadd.f32 1e-05, %v6129_v61  ;;  %v6130_v37 = vmul.f32 0.00390625, %v6086_v31  ;;  %v20639_v61 = vld [vmem:[#allocation50_spill] sm:$0xff] }
 0x99c   : > { %13612 = vrsqrt.f32 %v6145_v60  ;;  %v6146_v15 = vadd.f32 1e-05, %v6130_v37  ;;  %v6266_v60 = vrot.slane %v14188_v50, %v20378_v35  ;;  %v17576_v37 = vrot.slane %v6212_v8, %v20638_v56 }
 0x99e   : > { %13614 = vrsqrt.f32 %v6146_v15  ;;  %v6262_v15 = vrot.slane %v14188_v50, %v20639_v61  ;;  %v17581_v35 = vrot.slane %v6266_v60, %v20639_v61 }
 0x99f   : > { %v6089_v0 = vpop.xlane.xlu0 %6088 }
 0x9a0   : > { %v6131_v9 = vmul.f32 0.00390625, %v6089_v0  ;;  %v17573_v0 = vrot.slane %v6216_v14, %v20638_v56  ;;  %v17584_v50 = vrot.slane %v6262_v15, %v20639_v61 }
 0x9a1   : > { %v6092_v51 = vpop.xlane.xlu1 %6091 }
 0x9a2   : > { %v6147_v55 = vadd.f32 1e-05, %v6131_v9  ;;  %v6132_v24 = vmul.f32 0.00390625, %v6092_v51 }
 0x9a4   : > { %13616 = vrsqrt.f32 %v6147_v55  ;;  %v6148_v31 = vadd.f32 1e-05, %v6132_v24 }
 0x9a6   : > { %v13613_v2 = vpop.eup %13612  ;;  %13618 = vrsqrt.f32 %v6148_v31 }
 0x9a7   : > { %v6177_v42 = vmul.f32 %v13613_v2, %v17347_v58  ;;  %v6178_v9 = vmul.f32 %v13613_v2, %v17350_v5  ;;  %v6095_v51 = vpop.xlane.xlu0 %6094 }
 0x9a8   : > { %v13615_v55 = vpop.eup %13614  ;;  %v6133_v24 = vmul.f32 0.00390625, %v6095_v51 }
 0x9a9   : > { %v6179_v14 = vmul.f32 %v13615_v55, %v17358_v36  ;;  %v6180_v8 = vmul.f32 %v13615_v55, %v17361_v22  ;;  %v6098_v31 = vpop.xlane.xlu1 %6097  ;;  %v6228_v58 = vmul.f32 %v17573_v0, %v6178_v9  ;;  %v6227_v5 = vmul.f32 %v17576_v37, %v6177_v42  ;;  %v6320_v42 = vld [vmem:[%s15440_s12 + $0x58] sm:$0xff] }
 0x9aa   : > { %v6149_v2 = vadd.f32 1e-05, %v6133_v24  ;;  %v6134_v51 = vmul.f32 0.00390625, %v6098_v31  ;;  %v6324_v24 = vld [vmem:[%s15440_s12 + $0x78] sm:$0xff] }
 0x9ab   : > { %v6230_v60 = vmul.f32 %v17573_v0, %v6180_v8  ;;  %v6229_v16 = vmul.f32 %v17576_v37, %v6179_v14  ;;  %v6278_v36 = vadd.f32 %v17581_v35, %v6228_v58  ;;  %v6277_v55 = vadd.f32 %v17584_v50, %v6227_v5 }
 0x9ac   : > { %13620 = vrsqrt.f32 %v6149_v2  ;;  %v6150_v15 = vadd.f32 1e-05, %v6134_v51  ;;  %v11786_v14 = vcombine.low %v17528_v28, %v17531_v52  ;;  %v11788_v8 = vcombine.low %v17534_v40, %v17539_v63  ;;  %v6331_v52 = vld [vmem:[%s15440_s12 + $0xb0] sm:$0xff] }
 0x9ad   : > { %v6280_v22 = vadd.f32 %v17581_v35, %v6230_v60  ;;  %v6279_v9 = vadd.f32 %v17584_v50, %v6229_v16  ;;  %v11797_v1 = vcombine.high %v6320_v42, %v6324_v24 }
 0x9ae   : > { %v13617_v31 = vpop.eup %13616  ;;  %13622 = vrsqrt.f32 %v6150_v15  ;;  %v11795_v15 = vcombine.high %v17593_v30, %v6323_v26 }
 0x9af   : > { %v6181_v58 = vmul.f32 %v13617_v31, %v17376_v33  ;;  %v6182_v2 = vmul.f32 %v13617_v31, %v17379_v11  ;;  %v6101_v5 = vpop.xlane.xlu0 %6100  ;;  %v17608_v51 = vpack.c.bf16 %v6280_v22, %v6278_v36  ;;  %v17610_v16 = vpack.c.bf16 %v6279_v9, %v6277_v55  ;;  %v6327_v11 = vld [vmem:[%s15440_s12 + $0x90] sm:$0xff]  ;;  %v6332_v31 = vld [vmem:[%s15440_s12 + $0xb8] sm:$0xff] }
 0x9b0   : > { %v13619_v60 = vpop.eup %13618  ;;  %v6135_v4 = vmul.f32 0.00390625, %v6101_v5  ;;  %v11794_v9 = vcombine.low %v17593_v30, %v6323_v26  ;;  %v11796_v5 = vcombine.low %v6320_v42, %v6324_v24  ;;  %v6336_v26 = vld [vmem:[%s15440_s12 + $0xd8] sm:$0xff] }
 0x9b1   : > { %v6183_v28 = vmul.f32 %v13619_v60, %v17386_v18  ;;  %v6184_v40 = vmul.f32 %v13619_v60, %v17389_v53  ;;  %7167 = vmatprep.mubr.bf16.mxu1 %v17608_v51  ;;  %7280 = vmatprep.mubr.bf16.mxu0 %v17608_v51  ;;  %v6104_v63 = vpop.xlane.xlu1 %6103  ;;  %v6232_v33 = vmul.f32 %v17573_v0, %v6182_v2  ;;  %v6340_v30 = vld [vmem:[%s15440_s12 + $0xf8] sm:$0xff] }
 0x9b2   : > { %v6151_v36 = vadd.f32 1e-05, %v6135_v4  ;;  %v6136_v22 = vmul.f32 0.00390625, %v6104_v63  ;;  %7168 = vmatmul.mubr.bf16.vlgmr.msra.gmra.mrb[144].mxu1 %v17610_v16  ;;  %7281 = vmatmul.mubr.bf16.vlgmr.msra.gmra.mrb[240].mxu0 %v17610_v16  ;;  %v6231_v18 = vmul.f32 %v17576_v37, %v6181_v58  ;;  %v6328_v4 = vld [vmem:[%s15440_s12 + $0x98] sm:$0xff]  ;;  %v11803_v60 = vcombine.high %v6327_v11, %v6331_v52  ;;  %v6335_v58 = vld [vmem:[%s15440_s12 + $0xd0] sm:$0xff] }
 0x9b3   : > { %v6234_v53 = vmul.f32 %v17573_v0, %v6184_v40  ;;  %v6233_v55 = vmul.f32 %v17576_v37, %v6183_v28  ;;  %7362 = vmatpush1.bf16.msra.mxu1 %v11786_v14  ;;  %7475 = vmatpush1.bf16.msra.mxu0 %v11788_v8  ;;  %v6282_v40 = vadd.f32 %v17581_v35, %v6232_v33  ;;  %v6339_v63 = vld [vmem:[%s15440_s12 + $0xf0] sm:$0xff] }
 0x9b4   : > { %13624 = vrsqrt.f32 %v6151_v36  ;;  %v6152_v2 = vadd.f32 1e-05, %v6136_v22  ;;  %7363 = vmatprep.subr.bf16.mxu1 %v11795_v15  ;;  %7476 = vmatprep.subr.bf16.mxu0 %v11797_v1  ;;  %v6281_v14 = vadd.f32 %v17584_v50, %v6231_v18  ;;  %v11802_v36 = vcombine.low %v6327_v11, %v6331_v52  ;;  %v6347_v52 = vld [vmem:[%s15440_s12 + $0x130] sm:$0xff] }
 0x9b5   : > { %v6284_v28 = vadd.f32 %v17581_v35, %v6234_v53  ;;  %v6283_v8 = vadd.f32 %v17584_v50, %v6233_v55  ;;  %v11805_v22 = vcombine.high %v6328_v4, %v6332_v31  ;;  %v11804_v18 = vcombine.low %v6328_v4, %v6332_v31  ;;  %v6344_v31 = vld [vmem:[%s15440_s12 + $0x118] sm:$0xff] }
 0x9b6   : > { %v13621_v49 = vpop.eup %13620  ;;  %13626 = vrsqrt.f32 %v6152_v2  ;;  %v11811_v53 = vcombine.high %v6335_v58, %v6339_v63  ;;  %v11813_v55 = vcombine.high %v6336_v26, %v6340_v30  ;;  %v6348_v2 = vld [vmem:[%s15440_s12 + $0x138] sm:$0xff] }
 0x9b7   : > { %v6185_v42 = vmul.f32 %v13621_v49, %v17404_v45  ;;  %v6186_v1 = vmul.f32 %v13621_v49, %v17407_v17  ;;  %v17638_v24 = vpack.c.bf16 %v6284_v28, %v6282_v40  ;;  %v17640_v15 = vpack.c.bf16 %v6283_v8, %v6281_v14  ;;  %7364 = vmatpush1.bf16.msra.mxu1 %v11794_v9  ;;  %v6343_v17 = vld [vmem:[%s15440_s12 + $0x110] sm:$0xff] }
 0x9b8   : > { %v13623_v33 = vpop.eup %13622  ;;  %7477 = vmatpush1.bf16.msra.mxu0 %v11796_v5  ;;  %7365 = vmatprep.subr.bf16.mxu1 %v11803_v60  ;;  %v11812_v5 = vcombine.low %v6336_v26, %v6340_v30  ;;  %v11819_v60 = vcombine.high %v6343_v17, %v6347_v52  ;;  %v6351_v40 = vld [vmem:[%s15440_s12 + $0x150] sm:$0xff] }
 0x9b9   : > { %v6187_v11 = vmul.f32 %v13623_v33, %v17414_v46  ;;  %v6188_v45 = vmul.f32 %v13623_v33, %v17417_v7  ;;  %7177 = vmatprep.mubr.bf16.mxu1 %v17638_v24  ;;  %7290 = vmatprep.mubr.bf16.mxu0 %v17638_v24  ;;  %v6236_v49 = vmul.f32 %v17573_v0, %v6186_v1  ;;  %v6356_v1 = vld [vmem:[%s15440_s12 + $0x178] sm:$0xff] }
 0x9ba   : > { %7178 = vmatmul.mubr.bf16.gmra.mrb[148].mxu1 %v17640_v15  ;;  %7291 = vmatmul.mubr.bf16.gmra.mrb[244].mxu0 %v17640_v15  ;;  %v6235_v9 = vmul.f32 %v17576_v37, %v6185_v42  ;;  %v11810_v7 = vcombine.low %v6335_v58, %v6339_v63  ;;  %v11818_v63 = vcombine.low %v6343_v17, %v6347_v52 }
 0x9bb   : > { %v6238_v46 = vmul.f32 %v17573_v0, %v6188_v45  ;;  %v6237_v4 = vmul.f32 %v17576_v37, %v6187_v11  ;;  %7478 = vmatprep.subr.bf16.mxu0 %v11805_v22  ;;  %7366 = vmatpush1.bf16.msra.mxu1 %v11802_v36  ;;  %v6286_v28 = vadd.f32 %v17581_v35, %v6236_v49  ;;  %v6355_v22 = vld [vmem:[%s15440_s12 + $0x170] sm:$0xff]  ;;  %v6352_v36 = vld [vmem:[%s15440_s12 + $0x158] sm:$0xff] }
 0x9bc   : > { %7479 = vmatpush1.bf16.msra.mxu0 %v11804_v18  ;;  %7367 = vmatprep.subr.bf16.mxu1 %v11811_v53  ;;  %v6285_v8 = vadd.f32 %v17584_v50, %v6235_v9  ;;  %v11821_v33 = vcombine.high %v6344_v31, %v6348_v2  ;;  %v11827_v45 = vcombine.high %v6351_v40, %v6355_v22  ;;  %v6363_v9 = vld [vmem:[%s15440_s12 + $0x1b0] sm:$0xff] }
 0x9bd   : > { %v6288_v14 = vadd.f32 %v17581_v35, %v6238_v46  ;;  %v6287_v42 = vadd.f32 %v17584_v50, %v6237_v4  ;;  %7480 = vmatprep.subr.bf16.mxu0 %v11813_v55  ;;  %v11820_v55 = vcombine.low %v6344_v31, %v6348_v2  ;;  %v11829_v49 = vcombine.high %v6352_v36, %v6356_v1  ;;  %v6360_v2 = vld [vmem:[%s15440_s12 + $0x198] sm:$0xff] }
 0x9be   : > { %v13625_v58 = vpop.eup %13624  ;;  %v11826_v4 = vcombine.low %v6351_v40, %v6355_v22  ;;  %v6368_v40 = vld [vmem:[%s15440_s12 + $0x1d8] sm:$0xff] }
 0x9bf   : > { %v6189_v18 = vmul.f32 %v13625_v58, %v17424_v38  ;;  %v6190_v26 = vmul.f32 %v13625_v58, %v17427_v6  ;;  %v17666_v30 = vpack.c.bf16 %v6288_v14, %v6286_v28  ;;  %v17668_v53 = vpack.c.bf16 %v6287_v42, %v6285_v8  ;;  %7368 = vmatpush1.bf16.msra.mxu1 %v11810_v7  ;;  %v6359_v6 = vld [vmem:[%s15440_s12 + $0x190] sm:$0xff]  ;;  %v6372_v22 = vld [vmem:[%s15440_s12 + $0x1f8] sm:$0xff] }
 0x9c0   : > { %v13627_v11 = vpop.eup %13626  ;;  %7481 = vmatpush1.bf16.msra.mxu0 %v11812_v5  ;;  %7369 = vmatprep.subr.bf16.mxu1 %v11819_v60  ;;  %v11828_v7 = vcombine.low %v6352_v36, %v6356_v1  ;;  %v11835_v31 = vcombine.high %v6359_v6, %v6363_v9  ;;  %v6364_v5 = vld [vmem:[%s15440_s12 + $0x1b8] sm:$0xff]  ;;  %v6367_v42 = vld [vmem:[%s15440_s12 + $0x1d0] sm:$0xff]  ;;  %v11834_v1 = vcombine.low %v6359_v6, %v6363_v9 }
 0x9c1   : > { %v6191_v17 = vmul.f32 %v13627_v11, %v17438_v21  ;;  %v6192_v52 = vmul.f32 %v13627_v11, %v17441_v39  ;;  %7187 = vmatprep.mubr.bf16.mxu1 %v17666_v30  ;;  %7300 = vmatprep.mubr.bf16.mxu0 %v17666_v30  ;;  %v6240_v38 = vmul.f32 %v17573_v0, %v6190_v26  ;;  %v6371_v58 = vld [vmem:[%s15440_s12 + $0x1f0] sm:$0xff] }
 0x9c2   : > { %7188 = vmatmul.mubr.bf16.gmra.mrb[152].mxu1 %v17668_v53  ;;  %7301 = vmatmul.mubr.bf16.gmra.mrb[248].mxu0 %v17668_v53  ;;  %v6239_v46 = vmul.f32 %v17576_v37, %v6189_v18  ;;  %v11836_v18 = vcombine.low %v6360_v2, %v6364_v5  ;;  %v11843_v26 = vcombine.high %v6367_v42, %v6371_v58 }
 0x9c3   : > { %v6242_v21 = vmul.f32 %v17573_v0, %v6192_v52  ;;  %v6241_v39 = vmul.f32 %v17576_v37, %v6191_v17  ;;  %7482 = vmatprep.subr.bf16.mxu0 %v11821_v33  ;;  %7370 = vmatpush1.bf16.msra.mxu1 %v11818_v63  ;;  %v6290_v60 = vadd.f32 %v17581_v35, %v6240_v38  ;;  %v6380_v17 = vld [vmem:[%s15440_s12 + $0x238] sm:$0xff] }
 0x9c4   : > { %7483 = vmatpush1.bf16.msra.mxu0 %v11820_v55  ;;  %7371 = vmatprep.subr.bf16.mxu1 %v11827_v45  ;;  %v6289_v14 = vadd.f32 %v17584_v50, %v6239_v46  ;;  %v11837_v33 = vcombine.high %v6360_v2, %v6364_v5  ;;  %v11845_v11 = vcombine.high %v6368_v40, %v6372_v22  ;;  %v6375_v55 = vld [vmem:[%s15440_s12 + $0x210] sm:$0xff] }
 0x9c5   : > { %v6292_v28 = vadd.f32 %v17581_v35, %v6242_v21  ;;  %v6291_v8 = vadd.f32 %v17584_v50, %v6241_v39  ;;  %7484 = vmatprep.subr.bf16.mxu0 %v11829_v49  ;;  %v6379_v45 = vld [vmem:[%s15440_s12 + $0x230] sm:$0xff]  ;;  %v6376_v49 = vld [vmem:[%s15440_s12 + $0x218] sm:$0xff]  ;;  %v11842_v52 = vcombine.low %v6367_v42, %v6371_v58  ;;  %v11844_v38 = vcombine.low %v6368_v40, %v6372_v22 }
 0x9c6   : > { %v11851_v6 = vcombine.high %v6375_v55, %v6379_v45  ;;  %v11853_v9 = vcombine.high %v6376_v49, %v6380_v17  ;;  %v6383_v46 = vld [vmem:[%s15440_s12 + $0x250] sm:$0xff]  ;;  %v6384_v39 = vld [vmem:[%s15440_s12 + $0x258] sm:$0xff] }
 0x9c7   : > { %v17692_v63 = vpack.c.bf16 %v6292_v28, %v6290_v60  ;;  %v17694_v36 = vpack.c.bf16 %v6291_v8, %v6289_v14  ;;  %7372 = vmatpush1.bf16.msra.mxu1 %v11826_v4  ;;  %v6387_v21 = vld [vmem:[%s15440_s12 + $0x270] sm:$0xff]  ;;  %v6388_v4 = vld [vmem:[%s15440_s12 + $0x278] sm:$0xff] }
 0x9c8   : > { %7485 = vmatpush1.bf16.msra.mxu0 %v11828_v7  ;;  %7373 = vmatprep.subr.bf16.mxu1 %v11835_v31  ;;  %v11850_v7 = vcombine.low %v6375_v55, %v6379_v45  ;;  %v11852_v31 = vcombine.low %v6376_v49, %v6380_v17  ;;  %v11859_v2 = vcombine.high %v6383_v46, %v6387_v21  ;;  %v6391_v60 = vld [vmem:[%s15440_s12 + $0x290] sm:$0xff]  ;;  %v6392_v14 = vld [vmem:[%s15440_s12 + $0x298] sm:$0xff] }
 0x9c9   : > { %7197 = vmatprep.mubr.bf16.mxu1 %v17692_v63  ;;  %7310 = vmatprep.mubr.bf16.mxu0 %v17692_v63  ;;  %v11861_v5 = vcombine.high %v6384_v39, %v6388_v4  ;;  %v6395_v28 = vld [vmem:[%s15440_s12 + $0x2b0] sm:$0xff]  ;;  %v6396_v8 = vld [vmem:[%s15440_s12 + $0x2b8] sm:$0xff]  ;;  %v11858_v42 = vcombine.low %v6383_v46, %v6387_v21  ;;  %v11860_v58 = vcombine.low %v6384_v39, %v6388_v4 }
 0x9ca   : > { %7198 = vmatmul.mubr.bf16.gmra.mrb[156].mxu1 %v17694_v36  ;;  %7311 = vmatmul.mubr.bf16.gmra.mrb[252].mxu0 %v17694_v36  ;;  %v11867_v40 = vcombine.high %v6391_v60, %v6395_v28  ;;  %v11869_v22 = vcombine.high %v6392_v14, %v6396_v8  ;;  %v11868_v55 = vcombine.low %v6392_v14, %v6396_v8  ;;  %v6407_v17 = vld [vmem:[%s15440_s12 + $0x310] sm:$0xff] }
 0x9cb   : > { %7486 = vmatprep.subr.bf16.mxu0 %v11837_v33  ;;  %7374 = vmatpush1.bf16.msra.mxu1 %v11834_v1  ;;  %v6399_v1 = vld [vmem:[%s15440_s12 + $0x2d0] sm:$0xff] }
 0x9cc   : > { %7487 = vmatpush1.bf16.msra.mxu0 %v11836_v18  ;;  %7375 = vmatprep.subr.bf16.mxu1 %v11843_v26  ;;  %v6403_v33 = vld [vmem:[%s15440_s12 + $0x2f0] sm:$0xff]  ;;  %v6400_v18 = vld [vmem:[%s15440_s12 + $0x2d8] sm:$0xff] }
 0x9cd   : > { %7488 = vmatprep.subr.bf16.mxu0 %v11845_v11  ;;  %v6404_v26 = vld [vmem:[%s15440_s12 + $0x2f8] sm:$0xff]  ;;  %v11866_v11 = vcombine.low %v6391_v60, %v6395_v28  ;;  %v11875_v45 = vcombine.high %v6399_v1, %v6403_v33  ;;  %v6415_v4 = vld [vmem:[%s15440_s12 + $0x350] sm:$0xff] }
 0x9ce   : > { %v11877_v49 = vcombine.high %v6400_v18, %v6404_v26  ;;  %v11876_v46 = vcombine.low %v6400_v18, %v6404_v26  ;;  %v6424_v18 = vld [vmem:[%s15440_s12 + $0x398] sm:$0xff] }
 0x9cf   : > { %7376 = vmatpush1.bf16.msra.mxu1 %v11842_v52  ;;  %v6411_v52 = vld [vmem:[%s15440_s12 + $0x330] sm:$0xff]  ;;  %v6428_v26 = vld [vmem:[%s15440_s12 + $0x3b8] sm:$0xff] }
 0x9d0   : > { %7489 = vmatpush1.bf16.msra.mxu0 %v11844_v38  ;;  %7377 = vmatprep.subr.bf16.mxu1 %v11851_v6  ;;  %v6408_v38 = vld [vmem:[%s15440_s12 + $0x318] sm:$0xff]  ;;  %v11883_v21 = vcombine.high %v6407_v17, %v6411_v52  ;;  %v11882_v60 = vcombine.low %v6407_v17, %v6411_v52  ;;  %v11901_v17 = vcombine.high %v6424_v18, %v6428_v26  ;;  %v6431_v52 = vld [vmem:[%s15440_s12 + $0x3d0] sm:$0xff] }
 0x9d1   : > { %7490 = vmatprep.subr.bf16.mxu0 %v11853_v9  ;;  %v6412_v6 = vld [vmem:[%s15440_s12 + $0x338] sm:$0xff]  ;;  %v11874_v9 = vcombine.low %v6399_v1, %v6403_v33 }
 0x9d2   : > { %v11885_v39 = vcombine.high %v6408_v38, %v6412_v6  ;;  %v11884_v14 = vcombine.low %v6408_v38, %v6412_v6  ;;  %v6435_v38 = vld [vmem:[%s15440_s12 + $0x3f0] sm:$0xff]  ;;  %v6432_v6 = vld [vmem:[%s15440_s12 + $0x3d8] sm:$0xff] }
 0x9d3   : > { %7378 = vmatpush1.bf16.msra.mxu1 %v11850_v7  ;;  %v6419_v7 = vld [vmem:[%s15440_s12 + $0x370] sm:$0xff] }
 0x9d4   : > { %7491 = vmatpush1.bf16.msra.mxu0 %v11852_v31  ;;  %7379 = vmatprep.subr.bf16.mxu1 %v11859_v2  ;;  %v6416_v31 = vld [vmem:[%s15440_s12 + $0x358] sm:$0xff]  ;;  %v11891_v8 = vcombine.high %v6415_v4, %v6419_v7 }
 0x9d5   : > { %7492 = vmatprep.subr.bf16.mxu0 %v11861_v5  ;;  %v6420_v2 = vld [vmem:[%s15440_s12 + $0x378] sm:$0xff] }
 0x9d7   : > { %7380 = vmatpush1.bf16.msra.mxu1 %v11858_v42 }
 0x9d8   : > { %7493 = vmatpush1.bf16.msra.mxu0 %v11860_v58  ;;  %7381 = vmatprep.subr.bf16.mxu1 %v11867_v40  ;;  %v11893_v58 = vcombine.high %v6416_v31, %v6420_v2  ;;  %v6423_v40 = vld [vmem:[%s15440_s12 + $0x390] sm:$0xff] }
 0x9d9   : > { %7494 = vmatprep.subr.bf16.mxu0 %v11869_v22  ;;  %v6427_v22 = vld [vmem:[%s15440_s12 + $0x3b0] sm:$0xff] }
 0x9db   : > { %7382 = vmatpush1.bf16.msra.mxu1 %v11866_v11  ;;  %v11890_v11 = vcombine.low %v6415_v4, %v6419_v7  ;;  %v11906_v7 = vcombine.low %v6431_v52, %v6435_v38 }
 0x9dc   : > { %7495 = vmatpush1.bf16.msra.mxu0 %v11868_v55  ;;  %7383 = vmatprep.subr.bf16.mxu1 %v11875_v45  ;;  %v11892_v45 = vcombine.low %v6416_v31, %v6420_v2  ;;  %v13262_v2 = vld [vmem:[%s15449_s22 + $0x4] ss:$8 sps:$4 sm:$0xff]  }
 0x9dd   : > { %7496 = vmatprep.subr.bf16.mxu0 %v11877_v49  ;;  %v11899_v49 = vcombine.high %v6423_v40, %v6427_v22 }
 0x9df   : > { %v6107_v5 = vpop.xlane.xlu0 %6106  ;;  %7384 = vmatpush1.bf16.msra.mxu1 %v11874_v9  ;;  %v6436_v9 = vld [vmem:[%s15440_s12 + $0x3f8] sm:$0xff] }
 0x9e0   : > { %v6137_v28 = vmul.f32 0.00390625, %v6107_v5  ;;  %7497 = vmatpush1.bf16.msra.mxu0 %v11876_v46  ;;  %7385 = vmatprep.subr.bf16.mxu1 %v11883_v21  ;;  %v11898_v46 = vcombine.low %v6423_v40, %v6427_v22  ;;  %v11900_v21 = vcombine.low %v6424_v18, %v6428_v26  ;;  %v11909_v4 = vcombine.high %v6432_v6, %v6436_v9 }
 0x9e1   : > { %v6110_v42 = vpop.xlane.xlu1 %6109  ;;  %7498 = vmatprep.subr.bf16.mxu0 %v11885_v39  ;;  %v11907_v39 = vcombine.high %v6431_v52, %v6435_v38  ;;  %v11908_v31 = vcombine.low %v6432_v6, %v6436_v9 }
 0x9e2   : > { %v6153_v1 = vadd.f32 1e-05, %v6137_v28  ;;  %v6138_v33 = vmul.f32 0.00390625, %v6110_v42 }
 0x9e3   : > { %7386 = vmatpush1.bf16.msra.mxu1 %v11882_v60 }
 0x9e4   : > { %13628 = vrsqrt.f32 %v6153_v1  ;;  %v6154_v55 = vadd.f32 1e-05, %v6138_v33  ;;  %7499 = vmatpush1.bf16.msra.mxu0 %v11884_v14  ;;  %7387 = vmatprep.subr.bf16.mxu1 %v11891_v8 }
 0x9e5   : > { %7500 = vmatprep.subr.bf16.mxu0 %v11893_v58 }
 0x9e6   : > { %13630 = vrsqrt.f32 %v6154_v55 }
 0x9e7   : > { %7388 = vmatpush1.bf16.msra.mxu1 %v11890_v11 }
 0x9e8   : > { %7501 = vmatpush1.bf16.msra.mxu0 %v11892_v45  ;;  %7389 = vmatprep.subr.bf16.mxu1 %v11899_v49 }
 0x9e9   : > { %7502 = vmatprep.subr.bf16.mxu0 %v11901_v17 }
 0x9eb   : > { %7390 = vmatpush1.bf16.msra.mxu1 %v11898_v46 }
 0x9ec   : > { %7503 = vmatpush1.bf16.msra.mxu0 %v11900_v21  ;;  %7391 = vmatprep.subr.bf16.mxu1 %v11907_v39 }
 0x9ed   : > { %7504 = vmatprep.subr.bf16.mxu0 %v11909_v4 }
 0x9ee   : > { %v13629_v5 = vpop.eup %13628 }
 0x9ef   : > { %v6193_v60 = vmul.f32 %v13629_v5, %v17468_v23  ;;  %v6194_v28 = vmul.f32 %v13629_v5, %v17471_v59  ;;  %v6113_v14 = vpop.xlane.xlu0 %6112  ;;  %7392 = vmatpush1.bf16.msra.mxu1 %v11906_v7 }
 0x9f0   : > { %v13631_v8 = vpop.eup %13630  ;;  %v6139_v42 = vmul.f32 0.00390625, %v6113_v14  ;;  %7505 = vmatpush1.bf16.msra.mxu0 %v11908_v31  ;;  %9455 = vmatprep.subr.bf16.mxu1 %v13262_v2 }
 0x9f1   : > { %v6195_v58 = vmul.f32 %v13631_v8, %v17478_v25  ;;  %v6196_v40 = vmul.f32 %v13631_v8, %v17481_v54  ;;  %v6116_v22 = vpop.xlane.xlu1 %6115  ;;  %v6244_v1 = vmul.f32 %v17573_v0, %v6194_v28  ;;  %v6243_v33 = vmul.f32 %v17576_v37, %v6193_v60 }
 0x9f2   : > { %v6155_v18 = vadd.f32 1e-05, %v6139_v42  ;;  %v6140_v26 = vmul.f32 0.00390625, %v6116_v22 }
 0x9f3   : > { %v6246_v23 = vmul.f32 %v17573_v0, %v6196_v40  ;;  %v6245_v59 = vmul.f32 %v17576_v37, %v6195_v58  ;;  %v6294_v55 = vadd.f32 %v17581_v35, %v6244_v1  ;;  %v6293_v25 = vadd.f32 %v17584_v50, %v6243_v33 }
 0x9f4   : > { %13632 = vrsqrt.f32 %v6155_v18  ;;  %v6156_v11 = vadd.f32 1e-05, %v6140_v26 }
 0x9f5   : > { %v6296_v45 = vadd.f32 %v17581_v35, %v6246_v23  ;;  %v6295_v54 = vadd.f32 %v17584_v50, %v6245_v59 }
 0x9f6   : > { %13634 = vrsqrt.f32 %v6156_v11 }
 0x9f7   : > { %v17745_v49 = vpack.c.bf16 %v6296_v45, %v6294_v55  ;;  %v17747_v17 = vpack.c.bf16 %v6295_v54, %v6293_v25 }
 0x9f9   : > { %7207 = vmatprep.mubr.bf16.mxu1 %v17745_v49  ;;  %7320 = vmatprep.mubr.bf16.mxu0 %v17745_v49 }
 0x9fa   : > { %7208 = vmatmul.mubr.bf16.gmra.mrb[160].mxu1 %v17747_v17  ;;  %7321 = vmatmul.mubr.bf16.gmra.mrb[0].mxu0 %v17747_v17 }
 0x9fe   : > { %v13633_v52 = vpop.eup %13632 }
 0x9ff   : > { %v6197_v38 = vmul.f32 %v13633_v52, %v17488_v10  ;;  %v6198_v6 = vmul.f32 %v13633_v52, %v17491_v32  ;;  %v6119_v9 = vpop.xlane.xlu0 %6118 }
 0xa00   : > { %v13635_v46 = vpop.eup %13634  ;;  %v6141_v21 = vmul.f32 0.00390625, %v6119_v9 }
 0xa01   : > { %v6199_v39 = vmul.f32 %v13635_v46, %v17498_v44  ;;  %v6200_v4 = vmul.f32 %v13635_v46, %v17501_v29  ;;  %v6122_v7 = vpop.xlane.xlu1 %6121  ;;  %v6248_v31 = vmul.f32 %v17573_v0, %v6198_v6  ;;  %v6247_v2 = vmul.f32 %v17576_v37, %v6197_v38 }
 0xa02   : > { %v6157_v5 = vadd.f32 1e-05, %v6141_v21  ;;  %v6142_v60 = vmul.f32 0.00390625, %v6122_v7 }
 0xa03   : > { %v6250_v28 = vmul.f32 %v17573_v0, %v6200_v4  ;;  %v6249_v10 = vmul.f32 %v17576_v37, %v6199_v39  ;;  %v6298_v14 = vadd.f32 %v17581_v35, %v6248_v31  ;;  %v6297_v44 = vadd.f32 %v17584_v50, %v6247_v2 }
 0xa04   : > { %13636 = vrsqrt.f32 %v6157_v5  ;;  %v6158_v32 = vadd.f32 1e-05, %v6142_v60 }
 0xa05   : > { %v6300_v8 = vadd.f32 %v17581_v35, %v6250_v28  ;;  %v6299_v29 = vadd.f32 %v17584_v50, %v6249_v10 }
 0xa06   : > { %13638 = vrsqrt.f32 %v6158_v32 }
 0xa07   : > { %v17765_v42 = vpack.c.bf16 %v6300_v8, %v6298_v14  ;;  %v17767_v58 = vpack.c.bf16 %v6299_v29, %v6297_v44  ;;  %v13271_v8 = vld [vmem:[%s15449_s22 + $0x34] ss:$8 sps:$4 sm:$0xff]   ;;  %v13272_v44 = vld [vmem:[%s15449_s22 + $0x40] ss:$8 sps:$4 sm:$0xff]  }
 0xa08   : > { %v13277_v29 = vld [vmem:[%s15449_s22 + $0x54] ss:$8 sps:$4 sm:$0xff]  }
 0xa09   : > { %7217 = vmatprep.mubr.bf16.mxu1 %v17765_v42  ;;  %7330 = vmatprep.mubr.bf16.mxu0 %v17765_v42 }
 0xa0a   : > { %7218 = vmatmul.mubr.bf16.gmra.mrb[164].mxu1 %v17767_v58  ;;  %7331 = vmatmul.mubr.bf16.gmra.mrb[4].mxu0 %v17767_v58 }
 0xa0e   : > { %v13637_v40 = vpop.eup %13636 }
 0xa0f   : > { %v6201_v22 = vmul.f32 %v13637_v40, %v17508_v62  ;;  %v6202_v1 = vmul.f32 %v13637_v40, %v17511_v48  ;;  %v13278_v40 = vld [vmem:[%s15449_s22 + $0x60] ss:$8 sps:$4 sm:$0xff]  }
 0xa10   : > { %v13639_v33 = vpop.eup %13638  ;;  %v6125_v18 = vpop.xlane.xlu0 %6124 }
 0xa11   : > { %v6203_v26 = vmul.f32 %v13639_v33, %v17518_v3  ;;  %v6204_v23 = vmul.f32 %v13639_v33, %v17521_v34  ;;  %v6143_v59 = vmul.f32 0.00390625, %v6125_v18  ;;  %v6252_v11 = vmul.f32 %v17573_v0, %v6202_v1  ;;  %v13284_v1 = vld [vmem:[%s15449_s22 + $0x80] ss:$8 sps:$4 sm:$0xff]   ;;  %v13289_v33 = vld [vmem:[%s15449_s22 + $0x94] ss:$8 sps:$4 sm:$0xff]  }
 0xa12   : > { %v6128_v55 = vpop.xlane.xlu1 %6127  ;;  %v6251_v45 = vmul.f32 %v17576_v37, %v6201_v22  ;;  %v13283_v22 = vld [vmem:[%s15449_s22 + $0x74] ss:$8 sps:$4 sm:$0xff]   ;;  %v13290_v18 = vld [vmem:[%s15449_s22 + $0xa0] ss:$8 sps:$4 sm:$0xff]  }
 0xa13   : > { %v6159_v25 = vadd.f32 1e-05, %v6143_v59  ;;  %v6144_v54 = vmul.f32 0.00390625, %v6128_v55  ;;  %v6254_v52 = vmul.f32 %v17573_v0, %v6204_v23  ;;  %v6253_v62 = vmul.f32 %v17576_v37, %v6203_v26  ;;  %v13295_v26 = vld [vmem:[%s15449_s22 + $0xb4] ss:$8 sps:$4 sm:$0xff]  }
 0xa14   : > { %v6302_v38 = vadd.f32 %v17581_v35, %v6252_v11  ;;  %v6301_v34 = vadd.f32 %v17584_v50, %v6251_v45  ;;  %v13296_v23 = vld [vmem:[%s15449_s22 + $0xc0] ss:$8 sps:$4 sm:$0xff]   ;;  %v13301_v59 = vld [vmem:[%s15449_s22 + $0xd4] ss:$8 sps:$4 sm:$0xff]   ;;  %v13304_v11 = vld [vmem:[%s15449_s22 + $0xe4] ss:$8 sps:$4 sm:$0xff]  }
 0xa15   : > { %13640 = vrsqrt.f32 %v6159_v25  ;;  %v6160_v48 = vadd.f32 1e-05, %v6144_v54  ;;  %v6304_v3 = vadd.f32 %v17581_v35, %v6254_v52  ;;  %v6303_v6 = vadd.f32 %v17584_v50, %v6253_v62  ;;  %v13302_v55 = vld [vmem:[%s15449_s22 + $0xe0] ss:$8 sps:$4 sm:$0xff]   ;;  %v13307_v45 = vld [vmem:[%s15449_s22 + $0xf4] ss:$8 sps:$4 sm:$0xff]  }
 0xa16   : > { %v13305_v25 = vld [vmem:[%s15449_s22 + $0xf0] ss:$8 sps:$4 sm:$0xff]  }
 0xa17   : > { %13642 = vrsqrt.f32 %v6160_v48  ;;  %v17785_v9 = vpack.c.bf16 %v6304_v3, %v6302_v38  ;;  %v17787_v46 = vpack.c.bf16 %v6303_v6, %v6301_v34  ;;  %v6453_v54 = vld [vmem:[%s15443_s7] sm:$0xff] }
 0xa18   : > { %v17878_v52 = vrot.slane %v6453_v54, %v20603_v41  ;;  %v17881_v62 = vrot.slane %v6453_v54, %v20638_v56  ;;  %v17884_v48 = vrot.slane %v6453_v54, %v20604_v19  ;;  %v17887_v38 = vrot.slane %v6453_v54, %v20639_v61 }
 0xa19   : > { %7227 = vmatprep.mubr.bf16.mxu1 %v17785_v9  ;;  %7340 = vmatprep.mubr.bf16.mxu0 %v17785_v9 }
 0xa1a   : > { %7228 = vmatmul.mubr.bf16.gmra.mrb[168].mxu1 %v17787_v46  ;;  %7341 = vmatmul.mubr.bf16.gmra.mrb[8].mxu0 %v17787_v46 }
 0xa1f   : > { %v13641_v21 = vpop.eup %13640 }
 0xa20   : > { %v6205_v39 = vmul.f32 %v13641_v21, %v17544_v13  ;;  %v6206_v4 = vmul.f32 %v13641_v21, %v17547_v43 }
 0xa21   : > { %v13643_v7 = vpop.eup %13642 }
 0xa22   : > { %v6207_v31 = vmul.f32 %v13643_v7, %v17554_v57  ;;  %v6208_v2 = vmul.f32 %v13643_v7, %v17557_v47  ;;  %v6256_v5 = vmul.f32 %v17573_v0, %v6206_v4  ;;  %v6255_v60 = vmul.f32 %v17576_v37, %v6205_v39 }
 0xa24   : > { %v6258_v28 = vmul.f32 %v17573_v0, %v6208_v2  ;;  %v6257_v10 = vmul.f32 %v17576_v37, %v6207_v31  ;;  %v6306_v32 = vadd.f32 %v17581_v35, %v6256_v5  ;;  %v6305_v43 = vadd.f32 %v17584_v50, %v6255_v60  ;;  %v13265_v0 = vld [vmem:[%s15449_s22 + $0x14] ss:$8 sps:$4 sm:$0xff]   ;;  %v13263_v37 = vld [vmem:[%s15449_s22 + $0x10] ss:$8 sps:$4 sm:$0xff]  }
 0xa26   : > { %v6308_v13 = vadd.f32 %v17581_v35, %v6258_v28  ;;  %v6307_v57 = vadd.f32 %v17584_v50, %v6257_v10  ;;  %v13260_v35 = vld [vmem:[%s15449_s22] ss:$8 sps:$4 sm:$0xff]   ;;  %v13268_v50 = vld [vmem:[%s15449_s22 + $0x24] ss:$8 sps:$4 sm:$0xff]  }
 0xa28   : > { %v17805_v47 = vpack.c.bf16 %v6308_v13, %v6306_v32  ;;  %v17807_v14 = vpack.c.bf16 %v6307_v57, %v6305_v43 }
 0xa2a   : > { %7237 = vmatprep.mubr.bf16.mxu1 %v17805_v47  ;;  %7350 = vmatprep.mubr.bf16.mxu0 %v17805_v47 }
 0xa2b   : > { %7238 = vmatmul.mubr.bf16.gmra.mrb[172].mxu1 %v17807_v14  ;;  %7351 = vmatmul.mubr.bf16.gmra.mrb[12].mxu0 %v17807_v14 }
 0xa2c   : > { %7393 = vmatprep.mubr.bf16.mxu1 %v17608_v51  ;;  %7506 = vmatprep.mubr.bf16.mxu0 %v17608_v51  ;;  %v13266_v51 = vld [vmem:[%s15449_s22 + $0x20] ss:$8 sps:$4 sm:$0xff]  }
 0xa33   : > { %7394 = vmatmul.mubr.bf16.vlgmr.msra.gmra.mrb[176].mxu1 %v17610_v16  ;;  %7507 = vmatmul.mubr.bf16.vlgmr.msra.gmra.mrb[16].mxu0 %v17610_v16  ;;  %v13269_v16 = vld [vmem:[%s15449_s22 + $0x30] ss:$8 sps:$4 sm:$0xff]  }
 0xa34   : > { %7403 = vmatprep.mubr.bf16.mxu1 %v17638_v24  ;;  %7516 = vmatprep.mubr.bf16.mxu0 %v17638_v24  ;;  %v13274_v24 = vld [vmem:[%s15449_s22 + $0x44] ss:$8 sps:$4 sm:$0xff]  }
 0xa35   : > { %9456 = vmatpush1.bf16.msra.mxu1 %v13260_v35 }
 0xa36   : > { %9457 = vmatprep.subr.bf16.mxu1 %v13265_v0 }
 0xa39   : > { %9458 = vmatpush1.bf16.msra.mxu1 %v13263_v37 }
 0xa3a   : > { %9459 = vmatprep.subr.bf16.mxu1 %v13268_v50 }
 0xa3b   : > { %7404 = vmatmul.mubr.bf16.gmra.mrb[180].mxu1 %v17640_v15  ;;  %7517 = vmatmul.mubr.bf16.gmra.mrb[20].mxu0 %v17640_v15  ;;  %v13275_v15 = vld [vmem:[%s15449_s22 + $0x50] ss:$8 sps:$4 sm:$0xff]  }
 0xa3c   : > { %7413 = vmatprep.mubr.bf16.mxu1 %v17666_v30  ;;  %7526 = vmatprep.mubr.bf16.mxu0 %v17666_v30  ;;  %v13280_v30 = vld [vmem:[%s15449_s22 + $0x64] ss:$8 sps:$4 sm:$0xff]  }
 0xa3d   : > { %9460 = vmatpush1.bf16.msra.mxu1 %v13266_v51 }
 0xa3e   : > { %9461 = vmatprep.subr.bf16.mxu1 %v13271_v8 }
 0xa41   : > { %9462 = vmatpush1.bf16.msra.mxu1 %v13269_v16 }
 0xa42   : > { %9463 = vmatprep.subr.bf16.mxu1 %v13274_v24 }
 0xa43   : > { %7414 = vmatmul.mubr.bf16.gmra.mrb[184].mxu1 %v17668_v53  ;;  %7527 = vmatmul.mubr.bf16.gmra.mrb[24].mxu0 %v17668_v53  ;;  %v13281_v53 = vld [vmem:[%s15449_s22 + $0x70] ss:$8 sps:$4 sm:$0xff]  }
 0xa44   : > { %7423 = vmatprep.mubr.bf16.mxu1 %v17692_v63  ;;  %7536 = vmatprep.mubr.bf16.mxu0 %v17692_v63  ;;  %v13286_v63 = vld [vmem:[%s15449_s22 + $0x84] ss:$8 sps:$4 sm:$0xff]  }
 0xa45   : > { %9464 = vmatpush1.bf16.msra.mxu1 %v13272_v44 }
 0xa46   : > { %9465 = vmatprep.subr.bf16.mxu1 %v13277_v29  ;;  %v13310_v29 = vld [vmem:[%s15449_s22 + $0x104] ss:$8 sps:$4 sm:$0xff]  }
 0xa49   : > { %9466 = vmatpush1.bf16.msra.mxu1 %v13275_v15 }
 0xa4a   : > { %9467 = vmatprep.subr.bf16.mxu1 %v13280_v30 }
 0xa4b   : > { %7424 = vmatmul.mubr.bf16.gmra.mrb[188].mxu1 %v17694_v36  ;;  %7537 = vmatmul.mubr.bf16.gmra.mrb[28].mxu0 %v17694_v36  ;;  %v13287_v36 = vld [vmem:[%s15449_s22 + $0x90] ss:$8 sps:$4 sm:$0xff]  }
 0xa4c   : > { %7433 = vmatprep.mubr.bf16.mxu1 %v17745_v49  ;;  %7546 = vmatprep.mubr.bf16.mxu0 %v17745_v49  ;;  %v13292_v49 = vld [vmem:[%s15449_s22 + $0xa4] ss:$8 sps:$4 sm:$0xff]  }
 0xa4d   : > { %9468 = vmatpush1.bf16.msra.mxu1 %v13278_v40 }
 0xa4e   : > { %9469 = vmatprep.subr.bf16.mxu1 %v13283_v22 }
 0xa51   : > { %9470 = vmatpush1.bf16.msra.mxu1 %v13281_v53 }
 0xa52   : > { %9471 = vmatprep.subr.bf16.mxu1 %v13286_v63 }
 0xa53   : > { %7434 = vmatmul.mubr.bf16.gmra.mrb[192].mxu1 %v17747_v17  ;;  %7547 = vmatmul.mubr.bf16.gmra.mrb[32].mxu0 %v17747_v17  ;;  %v13293_v17 = vld [vmem:[%s15449_s22 + $0xb0] ss:$8 sps:$4 sm:$0xff]  }
 0xa54   : > { %7443 = vmatprep.mubr.bf16.mxu1 %v17765_v42  ;;  %7556 = vmatprep.mubr.bf16.mxu0 %v17765_v42  ;;  %v13298_v42 = vld [vmem:[%s15449_s22 + $0xc4] ss:$8 sps:$4 sm:$0xff]  }
 0xa55   : > { %9472 = vmatpush1.bf16.msra.mxu1 %v13284_v1 }
 0xa56   : > { %9473 = vmatprep.subr.bf16.mxu1 %v13289_v33 }
 0xa59   : > { %9474 = vmatpush1.bf16.msra.mxu1 %v13287_v36 }
 0xa5a   : > { %9475 = vmatprep.subr.bf16.mxu1 %v13292_v49 }
 0xa5b   : > { %7444 = vmatmul.mubr.bf16.gmra.mrb[196].mxu1 %v17767_v58  ;;  %7557 = vmatmul.mubr.bf16.gmra.mrb[36].mxu0 %v17767_v58  ;;  %v13299_v58 = vld [vmem:[%s15449_s22 + $0xd0] ss:$8 sps:$4 sm:$0xff]  }
 0xa5c   : > { %7453 = vmatprep.mubr.bf16.mxu1 %v17785_v9  ;;  %7566 = vmatprep.mubr.bf16.mxu0 %v17785_v9 }
 0xa5d   : > { %9476 = vmatpush1.bf16.msra.mxu1 %v13290_v18 }
 0xa5e   : > { %9477 = vmatprep.subr.bf16.mxu1 %v13295_v26 }
 0xa61   : > { %9478 = vmatpush1.bf16.msra.mxu1 %v13293_v17 }
 0xa62   : > { %9479 = vmatprep.subr.bf16.mxu1 %v13298_v42 }
 0xa63   : > { %7454 = vmatmul.mubr.bf16.gmra.mrb[200].mxu1 %v17787_v46  ;;  %7567 = vmatmul.mubr.bf16.gmra.mrb[40].mxu0 %v17787_v46 }
 0xa64   : > { %7463 = vmatprep.mubr.bf16.mxu1 %v17805_v47  ;;  %7576 = vmatprep.mubr.bf16.mxu0 %v17805_v47 }
 0xa65   : > { %9480 = vmatpush1.bf16.msra.mxu1 %v13296_v23 }
 0xa66   : > { %9481 = vmatprep.subr.bf16.mxu1 %v13301_v59 }
 0xa69   : > { %9482 = vmatpush1.bf16.msra.mxu1 %v13299_v58 }
 0xa6a   : > { %9483 = vmatprep.subr.bf16.mxu1 %v13304_v11 }
 0xa6b   : > { %7464 = vmatmul.mubr.bf16.gmra.mrb[204].mxu1 %v17807_v14  ;;  %7577 = vmatmul.mubr.bf16.gmra.mrb[44].mxu0 %v17807_v14 }
 0xa6d   : > { %9484 = vmatpush1.bf16.msra.mxu1 %v13302_v55 }
 0xa6e   : > { %9485 = vmatprep.subr.bf16.mxu1 %v13307_v45 }
 0xa71   : > { %9486 = vmatpush1.bf16.msra.mxu1 %v13305_v25 }
 0xa72   : > { %9568 = vmatprep.subr.bf16.mxu1 %v13310_v29 }
 0xa85   : > { %v7169_v3 = vpop.f32.mrb[144].mxu1  ;;  %v7282_v34 = vpop.f32.mrb[240].mxu0 }
 0xa86   : > { %v17890_v6 = vadd.f32 %v7169_v3, %v17878_v52  ;;  %v17893_v9 = vadd.f32 %v7282_v34, %v17881_v62  ;;  %v7171_v46 = vpop.f32.mrb[145].mxu1  ;;  %v7284_v21 = vpop.f32.mrb[241].mxu0 }
 0xa87   : > { %v17896_v39 = vadd.f32 %v7171_v46, %v17884_v48  ;;  %v17899_v56 = vadd.f32 %v7284_v21, %v17887_v38  ;;  %v7173_v4 = vpop.f32.mrb[146].mxu1  ;;  %v7286_v7 = vpop.f32.mrb[242].mxu0 }
 0xa88   : > { %v11910_v61 = vmul.f32 -1.702, %v17890_v6  ;;  %v11912_v31 = vmul.f32 -1.702, %v17893_v9  ;;  %v17904_v2 = vadd.f32 %v7173_v4, %v17878_v52  ;;  %v17907_v5 = vadd.f32 %v7286_v7, %v17881_v62  ;;  %v7175_v60 = vpop.f32.mrb[147].mxu1  ;;  %v7288_v28 = vpop.f32.mrb[243].mxu0 }
 0xa89   : > { %v11911_v10 = vmul.f32 -1.702, %v17896_v39  ;;  %v11913_v32 = vmul.f32 -1.702, %v17899_v56  ;;  %v17912_v13 = vadd.f32 %v7175_v60, %v17884_v48  ;;  %v17915_v43 = vadd.f32 %v7288_v28, %v17887_v38 }
 0xa8a   : > { %v7843_v57 = vmul.f32 1.442695, %v11910_v61  ;;  %v7847_v47 = vmul.f32 1.442695, %v11912_v31  ;;  %v11918_v14 = vmul.f32 -1.702, %v17904_v2 }
 0xa8b   : > { %v7845_v35 = vmul.f32 1.442695, %v11911_v10  ;;  %v7849_v0 = vmul.f32 1.442695, %v11913_v32  ;;  %v11920_v37 = vmul.f32 -1.702, %v17907_v5 }
 0xa8c   : > { %13644 = vpow2.f32 %v7843_v57  ;;  %v7859_v50 = vmul.f32 1.442695, %v11918_v14  ;;  %v11919_v51 = vmul.f32 -1.702, %v17912_v13  ;;  %v11921_v8 = vmul.f32 -1.702, %v17915_v43 }
 0xa8d   : > { %13646 = vpow2.f32 %v7847_v47  ;;  %v7863_v16 = vmul.f32 1.442695, %v11920_v37  ;;  %v7179_v24 = vpop.f32.mrb[148].mxu1  ;;  %v7292_v44 = vpop.f32.mrb[244].mxu0 }
 0xa8e   : > { %13648 = vpow2.f32 %v7845_v35  ;;  %v7861_v15 = vmul.f32 1.442695, %v11919_v51  ;;  %v7865_v30 = vmul.f32 1.442695, %v11921_v8  ;;  %v17923_v40 = vadd.f32 %v7179_v24, %v17878_v52  ;;  %v7181_v22 = vpop.f32.mrb[149].mxu1  ;;  %v7294_v53 = vpop.f32.mrb[245].mxu0 }
 0xa8f   : > { %13650 = vpow2.f32 %v7849_v0  ;;  %v17926_v63 = vadd.f32 %v7292_v44, %v17881_v62  ;;  %v17929_v1 = vadd.f32 %v7181_v22, %v17884_v48  ;;  %v17932_v33 = vadd.f32 %v7294_v53, %v17887_v38  ;;  %v7183_v36 = vpop.f32.mrb[150].mxu1  ;;  %v7296_v49 = vpop.f32.mrb[246].mxu0 }
 0xa90   : > { %13652 = vpow2.f32 %v7859_v50  ;;  %v11926_v18 = vmul.f32 -1.702, %v17923_v40  ;;  %v17936_v26 = vadd.f32 %v7183_v36, %v17878_v52  ;;  %v7185_v17 = vpop.f32.mrb[151].mxu1  ;;  %v7298_v42 = vpop.f32.mrb[247].mxu0  ;;  %v17943_v45 = vadd.f32 %v7296_v49, %v17881_v62 }
 0xa91   : > { %13654 = vpow2.f32 %v7863_v16  ;;  %v11928_v23 = vmul.f32 -1.702, %v17926_v63  ;;  %v11927_v59 = vmul.f32 -1.702, %v17929_v1  ;;  %v11929_v58 = vmul.f32 -1.702, %v17932_v33 }
 0xa92   : > { %13656 = vpow2.f32 %v7861_v15  ;;  %v7875_v11 = vmul.f32 1.442695, %v11926_v18  ;;  %v11934_v55 = vmul.f32 -1.702, %v17936_v26  ;;  %v11936_v28 = vmul.f32 -1.702, %v17943_v45 }
 0xa93   : > { %13658 = vpow2.f32 %v7865_v30  ;;  %v7879_v25 = vmul.f32 1.442695, %v11928_v23  ;;  %v7877_v54 = vmul.f32 1.442695, %v11927_v59  ;;  %v7881_v3 = vmul.f32 1.442695, %v11929_v58 }
 0xa94   : > { %13660 = vpow2.f32 %v7875_v11  ;;  %v7891_v34 = vmul.f32 1.442695, %v11934_v55  ;;  %v17947_v10 = vadd.f32 %v7185_v17, %v17884_v48  ;;  %v17950_v50 = vadd.f32 %v7298_v42, %v17887_v38 }
 0xa95   : > { %13662 = vpow2.f32 %v7879_v25  ;;  %v7189_v46 = vpop.f32.mrb[152].mxu1  ;;  %v7302_v21 = vpop.f32.mrb[248].mxu0  ;;  %v7895_v29 = vmul.f32 1.442695, %v11936_v28 }
 0xa96   : > { %v13645_v4 = vpop.eup %13644  ;;  %13664 = vpow2.f32 %v7877_v54  ;;  %v7191_v7 = vpop.f32.mrb[153].mxu1  ;;  %v11935_v15 = vmul.f32 -1.702, %v17947_v10  ;;  %v17954_v53 = vadd.f32 %v7189_v46, %v17878_v52  ;;  %v17957_v36 = vadd.f32 %v7302_v21, %v17881_v62 }
 0xa97   : > { %v7304_v61 = vpop.f32.mrb[249].mxu0  ;;  %v13647_v31 = vpop.eup %13646  ;;  %v8099_v60 = vadd.f32 1.0, %v13645_v4  ;;  %13666 = vpow2.f32 %v7881_v3  ;;  %v11937_v17 = vmul.f32 -1.702, %v17950_v50  ;;  %v17961_v42 = vadd.f32 %v7191_v7, %v17884_v48 }
 0xa98   : > { %v7193_v32 = vpop.f32.mrb[154].mxu1  ;;  %v7306_v57 = vpop.f32.mrb[250].mxu0  ;;  %v8101_v14 = vadd.f32 1.0, %v13647_v31  ;;  %13668 = vpow2.f32 %v7891_v34  ;;  %v17964_v55 = vadd.f32 %v7304_v61, %v17887_v38  ;;  %v7893_v21 = vmul.f32 1.442695, %v11935_v15 }
 0xa99   : > { %v13649_v47 = vpop.eup %13648  ;;  %v7195_v35 = vpop.f32.mrb[155].mxu1  ;;  %13670 = vrcp.f32 %v8099_v60  ;;  %v17967_v25 = vadd.f32 %v7193_v32, %v17878_v52  ;;  %v17974_v4 = vadd.f32 %v7306_v57, %v17881_v62  ;;  %v11942_v60 = vmul.f32 -1.702, %v17954_v53 }
 0xa9a   : > { %v13651_v0 = vpop.eup %13650  ;;  %v8100_v37 = vadd.f32 1.0, %v13649_v47  ;;  %v7308_v51 = vpop.f32.mrb[251].mxu0  ;;  %13672 = vrcp.f32 %v8101_v14  ;;  %v11944_v28 = vmul.f32 -1.702, %v17957_v36 }
 0xa9b   : > { %v13653_v8 = vpop.eup %13652  ;;  %v8102_v16 = vadd.f32 1.0, %v13651_v0  ;;  %v11943_v0 = vmul.f32 -1.702, %v17961_v42 }
 0xa9c   : > { %v13655_v24 = vpop.eup %13654  ;;  %13674 = vrcp.f32 %v8100_v37  ;;  %v8107_v44 = vadd.f32 1.0, %v13653_v8 }
 0xa9d   : > { %v13657_v30 = vpop.eup %13656  ;;  %13676 = vrcp.f32 %v8102_v16  ;;  %v8109_v22 = vadd.f32 1.0, %v13655_v24  ;;  %v7199_v23 = vpop.f32.mrb[156].mxu1  ;;  %v11945_v24 = vmul.f32 -1.702, %v17964_v55 }
 0xa9e   : > { %v13659_v49 = vpop.eup %13658  ;;  %13678 = vrcp.f32 %v8107_v44  ;;  %v8108_v18 = vadd.f32 1.0, %v13657_v30  ;;  %v7312_v59 = vpop.f32.mrb[252].mxu0  ;;  %v11950_v44 = vmul.f32 -1.702, %v17967_v25 }
 0xa9f   : > { %v13661_v58 = vpop.eup %13660  ;;  %13680 = vrcp.f32 %v8109_v22  ;;  %v8110_v11 = vadd.f32 1.0, %v13659_v49  ;;  %v17969_v54 = vpop.f32.mrb[157].mxu1  ;;  %v11952_v22 = vmul.f32 -1.702, %v17974_v4  ;;  %v17991_v49 = vadd.f32 %v7195_v35, %v17884_v48 }
 0xaa0   : > { %v17971_v3 = vpop.f32.mrb[253].mxu0  ;;  %v13663_v34 = vpop.eup %13662  ;;  %13682 = vrcp.f32 %v8108_v18  ;;  %v8115_v46 = vadd.f32 1.0, %v13661_v58  ;;  %v7897_v58 = vmul.f32 1.442695, %v11937_v17  ;;  %v18000_v35 = vadd.f32 %v7312_v59, %v17881_v62 }
 0xaa1   : > { %v17976_v7 = vpop.f32.mrb[158].mxu1  ;;  %v13665_v31 = vpop.eup %13664  ;;  %13684 = vrcp.f32 %v8110_v11  ;;  %v8117_v61 = vadd.f32 1.0, %v13663_v34  ;;  %v17994_v11 = vadd.f32 %v7308_v51, %v17887_v38  ;;  %v7923_v17 = vmul.f32 1.442695, %v11950_v44 }
 0xaa2   : > { %v17980_v32 = vpop.f32.mrb[254].mxu0  ;;  %v13667_v47 = vpop.eup %13666  ;;  %13686 = vrcp.f32 %v8115_v46  ;;  %v8116_v14 = vadd.f32 1.0, %v13665_v31  ;;  %v7907_v46 = vmul.f32 1.442695, %v11942_v60  ;;  %v7911_v31 = vmul.f32 1.442695, %v11944_v28 }
 0xaa3   : > { %v17983_v37 = vpop.f32.mrb[159].mxu1  ;;  %v17985_v57 = vpop.f32.mrb[255].mxu0  ;;  %13688 = vrcp.f32 %v8117_v61  ;;  %v8118_v16 = vadd.f32 1.0, %v13667_v47  ;;  %v17997_v61 = vadd.f32 %v7199_v23, %v17878_v52  ;;  %v11951_v51 = vmul.f32 -1.702, %v17991_v49 }
 0xaa4   : > { %v13669_v8 = vpop.eup %13668  ;;  %13690 = vrcp.f32 %v8116_v14  ;;  %v7909_v14 = vmul.f32 1.442695, %v11943_v0  ;;  %v11953_v23 = vmul.f32 -1.702, %v17994_v11 }
 0xaa5   : > { %v13671_v15 = vpop.eup %13670  ;;  %v8123_v30 = vadd.f32 1.0, %v13669_v8  ;;  %13692 = vrcp.f32 %v8118_v16  ;;  %v7913_v8 = vmul.f32 1.442695, %v11945_v24  ;;  %v7927_v16 = vmul.f32 1.442695, %v11952_v22 }
 0xaa6   : > { %v13673_v18 = vpop.eup %13672  ;;  %v8483_v60 = vmul.f32 %v13671_v15, %v17890_v6  ;;  %v7929_v15 = vmul.f32 1.442695, %v11953_v23 }
 0xaa7   : > { %v13675_v34 = vpop.eup %13674  ;;  %13694 = vrcp.f32 %v8123_v30  ;;  %v18007_v0 = vmul.f32 %v13673_v18, %v17893_v9  ;;  %v7925_v9 = vmul.f32 1.442695, %v11951_v51  ;;  %v13313_v51 = vld [vmem:[%s15449_s22 + $0x114] ss:$8 sps:$4 sm:$0xff]  }
 0xaa8   : > { %v13677_v47 = vpop.eup %13676  ;;  %13696 = vpow2.f32 %v7895_v29 }
 0xaa9   : > { %v13679_v20 = vpop.eup %13678  ;;  %13698 = vpow2.f32 %v7893_v21  ;;  %20640 = vst [vmem:[#allocation49_spill] sm:$0xff] %v18007_v0  ;;  %v11958_v21 = vmul.f32 -1.702, %v17997_v61 }
 0xaaa   : > { %v13681_v12 = vpop.eup %13680  ;;  %v8491_v28 = vmul.f32 %v13679_v20, %v17904_v2  ;;  %13700 = vpow2.f32 %v7897_v58  ;;  %v11960_v20 = vmul.f32 -1.702, %v18000_v35 }
 0xaab   : > { %v13683_v29 = vpop.eup %13682  ;;  %v18010_v59 = vmul.f32 %v13681_v12, %v17907_v5  ;;  %13702 = vpow2.f32 %v7907_v46  ;;  %v8484_v5 = vmul.f32 %v13675_v34, %v17896_v39 }
 0xaac   : > { %v13685_v24 = vpop.eup %13684  ;;  %v8739_v44 = vpack.c.bf16 %v8491_v28, %v8483_v60  ;;  %v8492_v30 = vmul.f32 %v13683_v29, %v17912_v13  ;;  %13704 = vpow2.f32 %v7911_v31  ;;  %v7939_v13 = vmul.f32 1.442695, %v11958_v21  ;;  %v13308_v31 = vld [vmem:[%s15449_s22 + $0x100] ss:$8 sps:$4 sm:$0xff]   ;;  %v13311_v29 = vld [vmem:[%s15449_s22 + $0x110] ss:$8 sps:$4 sm:$0xff]  }
 0xaad   : > { %20641 = vst [vmem:[#allocation50_spill] sm:$0xff] %v18010_v59  ;;  %v13687_v6 = vpop.eup %13686  ;;  %13706 = vpow2.f32 %v7909_v14  ;;  %v7943_v58 = vmul.f32 1.442695, %v11960_v20  ;;  %v18026_v14 = vmul.f32 %v13685_v24, %v17915_v43  ;;  %v13316_v24 = vld [vmem:[%s15449_s22 + $0x124] ss:$8 sps:$4 sm:$0xff]  }
 0xaae   : > { %v18017_v12 = vpop.eup %13688  ;;  %13708 = vpow2.f32 %v7913_v8  ;;  %v8740_v46 = vpack.c.bf16 %v8492_v30, %v8484_v5  ;;  %v18030_v34 = vmul.f32 %v13687_v6, %v17923_v40  ;;  %v18046_v30 = vadd.f32 %v17969_v54, %v17884_v48 }
 0xaaf   : > { %v18020_v22 = vpop.eup %13690  ;;  %13710 = vpow2.f32 %v7923_v17  ;;  %20642 = vst [vmem:[#allocation83_spill] sm:$0xff] %v18026_v14 }
 0xab0   : > { %v18022_v18 = vpop.eup %13692  ;;  %13712 = vpow2.f32 %v7927_v16  ;;  %9487 = vmatprep.mubr.bf16.mxu1 %v8740_v46  ;;  %v18036_v16 = vmul.f32 %v13677_v47, %v17899_v56 }
 0xab1   : > { %v13695_v60 = vpop.eup %13694  ;;  %13714 = vpow2.f32 %v7925_v9  ;;  %9488 = vmatmul.mubr.bf16.vlgmr.msra.gmra.mrb[208].mxu1 %v8739_v44  ;;  %v18050_v9 = vadd.f32 %v17971_v3, %v17887_v38 }
 0xab2   : > { %v13697_v39 = vpop.eup %13696  ;;  %v18033_v8 = vmul.f32 %v13695_v60, %v17936_v26  ;;  %13716 = vpow2.f32 %v7929_v15  ;;  %20643 = vst [vmem:[#allocation84_spill] sm:$0xff] %v18036_v16  ;;  %9569 = vmatpush1.bf16.msra.mxu1 %v13308_v31  ;;  %v18059_v31 = vadd.f32 %v17980_v32, %v17881_v62  ;;  %v13319_v60 = vld [vmem:[%s15449_s22 + $0x134] ss:$8 sps:$4 sm:$0xff]   ;;  %v18070_v32 = vadd.f32 %v17985_v57, %v17887_v38 }
 0xab3   : > { %v13699_v17 = vpop.eup %13698  ;;  %v8125_v28 = vadd.f32 1.0, %v13697_v39  ;;  %13718 = vpow2.f32 %v7939_v13  ;;  %9570 = vmatprep.subr.bf16.mxu1 %v13313_v51  ;;  %v18054_v13 = vadd.f32 %v17976_v7, %v17878_v52  ;;  %v11959_v39 = vmul.f32 -1.702, %v18046_v30 }
 0xab4   : > { %v13701_v43 = vpop.eup %13700  ;;  %v8124_v23 = vadd.f32 1.0, %v13699_v17  ;;  %13720 = vpow2.f32 %v7943_v58  ;;  %v8747_v40 = vpack.c.bf16 %v18033_v8, %v18030_v34  ;;  %v13314_v58 = vld [vmem:[%s15449_s22 + $0x120] ss:$8 sps:$4 sm:$0xff]   ;;  %v18065_v7 = vadd.f32 %v17983_v37, %v17884_v48 }
 0xab5   : > { %v13703_v26 = vpop.eup %13702  ;;  %13722 = vrcp.f32 %v8125_v28  ;;  %v8126_v21 = vadd.f32 1.0, %v13701_v43  ;;  %v11961_v43 = vmul.f32 -1.702, %v18050_v9 }
 0xab6   : > { %v13705_v47 = vpop.eup %13704  ;;  %13724 = vrcp.f32 %v8124_v23  ;;  %v8131_v44 = vadd.f32 1.0, %v13703_v26  ;;  %9571 = vmatpush1.bf16.msra.mxu1 %v13311_v29  ;;  %v11966_v26 = vmul.f32 -1.702, %v18054_v13  ;;  %v11967_v57 = vmul.f32 -1.702, %v18065_v7 }
 0xab7   : > { %v13707_v20 = vpop.eup %13706  ;;  %13726 = vrcp.f32 %v8126_v21  ;;  %v8133_v6 = vadd.f32 1.0, %v13705_v47  ;;  %9572 = vmatprep.subr.bf16.mxu1 %v13316_v24  ;;  %v13317_v21 = vld [vmem:[%s15449_s22 + $0x130] ss:$8 sps:$4 sm:$0xff]   ;;  %v11968_v47 = vmul.f32 -1.702, %v18059_v31 }
 0xab8   : > { %v13709_v5 = vpop.eup %13708  ;;  %13728 = vrcp.f32 %v8131_v44  ;;  %v8132_v15 = vadd.f32 1.0, %v13707_v20  ;;  %v13322_v44 = vld [vmem:[%s15449_s22 + $0x144] ss:$8 sps:$4 sm:$0xff]  }
 0xab9   : > { %v13711_v46 = vpop.eup %13710  ;;  %13730 = vrcp.f32 %v8133_v6  ;;  %v8134_v54 = vadd.f32 1.0, %v13709_v5  ;;  %v7941_v6 = vmul.f32 1.442695, %v11959_v39 }
 0xaba   : > { %v13713_v3 = vpop.eup %13712  ;;  %13732 = vrcp.f32 %v8132_v15  ;;  %v8139_v51 = vadd.f32 1.0, %v13711_v46  ;;  %9573 = vmatpush1.bf16.msra.mxu1 %v13314_v58  ;;  %v7945_v15 = vmul.f32 1.442695, %v11961_v43  ;;  %v11969_v58 = vmul.f32 -1.702, %v18070_v32 }
 0xabb   : > { %v13715_v17 = vpop.eup %13714  ;;  %13734 = vrcp.f32 %v8134_v54  ;;  %v8141_v28 = vadd.f32 1.0, %v13713_v3  ;;  %9574 = vmatprep.subr.bf16.mxu1 %v13319_v60  ;;  %v18080_v54 = vmul.f32 %v18017_v12, %v17926_v63  ;;  %v7955_v60 = vmul.f32 1.442695, %v11966_v26  ;;  %v13325_v63 = vld [vmem:[%s15449_s22 + $0x154] ss:$8 sps:$4 sm:$0xff]  }
 0xabc   : > { %v13717_v23 = vpop.eup %13716  ;;  %13736 = vrcp.f32 %v8139_v51  ;;  %v8140_v29 = vadd.f32 1.0, %v13715_v17  ;;  %v13320_v51 = vld [vmem:[%s15449_s22 + $0x140] ss:$8 sps:$4 sm:$0xff]   ;;  %v8500_v17 = vmul.f32 %v18020_v22, %v17929_v1 }
 0xabd   : > { %v13719_v24 = vpop.eup %13718  ;;  %13738 = vrcp.f32 %v8141_v28  ;;  %v8142_v37 = vadd.f32 1.0, %v13717_v23  ;;  %20644 = vst [vmem:[#allocation85_spill] sm:$0xff] %v18080_v54  ;;  %v18090_v28 = vmul.f32 %v18022_v18, %v17932_v33  ;;  %v7959_v23 = vmul.f32 1.442695, %v11968_v47 }
 0xabe   : > { %v13721_v20 = vpop.eup %13720  ;;  %13740 = vrcp.f32 %v8140_v29  ;;  %9575 = vmatpush1.bf16.msra.mxu1 %v13317_v21  ;;  %v7957_v29 = vmul.f32 1.442695, %v11967_v57  ;;  %v7961_v33 = vmul.f32 1.442695, %v11969_v58 }
 0xabf   : > { %v13723_v5 = vpop.eup %13722  ;;  %13742 = vrcp.f32 %v8142_v37  ;;  %20646 = vst [vmem:[#allocation87_spill] sm:$0xff] %v18090_v28  ;;  %9576 = vmatprep.subr.bf16.mxu1 %v13322_v44 }
 0xac0   : > { %v13725_v46 = vpop.eup %13724  ;;  %v18083_v3 = vmul.f32 %v13723_v5, %v17943_v45  ;;  %13744 = vpow2.f32 %v7941_v6 }
 0xac1   : > { %v13727_v39 = vpop.eup %13726  ;;  %v8508_v43 = vmul.f32 %v13725_v46, %v17947_v10  ;;  %13746 = vpow2.f32 %v7945_v15  ;;  %v13323_v10 = vld [vmem:[%s15449_s22 + $0x150] ss:$8 sps:$4 sm:$0xff]   ;;  %v13326_v46 = vld [vmem:[%s15449_s22 + $0x160] ss:$8 sps:$4 sm:$0xff]  }
 0xac2   : > { %20645 = vst [vmem:[#allocation86_spill] sm:$0xff] %v18083_v3  ;;  %v13729_v12 = vpop.eup %13728  ;;  %v18095_v45 = vmul.f32 %v13727_v39, %v17950_v50  ;;  %13748 = vpow2.f32 %v7955_v60  ;;  %9577 = vmatpush1.bf16.msra.mxu1 %v13320_v51  ;;  %v13328_v50 = vld [vmem:[%s15449_s22 + $0x164] ss:$8 sps:$4 sm:$0xff]  }
 0xac3   : > { %v13731_v22 = vpop.eup %13730  ;;  %v8748_v18 = vpack.c.bf16 %v8508_v43, %v8500_v17  ;;  %13750 = vpow2.f32 %v7959_v23  ;;  %9578 = vmatprep.subr.bf16.mxu1 %v13325_v63  ;;  %v8515_v6 = vmul.f32 %v13729_v12, %v17954_v53 }
 0xac4   : > { %20647 = vst [vmem:[#allocation88_spill] sm:$0xff] %v18095_v45  ;;  %v13733_v26 = vpop.eup %13732  ;;  %13752 = vpow2.f32 %v7957_v29  ;;  %v18109_v15 = vmul.f32 %v13731_v22, %v17957_v36 }
 0xac5   : > { %v13735_v37 = vpop.eup %13734  ;;  %9497 = vmatprep.mubr.bf16.mxu1 %v8748_v18  ;;  %13754 = vpow2.f32 %v7961_v33  ;;  %v8516_v34 = vmul.f32 %v13733_v26, %v17961_v42  ;;  %v13329_v42 = vld [vmem:[%s15449_s22 + $0x170] ss:$8 sps:$4 sm:$0xff]  }
 0xac6   : > { %v13737_v47 = vpop.eup %13736  ;;  %9498 = vmatmul.mubr.bf16.gmra.mrb[212].mxu1 %v8747_v40  ;;  %20648 = vst [vmem:[#allocation89_spill] sm:$0xff] %v18109_v15  ;;  %v8147_v40 = vadd.f32 1.0, %v13719_v24  ;;  %v18119_v51 = vmul.f32 %v13735_v37, %v17964_v55  ;;  %v13334_v55 = vld [vmem:[%s15449_s22 + $0x184] ss:$8 sps:$4 sm:$0xff]   ;;  %v20668_v15 = vsub.s32 6, %v20637_v27 }
 0xac7   : > { %v13739_v44 = vpop.eup %13738  ;;  %v8523_v57 = vmul.f32 %v13737_v47, %v17967_v25  ;;  %9579 = vmatpush1.bf16.msra.mxu1 %v13323_v10  ;;  %v13331_v25 = vld [vmem:[%s15449_s22 + $0x174] ss:$8 sps:$4 sm:$0xff]   ;;  %v13332_v47 = vld [vmem:[%s15449_s22 + $0x180] ss:$8 sps:$4 sm:$0xff]  }
 0xac8   : > { %v13741_v5 = vpop.eup %13740  ;;  %v18112_v58 = vmul.f32 %v13739_v44, %v17974_v4  ;;  %9580 = vmatprep.subr.bf16.mxu1 %v13328_v50  ;;  %20650 = vst [vmem:[#allocation91_spill] sm:$0xff] %v18119_v51  ;;  %v8149_v4 = vadd.f32 1.0, %v13721_v20  ;;  %13756 = vrcp.f32 %v8147_v40 }
 0xac9   : > { %v13743_v60 = vpop.eup %13742  ;;  %v8524_v8 = vmul.f32 %v13741_v5, %v17991_v49  ;;  %v8755_v53 = vpack.c.bf16 %v8523_v57, %v8515_v6 }
 0xaca   : > { %20649 = vst [vmem:[#allocation90_spill] sm:$0xff] %v18112_v58  ;;  %v18122_v36 = vmul.f32 %v13743_v60, %v17994_v11  ;;  %v13745_v43 = vpop.eup %13744  ;;  %13758 = vrcp.f32 %v8149_v4  ;;  %v13335_v4 = vld [vmem:[%s15449_s22 + $0x190] ss:$8 sps:$4 sm:$0xff]  }
 0xacb   : > { %v8756_v17 = vpack.c.bf16 %v8524_v8, %v8516_v34  ;;  %9581 = vmatpush1.bf16.msra.mxu1 %v13326_v46  ;;  %v13747_v24 = vpop.eup %13746  ;;  %v8148_v23 = vadd.f32 1.0, %v13745_v43  ;;  %v13337_v34 = vld [vmem:[%s15449_s22 + $0x194] ss:$8 sps:$4 sm:$0xff]  }
 0xacc   : > { %20651 = vst [vmem:[#allocation92_spill] sm:$0xff] %v18122_v36  ;;  %9582 = vmatprep.subr.bf16.mxu1 %v13331_v25  ;;  %v13749_v63 = vpop.eup %13748  ;;  %v8150_v11 = vadd.f32 1.0, %v13747_v24 }
 0xacd   : > { %9507 = vmatprep.mubr.bf16.mxu1 %v8756_v17  ;;  %v13751_v20 = vpop.eup %13750  ;;  %13760 = vrcp.f32 %v8148_v23  ;;  %v8155_v12 = vadd.f32 1.0, %v13749_v63  ;;  %v7209_v29 = vpop.f32.mrb[160].mxu1 }
 0xace   : > { %9508 = vmatmul.mubr.bf16.gmra.mrb[216].mxu1 %v8755_v53  ;;  %v7322_v22 = vpop.f32.mrb[0].mxu0  ;;  %v13753_v33 = vpop.eup %13752  ;;  %13762 = vrcp.f32 %v8150_v11  ;;  %v8157_v18 = vadd.f32 1.0, %v13751_v20  ;;  %v18131_v26 = vadd.f32 %v7209_v29, %v17878_v52  ;;  %v13340_v11 = vld [vmem:[%s15449_s22 + $0x1a4] ss:$8 sps:$4 sm:$0xff]  }
 0xacf   : > { %v18134_v10 = vadd.f32 %v7322_v22, %v17881_v62  ;;  %v7211_v37 = vpop.f32.mrb[161].mxu1  ;;  %v7324_v50 = vpop.f32.mrb[1].mxu0  ;;  %9583 = vmatpush1.bf16.msra.mxu1 %v13329_v42  ;;  %13764 = vrcp.f32 %v8155_v12  ;;  %v8156_v6 = vadd.f32 1.0, %v13753_v33 }
 0xad0   : > { %v13755_v44 = vpop.eup %13754  ;;  %v18138_v57 = vadd.f32 %v7211_v37, %v17884_v48  ;;  %v18141_v5 = vadd.f32 %v7324_v50, %v17887_v38  ;;  %v7213_v46 = vpop.f32.mrb[162].mxu1  ;;  %9584 = vmatprep.subr.bf16.mxu1 %v13334_v55  ;;  %13766 = vrcp.f32 %v8157_v18  ;;  %v11974_v40 = vmul.f32 -1.702, %v18131_v26 }
 0xad1   : > { %v7326_v60 = vpop.f32.mrb[2].mxu0  ;;  %v8158_v8 = vadd.f32 1.0, %v13755_v44  ;;  %v11976_v53 = vmul.f32 -1.702, %v18134_v10  ;;  %v7215_v25 = vpop.f32.mrb[163].mxu1  ;;  %13768 = vrcp.f32 %v8156_v6  ;;  %v18150_v42 = vadd.f32 %v7213_v46, %v17878_v52 }
 0xad2   : > { %v11975_v17 = vmul.f32 -1.702, %v18138_v57  ;;  %v11977_v43 = vmul.f32 -1.702, %v18141_v5  ;;  %v7328_v24 = vpop.f32.mrb[3].mxu0  ;;  %v18153_v63 = vadd.f32 %v7326_v60, %v17881_v62  ;;  %v18158_v22 = vadd.f32 %v7215_v25, %v17884_v48  ;;  %v13757_v37 = vpop.eup %13756 }
 0xad3   : > { %13770 = vrcp.f32 %v8158_v8  ;;  %v7971_v23 = vmul.f32 1.442695, %v11974_v40  ;;  %v7975_v55 = vmul.f32 1.442695, %v11976_v53  ;;  %9585 = vmatpush1.bf16.msra.mxu1 %v13332_v47  ;;  %v11982_v29 = vmul.f32 -1.702, %v18150_v42 }
 0xad4   : > { %v7973_v20 = vmul.f32 1.442695, %v11975_v17  ;;  %v7977_v12 = vmul.f32 1.442695, %v11977_v43  ;;  %9586 = vmatprep.subr.bf16.mxu1 %v13337_v34  ;;  %v11984_v33 = vmul.f32 -1.702, %v18153_v63  ;;  %v18162_v18 = vadd.f32 %v7328_v24, %v17887_v38  ;;  %v13759_v44 = vpop.eup %13758 }
 0xad5   : > { %13772 = vpow2.f32 %v7971_v23  ;;  %v7987_v50 = vmul.f32 1.442695, %v11982_v29  ;;  %v11983_v47 = vmul.f32 -1.702, %v18158_v22  ;;  %v13338_v60 = vld [vmem:[%s15449_s22 + $0x1a0] ss:$8 sps:$4 sm:$0xff]   ;;  %v8531_v24 = vmul.f32 %v13757_v37, %v17997_v61 }
 0xad6   : > { %13774 = vpow2.f32 %v7975_v55  ;;  %v7991_v6 = vmul.f32 1.442695, %v11984_v33  ;;  %v11985_v46 = vmul.f32 -1.702, %v18162_v18  ;;  %v13343_v40 = vld [vmem:[%s15449_s22 + $0x1b4] ss:$8 sps:$4 sm:$0xff]  }
 0xad7   : > { %13776 = vpow2.f32 %v7973_v20  ;;  %9587 = vmatpush1.bf16.msra.mxu1 %v13335_v4  ;;  %v13761_v34 = vpop.eup %13760  ;;  %v7989_v8 = vmul.f32 1.442695, %v11983_v47  ;;  %v13341_v4 = vld [vmem:[%s15449_s22 + $0x1b0] ss:$8 sps:$4 sm:$0xff]   ;;  %v18172_v20 = vmul.f32 %v13759_v44, %v18000_v35 }
 0xad8   : > { %13778 = vpow2.f32 %v7977_v12  ;;  %9588 = vmatprep.subr.bf16.mxu1 %v13340_v11  ;;  %v13763_v53 = vpop.eup %13762  ;;  %v7993_v25 = vmul.f32 1.442695, %v11985_v46  ;;  %v13346_v12 = vld [vmem:[%s15449_s22 + $0x1c4] ss:$8 sps:$4 sm:$0xff]   ;;  %v8532_v33 = vmul.f32 %v13761_v34, %v18046_v30 }
 0xad9   : > { %13780 = vpow2.f32 %v7987_v50  ;;  %v13765_v17 = vpop.eup %13764  ;;  %20652 = vst [vmem:[#allocation93_spill] sm:$0xff] %v18172_v20  ;;  %v18181_v37 = vmul.f32 %v13763_v53, %v18050_v9 }
 0xada   : > { %13782 = vpow2.f32 %v7991_v6  ;;  %v13767_v43 = vpop.eup %13766  ;;  %v8539_v23 = vmul.f32 %v13765_v17, %v18054_v13  ;;  %v13349_v17 = vld [vmem:[%s15449_s22 + $0x1d4] ss:$8 sps:$4 sm:$0xff]  }
 0xadb   : > { %13784 = vpow2.f32 %v7989_v8  ;;  %9589 = vmatpush1.bf16.msra.mxu1 %v13338_v60  ;;  %v13769_v55 = vpop.eup %13768  ;;  %v18175_v11 = vmul.f32 %v13767_v43, %v18059_v31  ;;  %20654 = vst [vmem:[#allocation95_spill] sm:$0xff] %v18181_v37  ;;  %v13344_v60 = vld [vmem:[%s15449_s22 + $0x1c0] ss:$8 sps:$4 sm:$0xff]  }
 0xadc   : > { %13786 = vpow2.f32 %v7993_v25  ;;  %9590 = vmatprep.subr.bf16.mxu1 %v13343_v40  ;;  %v8540_v61 = vmul.f32 %v13769_v55, %v18065_v7  ;;  %v8763_v13 = vpack.c.bf16 %v8539_v23, %v8531_v24 }
 0xadd   : > { %20653 = vst [vmem:[#allocation94_spill] sm:$0xff] %v18175_v11  ;;  %v13771_v29 = vpop.eup %13770  ;;  %v7219_v35 = vpop.f32.mrb[164].mxu1 }
 0xade   : > { %v18184_v50 = vmul.f32 %v13771_v29, %v18070_v32  ;;  %v7332_v47 = vpop.f32.mrb[4].mxu0  ;;  %v8764_v6 = vpack.c.bf16 %v8540_v61, %v8532_v33  ;;  %v18189_v46 = vadd.f32 %v7219_v35, %v17878_v52  ;;  %v7221_v7 = vpop.f32.mrb[165].mxu1 }
 0xadf   : > { %v13773_v44 = vpop.eup %13772  ;;  %v18192_v30 = vadd.f32 %v7332_v47, %v17881_v62  ;;  %v7334_v9 = vpop.f32.mrb[5].mxu0  ;;  %9591 = vmatpush1.bf16.msra.mxu1 %v13341_v4  ;;  %v18196_v8 = vadd.f32 %v7221_v7, %v17884_v48  ;;  %v13347_v47 = vld [vmem:[%s15449_s22 + $0x1d0] ss:$8 sps:$4 sm:$0xff]  }
 0xae0   : > { %20655 = vst [vmem:[#allocation96_spill] sm:$0xff] %v18184_v50  ;;  %v13775_v32 = vpop.eup %13774  ;;  %v8163_v34 = vadd.f32 1.0, %v13773_v44  ;;  %v18199_v40 = vadd.f32 %v7334_v9, %v17887_v38  ;;  %v7223_v53 = vpop.f32.mrb[166].mxu1  ;;  %9592 = vmatprep.subr.bf16.mxu1 %v13346_v12  ;;  %9517 = vmatprep.mubr.bf16.mxu1 %v8764_v6  ;;  %v11990_v4 = vmul.f32 -1.702, %v18189_v46 }
 0xae1   : > { %v7336_v25 = vpop.f32.mrb[6].mxu0  ;;  %v13777_v24 = vpop.eup %13776  ;;  %v8165_v23 = vadd.f32 1.0, %v13775_v32  ;;  %v18206_v55 = vadd.f32 %v7223_v53, %v17878_v52  ;;  %9518 = vmatmul.mubr.bf16.gmra.mrb[220].mxu1 %v8763_v13  ;;  %v13352_v12 = vld [vmem:[%s15449_s22 + $0x1e4] ss:$8 sps:$4 sm:$0xff]   ;;  %v11992_v9 = vmul.f32 -1.702, %v18192_v30 }
 0xae2   : > { %v7225_v29 = vpop.f32.mrb[167].mxu1  ;;  %v13779_v33 = vpop.eup %13778  ;;  %13788 = vrcp.f32 %v8163_v34  ;;  %v8164_v61 = vadd.f32 1.0, %v13777_v24  ;;  %v11991_v6 = vmul.f32 -1.702, %v18196_v8  ;;  %v8003_v31 = vmul.f32 1.442695, %v11990_v4 }
 0xae3   : > { %v7338_v35 = vpop.f32.mrb[7].mxu0  ;;  %v13781_v44 = vpop.eup %13780  ;;  %13790 = vrcp.f32 %v8165_v23  ;;  %v8166_v7 = vadd.f32 1.0, %v13779_v33  ;;  %9593 = vmatpush1.bf16.msra.mxu1 %v13344_v60  ;;  %v11993_v13 = vmul.f32 -1.702, %v18199_v40  ;;  %v11998_v43 = vmul.f32 -1.702, %v18206_v55 }
 0xae4   : > { %v13783_v32 = vpop.eup %13782  ;;  %13792 = vrcp.f32 %v8164_v61  ;;  %v8171_v53 = vadd.f32 1.0, %v13781_v44  ;;  %9594 = vmatprep.subr.bf16.mxu1 %v13349_v17  ;;  %v18215_v23 = vadd.f32 %v7336_v25, %v17881_v62  ;;  %v18218_v39 = vadd.f32 %v7225_v29, %v17884_v48  ;;  %v13350_v61 = vld [vmem:[%s15449_s22 + $0x1e0] ss:$8 sps:$4 sm:$0xff]  }
 0xae5   : > { %v13785_v34 = vpop.eup %13784  ;;  %13794 = vrcp.f32 %v8166_v7  ;;  %v8173_v24 = vadd.f32 1.0, %v13783_v32  ;;  %v18221_v4 = vadd.f32 %v7338_v35, %v17887_v38  ;;  %v8007_v44 = vmul.f32 1.442695, %v11992_v9  ;;  %v13353_v9 = vld [vmem:[%s15449_s22 + $0x1f0] ss:$8 sps:$4 sm:$0xff]  }
 0xae6   : > { %v13787_v33 = vpop.eup %13786  ;;  %13796 = vrcp.f32 %v8171_v53  ;;  %v8172_v60 = vadd.f32 1.0, %v13785_v34  ;;  %v12000_v7 = vmul.f32 -1.702, %v18215_v23  ;;  %v8005_v25 = vmul.f32 1.442695, %v11991_v6 }
 0xae7   : > { %13798 = vrcp.f32 %v8173_v24  ;;  %v8174_v17 = vadd.f32 1.0, %v13787_v33  ;;  %9595 = vmatpush1.bf16.msra.mxu1 %v13347_v47  ;;  %v11999_v32 = vmul.f32 -1.702, %v18218_v39  ;;  %v13355_v53 = vld [vmem:[%s15449_s22 + $0x1f4] ss:$8 sps:$4 sm:$0xff]  }
 0xae8   : > { %13800 = vrcp.f32 %v8172_v60  ;;  %9596 = vmatprep.subr.bf16.mxu1 %v13352_v12  ;;  %v8009_v29 = vmul.f32 1.442695, %v11993_v13  ;;  %v12001_v35 = vmul.f32 -1.702, %v18221_v4  ;;  %v8019_v34 = vmul.f32 1.442695, %v11998_v43 }
 0xae9   : > { %13802 = vrcp.f32 %v8174_v17  ;;  %v8023_v24 = vmul.f32 1.442695, %v12000_v7  ;;  %v8021_v47 = vmul.f32 1.442695, %v11999_v32  ;;  %v13358_v6 = vld [vmem:[%s15449_s22 + $0x204] ss:$8 sps:$4 sm:$0xff]  }
 0xaea   : > { %13804 = vpow2.f32 %v8003_v31  ;;  %v8025_v49 = vmul.f32 1.442695, %v12001_v35 }
 0xaeb   : > { %13806 = vpow2.f32 %v8007_v44  ;;  %9597 = vmatpush1.bf16.msra.mxu1 %v13350_v61 }
 0xaec   : > { %v13789_v33 = vpop.eup %13788  ;;  %13808 = vpow2.f32 %v8005_v25  ;;  %9598 = vmatprep.subr.bf16.mxu1 %v13355_v53 }
 0xaed   : > { %v13791_v60 = vpop.eup %13790  ;;  %13810 = vpow2.f32 %v8009_v29  ;;  %v7229_v17 = vpop.f32.mrb[168].mxu1 }
 0xaee   : > { %v13793_v12 = vpop.eup %13792  ;;  %13812 = vpow2.f32 %v8019_v34  ;;  %v7342_v13 = vpop.f32.mrb[8].mxu0  ;;  %v18231_v31 = vadd.f32 %v7229_v17, %v17878_v52 }
 0xaef   : > { %v13795_v1 = vpop.eup %13794  ;;  %13814 = vpow2.f32 %v8023_v24  ;;  %v18234_v43 = vadd.f32 %v7342_v13, %v17881_v62  ;;  %v7231_v61 = vpop.f32.mrb[169].mxu1  ;;  %9599 = vmatpush1.bf16.msra.mxu1 %v13353_v9  ;;  %v8548_v21 = vmul.f32 %v13793_v12, %v18138_v57 }
 0xaf0   : > { %v7344_v44 = vpop.f32.mrb[9].mxu0  ;;  %v13797_v7 = vpop.eup %13796  ;;  %13816 = vpow2.f32 %v8021_v47  ;;  %v18237_v25 = vadd.f32 %v7231_v61, %v17884_v48  ;;  %9681 = vmatprep.subr.bf16.mxu1 %v13358_v6  ;;  %v12006_v35 = vmul.f32 -1.702, %v18231_v31  ;;  %v8547_v47 = vmul.f32 %v13789_v33, %v18131_v26 }
 0xaf1   : > { %v7233_v32 = vpop.f32.mrb[170].mxu1  ;;  %v7346_v53 = vpop.f32.mrb[10].mxu0  ;;  %13818 = vpow2.f32 %v8025_v49  ;;  %v12008_v34 = vmul.f32 -1.702, %v18234_v43  ;;  %v18242_v24 = vadd.f32 %v7344_v44, %v17887_v38  ;;  %v18246_v61 = vmul.f32 %v13791_v60, %v18134_v10 }
 0xaf2   : > { %v13799_v29 = vpop.eup %13798  ;;  %v7235_v17 = vpop.f32.mrb[171].mxu1  ;;  %v18250_v49 = vmul.f32 %v13795_v1, %v18141_v5  ;;  %v8035_v2 = vmul.f32 1.442695, %v12006_v35  ;;  %v12007_v19 = vmul.f32 -1.702, %v18237_v25  ;;  %v8555_v41 = vmul.f32 %v13797_v7, %v18150_v42 }
 0xaf3   : > { %v7348_v13 = vpop.f32.mrb[11].mxu0  ;;  %v13801_v9 = vpop.eup %13800  ;;  %20656 = vst [vmem:[#allocation97_spill] sm:$0xff] %v18246_v61  ;;  %v8039_v56 = vmul.f32 1.442695, %v12008_v34  ;;  %v18255_v20 = vmul.f32 %v13799_v29, %v18153_v63  ;;  %v18259_v10 = vadd.f32 %v7233_v32, %v17878_v52  ;;  %v12009_v1 = vmul.f32 -1.702, %v18242_v24 }
 0xaf4   : > { %v13803_v6 = vpop.eup %13802  ;;  %20657 = vst [vmem:[#allocation98_spill] sm:$0xff] %v18250_v49  ;;  %v8556_v26 = vmul.f32 %v13801_v9, %v18158_v22  ;;  %13820 = vpow2.f32 %v8035_v2  ;;  %v18263_v5 = vadd.f32 %v7346_v53, %v17881_v62  ;;  %v18269_v63 = vadd.f32 %v7235_v17, %v17884_v48 }
 0xaf5   : > { %v13805_v44 = vpop.eup %13804  ;;  %20658 = vst [vmem:[#allocation99_spill] sm:$0xff] %v18255_v20  ;;  %v18266_v12 = vmul.f32 %v13803_v6, %v18162_v18  ;;  %13822 = vpow2.f32 %v8039_v56  ;;  %v8037_v32 = vmul.f32 1.442695, %v12007_v19  ;;  %v18272_v2 = vadd.f32 %v7348_v13, %v17887_v38 }
 0xaf6   : > { %v13807_v57 = vpop.eup %13806  ;;  %v8179_v33 = vadd.f32 1.0, %v13805_v44  ;;  %v12014_v35 = vmul.f32 -1.702, %v18259_v10  ;;  %v8772_v34 = vpack.c.bf16 %v8556_v26, %v8548_v21  ;;  %v12016_v56 = vmul.f32 -1.702, %v18263_v5 }
 0xaf7   : > { %v13809_v60 = vpop.eup %13808  ;;  %20659 = vst [vmem:[#allocation100_spill] sm:$0xff] %v18266_v12  ;;  %v8181_v42 = vadd.f32 1.0, %v13807_v57  ;;  %20660 = vst [vmem:[#allocation101_spill] sm:$0xff] %v18272_v2  ;;  %v8771_v17 = vpack.c.bf16 %v8555_v41, %v8547_v47  ;;  %v12015_v19 = vmul.f32 -1.702, %v18269_v63 }
 0xaf8   : > { %v13811_v22 = vpop.eup %13810  ;;  %13824 = vrcp.f32 %v8179_v33  ;;  %v8180_v7 = vadd.f32 1.0, %v13809_v60  ;;  %9527 = vmatprep.mubr.bf16.mxu1 %v8772_v34  ;;  %v12017_v21 = vmul.f32 -1.702, %v18272_v2  ;;  %v8041_v47 = vmul.f32 1.442695, %v12009_v1 }
 0xaf9   : > { %v13813_v29 = vpop.eup %13812  ;;  %13826 = vrcp.f32 %v8181_v42  ;;  %v8182_v53 = vadd.f32 1.0, %v13811_v22  ;;  %9528 = vmatmul.mubr.bf16.gmra.mrb[224].mxu1 %v8771_v17  ;;  %v8051_v60 = vmul.f32 1.442695, %v12014_v35  ;;  %v8055_v42 = vmul.f32 1.442695, %v12016_v56 }
 0xafa   : > { %v13815_v18 = vpop.eup %13814  ;;  %13828 = vrcp.f32 %v8180_v7  ;;  %v8187_v9 = vadd.f32 1.0, %v13813_v29  ;;  %v8053_v7 = vmul.f32 1.442695, %v12015_v19  ;;  %v8057_v29 = vmul.f32 1.442695, %v12017_v21 }
 0xafb   : > { %v13817_v6 = vpop.eup %13816  ;;  %13830 = vrcp.f32 %v8182_v53  ;;  %v8189_v44 = vadd.f32 1.0, %v13815_v18 }
 0xafc   : > { %v13819_v57 = vpop.eup %13818  ;;  %13832 = vrcp.f32 %v8187_v9  ;;  %v8188_v33 = vadd.f32 1.0, %v13817_v6 }
 0xafd   : > { %13834 = vrcp.f32 %v8189_v44  ;;  %v8190_v41 = vadd.f32 1.0, %v13819_v57 }
 0xafe   : > { %13836 = vrcp.f32 %v8188_v33  ;;  %v13821_v22 = vpop.eup %13820  ;;  %v7239_v53 = vpop.f32.mrb[172].mxu1 }
 0xaff   : > { %13838 = vrcp.f32 %v8190_v41  ;;  %v7352_v34 = vpop.f32.mrb[12].mxu0  ;;  %v13823_v18 = vpop.eup %13822  ;;  %v8195_v9 = vadd.f32 1.0, %v13821_v22  ;;  %v18283_v17 = vadd.f32 %v7239_v53, %v17878_v52 }
 0xb00   : > { %13840 = vpow2.f32 %v8037_v32  ;;  %v18286_v6 = vadd.f32 %v7352_v34, %v17881_v62  ;;  %v7241_v1 = vpop.f32.mrb[173].mxu1  ;;  %v7354_v44 = vpop.f32.mrb[13].mxu0  ;;  %v8197_v57 = vadd.f32 1.0, %v13823_v18 }
 0xb01   : > { %13842 = vpow2.f32 %v8041_v47  ;;  %20661 = vst [vmem:[#allocation102_spill] sm:$0xff] %v18283_v17  ;;  %v18289_v32 = vadd.f32 %v7241_v1, %v17884_v48  ;;  %v18292_v56 = vadd.f32 %v7354_v44, %v17887_v38  ;;  %v7243_v19 = vpop.f32.mrb[174].mxu1  ;;  %v7356_v33 = vpop.f32.mrb[14].mxu0  ;;  %v12022_v41 = vmul.f32 -1.702, %v18283_v17 }
 0xb02   : > { %20662 = vst [vmem:[#allocation103_spill] sm:$0xff] %v18286_v6  ;;  %v13825_v35 = vpop.eup %13824  ;;  %13844 = vpow2.f32 %v8051_v60  ;;  %v12024_v47 = vmul.f32 -1.702, %v18286_v6  ;;  %v7245_v22 = vpop.f32.mrb[175].mxu1  ;;  %v18305_v49 = vadd.f32 %v7243_v19, %v17878_v52 }
 0xb03   : > { %20663 = vst [vmem:[#allocation104_spill] sm:$0xff] %v18289_v32  ;;  %20664 = vst [vmem:[#allocation105_spill] sm:$0xff] %v18292_v56  ;;  %v18294_v21 = vpop.eup %13826  ;;  %13846 = vrcp.f32 %v8195_v9  ;;  %v7358_v53 = vpop.f32.mrb[15].mxu0  ;;  %v12023_v60 = vmul.f32 -1.702, %v18289_v32 }
 0xb04   : > { %v13829_v34 = vpop.eup %13828  ;;  %13848 = vrcp.f32 %v8197_v57  ;;  %v12025_v18 = vmul.f32 -1.702, %v18292_v56  ;;  %v8067_v44 = vmul.f32 1.442695, %v12022_v41  ;;  %v8071_v26 = vmul.f32 1.442695, %v12024_v47 }
 0xb05   : > { %v18300_v1 = vpop.eup %13830  ;;  %13850 = vpow2.f32 %v8055_v42  ;;  %v8069_v9 = vmul.f32 1.442695, %v12023_v60  ;;  %20665 = vst [vmem:[#allocation106_spill] sm:$0xff] %v18305_v49  ;;  %v18308_v57 = vadd.f32 %v7356_v33, %v17881_v62  ;;  %v8564_v33 = vmul.f32 %v13829_v34, %v18196_v8 }
 0xb06   : > { %v13833_v13 = vpop.eup %13832  ;;  %13852 = vpow2.f32 %v8053_v7  ;;  %v8073_v20 = vmul.f32 1.442695, %v12025_v18  ;;  %v7395_v42 = vpop.f32.mrb[176].mxu1  ;;  %v20667_v18 = vld [vmem:[#allocation45_spill] sm:$0xff] }
 0xb07   : > { %v18302_v61 = vpop.eup %13834  ;;  %13854 = vpow2.f32 %v8057_v29  ;;  %20666 = vst [vmem:[#allocation107_spill] sm:$0xff] %v18308_v57  ;;  %v8571_v11 = vmul.f32 %v13833_v13, %v18206_v55  ;;  %v7508_v41 = vpop.f32.mrb[16].mxu0  ;;  %v12030_v29 = vmul.f32 -1.702, %v18305_v49  ;;  %v12032_v52 = vmul.f32 -1.702, %v18308_v57 }
 0xb08   : > { %v13837_v12 = vpop.eup %13836  ;;  %13856 = vpow2.f32 %v8067_v44  ;;  %v7397_v19 = vpop.f32.mrb[177].mxu1  ;;  %v18318_v55 = vadd.f32 %v7245_v22, %v17884_v48  ;;  %v14189_v13 = vld [vmem:[%s15443_s7] sm:$0xff] }
 0xb09   : > { %v18311_v47 = vpop.eup %13838  ;;  %v8572_v7 = vmul.f32 %v13837_v12, %v18218_v39  ;;  %13858 = vpow2.f32 %v8071_v26  ;;  %v7510_v60 = vpop.f32.mrb[17].mxu0  ;;  %v18322_v44 = vrot.slane %v14189_v13, %v20667_v18  ;;  %v8563_v26 = vmul.f32 %v13825_v35, %v18189_v46 }
 0xb0a   : > { %v13841_v62 = vpop.eup %13840  ;;  %13860 = vpow2.f32 %v8069_v9  ;;  %v7399_v37 = vpop.f32.mrb[178].mxu1  ;;  %v18329_v58 = vrot.slane %v14189_v13, %v20668_v15  ;;  %v8083_v34 = vmul.f32 1.442695, %v12030_v29  ;;  %v18334_v9 = vadd.f32 %v7358_v53, %v17887_v38 }
 0xb0b   : > { %v18324_v39 = vpop.f32.mrb[18].mxu0  ;;  %v13843_v12 = vpop.eup %13842  ;;  %v8196_v50 = vadd.f32 1.0, %v13841_v62  ;;  %13862 = vpow2.f32 %v8073_v20  ;;  %v8780_v18 = vpack.c.bf16 %v8572_v7, %v8564_v33  ;;  %v8087_v20 = vmul.f32 1.442695, %v12032_v52 }
 0xb0c   : > { %v18331_v8 = vpop.f32.mrb[179].mxu1  ;;  %v13845_v48 = vpop.eup %13844  ;;  %v8198_v22 = vadd.f32 1.0, %v13843_v12  ;;  %20669 = vst [vmem:[#allocation45_spill] sm:$0xff] %v18334_v9  ;;  %v8779_v35 = vpack.c.bf16 %v8571_v11, %v8563_v26  ;;  %v12031_v15 = vmul.f32 -1.702, %v18318_v55  ;;  %v20670_v12 = vld [vmem:[#allocation47_spill] sm:$0xff]  ;;  %v18347_v53 = vadd.f32 %v7395_v42, %v18322_v44 }
 0xb0d   : > { %v18336_v51 = vpop.f32.mrb[19].mxu0  ;;  %v18338_v36 = vpop.eup %13846  ;;  %13864 = vrcp.f32 %v8196_v50  ;;  %v8203_v46 = vadd.f32 1.0, %v13845_v48  ;;  %9537 = vmatprep.mubr.bf16.mxu1 %v8780_v18  ;;  %v18344_v29 = vrot.slane %v14189_v13, %v20670_v12  ;;  %v18350_v11 = vadd.f32 %v7508_v41, %v18329_v58 }
 0xb0e   : > { %v18340_v62 = vpop.eup %13848  ;;  %13866 = vrcp.f32 %v8198_v22  ;;  %9538 = vmatmul.mubr.bf16.gmra.mrb[228].mxu1 %v8779_v35  ;;  %v20671_v52 = vsub.s32 7, %v20637_v27  ;;  %v7405_v26 = vpop.f32.mrb[180].mxu1  ;;  %v12033_v18 = vmul.f32 -1.702, %v18334_v9  ;;  %v8085_v12 = vmul.f32 1.442695, %v12031_v15 }
 0xb0f   : > { %v13851_v38 = vpop.eup %13850  ;;  %13868 = vrcp.f32 %v8203_v46  ;;  %v18357_v46 = vpop.f32.mrb[20].mxu0  ;;  %v18378_v28 = vadd.f32 %v7399_v37, %v18322_v44 }
 0xb10   : > { %v13853_v7 = vpop.eup %13852  ;;  %v8205_v50 = vadd.f32 1.0, %v13851_v38  ;;  %13870 = vpow2.f32 %v8083_v34  ;;  %v18354_v33 = vrot.slane %v14189_v13, %v20671_v52  ;;  %v18360_v34 = vadd.f32 %v7397_v19, %v18344_v29  ;;  %v18362_v41 = vpop.f32.mrb[181].mxu1 }
 0xb11   : > { %v13855_v48 = vpop.eup %13854  ;;  %v8204_v22 = vadd.f32 1.0, %v13853_v7  ;;  %13872 = vpow2.f32 %v8087_v20  ;;  %v11914_v38 = vmul.f32 -1.702, %v18347_v53  ;;  %v18365_v7 = vpop.f32.mrb[21].mxu0  ;;  %v8089_v3 = vmul.f32 1.442695, %v12033_v18 }
 0xb12   : > { %v13857_v42 = vpop.eup %13856  ;;  %13874 = vrcp.f32 %v8205_v50  ;;  %v8206_v35 = vadd.f32 1.0, %v13855_v48  ;;  %20672 = vst [vmem:[#allocation47_spill] sm:$0xff] %v18360_v34  ;;  %v18367_v20 = vpop.f32.mrb[182].mxu1  ;;  %v11916_v50 = vmul.f32 -1.702, %v18350_v11  ;;  %v18371_v15 = vadd.f32 %v7510_v60, %v18354_v33 }
 0xb13   : > { %v13859_v27 = vpop.eup %13858  ;;  %13876 = vrcp.f32 %v8204_v22  ;;  %v8211_v13 = vadd.f32 1.0, %v13857_v42  ;;  %v18373_v19 = vpop.f32.mrb[22].mxu0  ;;  %v18385_v60 = vadd.f32 %v18324_v39, %v18329_v58  ;;  %v7851_v59 = vmul.f32 1.442695, %v11914_v38 }
 0xb14   : > { %v13861_v52 = vpop.eup %13860  ;;  %13878 = vrcp.f32 %v8206_v35  ;;  %v8213_v54 = vadd.f32 1.0, %v13859_v27  ;;  %20673 = vst [vmem:[#allocation108_spill] sm:$0xff] %v18371_v15  ;;  %v18375_v48 = vpop.f32.mrb[183].mxu1  ;;  %v11915_v27 = vmul.f32 -1.702, %v18360_v34 }
 0xb15   : > { %v13863_v22 = vpop.eup %13862  ;;  %13880 = vrcp.f32 %v8211_v13  ;;  %v8212_v42 = vadd.f32 1.0, %v13861_v52  ;;  %v18380_v45 = vpop.f32.mrb[23].mxu0  ;;  %20674 = vst [vmem:[#allocation109_spill] sm:$0xff] %v18385_v60  ;;  %v18389_v13 = vadd.f32 %v18331_v8, %v18344_v29  ;;  %v7855_v37 = vmul.f32 1.442695, %v11916_v50 }
 0xb16   : > { %13882 = vrcp.f32 %v8213_v54  ;;  %v8214_v35 = vadd.f32 1.0, %v13863_v22  ;;  %v11917_v54 = vmul.f32 -1.702, %v18371_v15  ;;  %v18396_v52 = vadd.f32 %v18336_v51, %v18354_v33  ;;  %v18398_v22 = vpop.f32.mrb[184].mxu1  ;;  %v18400_v39 = vpop.f32.mrb[24].mxu0 }
 0xb17   : > { %v13865_v0 = vpop.eup %13864  ;;  %13884 = vrcp.f32 %v8212_v42  ;;  %20675 = vst [vmem:[#allocation110_spill] sm:$0xff] %v18389_v13  ;;  %v11922_v38 = vmul.f32 -1.702, %v18378_v28  ;;  %v18404_v8 = vadd.f32 %v7405_v26, %v18322_v44  ;;  %v18406_v34 = vpop.f32.mrb[185].mxu1  ;;  %v7853_v15 = vmul.f32 1.442695, %v11915_v27 }
 0xb18   : > { %v18391_v18 = vpop.eup %13866  ;;  %13886 = vrcp.f32 %v8214_v35  ;;  %20676 = vst [vmem:[#allocation111_spill] sm:$0xff] %v18396_v52  ;;  %v18408_v50 = vpop.f32.mrb[25].mxu0  ;;  %v11924_v51 = vmul.f32 -1.702, %v18385_v60  ;;  %v11923_v14 = vmul.f32 -1.702, %v18389_v13  ;;  %v18428_v13 = vadd.f32 %v18357_v46, %v18329_v58 }
 0xb19   : > { %v13869_v42 = vpop.eup %13868  ;;  %13888 = vpow2.f32 %v8085_v12  ;;  %20677 = vst [vmem:[#allocation112_spill] sm:$0xff] %v18404_v8  ;;  %v18411_v9 = vpop.f32.mrb[186].mxu1  ;;  %v11925_v27 = vmul.f32 -1.702, %v18396_v52  ;;  %v7867_v32 = vmul.f32 1.442695, %v11922_v38 }
 0xb1a   : > { %v13871_v35 = vpop.eup %13870  ;;  %13890 = vpow2.f32 %v8089_v3  ;;  %v18413_v57 = vpop.f32.mrb[26].mxu0  ;;  %v7857_v3 = vmul.f32 1.442695, %v11917_v54  ;;  %v11930_v49 = vmul.f32 -1.702, %v18404_v8  ;;  %20678 = vst [vmem:[#allocation113_spill] sm:$0xff] %v18428_v13  ;;  %v18435_v54 = vadd.f32 %v18362_v41, %v18344_v29 }
 0xb1b   : > { %v13873_v16 = vpop.eup %13872  ;;  %v8219_v12 = vadd.f32 1.0, %v13871_v35  ;;  %13892 = vpow2.f32 %v7851_v59  ;;  %v18416_v26 = vpop.f32.mrb[187].mxu1  ;;  %v7871_v59 = vmul.f32 1.442695, %v11924_v51  ;;  %v8580_v8 = vmul.f32 %v13865_v0, %v18237_v25 }
 0xb1c   : > { %v18418_v56 = vpop.f32.mrb[27].mxu0  ;;  %v18420_v6 = vpop.eup %13874  ;;  %v8221_v2 = vadd.f32 1.0, %v13873_v16  ;;  %13894 = vpow2.f32 %v7855_v37  ;;  %v7869_v37 = vmul.f32 1.442695, %v11923_v14  ;;  %20679 = vst [vmem:[#allocation114_spill] sm:$0xff] %v18435_v54 }
 0xb1d   : > { %v13877_v17 = vpop.eup %13876  ;;  %13896 = vrcp.f32 %v8219_v12  ;;  %v7873_v12 = vmul.f32 1.442695, %v11925_v27  ;;  %v7883_v14 = vmul.f32 1.442695, %v11930_v49  ;;  %v11932_v27 = vmul.f32 -1.702, %v18428_v13 }
 0xb1e   : > { %v18424_v35 = vpop.eup %13878  ;;  %13898 = vrcp.f32 %v8221_v2  ;;  %v8588_v16 = vmul.f32 %v13877_v17, %v18269_v63  ;;  %v18439_v2 = vpop.f32.mrb[188].mxu1  ;;  %v8587_v63 = vmul.f32 %v13869_v42, %v18259_v10  ;;  %v11931_v25 = vmul.f32 -1.702, %v18435_v54 }
 0xb1f   : > { %v18430_v60 = vpop.eup %13880  ;;  %13900 = vpow2.f32 %v7853_v15  ;;  %v18441_v51 = vpop.f32.mrb[28].mxu0  ;;  %v18463_v49 = vadd.f32 %v18365_v7, %v18354_v33 }
 0xb20   : > { %v18437_v38 = vpop.eup %13882  ;;  %13902 = vpow2.f32 %v7857_v3  ;;  %v18447_v17 = vpop.f32.mrb[189].mxu1  ;;  %v8579_v3 = vmul.f32 %v18338_v36, %v18231_v31  ;;  %v8788_v10 = vpack.c.bf16 %v8588_v16, %v8580_v8  ;;  %v7885_v8 = vmul.f32 1.442695, %v11931_v25 }
 0xb21   : > { %20680 = vst [vmem:[#allocation115_spill] sm:$0xff] %v18437_v38  ;;  %v18443_v46 = vpop.eup %13884  ;;  %13904 = vpow2.f32 %v7867_v32  ;;  %v18449_v41 = vpop.f32.mrb[29].mxu0  ;;  %v11933_v16 = vmul.f32 -1.702, %v18463_v49 }
 0xb22   : > { %v18451_v15 = vpop.eup %13886  ;;  %13906 = vpow2.f32 %v7871_v59  ;;  %v18456_v52 = vpop.f32.mrb[190].mxu1  ;;  %9547 = vmatprep.mubr.bf16.mxu1 %v8788_v10 }
 0xb23   : > { %20681 = vst [vmem:[#allocation116_spill] sm:$0xff] %v18451_v15  ;;  %20682 = vst [vmem:[#allocation117_spill] sm:$0xff] %v18456_v52  ;;  %v18458_v38 = vpop.f32.mrb[30].mxu0  ;;  %v13889_v0 = vpop.eup %13888  ;;  %13908 = vpow2.f32 %v7869_v37  ;;  %v7887_v52 = vmul.f32 1.442695, %v11932_v27 }
 0xb24   : > { %20683 = vst [vmem:[#allocation118_spill] sm:$0xff] %v18458_v38  ;;  %v18465_v32 = vpop.f32.mrb[191].mxu1  ;;  %v18467_v42 = vpop.f32.mrb[31].mxu0  ;;  %v8220_v31 = vadd.f32 1.0, %v13889_v0  ;;  %13910 = vpow2.f32 %v7873_v12  ;;  %v8787_v38 = vpack.c.bf16 %v8587_v63, %v8579_v3  ;;  %v18476_v12 = vadd.f32 %v18367_v20, %v18322_v44 }
 0xb25   : > { %20684 = vst [vmem:[#allocation119_spill] sm:$0xff] %v18467_v42  ;;  %v13891_v36 = vpop.eup %13890  ;;  %13912 = vpow2.f32 %v7883_v14  ;;  %v18496_v0 = vmul.f32 %v18300_v1, %v18199_v40  ;;  %v18512_v1 = vmul.f32 %v18311_v47, %v18221_v4 }
 0xb26   : > { %v13893_v59 = vpop.eup %13892  ;;  %v8222_v13 = vadd.f32 1.0, %v13891_v36  ;;  %13914 = vrcp.f32 %v8220_v31  ;;  %9548 = vmatmul.mubr.bf16.gmra.mrb[232].mxu1 %v8787_v38  ;;  %v18478_v63 = vpop.f32.mrb[192].mxu1  ;;  %v18488_v38 = vadd.f32 %v18373_v19, %v18329_v58  ;;  %v18506_v19 = vmul.f32 %v18302_v61, %v18215_v23 }
 0xb27   : > { %v13895_v37 = vpop.eup %13894  ;;  %v8103_v54 = vadd.f32 1.0, %v13893_v59  ;;  %v18480_v14 = vpop.f32.mrb[32].mxu0  ;;  %20686 = vst [vmem:[#allocation121_spill] sm:$0xff] %v18496_v0  ;;  %v7889_v31 = vmul.f32 1.442695, %v11933_v16  ;;  %20689 = vst [vmem:[#allocation124_spill] sm:$0xff] %v18512_v1  ;;  %v18522_v16 = vadd.f32 %v18380_v45, %v18354_v33  ;;  %v18535_v45 = vadd.f32 %v18406_v34, %v18344_v29 }
 0xb28   : > { %v18469_v15 = vpop.eup %13896  ;;  %13916 = vrcp.f32 %v8222_v13  ;;  %v8105_v7 = vadd.f32 1.0, %v13895_v37  ;;  %v18484_v13 = vmul.f32 %v18294_v21, %v18192_v30  ;;  %v18490_v27 = vpop.f32.mrb[193].mxu1  ;;  %v18500_v30 = vadd.f32 %v18375_v48, %v18344_v29  ;;  %20688 = vst [vmem:[#allocation123_spill] sm:$0xff] %v18506_v19 }
 0xb29   : > { %v18472_v42 = vpop.eup %13898  ;;  %13918 = vrcp.f32 %v8103_v54  ;;  %v18492_v54 = vpop.f32.mrb[33].mxu0  ;;  %20690 = vst [vmem:[#allocation125_spill] sm:$0xff] %v18522_v16  ;;  %20693 = vst [vmem:[#allocation128_spill] sm:$0xff] %v18535_v45  ;;  %v18550_v34 = vadd.f32 %v18411_v9, %v18322_v44 }
 0xb2a   : > { %v13901_v3 = vpop.eup %13900  ;;  %20685 = vst [vmem:[#allocation120_spill] sm:$0xff] %v18484_v13  ;;  %13920 = vrcp.f32 %v8105_v7  ;;  %20687 = vst [vmem:[#allocation122_spill] sm:$0xff] %v18500_v30  ;;  %v18502_v21 = vpop.f32.mrb[194].mxu1  ;;  %v11939_v47 = vmul.f32 -1.702, %v18500_v30  ;;  %v18569_v30 = vadd.f32 %v18413_v57, %v18329_v58 }
 0xb2b   : > { %v13903_v20 = vpop.eup %13902  ;;  %v8104_v25 = vadd.f32 1.0, %v13901_v3  ;;  %13922 = vpow2.f32 %v7887_v52  ;;  %v18508_v59 = vpop.f32.mrb[34].mxu0  ;;  %v11938_v52 = vmul.f32 -1.702, %v18476_v12  ;;  %20695 = vst [vmem:[#allocation130_spill] sm:$0xff] %v18550_v34 }
 0xb2c   : > { %v13905_v10 = vpop.eup %13904  ;;  %v8106_v36 = vadd.f32 1.0, %v13903_v20  ;;  %13924 = vpow2.f32 %v7885_v8  ;;  %v18515_v37 = vpop.f32.mrb[195].mxu1  ;;  %v11940_v8 = vmul.f32 -1.702, %v18488_v38  ;;  %v18527_v20 = vadd.f32 %v18398_v22, %v18322_v44 }
 0xb2d   : > { %v13907_v40 = vpop.eup %13906  ;;  %13926 = vrcp.f32 %v8104_v25  ;;  %v8111_v48 = vadd.f32 1.0, %v13905_v10  ;;  %v18517_v7 = vpop.f32.mrb[35].mxu0  ;;  %v18541_v22 = vadd.f32 %v18408_v50, %v18354_v33  ;;  %v18558_v50 = vmul.f32 %v18340_v62, %v18234_v43 }
 0xb2e   : > { %v13909_v23 = vpop.eup %13908  ;;  %13928 = vrcp.f32 %v8106_v36  ;;  %v8113_v61 = vadd.f32 1.0, %v13907_v40  ;;  %20691 = vst [vmem:[#allocation126_spill] sm:$0xff] %v18527_v20  ;;  %v18531_v36 = vadd.f32 %v18400_v39, %v18329_v58  ;;  %v18543_v19 = vpop.f32.mrb[196].mxu1  ;;  %v7903_v39 = vmul.f32 1.442695, %v11940_v8 }
 0xb2f   : > { %v13911_v3 = vpop.eup %13910  ;;  %13930 = vrcp.f32 %v8111_v48  ;;  %v8112_v4 = vadd.f32 1.0, %v13909_v23  ;;  %v7899_v23 = vmul.f32 1.442695, %v11938_v52  ;;  %20694 = vst [vmem:[#allocation129_spill] sm:$0xff] %v18541_v22  ;;  %v18552_v13 = vpop.f32.mrb[36].mxu0  ;;  %20696 = vst [vmem:[#allocation131_spill] sm:$0xff] %v18558_v50  ;;  %v18582_v50 = vadd.f32 %v18416_v26, %v18344_v29 }
 0xb30   : > { %v13913_v25 = vpop.eup %13912  ;;  %13932 = vrcp.f32 %v8113_v61  ;;  %v8114_v10 = vadd.f32 1.0, %v13911_v3  ;;  %20692 = vst [vmem:[#allocation127_spill] sm:$0xff] %v18531_v36  ;;  %v11941_v3 = vmul.f32 -1.702, %v18522_v16  ;;  %v18561_v8 = vpop.f32.mrb[37].mxu0 }
 0xb31   : > { %v18537_v40 = vpop.eup %13914  ;;  %13934 = vrcp.f32 %v8112_v4  ;;  %v8119_v48 = vadd.f32 1.0, %v13913_v25  ;;  %v18554_v4 = vpop.f32.mrb[197].mxu1  ;;  %v7901_v25 = vmul.f32 1.442695, %v11939_v47  ;;  %v11948_v9 = vmul.f32 -1.702, %v18531_v36 }
 0xb32   : > { %v18545_v61 = vpop.eup %13916  ;;  %13936 = vrcp.f32 %v8114_v10  ;;  %v11946_v10 = vmul.f32 -1.702, %v18527_v20  ;;  %v18563_v1 = vpop.f32.mrb[198].mxu1  ;;  %v11947_v16 = vmul.f32 -1.702, %v18535_v45  ;;  %20700 = vst [vmem:[#allocation135_spill] sm:$0xff] %v18582_v50 }
 0xb33   : > { %v13919_v52 = vpop.eup %13918  ;;  %13938 = vrcp.f32 %v8119_v48  ;;  %v18571_v43 = vpop.f32.mrb[38].mxu0  ;;  %v18577_v48 = vmul.f32 %v18391_v18, %v18242_v24  ;;  %v18591_v24 = vmul.f32 %v18420_v6, %v18263_v5  ;;  %v7919_v26 = vmul.f32 1.442695, %v11948_v9 }
 0xb34   : > { %v13921_v0 = vpop.eup %13920  ;;  %13940 = vpow2.f32 %v7889_v31  ;;  %20697 = vst [vmem:[#allocation132_spill] sm:$0xff] %v18571_v43  ;;  %v18573_v62 = vpop.f32.mrb[199].mxu1  ;;  %v11949_v31 = vmul.f32 -1.702, %v18541_v22  ;;  %v7905_v43 = vmul.f32 1.442695, %v11941_v3 }
 0xb35   : > { %20698 = vst [vmem:[#allocation133_spill] sm:$0xff] %v18573_v62  ;;  %v13923_v47 = vpop.eup %13922  ;;  %20699 = vst [vmem:[#allocation134_spill] sm:$0xff] %v18577_v48  ;;  %13942 = vpow2.f32 %v7899_v23  ;;  %v18584_v45 = vpop.f32.mrb[39].mxu0  ;;  %v11954_v62 = vmul.f32 -1.702, %v18550_v34 }
 0xb36   : > { %20701 = vst [vmem:[#allocation136_spill] sm:$0xff] %v18584_v45  ;;  %v13925_v57 = vpop.eup %13924  ;;  %v8121_v36 = vadd.f32 1.0, %v13923_v47  ;;  %13944 = vpow2.f32 %v7903_v39  ;;  %20702 = vst [vmem:[#allocation137_spill] sm:$0xff] %v18591_v24  ;;  %v7915_v23 = vmul.f32 1.442695, %v11946_v10  ;;  %v18599_v45 = vadd.f32 %v18418_v56, %v18354_v33  ;;  %v18601_v5 = vpop.f32.mrb[200].mxu1 }
 0xb37   : > { %v18587_v20 = vpop.eup %13926  ;;  %v8120_v18 = vadd.f32 1.0, %v13925_v57  ;;  %13946 = vpow2.f32 %v7901_v25  ;;  %v7917_v22 = vmul.f32 1.442695, %v11947_v16  ;;  %v11956_v47 = vmul.f32 -1.702, %v18569_v30  ;;  %v18603_v6 = vpop.f32.mrb[40].mxu0 }
 0xb38   : > { %v18593_v48 = vpop.eup %13928  ;;  %13948 = vrcp.f32 %v8121_v36  ;;  %v7921_v3 = vmul.f32 1.442695, %v11949_v31  ;;  %v11955_v34 = vmul.f32 -1.702, %v18582_v50  ;;  %v18606_v36 = vmul.f32 %v13919_v52, %v18347_v53  ;;  %v18611_v9 = vpop.f32.mrb[201].mxu1  ;;  %v20706_v24 = vld [vmem:[#allocation109_spill] sm:$0xff] }
 0xb39   : > { %v13931_v39 = vpop.eup %13930  ;;  %13950 = vrcp.f32 %v8120_v18  ;;  %v7931_v10 = vmul.f32 1.442695, %v11954_v62  ;;  %v18613_v31 = vpop.f32.mrb[41].mxu0  ;;  %v8604_v56 = vmul.f32 %v18537_v40, %v18318_v55  ;;  %v18620_v18 = vmul.f32 %v13921_v0, %v18350_v11  ;;  %v20709_v62 = vld [vmem:[#allocation106_spill] sm:$0xff] }
 0xb3a   : > { %v13933_v25 = vpop.eup %13932  ;;  %20703 = vst [vmem:[#allocation138_spill] sm:$0xff] %v18606_v36  ;;  %v18609_v16 = vmul.f32 %v13931_v39, %v18378_v28  ;;  %13952 = vpow2.f32 %v7905_v43  ;;  %v18625_v28 = vpop.f32.mrb[202].mxu1  ;;  %v8603_v39 = vmul.f32 %v18469_v15, %v20709_v62  ;;  %v7935_v55 = vmul.f32 1.442695, %v11956_v47 }
 0xb3b   : > { %v18615_v57 = vpop.eup %13934  ;;  %20705 = vst [vmem:[#allocation140_spill] sm:$0xff] %v18620_v18  ;;  %v18623_v53 = vmul.f32 %v13933_v25, %v20706_v24  ;;  %13954 = vpow2.f32 %v7915_v23  ;;  %v18627_v52 = vpop.f32.mrb[42].mxu0  ;;  %v20710_v24 = vld [vmem:[#allocation104_spill] sm:$0xff]  ;;  %v11957_v15 = vmul.f32 -1.702, %v18599_v45  ;;  %v18650_v50 = vadd.f32 %v18439_v2, %v18322_v44 }
 0xb3c   : > { %20704 = vst [vmem:[#allocation139_spill] sm:$0xff] %v18609_v16  ;;  %20708 = vst [vmem:[#allocation141_spill] sm:$0xff] %v18627_v52  ;;  %v18629_v43 = vpop.eup %13936  ;;  %13956 = vpow2.f32 %v7919_v26  ;;  %v18635_v11 = vpop.f32.mrb[203].mxu1  ;;  %v8596_v23 = vmul.f32 %v18443_v46, %v20710_v24  ;;  %v20711_v52 = vld [vmem:[#allocation102_spill] sm:$0xff]  ;;  %v7933_v47 = vmul.f32 1.442695, %v11955_v34  ;;  %v18654_v46 = vadd.f32 %v18441_v51, %v18329_v58 }
 0xb3d   : > { %20707 = vst [vmem:[#allocation109_spill] sm:$0xff] %v18623_v53  ;;  %v18637_v0 = vpop.f32.mrb[43].mxu0  ;;  %v18639_v40 = vpop.eup %13938  ;;  %13958 = vpow2.f32 %v7917_v22  ;;  %v8595_v26 = vmul.f32 %v18430_v60, %v20711_v52  ;;  %v18658_v60 = vadd.f32 %v18447_v17, %v18344_v29  ;;  %v7937_v52 = vmul.f32 1.442695, %v11957_v15  ;;  %v20723_v18 = vld [vmem:[#allocation116_spill] sm:$0xff] }
 0xb3e   : > { %v13941_v62 = vpop.eup %13940  ;;  %13960 = vpow2.f32 %v7921_v3  ;;  %v8796_v22 = vpack.c.bf16 %v8604_v56, %v8596_v23  ;;  %v18664_v51 = vpop.f32.mrb[204].mxu1 }
 0xb3f   : > { %v13943_v36 = vpop.eup %13942  ;;  %v8122_v16 = vadd.f32 1.0, %v13941_v62  ;;  %13962 = vpow2.f32 %v7931_v10  ;;  %20712 = vst [vmem:[#allocation106_spill] sm:$0xff] %v18658_v60  ;;  %v8795_v34 = vpack.c.bf16 %v8603_v39, %v8595_v26  ;;  %v18662_v10 = vadd.f32 %v18449_v41, %v18354_v33  ;;  %v18666_v56 = vpop.f32.mrb[44].mxu0  ;;  %v20719_v62 = vld [vmem:[#allocation103_spill] sm:$0xff] }
 0xb40   : > { %v13945_v24 = vpop.eup %13944  ;;  %v8127_v25 = vadd.f32 1.0, %v13943_v36  ;;  %13964 = vpow2.f32 %v7935_v55  ;;  %9557 = vmatprep.mubr.bf16.mxu1 %v8796_v22  ;;  %20714 = vst [vmem:[#allocation102_spill] sm:$0xff] %v18666_v56  ;;  %v20715_v55 = vld [vmem:[#allocation101_spill] sm:$0xff]  ;;  %v18675_v23 = vpop.f32.mrb[205].mxu1  ;;  %v20720_v26 = vld [vmem:[#allocation115_spill] sm:$0xff] }
 0xb41   : > { %v13947_v3 = vpop.eup %13946  ;;  %13966 = vrcp.f32 %v8122_v16  ;;  %v8129_v2 = vadd.f32 1.0, %v13945_v24  ;;  %20713 = vst [vmem:[#allocation104_spill] sm:$0xff] %v18662_v10  ;;  %v18672_v17 = vmul.f32 %v18424_v35, %v20715_v55  ;;  %v11962_v16 = vmul.f32 -1.702, %v18650_v50  ;;  %9558 = vmatmul.mubr.bf16.gmra.mrb[236].mxu1 %v8795_v34  ;;  %20717 = vst [vmem:[#allocation142_spill] sm:$0xff] %v18675_v23  ;;  %v18677_v41 = vpop.f32.mrb[45].mxu0 }
 0xb42   : > { %v18668_v36 = vpop.eup %13948  ;;  %13968 = vrcp.f32 %v8127_v25  ;;  %v8128_v39 = vadd.f32 1.0, %v13947_v3  ;;  %20718 = vst [vmem:[#allocation143_spill] sm:$0xff] %v18677_v41  ;;  %v18683_v22 = vmul.f32 %v20720_v26, %v20719_v62  ;;  %v20722_v24 = vld [vmem:[#allocation105_spill] sm:$0xff]  ;;  %v11964_v35 = vmul.f32 -1.702, %v18654_v46  ;;  %v20725_v25 = vld [vmem:[#allocation83_spill] sm:$0xff] }
 0xb43   : > { %20716 = vst [vmem:[#allocation101_spill] sm:$0xff] %v18672_v17  ;;  %v18679_v15 = vpop.eup %13950  ;;  %v18687_v53 = vmul.f32 %v20723_v18, %v20722_v24  ;;  %13970 = vrcp.f32 %v8129_v2  ;;  %v20726_v3 = vld [vmem:[#allocation84_spill] sm:$0xff]  ;;  %v18693_v55 = vpop.f32.mrb[206].mxu1  ;;  %v20730_v56 = vld [vmem:[#allocation107_spill] sm:$0xff]  ;;  %v20732_v26 = vld [vmem:[#allocation45_spill] sm:$0xff] }
 0xb44   : > { %20721 = vst [vmem:[#allocation103_spill] sm:$0xff] %v18683_v22  ;;  %v20727_v34 = vpack.c.bf16 %v20725_v25, %v20726_v3  ;;  %20728 = vst [vmem:[#allocation105_spill] sm:$0xff] %v18693_v55  ;;  %v18695_v41 = vpop.f32.mrb[46].mxu0  ;;  %v13953_v23 = vpop.eup %13952  ;;  %v18699_v62 = vmul.f32 %v18472_v42, %v20730_v56  ;;  %v18703_v18 = vmul.f32 %v18545_v61, %v20732_v26  ;;  %13972 = vrcp.f32 %v8128_v39  ;;  %v20736_v42 = vld [vmem:[#allocation117_spill] sm:$0xff]  ;;  %v20738_v26 = vld [vmem:[#allocation118_spill] sm:$0xff] }
 0xb45   : > { %20724 = vst [vmem:[#allocation115_spill] sm:$0xff] %v18687_v53  ;;  %20729 = vst [vmem:[#allocation116_spill] sm:$0xff] %v18695_v41  ;;  %v11963_v2 = vmul.f32 -1.702, %v18658_v60  ;;  %v18706_v24 = vpop.f32.mrb[207].mxu1  ;;  %v18708_v25 = vpop.f32.mrb[47].mxu0  ;;  %13974 = vpow2.f32 %v7933_v47  ;;  %v18713_v56 = vadd.f32 %v20736_v42, %v18322_v44  ;;  %v18721_v47 = vadd.f32 %v18465_v32, %v18344_v29 }
 0xb46   : > { %9600 = vmatprep.mubr.bf16.mxu1 %v20727_v34  ;;  %20731 = vst [vmem:[#allocation83_spill] sm:$0xff] %v18699_v62  ;;  %20733 = vst [vmem:[#allocation84_spill] sm:$0xff] %v18703_v18  ;;  %v13955_v3 = vpop.eup %13954  ;;  %v8130_v34 = vadd.f32 1.0, %v13953_v23  ;;  %v11965_v41 = vmul.f32 -1.702, %v18662_v10  ;;  %13976 = vpow2.f32 %v7937_v52  ;;  %v20740_v18 = vld [vmem:[#allocation47_spill] sm:$0xff] }
 0xb47   : > { %20734 = vst [vmem:[#allocation107_spill] sm:$0xff] %v18706_v24  ;;  %20735 = vst [vmem:[#allocation45_spill] sm:$0xff] %v18708_v25  ;;  %v13957_v55 = vpop.eup %13956  ;;  %v8135_v61 = vadd.f32 1.0, %v13955_v3  ;;  %v7947_v39 = vmul.f32 1.442695, %v11962_v16  ;;  %v18717_v24 = vadd.f32 %v20738_v26, %v18329_v58  ;;  %v18726_v53 = vmul.f32 %v18587_v20, %v20740_v18  ;;  %v20742_v60 = vld [vmem:[#allocation119_spill] sm:$0xff] }
 0xb48   : > { %20737 = vst [vmem:[#allocation117_spill] sm:$0xff] %v18713_v56  ;;  %v13959_v25 = vpop.eup %13958  ;;  %13978 = vrcp.f32 %v8130_v34  ;;  %v8137_v62 = vadd.f32 1.0, %v13957_v55  ;;  %v7951_v23 = vmul.f32 1.442695, %v11964_v35  ;;  %v13356_v22 = vld [vmem:[%s15449_s22 + $0x200] ss:$8 sps:$4 sm:$0xff]   ;;  %v18733_v20 = vadd.f32 %v20742_v60, %v18354_v33 }
 0xb49   : > { %20739 = vst [vmem:[#allocation118_spill] sm:$0xff] %v18717_v24  ;;  %v13961_v42 = vpop.eup %13960  ;;  %20741 = vst [vmem:[#allocation47_spill] sm:$0xff] %v18726_v53  ;;  %13980 = vrcp.f32 %v8135_v61  ;;  %v8136_v52 = vadd.f32 1.0, %v13959_v25  ;;  %v7949_v16 = vmul.f32 1.442695, %v11963_v2  ;;  %v20743_v18 = vld [vmem:[#allocation50_spill] sm:$0xff] }
 0xb4a   : > { %v13361_v3 = vld [vmem:[%s15449_s22 + $0x214] ss:$8 sps:$4 sm:$0xff]   ;;  %v13963_v26 = vpop.eup %13962  ;;  %13982 = vrcp.f32 %v8137_v62  ;;  %v8138_v17 = vadd.f32 1.0, %v13961_v42  ;;  %v7953_v55 = vmul.f32 1.442695, %v11965_v41  ;;  %v20746_v61 = vld [vmem:[#allocation108_spill] sm:$0xff] }
 0xb4b   : > { %v11970_v35 = vmul.f32 -1.702, %v18713_v56  ;;  %v13965_v34 = vpop.eup %13964  ;;  %13984 = vrcp.f32 %v8136_v52  ;;  %v8143_v32 = vadd.f32 1.0, %v13963_v26  ;;  %v11972_v10 = vmul.f32 -1.702, %v18717_v24  ;;  %v20744_v25 = vld [vmem:[#allocation49_spill] sm:$0xff] }
 0xb4c   : > { %v20745_v2 = vpack.c.bf16 %v20743_v18, %v20744_v25  ;;  %v18738_v62 = vpop.eup %13966  ;;  %v18742_v41 = vmul.f32 %v18593_v48, %v20746_v61  ;;  %13986 = vrcp.f32 %v8138_v17  ;;  %v8145_v42 = vadd.f32 1.0, %v13965_v34  ;;  %v20747_v26 = vld [vmem:[#allocation88_spill] sm:$0xff]  ;;  %v20748_v53 = vld [vmem:[#allocation87_spill] sm:$0xff]  ;;  %v13359_v60 = vld [vmem:[%s15449_s22 + $0x210] ss:$8 sps:$4 sm:$0xff]  }
 0xb4d   : > { %v11971_v52 = vmul.f32 -1.702, %v18721_v47  ;;  %v20749_v24 = vpack.c.bf16 %v20747_v26, %v20748_v53  ;;  %v18749_v56 = vpop.eup %13968  ;;  %v20750_v18 = vld [vmem:[#allocation110_spill] sm:$0xff]  ;;  %13988 = vrcp.f32 %v8143_v32  ;;  %v18761_v17 = vadd.f32 %v18478_v63, %v18322_v44  ;;  %v13364_v53 = vld [vmem:[%s15449_s22 + $0x224] ss:$8 sps:$4 sm:$0xff]  }
 0xb4e   : > { %9601 = vmatmul.mubr.bf16.vlgmr.msra.gmra.mrb[208].mxu1 %v20745_v2  ;;  %v18753_v25 = vmul.f32 %v18615_v57, %v20750_v18  ;;  %v20751_v2 = vld [vmem:[#allocation111_spill] sm:$0xff]  ;;  %13990 = vrcp.f32 %v8145_v42  ;;  %v7963_v57 = vmul.f32 1.442695, %v11970_v35  ;;  %v7967_v63 = vmul.f32 1.442695, %v11972_v10 }
 0xb4f   : > { %9610 = vmatprep.mubr.bf16.mxu1 %v20749_v24  ;;  %9682 = vmatpush1.bf16.msra.mxu1 %v13356_v22  ;;  %v18757_v48 = vmul.f32 %v18629_v43, %v20751_v2  ;;  %v18764_v24 = vpop.eup %13970  ;;  %v20753_v22 = vld [vmem:[#allocation112_spill] sm:$0xff]  ;;  %v18772_v43 = vadd.f32 %v18480_v14, %v18329_v58  ;;  %13992 = vpow2.f32 %v7947_v39  ;;  %v18779_v61 = vadd.f32 %v18490_v27, %v18344_v29  ;;  %v20759_v2 = vld [vmem:[#allocation113_spill] sm:$0xff] }
 0xb50   : > { %9683 = vmatprep.subr.bf16.mxu1 %v13361_v3  ;;  %v18768_v34 = vmul.f32 %v18639_v40, %v20753_v22  ;;  %v18774_v32 = vpop.eup %13972  ;;  %v11973_v3 = vmul.f32 -1.702, %v18733_v20  ;;  %13994 = vpow2.f32 %v7951_v23  ;;  %v7965_v40 = vmul.f32 1.442695, %v11971_v52  ;;  %v13362_v10 = vld [vmem:[%s15449_s22 + $0x220] ss:$8 sps:$4 sm:$0xff]  }
 0xb51   : > { %20752 = vst [vmem:[#allocation119_spill] sm:$0xff] %v18757_v48  ;;  %20754 = vst [vmem:[#allocation50_spill] sm:$0xff] %v18772_v43  ;;  %v13975_v26 = vpop.eup %13974  ;;  %v18783_v35 = vadd.f32 %v18492_v54, %v18354_v33  ;;  %v18787_v14 = vadd.f32 %v18502_v21, %v18322_v44  ;;  %13996 = vpow2.f32 %v7949_v16  ;;  %v11978_v18 = vmul.f32 -1.702, %v18761_v17  ;;  %v13367_v23 = vld [vmem:[%s15449_s22 + $0x234] ss:$8 sps:$4 sm:$0xff]  }
 0xb52   : > { %20755 = vst [vmem:[#allocation49_spill] sm:$0xff] %v18779_v61  ;;  %v13977_v39 = vpop.eup %13976  ;;  %v8144_v42 = vadd.f32 1.0, %v13975_v26  ;;  %v18793_v27 = vadd.f32 %v18508_v59, %v18329_v58  ;;  %13998 = vpow2.f32 %v7953_v55  ;;  %v11980_v21 = vmul.f32 -1.702, %v18772_v43  ;;  %v20761_v26 = vld [vmem:[#allocation86_spill] sm:$0xff] }
 0xb53   : > { %20756 = vst [vmem:[#allocation108_spill] sm:$0xff] %v18783_v35  ;;  %9684 = vmatpush1.bf16.msra.mxu1 %v13359_v60  ;;  %v18796_v52 = vpop.eup %13978  ;;  %v8146_v54 = vadd.f32 1.0, %v13977_v39  ;;  %v18801_v60 = vadd.f32 %v18515_v37, %v18344_v29  ;;  %v18807_v22 = vmul.f32 %v18668_v36, %v20759_v2  ;;  %v7969_v59 = vmul.f32 1.442695, %v11973_v3  ;;  %v20762_v39 = vld [vmem:[#allocation85_spill] sm:$0xff]  ;;  %v20766_v3 = vld [vmem:[#allocation91_spill] sm:$0xff] }
 0xb54   : > { %20757 = vst [vmem:[#allocation88_spill] sm:$0xff] %v18793_v27  ;;  %9685 = vmatprep.subr.bf16.mxu1 %v13364_v53  ;;  %v18803_v16 = vpop.eup %13980  ;;  %14000 = vrcp.f32 %v8144_v42  ;;  %v11979_v53 = vmul.f32 -1.702, %v18779_v61  ;;  %v20763_v55 = vpack.c.bf16 %v20761_v26, %v20762_v39  ;;  %v11981_v37 = vmul.f32 -1.702, %v18783_v35  ;;  %v20765_v42 = vld [vmem:[#allocation92_spill] sm:$0xff] }
 0xb55   : > { %20758 = vst [vmem:[#allocation87_spill] sm:$0xff] %v18801_v60  ;;  %20760 = vst [vmem:[#allocation110_spill] sm:$0xff] %v18807_v22  ;;  %v18813_v43 = vpop.eup %13982  ;;  %14002 = vrcp.f32 %v8146_v54  ;;  %v11986_v48 = vmul.f32 -1.702, %v18787_v14  ;;  %v18819_v36 = vadd.f32 %v18517_v7, %v18354_v33  ;;  %v20767_v2 = vpack.c.bf16 %v20765_v42, %v20766_v3  ;;  %v13365_v61 = vld [vmem:[%s15449_s22 + $0x230] ss:$8 sps:$4 sm:$0xff]  }
 0xb56   : > { %9611 = vmatmul.mubr.bf16.gmra.mrb[212].mxu1 %v20763_v55  ;;  %v18825_v26 = vpop.eup %13984  ;;  %v20768_v39 = vld [vmem:[#allocation114_spill] sm:$0xff]  ;;  %14004 = vpow2.f32 %v7963_v57  ;;  %v7979_v54 = vmul.f32 1.442695, %v11978_v18  ;;  %v11988_v35 = vmul.f32 -1.702, %v18793_v27  ;;  %v18838_v3 = vadd.f32 %v18543_v19, %v18322_v44 }
 0xb57   : > { %20764 = vst [vmem:[#allocation111_spill] sm:$0xff] %v18819_v36  ;;  %9620 = vmatprep.mubr.bf16.mxu1 %v20767_v2  ;;  %9686 = vmatpush1.bf16.msra.mxu1 %v13362_v10  ;;  %v18829_v55 = vmul.f32 %v18679_v15, %v20768_v39  ;;  %v13370_v7 = vld [vmem:[%s15449_s22 + $0x244] ss:$8 sps:$4 sm:$0xff]   ;;  %v18833_v22 = vpop.eup %13986  ;;  %14006 = vpow2.f32 %v7967_v63  ;;  %v7983_v42 = vmul.f32 1.442695, %v11980_v21  ;;  %v18844_v57 = vadd.f32 %v18552_v13, %v18329_v58 }
 0xb58   : > { %9687 = vmatprep.subr.bf16.mxu1 %v13367_v23  ;;  %v11987_v10 = vmul.f32 -1.702, %v18801_v60  ;;  %20769 = vst [vmem:[#allocation112_spill] sm:$0xff] %v18838_v3  ;;  %v18840_v2 = vpop.eup %13988  ;;  %14008 = vpow2.f32 %v7965_v40  ;;  %v7981_v15 = vmul.f32 1.442695, %v11979_v53  ;;  %v18848_v18 = vadd.f32 %v18554_v4, %v18344_v29 }
 0xb59   : > { %20770 = vst [vmem:[#allocation113_spill] sm:$0xff] %v18844_v57  ;;  %v13368_v63 = vld [vmem:[%s15449_s22 + $0x240] ss:$8 sps:$4 sm:$0xff]   ;;  %v18851_v23 = vpop.eup %13990  ;;  %14010 = vpow2.f32 %v7969_v59  ;;  %v7985_v21 = vmul.f32 1.442695, %v11981_v37  ;;  %v18856_v53 = vmul.f32 %v18738_v62, %v18463_v49  ;;  %v18862_v4 = vadd.f32 %v18561_v8, %v18354_v33  ;;  %v20774_v8 = vld [vmem:[#allocation89_spill] sm:$0xff] }
 0xb5a   : > { %20771 = vst [vmem:[#allocation86_spill] sm:$0xff] %v18848_v18  ;;  %v7995_v19 = vmul.f32 1.442695, %v11986_v48  ;;  %v11989_v39 = vmul.f32 -1.702, %v18819_v36  ;;  %v13993_v40 = vpop.eup %13992  ;;  %14012 = vpow2.f32 %v7979_v54  ;;  %v20773_v54 = vld [vmem:[#allocation90_spill] sm:$0xff] }
 0xb5b   : > { %9688 = vmatpush1.bf16.msra.mxu1 %v13365_v61  ;;  %v18858_v13 = vmul.f32 1.442695, %v11988_v35  ;;  %20772 = vst [vmem:[#allocation85_spill] sm:$0xff] %v18862_v4  ;;  %v13373_v60 = vld [vmem:[%s15449_s22 + $0x254] ss:$8 sps:$4 sm:$0xff]   ;;  %v13995_v59 = vpop.eup %13994  ;;  %v8151_v37 = vadd.f32 1.0, %v13993_v40  ;;  %14014 = vpow2.f32 %v7983_v42  ;;  %v20775_v27 = vpack.c.bf16 %v20773_v54, %v20774_v8 }
 0xb5c   : > { %9689 = vmatprep.subr.bf16.mxu1 %v13370_v7  ;;  %v18865_v48 = vmul.f32 1.442695, %v11987_v10  ;;  %v11994_v61 = vmul.f32 -1.702, %v18838_v3  ;;  %v13997_v36 = vpop.eup %13996  ;;  %v8153_v49 = vadd.f32 1.0, %v13995_v59  ;;  %14016 = vpow2.f32 %v7981_v15  ;;  %v20776_v59 = vld [vmem:[#allocation96_spill] sm:$0xff] }
 0xb5d   : > { %v11996_v62 = vmul.f32 -1.702, %v18844_v57  ;;  %v11995_v35 = vmul.f32 -1.702, %v18848_v18  ;;  %v13999_v7 = vpop.eup %13998  ;;  %v18875_v42 = vmul.f32 %v18749_v56, %v18476_v12  ;;  %14018 = vrcp.f32 %v8151_v37  ;;  %v20777_v15 = vld [vmem:[#allocation95_spill] sm:$0xff]  ;;  %v20782_v37 = vld [vmem:[#allocation125_spill] sm:$0xff] }
 0xb5e   : > { %9621 = vmatmul.mubr.bf16.gmra.mrb[216].mxu1 %v20775_v27  ;;  %v8152_v10 = vadd.f32 1.0, %v13997_v36  ;;  %v18877_v40 = vmul.f32 1.442695, %v11989_v39  ;;  %v20778_v3 = vpack.c.bf16 %v20776_v59, %v20777_v15  ;;  %v13371_v18 = vld [vmem:[%s15449_s22 + $0x250] ss:$8 sps:$4 sm:$0xff]   ;;  %v18883_v57 = vpop.eup %14000  ;;  %v18887_v27 = vmul.f32 %v18764_v24, %v18488_v38 }
 0xb5f   : > { %9690 = vmatpush1.bf16.msra.mxu1 %v13368_v63  ;;  %14020 = vrcp.f32 %v8153_v49  ;;  %v8154_v54 = vadd.f32 1.0, %v13999_v7  ;;  %v11997_v12 = vmul.f32 -1.702, %v18862_v4  ;;  %v13376_v56 = vld [vmem:[%s15449_s22 + $0x264] ss:$8 sps:$4 sm:$0xff]   ;;  %v18891_v36 = vpop.eup %14002  ;;  %v20780_v39 = vld [vmem:[#allocation122_spill] sm:$0xff]  ;;  %v18901_v38 = vadd.f32 %v18563_v1, %v18322_v44 }
 0xb60   : > { %9630 = vmatprep.mubr.bf16.mxu1 %v20778_v3  ;;  %20779 = vst [vmem:[#allocation92_spill] sm:$0xff] %v18887_v27  ;;  %9691 = vmatprep.subr.bf16.mxu1 %v13373_v60  ;;  %v18895_v3 = vmul.f32 %v18774_v32, %v20780_v39  ;;  %14022 = vrcp.f32 %v8152_v10  ;;  %v18897_v63 = vmul.f32 1.442695, %v11994_v61  ;;  %v14005_v24 = vpop.eup %14004  ;;  %v18905_v49 = vmul.f32 %v18796_v52, %v20782_v37  ;;  %v20783_v7 = vld [vmem:[#allocation126_spill] sm:$0xff]  ;;  %v20784_v1 = vld [vmem:[#allocation132_spill] sm:$0xff]  ;;  %v20794_v27 = vld [vmem:[#allocation93_spill] sm:$0xff] }
 0xb61   : > { %20781 = vst [vmem:[#allocation91_spill] sm:$0xff] %v18901_v38  ;;  %14024 = vrcp.f32 %v8154_v54  ;;  %v18907_v60 = vmul.f32 1.442695, %v11996_v62  ;;  %v18909_v8 = vmul.f32 1.442695, %v11995_v35  ;;  %v14007_v32 = vpop.eup %14006  ;;  %v18913_v61 = vmul.f32 %v18803_v16, %v20783_v7  ;;  %v20786_v35 = vld [vmem:[#allocation133_spill] sm:$0xff] }
 0xb62   : > { %v8159_v10 = vadd.f32 1.0, %v14005_v24  ;;  %14026 = vpow2.f32 %v7985_v21  ;;  %v18917_v59 = vadd.f32 %v20784_v1, %v18329_v58  ;;  %v13374_v52 = vld [vmem:[%s15449_s22 + $0x260] ss:$8 sps:$4 sm:$0xff]   ;;  %v14009_v15 = vpop.eup %14008  ;;  %v8161_v54 = vadd.f32 1.0, %v14007_v32  ;;  %v13379_v16 = vld [vmem:[%s15449_s22 + $0x274] ss:$8 sps:$4 sm:$0xff]  }
 0xb63   : > { %9692 = vmatpush1.bf16.msra.mxu1 %v13371_v18  ;;  %14028 = vpow2.f32 %v7995_v19  ;;  %v18920_v62 = vmul.f32 1.442695, %v11997_v12  ;;  %v18924_v39 = vadd.f32 %v20786_v35, %v18344_v29  ;;  %v14011_v37 = vpop.eup %14010  ;;  %v20788_v24 = vld [vmem:[#allocation127_spill] sm:$0xff]  ;;  %v8160_v18 = vadd.f32 1.0, %v14009_v15  ;;  %v20790_v19 = vld [vmem:[#allocation128_spill] sm:$0xff]  ;;  %v20793_v4 = vld [vmem:[#allocation94_spill] sm:$0xff] }
 0xb64   : > { %20785 = vst [vmem:[#allocation114_spill] sm:$0xff] %v18917_v59  ;;  %9693 = vmatprep.subr.bf16.mxu1 %v13376_v56  ;;  %v18929_v21 = vmul.f32 %v18813_v43, %v20788_v24  ;;  %14030 = vrcp.f32 %v8159_v10  ;;  %v12002_v7 = vmul.f32 -1.702, %v18901_v38  ;;  %v14013_v32 = vpop.eup %14012  ;;  %v18934_v12 = vmul.f32 %v18825_v26, %v20790_v19  ;;  %v20791_v56 = vld [vmem:[#allocation136_spill] sm:$0xff] }
 0xb65   : > { %20787 = vst [vmem:[#allocation90_spill] sm:$0xff] %v18924_v39  ;;  %14032 = vrcp.f32 %v8161_v54  ;;  %v8162_v1 = vadd.f32 1.0, %v14011_v37  ;;  %v18938_v35 = vadd.f32 %v20791_v56, %v18354_v33  ;;  %v20795_v43 = vpack.c.bf16 %v20793_v4, %v20794_v27  ;;  %v14015_v10 = vpop.eup %14014  ;;  %v20797_v54 = vld [vmem:[#allocation100_spill] sm:$0xff]  ;;  %v20798_v37 = vld [vmem:[#allocation98_spill] sm:$0xff] }
 0xb66   : > { %20789 = vst [vmem:[#allocation89_spill] sm:$0xff] %v18929_v21  ;;  %14034 = vrcp.f32 %v8160_v18  ;;  %v8167_v15 = vadd.f32 1.0, %v14013_v32  ;;  %v12004_v24 = vmul.f32 -1.702, %v18917_v59  ;;  %v18946_v26 = vadd.f32 %v18601_v5, %v18322_v44  ;;  %v13377_v56 = vld [vmem:[%s15449_s22 + $0x270] ss:$8 sps:$4 sm:$0xff]   ;;  %v14017_v38 = vpop.eup %14016 }
 0xb67   : > { %20792 = vst [vmem:[#allocation96_spill] sm:$0xff] %v18938_v35  ;;  %9631 = vmatmul.mubr.bf16.gmra.mrb[220].mxu1 %v20795_v43  ;;  %v20799_v19 = vpack.c.bf16 %v20797_v54, %v20798_v37  ;;  %14036 = vrcp.f32 %v8162_v1  ;;  %v8169_v4 = vadd.f32 1.0, %v14015_v10  ;;  %v12003_v27 = vmul.f32 -1.702, %v18924_v39  ;;  %v13382_v32 = vld [vmem:[%s15449_s22 + $0x284] ss:$8 sps:$4 sm:$0xff]   ;;  %v14019_v43 = vpop.eup %14018 }
 0xb68   : > { %20796 = vst [vmem:[#allocation95_spill] sm:$0xff] %v18946_v26  ;;  %9694 = vmatpush1.bf16.msra.mxu1 %v13374_v52  ;;  %v18955_v18 = vadd.f32 %v18603_v6, %v18329_v58  ;;  %v20801_v5 = vld [vmem:[#allocation129_spill] sm:$0xff]  ;;  %14038 = vrcp.f32 %v8167_v15  ;;  %v8168_v52 = vadd.f32 1.0, %v14017_v38  ;;  %v18964_v1 = vadd.f32 %v18611_v9, %v18344_v29  ;;  %v20803_v54 = vld [vmem:[#allocation130_spill] sm:$0xff]  ;;  %v13380_v15 = vld [vmem:[%s15449_s22 + $0x280] ss:$8 sps:$4 sm:$0xff]  }
 0xb69   : > { %9640 = vmatprep.mubr.bf16.mxu1 %v20799_v19  ;;  %9695 = vmatprep.subr.bf16.mxu1 %v13379_v16  ;;  %v18960_v59 = vmul.f32 %v18833_v22, %v20801_v5  ;;  %v14021_v10 = vpop.eup %14020  ;;  %v18968_v37 = vmul.f32 %v18840_v2, %v20803_v54  ;;  %14040 = vrcp.f32 %v8169_v4  ;;  %v18970_v6 = vmul.f32 1.442695, %v12002_v7  ;;  %v20849_v21 = vld [vmem:[#allocation111_spill] sm:$0xff] }
 0xb6a   : > { %20800 = vst [vmem:[#allocation122_spill] sm:$0xff] %v18955_v18  ;;  %20802 = vst [vmem:[#allocation125_spill] sm:$0xff] %v18964_v1  ;;  %v12005_v16 = vmul.f32 -1.702, %v18938_v35  ;;  %v14023_v19 = vpop.eup %14022  ;;  %v18975_v22 = vmul.f32 %v18851_v23, %v18569_v30  ;;  %14042 = vrcp.f32 %v8168_v52  ;;  %v18977_v38 = vmul.f32 1.442695, %v12004_v24 }
 0xb6b   : > { %v12010_v9 = vmul.f32 -1.702, %v18946_v26  ;;  %v14025_v2 = vpop.eup %14024  ;;  %14044 = vpow2.f32 %v18858_v13  ;;  %v18982_v4 = vmul.f32 1.442695, %v12003_v27  ;;  %v12012_v7 = vmul.f32 -1.702, %v18955_v18 }
 0xb6c   : > { %20804 = vst [vmem:[#allocation126_spill] sm:$0xff] %v18975_v22  ;;  %9696 = vmatpush1.bf16.msra.mxu1 %v13377_v56  ;;  %v18987_v5 = vadd.f32 %v18613_v31, %v18354_v33  ;;  %v13385_v30 = vld [vmem:[%s15449_s22 + $0x294] ss:$8 sps:$4 sm:$0xff]   ;;  %v14027_v23 = vpop.eup %14026  ;;  %14046 = vpow2.f32 %v18865_v48  ;;  %v12011_v24 = vmul.f32 -1.702, %v18964_v1  ;;  %v18994_v56 = vadd.f32 %v18625_v28, %v18322_v44  ;;  %v20813_v26 = vld [vmem:[#allocation135_spill] sm:$0xff] }
 0xb6d   : > { %9697 = vmatprep.subr.bf16.mxu1 %v13382_v32  ;;  %v20807_v13 = vld [vmem:[#allocation141_spill] sm:$0xff]  ;;  %v14029_v52 = vpop.eup %14028  ;;  %v8170_v54 = vadd.f32 1.0, %v14027_v23  ;;  %14048 = vpow2.f32 %v18877_v40  ;;  %v8033_v31 = vmul.f32 1.442695, %v12005_v16  ;;  %v19003_v48 = vadd.f32 %v18635_v11, %v18344_v29  ;;  %v20810_v32 = vld [vmem:[#allocation99_spill] sm:$0xff] }
 0xb6e   : > { %20805 = vst [vmem:[#allocation132_spill] sm:$0xff] %v18987_v5  ;;  %20806 = vst [vmem:[#allocation133_spill] sm:$0xff] %v18994_v56  ;;  %v18998_v27 = vadd.f32 %v20807_v13, %v18329_v58  ;;  %v20811_v1 = vld [vmem:[#allocation97_spill] sm:$0xff]  ;;  %v14031_v28 = vpop.eup %14030  ;;  %v19010_v35 = vmul.f32 %v18883_v57, %v20813_v26  ;;  %v8175_v13 = vadd.f32 1.0, %v14029_v52  ;;  %14050 = vpow2.f32 %v18897_v63  ;;  %v13388_v57 = vld [vmem:[%s15449_s22 + $0x2a4] ss:$8 sps:$4 sm:$0xff]  }
 0xb6f   : > { %20809 = vst [vmem:[#allocation128_spill] sm:$0xff] %v19003_v48  ;;  %v20812_v18 = vpack.c.bf16 %v20810_v32, %v20811_v1  ;;  %v19013_v23 = vmul.f32 1.442695, %v12010_v9  ;;  %v13383_v40 = vld [vmem:[%s15449_s22 + $0x290] ss:$8 sps:$4 sm:$0xff]   ;;  %v14033_v16 = vpop.eup %14032  ;;  %v19018_v11 = vmul.f32 %v18891_v36, %v18599_v45  ;;  %14052 = vrcp.f32 %v8170_v54 }
 0xb70   : > { %20808 = vst [vmem:[#allocation127_spill] sm:$0xff] %v18998_v27  ;;  %9698 = vmatpush1.bf16.msra.mxu1 %v13380_v15  ;;  %v19020_v1 = vmul.f32 1.442695, %v12012_v7  ;;  %v14035_v26 = vpop.eup %14034  ;;  %14054 = vrcp.f32 %v8175_v13  ;;  %v19026_v63 = vmul.f32 1.442695, %v12011_v24  ;;  %v19040_v7 = vadd.f32 %v18637_v0, %v18354_v33  ;;  %v20815_v32 = vld [vmem:[#allocation106_spill] sm:$0xff] }
 0xb71   : > { %9641 = vmatmul.mubr.bf16.gmra.mrb[224].mxu1 %v20812_v18  ;;  %v19023_v18 = vmul.f32 -1.702, %v18987_v5  ;;  %9699 = vmatprep.subr.bf16.mxu1 %v13385_v30  ;;  %v19029_v9 = vmul.f32 -1.702, %v18994_v56  ;;  %v19032_v15 = vmul.f32 -1.702, %v18998_v27  ;;  %v14037_v45 = vpop.eup %14036  ;;  %14056 = vpow2.f32 %v18907_v60 }
 0xb72   : > { %v19036_v36 = vmul.f32 -1.702, %v19003_v48  ;;  %v19044_v30 = vadd.f32 %v18664_v51, %v18322_v44  ;;  %v14039_v24 = vpop.eup %14038  ;;  %v19047_v52 = vmul.f32 %v14019_v43, %v18650_v50  ;;  %v19050_v54 = vmul.f32 %v14021_v10, %v18654_v46  ;;  %v20816_v13 = vld [vmem:[#allocation104_spill] sm:$0xff]  ;;  %v20818_v51 = vld [vmem:[#allocation117_spill] sm:$0xff]  ;;  %v20833_v56 = vld [vmem:[#allocation83_spill] sm:$0xff] }
 0xb73   : > { %v19053_v60 = vmul.f32 %v14023_v19, %v20815_v32  ;;  %14058 = vpow2.f32 %v18909_v8  ;;  %v19056_v0 = vpop.eup %14040  ;;  %v19059_v5 = vmul.f32 %v14025_v2, %v20816_v13  ;;  %v19062_v48 = vmul.f32 %v14031_v28, %v20818_v51  ;;  %v20819_v50 = vld [vmem:[#allocation121_spill] sm:$0xff]  ;;  %v20820_v46 = vld [vmem:[#allocation124_spill] sm:$0xff]  ;;  %v20821_v32 = vld [vmem:[#allocation118_spill] sm:$0xff] }
 0xb74   : > { %20814 = vst [vmem:[#allocation136_spill] sm:$0xff] %v19050_v54  ;;  %9700 = vmatpush1.bf16.msra.mxu1 %v13383_v40  ;;  %14060 = vpow2.f32 %v18920_v62  ;;  %v8782_v43 = vpack.c.bf16 %v20820_v46, %v20819_v50  ;;  %v13386_v10 = vld [vmem:[%s15449_s22 + $0x2a0] ss:$8 sps:$4 sm:$0xff]   ;;  %v19068_v19 = vpop.eup %14042  ;;  %v19071_v8 = vmul.f32 %v14033_v16, %v20821_v32  ;;  %v19074_v40 = vmul.f32 %v14035_v26, %v18721_v47  ;;  %v13391_v51 = vld [vmem:[%s15449_s22 + $0x2b4] ss:$8 sps:$4 sm:$0xff]  }
 0xb75   : > { %20817 = vst [vmem:[#allocation94_spill] sm:$0xff] %v19059_v5  ;;  %9701 = vmatprep.subr.bf16.mxu1 %v13388_v57  ;;  %14062 = vpow2.f32 %v18970_v6  ;;  %v20823_v2 = vld [vmem:[#allocation120_spill] sm:$0xff]  ;;  %v20824_v28 = vld [vmem:[#allocation123_spill] sm:$0xff]  ;;  %v14045_v62 = vpop.eup %14044  ;;  %v19081_v27 = vmul.f32 %v14037_v45, %v18733_v20  ;;  %v20826_v57 = vld [vmem:[#allocation134_spill] sm:$0xff] }
 0xb76   : > { %20822 = vst [vmem:[#allocation93_spill] sm:$0xff] %v19071_v8  ;;  %v8781_v13 = vpack.c.bf16 %v20824_v28, %v20823_v2  ;;  %14064 = vpow2.f32 %v18977_v38  ;;  %9650 = vmatprep.mubr.bf16.mxu1 %v8782_v43  ;;  %v20827_v16 = vld [vmem:[#allocation101_spill] sm:$0xff]  ;;  %v20828_v46 = vld [vmem:[#allocation131_spill] sm:$0xff]  ;;  %v14047_v32 = vpop.eup %14046  ;;  %v8177_v6 = vadd.f32 1.0, %v14045_v62  ;;  %v20831_v28 = vld [vmem:[#allocation84_spill] sm:$0xff] }
 0xb77   : > { %20825 = vst [vmem:[#allocation100_spill] sm:$0xff] %v19081_v27  ;;  %v8790_v50 = vpack.c.bf16 %v20827_v16, %v20826_v57  ;;  %v20829_v47 = vld [vmem:[#allocation137_spill] sm:$0xff]  ;;  %14066 = vpow2.f32 %v18982_v4  ;;  %v20830_v2 = vld [vmem:[#allocation115_spill] sm:$0xff]  ;;  %v14049_v38 = vpop.eup %14048  ;;  %v8176_v43 = vadd.f32 1.0, %v14047_v32  ;;  %v20836_v4 = vld [vmem:[#allocation110_spill] sm:$0xff] }
 0xb78   : > { %v8789_v26 = vpack.c.bf16 %v20829_v47, %v20828_v46  ;;  %v8798_v20 = vpack.c.bf16 %v20831_v28, %v20830_v2  ;;  %v20832_v45 = vld [vmem:[#allocation103_spill] sm:$0xff]  ;;  %14068 = vpow2.f32 %v8033_v31  ;;  %9702 = vmatpush1.bf16.msra.mxu1 %v13386_v10  ;;  %v13389_v57 = vld [vmem:[%s15449_s22 + $0x2b0] ss:$8 sps:$4 sm:$0xff]   ;;  %v14051_v62 = vpop.eup %14050  ;;  %v13397_v2 = vld [vmem:[%s15449_s22 + $0x2d4] ss:$8 sps:$4 sm:$0xff]  }
 0xb79   : > { %9651 = vmatmul.mubr.bf16.gmra.mrb[228].mxu1 %v8781_v13  ;;  %v20834_v16 = vld [vmem:[#allocation47_spill] sm:$0xff]  ;;  %14070 = vrcp.f32 %v8177_v6  ;;  %v8178_v13 = vadd.f32 1.0, %v14049_v38  ;;  %9703 = vmatprep.subr.bf16.mxu1 %v13391_v51  ;;  %v19103_v10 = vpop.eup %14052  ;;  %v19110_v51 = vmul.f32 %v14039_v24, %v18761_v17  ;;  %v20837_v17 = vld [vmem:[#allocation92_spill] sm:$0xff]  ;;  %v8049_v6 = vmul.f32 1.442695, %v19023_v18  ;;  %v20838_v24 = vld [vmem:[#allocation102_spill] sm:$0xff] }
 0xb7a   : > { %9660 = vmatprep.mubr.bf16.mxu1 %v8790_v50  ;;  %v13394_v47 = vld [vmem:[%s15449_s22 + $0x2c4] ss:$8 sps:$4 sm:$0xff]   ;;  %14072 = vrcp.f32 %v8176_v43  ;;  %v8183_v50 = vadd.f32 1.0, %v14051_v62  ;;  %v14055_v28 = vpop.eup %14054  ;;  %v13392_v32 = vld [vmem:[%s15449_s22 + $0x2c0] ss:$8 sps:$4 sm:$0xff]   ;;  %v19142_v39 = vadd.f32 %v20838_v24, %v18329_v58  ;;  %v20841_v54 = vld [vmem:[#allocation50_spill] sm:$0xff] }
 0xb7b   : > { %14074 = vrcp.f32 %v8178_v13  ;;  %v20835_v31 = vld [vmem:[#allocation119_spill] sm:$0xff]  ;;  %v14057_v43 = vpop.eup %14056  ;;  %v19117_v62 = vmul.f32 %v14055_v28, %v18787_v14  ;;  %v13395_v14 = vld [vmem:[%s15449_s22 + $0x2d0] ss:$8 sps:$4 sm:$0xff]   ;;  %v8059_v38 = vmul.f32 1.442695, %v19029_v9 }
 0xb7c   : > { %14076 = vrcp.f32 %v8183_v50  ;;  %9704 = vmatpush1.bf16.msra.mxu1 %v13389_v57  ;;  %v8185_v46 = vadd.f32 1.0, %v14057_v43  ;;  %v12021_v43 = vmul.f32 -1.702, %v19040_v7  ;;  %v8061_v9 = vmul.f32 1.442695, %v19036_v36  ;;  %v20843_v36 = vld [vmem:[#allocation88_spill] sm:$0xff] }
 0xb7d   : > { %v14059_v13 = vpop.eup %14058  ;;  %14078 = vpow2.f32 %v19013_v23  ;;  %9705 = vmatprep.subr.bf16.mxu1 %v13394_v47  ;;  %v12026_v24 = vmul.f32 -1.702, %v19044_v30 }
 0xb7e   : > { %v14061_v50 = vpop.eup %14060  ;;  %v8184_v28 = vadd.f32 1.0, %v14059_v13  ;;  %14080 = vpow2.f32 %v19020_v1 }
 0xb7f   : > { %v14063_v23 = vpop.eup %14062  ;;  %14082 = vrcp.f32 %v8185_v46  ;;  %v8186_v47 = vadd.f32 1.0, %v14061_v50  ;;  %v13400_v46 = vld [vmem:[%s15449_s22 + $0x2e4] ss:$8 sps:$4 sm:$0xff]  }
 0xb80   : > { %v14065_v13 = vpop.eup %14064  ;;  %14084 = vrcp.f32 %v8184_v28  ;;  %v8191_v1 = vadd.f32 1.0, %v14063_v23  ;;  %9706 = vmatpush1.bf16.msra.mxu1 %v13392_v32  ;;  %v20839_v32 = vld [vmem:[#allocation142_spill] sm:$0xff] }
 0xb81   : > { %9661 = vmatmul.mubr.bf16.gmra.mrb[232].mxu1 %v8789_v26  ;;  %v14067_v50 = vpop.eup %14066  ;;  %14086 = vrcp.f32 %v8186_v47  ;;  %v8193_v18 = vadd.f32 1.0, %v14065_v13  ;;  %v8063_v26 = vmul.f32 1.442695, %v19032_v15  ;;  %9707 = vmatprep.subr.bf16.mxu1 %v13397_v2  ;;  %v19151_v47 = vadd.f32 %v20839_v32, %v18344_v29  ;;  %v20840_v15 = vld [vmem:[#allocation143_spill] sm:$0xff]  ;;  %v20845_v32 = vld [vmem:[#allocation49_spill] sm:$0xff] }
 0xb82   : > { %9670 = vmatprep.mubr.bf16.mxu1 %v8798_v20  ;;  %v14069_v57 = vpop.eup %14068  ;;  %14088 = vrcp.f32 %v8191_v1  ;;  %v8192_v28 = vadd.f32 1.0, %v14067_v50  ;;  %v19155_v13 = vadd.f32 %v20840_v15, %v18354_v33  ;;  %v19159_v1 = vmul.f32 %v19056_v0, %v20841_v54  ;;  %v20846_v15 = vld [vmem:[#allocation87_spill] sm:$0xff]  ;;  %v20847_v54 = vld [vmem:[#allocation105_spill] sm:$0xff] }
 0xb83   : > { %v14071_v23 = vpop.eup %14070  ;;  %14090 = vrcp.f32 %v8193_v18  ;;  %v8194_v20 = vadd.f32 1.0, %v14069_v57  ;;  %v12028_v57 = vmul.f32 -1.702, %v19142_v39  ;;  %v13398_v18 = vld [vmem:[%s15449_s22 + $0x2e0] ss:$8 sps:$4 sm:$0xff]   ;;  %v19168_v5 = vmul.f32 %v19068_v19, %v20845_v32 }
 0xb84   : > { %v14073_v2 = vpop.eup %14072  ;;  %20842 = vst [vmem:[#allocation98_spill] sm:$0xff] %v19159_v1  ;;  %v19162_v50 = vmul.f32 %v14071_v23, %v20843_v36  ;;  %14092 = vrcp.f32 %v8192_v28  ;;  %9708 = vmatpush1.bf16.msra.mxu1 %v13395_v14  ;;  %v19175_v0 = vadd.f32 %v20847_v54, %v18322_v44  ;;  %v13403_v23 = vld [vmem:[%s15449_s22 + $0x2f4] ss:$8 sps:$4 sm:$0xff]   ;;  %v20848_v36 = vld [vmem:[#allocation108_spill] sm:$0xff]  ;;  %v12027_v44 = vmul.f32 -1.702, %v19151_v47 }
 0xb85   : > { %v14075_v8 = vpop.eup %14074  ;;  %v19171_v27 = vmul.f32 %v14073_v2, %v20846_v15  ;;  %14094 = vrcp.f32 %v8194_v20  ;;  %9709 = vmatprep.subr.bf16.mxu1 %v13400_v46  ;;  %v19180_v14 = vmul.f32 %v19103_v10, %v20848_v36  ;;  %v12029_v46 = vmul.f32 -1.702, %v19155_v13  ;;  %v13401_v15 = vld [vmem:[%s15449_s22 + $0x2f0] ss:$8 sps:$4 sm:$0xff]   ;;  %v13406_v54 = vld [vmem:[%s15449_s22 + $0x304] ss:$8 sps:$4 sm:$0xff]  }
 0xb86   : > { %20844 = vst [vmem:[#allocation129_spill] sm:$0xff] %v19162_v50  ;;  %v14077_v28 = vpop.eup %14076  ;;  %v19183_v22 = vmul.f32 %v14075_v8, %v20849_v21  ;;  %14096 = vpow2.f32 %v19026_v63  ;;  %v20850_v10 = vpack.c.bf16 %v20833_v56, %v20832_v45  ;;  %v20851_v63 = vld [vmem:[#allocation116_spill] sm:$0xff] }
 0xb87   : > { %v14079_v20 = vpop.eup %14078  ;;  %14098 = vpow2.f32 %v8049_v6  ;;  %v19197_v32 = vadd.f32 %v20851_v63, %v18329_v58  ;;  %v20852_v6 = vpack.c.bf16 %v18753_v25, %v20834_v16  ;;  %v8079_v63 = vmul.f32 1.442695, %v12028_v57  ;;  %v20854_v56 = vld [vmem:[#allocation112_spill] sm:$0xff] }
 0xb88   : > { %v14081_v8 = vpop.eup %14080  ;;  %v8199_v2 = vadd.f32 1.0, %v14079_v20  ;;  %14100 = vpow2.f32 %v8059_v38  ;;  %9710 = vmatpush1.bf16.msra.mxu1 %v13398_v18  ;;  %v8065_v20 = vmul.f32 1.442695, %v12021_v43  ;;  %v12034_v38 = vmul.f32 -1.702, %v19175_v0 }
 0xb89   : > { %9671 = vmatmul.mubr.bf16.gmra.mrb[236].mxu1 %v20850_v10  ;;  %v14083_v45 = vpop.eup %14082  ;;  %v8201_v36 = vadd.f32 1.0, %v14081_v8  ;;  %14102 = vpow2.f32 %v8063_v26  ;;  %9711 = vmatprep.subr.bf16.mxu1 %v13403_v23  ;;  %v8075_v18 = vmul.f32 1.442695, %v12026_v24  ;;  %v20853_v10 = vld [vmem:[#allocation107_spill] sm:$0xff]  ;;  %v8077_v8 = vmul.f32 1.442695, %v12027_v44 }
 0xb8a   : > { %9713 = vmatprep.mubr.bf16.mxu1 %v20852_v6  ;;  %v14085_v58 = vpop.eup %14084  ;;  %14104 = vrcp.f32 %v8199_v2  ;;  %v19209_v25 = vadd.f32 %v20853_v10, %v18344_v29  ;;  %v13404_v6 = vld [vmem:[%s15449_s22 + $0x300] ss:$8 sps:$4 sm:$0xff]   ;;  %v8081_v26 = vmul.f32 1.442695, %v12029_v46  ;;  %v12036_v43 = vmul.f32 -1.702, %v19197_v32 }
 0xb8b   : > { %v14087_v16 = vpop.eup %14086  ;;  %14106 = vrcp.f32 %v8201_v36  ;;  %v19214_v2 = vmul.f32 %v14077_v28, %v20854_v56  ;;  %v20855_v24 = vld [vmem:[#allocation91_spill] sm:$0xff]  ;;  %v8091_v29 = vmul.f32 1.442695, %v12034_v38  ;;  %v13409_v36 = vld [vmem:[%s15449_s22 + $0x314] ss:$8 sps:$4 sm:$0xff]  }
 0xb8c   : > { %v14089_v19 = vpop.eup %14088  ;;  %14108 = vpow2.f32 %v8061_v9  ;;  %9712 = vmatpush1.bf16.msra.mxu1 %v13401_v15  ;;  %v20856_v10 = vld [vmem:[#allocation113_spill] sm:$0xff]  ;;  %v20857_v9 = vld [vmem:[#allocation114_spill] sm:$0xff]  ;;  %v12035_v46 = vmul.f32 -1.702, %v19209_v25 }
 0xb8d   : > { %v14091_v23 = vpop.eup %14090  ;;  %v19217_v21 = vmul.f32 %v14089_v19, %v20855_v24  ;;  %14110 = vpow2.f32 %v8065_v20  ;;  %9794 = vmatprep.subr.bf16.mxu1 %v13406_v54  ;;  %v19221_v1 = vmul.f32 %v14083_v45, %v20856_v10  ;;  %v20858_v15 = vld [vmem:[#allocation86_spill] sm:$0xff]  ;;  %v20860_v54 = vld [vmem:[#allocation139_spill] sm:$0xff] }
 0xb8e   : > { %v14093_v57 = vpop.eup %14092  ;;  %v19224_v44 = vmul.f32 %v14091_v23, %v20857_v9  ;;  %14112 = vpow2.f32 %v8075_v18  ;;  %v19228_v56 = vmul.f32 %v14085_v58, %v20858_v15  ;;  %v20859_v19 = vld [vmem:[#allocation90_spill] sm:$0xff]  ;;  %v20863_v18 = vld [vmem:[#allocation85_spill] sm:$0xff]  ;;  %v20864_v9 = vld [vmem:[#allocation96_spill] sm:$0xff]  ;;  %v20865_v58 = vpack.c.bf16 %v18895_v3, %v18829_v55 }
 0xb8f   : > { %v14095_v28 = vpop.eup %14094  ;;  %v19231_v20 = vmul.f32 %v14093_v57, %v20859_v19  ;;  %14114 = vpow2.f32 %v8079_v63  ;;  %v20861_v38 = vld [vmem:[#allocation138_spill] sm:$0xff]  ;;  %v8783_v23 = vpack.c.bf16 %v19217_v21, %v19214_v2  ;;  %v19239_v10 = vmul.f32 %v14087_v16, %v20863_v18  ;;  %v13448_v2 = vld [vmem:[%s15449_s22 + $0x3e4] ss:$8 sps:$4 sm:$0xff]  }
 0xb90   : > { %v20862_v45 = vpack.c.bf16 %v20860_v54, %v20861_v38  ;;  %v14097_v24 = vpop.eup %14096  ;;  %v19242_v50 = vmul.f32 %v14095_v28, %v20864_v9  ;;  %14116 = vpow2.f32 %v8077_v8  ;;  %v13407_v63 = vld [vmem:[%s15449_s22 + $0x310] ss:$8 sps:$4 sm:$0xff]   ;;  %v8785_v57 = vpack.c.bf16 %v19224_v44, %v19221_v1  ;;  %v13412_v54 = vld [vmem:[%s15449_s22 + $0x324] ss:$8 sps:$4 sm:$0xff]   ;;  %v13410_v9 = vld [vmem:[%s15449_s22 + $0x320] ss:$8 sps:$4 sm:$0xff]  }
 0xb91   : > { %v14099_v15 = vpop.eup %14098  ;;  %v8200_v19 = vadd.f32 1.0, %v14097_v24  ;;  %14118 = vpow2.f32 %v8081_v26  ;;  %v8784_v16 = vpack.c.bf16 %v19231_v20, %v19228_v56  ;;  %v8095_v38 = vmul.f32 1.442695, %v12036_v43  ;;  %v20866_v24 = vld [vmem:[#allocation45_spill] sm:$0xff] }
 0xb92   : > { %9714 = vmatmul.mubr.bf16.vlgmr.msra.gmra.mrb[208].mxu1 %v20862_v45  ;;  %v14101_v28 = vpop.eup %14100  ;;  %v8202_v8 = vadd.f32 1.0, %v14099_v15  ;;  %14120 = vpow2.f32 %v8091_v29  ;;  %v8786_v55 = vpack.c.bf16 %v19242_v50, %v19239_v10  ;;  %v19257_v18 = vadd.f32 %v20866_v24, %v18354_v33  ;;  %v13415_v29 = vld [vmem:[%s15449_s22 + $0x334] ss:$8 sps:$4 sm:$0xff]   ;;  %v13416_v24 = vld [vmem:[%s15449_s22 + $0x340] ss:$8 sps:$4 sm:$0xff]  }
 0xb93   : > { %9723 = vmatprep.mubr.bf16.mxu1 %v20865_v58  ;;  %9795 = vmatpush1.bf16.msra.mxu1 %v13404_v6  ;;  %v14103_v3 = vpop.eup %14102  ;;  %14122 = vrcp.f32 %v8200_v19  ;;  %v8207_v6 = vadd.f32 1.0, %v14101_v28  ;;  %v13445_v21 = vld [vmem:[%s15449_s22 + $0x3d4] ss:$8 sps:$4 sm:$0xff]   ;;  %v20902_v50 = vld [vmem:[#allocation48_spill] sm:$0xff] }
 0xb94   : > { %9796 = vmatprep.subr.bf16.mxu1 %v13409_v36  ;;  %v14105_v45 = vpop.eup %14104  ;;  %14124 = vrcp.f32 %v8202_v8  ;;  %v8209_v26 = vadd.f32 1.0, %v14103_v3  ;;  %v8093_v36 = vmul.f32 1.442695, %v12035_v46  ;;  %v20867_v46 = vpack.c.bf16 %v18875_v42, %v18768_v34  ;;  %v13413_v8 = vld [vmem:[%s15449_s22 + $0x330] ss:$8 sps:$4 sm:$0xff]  }
 0xb95   : > { %v14107_v58 = vpop.eup %14106  ;;  %14126 = vrcp.f32 %v8207_v6 }
 0xb96   : > { %v14109_v15 = vpop.eup %14108  ;;  %14128 = vrcp.f32 %v8209_v26 }
 0xb97   : > { %9797 = vmatpush1.bf16.msra.mxu1 %v13407_v63  ;;  %v14111_v19 = vpop.eup %14110  ;;  %v8208_v43 = vadd.f32 1.0, %v14109_v15  ;;  %14130 = vpow2.f32 %v8095_v38  ;;  %v12037_v63 = vmul.f32 -1.702, %v19257_v18  ;;  %v13418_v38 = vld [vmem:[%s15449_s22 + $0x344] ss:$8 sps:$4 sm:$0xff]  }
 0xb98   : > { %9798 = vmatprep.subr.bf16.mxu1 %v13412_v54  ;;  %v14113_v28 = vpop.eup %14112  ;;  %v8210_v33 = vadd.f32 1.0, %v14111_v19  ;;  %14132 = vpow2.f32 %v8093_v36  ;;  %v20868_v54 = vpack.c.bf16 %v19010_v35, %v18934_v12  ;;  %v13421_v35 = vld [vmem:[%s15449_s22 + $0x354] ss:$8 sps:$4 sm:$0xff]  }
 0xb99   : > { %v14115_v3 = vpop.eup %14114  ;;  %14134 = vrcp.f32 %v8208_v43  ;;  %v8215_v6 = vadd.f32 1.0, %v14113_v28  ;;  %v8097_v36 = vmul.f32 1.442695, %v12037_v63 }
 0xb9a   : > { %9724 = vmatmul.mubr.bf16.gmra.mrb[212].mxu1 %v20867_v46  ;;  %v14117_v34 = vpop.eup %14116  ;;  %14136 = vrcp.f32 %v8210_v33  ;;  %v8217_v19 = vadd.f32 1.0, %v14115_v3  ;;  %v20870_v33 = vld [vmem:[#allocation95_spill] sm:$0xff]  ;;  %v13419_v3 = vld [vmem:[%s15449_s22 + $0x350] ss:$8 sps:$4 sm:$0xff]  }
 0xb9b   : > { %9733 = vmatprep.mubr.bf16.mxu1 %v20868_v54  ;;  %9799 = vmatpush1.bf16.msra.mxu1 %v13410_v9  ;;  %v14119_v42 = vpop.eup %14118  ;;  %14138 = vrcp.f32 %v8215_v6  ;;  %v8216_v46 = vadd.f32 1.0, %v14117_v34  ;;  %v19276_v63 = vmul.f32 %v14105_v45, %v20870_v33  ;;  %v20871_v54 = vld [vmem:[#allocation133_spill] sm:$0xff]  ;;  %v20872_v6 = vpack.c.bf16 %v19074_v40, %v19053_v60  ;;  %v20873_v34 = vld [vmem:[#allocation122_spill] sm:$0xff]  ;;  %v13424_v45 = vld [vmem:[%s15449_s22 + $0x364] ss:$8 sps:$4 sm:$0xff]  }
 0xb9c   : > { %9800 = vmatprep.subr.bf16.mxu1 %v13415_v29  ;;  %v14121_v26 = vpop.eup %14120  ;;  %v20869_v29 = vpack.c.bf16 %v18968_v37, %v18913_v61  ;;  %v20874_v61 = vld [vmem:[#allocation127_spill] sm:$0xff]  ;;  %v20876_v33 = vld [vmem:[#allocation128_spill] sm:$0xff] }
 0xb9d   : > { %v14123_v15 = vpop.eup %14122  ;;  %v8223_v12 = vadd.f32 1.0, %v14121_v26  ;;  %v19286_v26 = vmul.f32 %v14107_v58, %v20873_v34 }
 0xb9e   : > { %v14125_v9 = vpop.eup %14124 }
 0xb9f   : > { %9801 = vmatpush1.bf16.msra.mxu1 %v13413_v8  ;;  %v14127_v43 = vpop.eup %14126  ;;  %14140 = vrcp.f32 %v8223_v12 }
 0xba0   : > { %9802 = vmatprep.subr.bf16.mxu1 %v13418_v38  ;;  %v14129_v28 = vpop.eup %14128  ;;  %v19279_v8 = vmul.f32 %v14127_v43, %v20871_v54  ;;  %14142 = vpow2.f32 %v8097_v36 }
 0xba1   : > { %v14131_v38 = vpop.eup %14130  ;;  %v19289_v37 = vmul.f32 %v14129_v28, %v20874_v61  ;;  %14144 = vrcp.f32 %v8217_v19  ;;  %v20877_v19 = vld [vmem:[#allocation132_spill] sm:$0xff] }
 0xba2   : > { %9734 = vmatmul.mubr.bf16.gmra.mrb[216].mxu1 %v20869_v29  ;;  %v14133_v12 = vpop.eup %14132  ;;  %v8225_v43 = vadd.f32 1.0, %v14131_v38  ;;  %v8791_v60 = vpack.c.bf16 %v19279_v8, %v19276_v63  ;;  %14146 = vrcp.f32 %v8216_v46  ;;  %v20875_v29 = vld [vmem:[#allocation125_spill] sm:$0xff]  ;;  %v20883_v8 = vld [vmem:[#allocation140_spill] sm:$0xff] }
 0xba3   : > { %9743 = vmatprep.mubr.bf16.mxu1 %v20872_v6  ;;  %9803 = vmatpush1.bf16.msra.mxu1 %v13416_v24  ;;  %v14135_v40 = vpop.eup %14134  ;;  %v8224_v36 = vadd.f32 1.0, %v14133_v12  ;;  %v8793_v58 = vpack.c.bf16 %v19289_v37, %v19286_v26  ;;  %v8584_v28 = vmul.f32 %v14123_v15, %v20875_v29  ;;  %v19300_v6 = vmul.f32 %v14125_v9, %v20877_v19  ;;  %v13427_v46 = vld [vmem:[%s15449_s22 + $0x374] ss:$8 sps:$4 sm:$0xff]  }
 0xba4   : > { %9804 = vmatprep.subr.bf16.mxu1 %v13421_v35  ;;  %v14137_v24 = vpop.eup %14136  ;;  %v8592_v54 = vmul.f32 %v14135_v40, %v20876_v33  ;;  %14148 = vrcp.f32 %v8225_v43  ;;  %v13422_v35 = vld [vmem:[%s15449_s22 + $0x360] ss:$8 sps:$4 sm:$0xff]   ;;  %v8218_v12 = vadd.f32 1.0, %v14119_v42  ;;  %v20878_v15 = vpack.c.bf16 %v19062_v48, %v19047_v52  ;;  %v13430_v43 = vld [vmem:[%s15449_s22 + $0x384] ss:$8 sps:$4 sm:$0xff]   ;;  %v20882_v63 = vld [vmem:[#allocation109_spill] sm:$0xff] }
 0xba5   : > { %v19303_v38 = vmul.f32 %v14137_v24, %v19040_v7  ;;  %14150 = vrcp.f32 %v8224_v36  ;;  %v14139_v61 = vpop.eup %14138  ;;  %v20879_v9 = vpack.c.bf16 %v19171_v27, %v19168_v5  ;;  %v13425_v7 = vld [vmem:[%s15449_s22 + $0x370] ss:$8 sps:$4 sm:$0xff]   ;;  %v13428_v24 = vld [vmem:[%s15449_s22 + $0x380] ss:$8 sps:$4 sm:$0xff]   ;;  %v13433_v27 = vld [vmem:[%s15449_s22 + $0x394] ss:$8 sps:$4 sm:$0xff]  }
 0xba6   : > { %v8792_v34 = vpack.c.bf16 %v8592_v54, %v8584_v28  ;;  %v8599_v42 = vmul.f32 %v14139_v61, %v19044_v30  ;;  %14152 = vrcp.f32 %v8218_v12  ;;  %v13442_v12 = vld [vmem:[%s15449_s22 + $0x3c4] ss:$8 sps:$4 sm:$0xff]  }
 0xba7   : > { %9805 = vmatpush1.bf16.msra.mxu1 %v13419_v3  ;;  %v8794_v3 = vpack.c.bf16 %v19303_v38, %v19300_v6  ;;  %v20903_v38 = vld [vmem:[#allocation51_spill] sm:$0xff] }
 0xba8   : > { %9806 = vmatprep.subr.bf16.mxu1 %v13424_v45 }
 0xba9   : > { %v14141_v45 = vpop.eup %14140 }
 0xbaa   : > { %9744 = vmatmul.mubr.bf16.gmra.mrb[220].mxu1 %v20878_v15  ;;  %v14143_v40 = vpop.eup %14142  ;;  %v8607_v48 = vmul.f32 %v14141_v45, %v19175_v0  ;;  %v20880_v0 = vpack.c.bf16 %v19117_v62, %v19110_v51  ;;  %v13434_v51 = vld [vmem:[%s15449_s22 + $0x3a0] ss:$8 sps:$4 sm:$0xff]   ;;  %v20885_v45 = vpack.c.bf16 %v18905_v49, %v18856_v53  ;;  %v20897_v49 = vpack.c.bf16 %v19183_v22, %v19180_v14 }
 0xbab   : > { %9753 = vmatprep.mubr.bf16.mxu1 %v20879_v9  ;;  %9807 = vmatpush1.bf16.msra.mxu1 %v13422_v35  ;;  %v8226_v52 = vadd.f32 1.0, %v14143_v40  ;;  %v14145_v36 = vpop.eup %14144  ;;  %v13440_v9 = vld [vmem:[%s15449_s22 + $0x3c0] ss:$8 sps:$4 sm:$0xff]   ;;  %v20889_v40 = vld [vmem:[#allocation89_spill] sm:$0xff] }
 0xbac   : > { %9808 = vmatprep.subr.bf16.mxu1 %v13427_v46  ;;  %v8799_v29 = vpack.c.bf16 %v8607_v48, %v8599_v42  ;;  %v14147_v5 = vpop.eup %14146  ;;  %v8601_v54 = vmul.f32 %v14145_v36, %v19142_v39  ;;  %v13431_v46 = vld [vmem:[%s15449_s22 + $0x390] ss:$8 sps:$4 sm:$0xff]   ;;  %v13436_v39 = vld [vmem:[%s15449_s22 + $0x3a4] ss:$8 sps:$4 sm:$0xff]   ;;  %v8803_v22 = vld [vmem:[%s15452_s5] sm:$0x3] }
 0xbad   : > { %14154 = vrcp.f32 %v8226_v52  ;;  %v8600_v35 = vmul.f32 %v14147_v5, %v19151_v47  ;;  %v13439_v47 = vld [vmem:[%s15449_s22 + $0x3b4] ss:$8 sps:$4 sm:$0xff]   ;;  %v20891_v48 = vld [vmem:[#allocation100_spill] sm:$0xff]  ;;  %v19398_v10 = vrot.slane %v8803_v22, %v20902_v50 }
 0xbae   : > { %v14149_v28 = vpop.eup %14148  ;;  %v20892_v52 = vld [vmem:[#allocation94_spill] sm:$0xff] }
 0xbaf   : > { %9809 = vmatpush1.bf16.msra.mxu1 %v13425_v7  ;;  %v14151_v33 = vpop.eup %14150  ;;  %v8609_v30 = vmul.f32 %v14149_v28, %v19197_v32  ;;  %v13449_v7 = vld [vmem:[%s15449_s22 + $0x3f0] ss:$8 sps:$4 sm:$0xff]   ;;  %v20893_v36 = vpack.c.bf16 %v20891_v48, %v20892_v52 }
 0xbb0   : > { %9810 = vmatprep.subr.bf16.mxu1 %v13430_v43  ;;  %v8608_v19 = vmul.f32 %v14151_v33, %v19209_v25  ;;  %v14153_v62 = vpop.eup %14152  ;;  %v20886_v43 = vpack.c.bf16 %v20837_v17, %v20836_v4  ;;  %v20898_v4 = vld [vmem:[#allocation129_spill] sm:$0xff]  ;;  %v20899_v17 = vld [vmem:[#allocation98_spill] sm:$0xff] }
 0xbb1   : > { %v8801_v61 = vpack.c.bf16 %v8609_v30, %v8601_v54  ;;  %v8602_v56 = vmul.f32 %v14153_v62, %v19155_v13  ;;  %v13443_v13 = vld [vmem:[%s15449_s22 + $0x3d0] ss:$8 sps:$4 sm:$0xff]  }
 0xbb2   : > { %9754 = vmatmul.mubr.bf16.gmra.mrb[224].mxu1 %v20880_v0  ;;  %v8800_v32 = vpack.c.bf16 %v8608_v19, %v8600_v35  ;;  %v20905_v28 = vld [vmem:[#allocation53_spill] sm:$0xff]  ;;  %v20906_v54 = vld [vmem:[#allocation54_spill] sm:$0xff] }
 0xbb3   : > { %9763 = vmatprep.mubr.bf16.mxu1 %v8784_v16  ;;  %9811 = vmatpush1.bf16.msra.mxu1 %v13428_v24  ;;  %v13437_v16 = vld [vmem:[%s15449_s22 + $0x3b0] ss:$8 sps:$4 sm:$0xff]  }
 0xbb4   : > { %9812 = vmatprep.subr.bf16.mxu1 %v13433_v27  ;;  %v20894_v24 = vld [vmem:[#allocation93_spill] sm:$0xff] }
 0xbb7   : > { %9813 = vmatpush1.bf16.msra.mxu1 %v13431_v46  ;;  %v14155_v25 = vpop.eup %14154 }
 0xbb8   : > { %9814 = vmatprep.subr.bf16.mxu1 %v13436_v39  ;;  %v8610_v20 = vmul.f32 %v14155_v25, %v19257_v18  ;;  %v13451_v18 = vld [vmem:[%s15449_s22 + $0x3f4] ss:$8 sps:$4 sm:$0xff]  }
 0xbba   : > { %9764 = vmatmul.mubr.bf16.gmra.mrb[228].mxu1 %v8783_v23  ;;  %v8802_v15 = vpack.c.bf16 %v8610_v20, %v8602_v56  ;;  %v13446_v23 = vld [vmem:[%s15449_s22 + $0x3e0] ss:$8 sps:$4 sm:$0xff]   ;;  %v20909_v20 = vld [vmem:[#allocation57_spill] sm:$0xff] }
 0xbbb   : > { %9773 = vmatprep.mubr.bf16.mxu1 %v8792_v34  ;;  %9815 = vmatpush1.bf16.msra.mxu1 %v13434_v51  ;;  %v20881_v34 = vpack.c.bf16 %v20835_v31, %v18742_v41  ;;  %v20887_v41 = vpack.c.bf16 %v19018_v11, %v18960_v59  ;;  %v20888_v31 = vld [vmem:[#allocation126_spill] sm:$0xff]  ;;  %v20900_v59 = vpack.c.bf16 %v20898_v4, %v20899_v17  ;;  %v20916_v17 = vld [vmem:[#allocation64_spill] sm:$0xff] }
 0xbbc   : > { %9816 = vmatprep.subr.bf16.mxu1 %v13439_v47  ;;  %v20890_v42 = vpack.c.bf16 %v20888_v31, %v20889_v40  ;;  %v20901_v11 = vld [vmem:[#allocation46_spill] sm:$0xff]  ;;  %v20908_v47 = vld [vmem:[#allocation56_spill] sm:$0xff] }
 0xbbd   : > { %v19395_v14 = vrot.slane %v8803_v22, %v20901_v11  ;;  %v20914_v31 = vld [vmem:[#allocation62_spill] sm:$0xff]  ;;  %v20917_v11 = vld [vmem:[#allocation65_spill] sm:$0xff] }
 0xbbf   : > { %9817 = vmatpush1.bf16.msra.mxu1 %v13437_v16 }
 0xbc0   : > { %9818 = vmatprep.subr.bf16.mxu1 %v13442_v12  ;;  %v20910_v12 = vld [vmem:[#allocation58_spill] sm:$0xff] }
 0xbc2   : > { %9774 = vmatmul.mubr.bf16.gmra.mrb[232].mxu1 %v8791_v60  ;;  %v20884_v60 = vpack.c.bf16 %v20882_v63, %v20883_v8  ;;  %v20912_v8 = vld [vmem:[#allocation60_spill] sm:$0xff] }
 0xbc3   : > { %9783 = vmatprep.mubr.bf16.mxu1 %v8800_v32  ;;  %9819 = vmatpush1.bf16.msra.mxu1 %v13440_v9 }
 0xbc4   : > { %9820 = vmatprep.subr.bf16.mxu1 %v13445_v21 }
 0xbc7   : > { %9821 = vmatpush1.bf16.msra.mxu1 %v13443_v13 }
 0xbc8   : > { %9822 = vmatprep.subr.bf16.mxu1 %v13448_v2 }
 0xbca   : > { %9784 = vmatmul.mubr.bf16.gmra.mrb[236].mxu1 %v8799_v29  ;;  %v20895_v29 = vld [vmem:[#allocation136_spill] sm:$0xff] }
 0xbcb   : > { %9823 = vmatpush1.bf16.msra.mxu1 %v13446_v23  ;;  %9826 = vmatprep.mubr.bf16.mxu1 %v20881_v34  ;;  %v20896_v53 = vpack.c.bf16 %v20894_v24, %v20895_v29  ;;  %v20915_v29 = vld [vmem:[#allocation63_spill] sm:$0xff] }
 0xbcc   : > { %9824 = vmatprep.subr.bf16.mxu1 %v13451_v18  ;;  %v20911_v18 = vld [vmem:[#allocation59_spill] sm:$0xff] }
 0xbcf   : > { %9825 = vmatpush1.bf16.msra.mxu1 %v13449_v7 }
 0xbd2   : > { %9827 = vmatmul.mubr.bf16.vlgmr.msra.gmra.mrb[208].mxu1 %v20884_v60 }
 0xbd3   : > { %9836 = vmatprep.mubr.bf16.mxu1 %v20885_v45 }
 0xbda   : > { %9837 = vmatmul.mubr.bf16.gmra.mrb[212].mxu1 %v20886_v43  ;;  %v20913_v43 = vld [vmem:[#allocation61_spill] sm:$0xff] }
 0xbdb   : > { %9846 = vmatprep.mubr.bf16.mxu1 %v20887_v41 }
 0xbe2   : > { %9847 = vmatmul.mubr.bf16.gmra.mrb[216].mxu1 %v20890_v42 }
 0xbe3   : > { %9856 = vmatprep.mubr.bf16.mxu1 %v20893_v36 }
 0xbea   : > { %9857 = vmatmul.mubr.bf16.gmra.mrb[220].mxu1 %v20896_v53 }
 0xbeb   : > { %9866 = vmatprep.mubr.bf16.mxu1 %v20897_v49 }
 0xbf2   : > { %9867 = vmatmul.mubr.bf16.gmra.mrb[224].mxu1 %v20900_v59 }
 0xbf3   : > { %9876 = vmatprep.mubr.bf16.mxu1 %v8786_v55 }
 0xbfa   : > { %9877 = vmatmul.mubr.bf16.gmra.mrb[228].mxu1 %v8785_v57 }
 0xbfb   : > { %9886 = vmatprep.mubr.bf16.mxu1 %v8794_v3 }
 0xc02   : > { %9887 = vmatmul.mubr.bf16.gmra.mrb[232].mxu1 %v8793_v58  ;;  %v20904_v58 = vld [vmem:[#allocation52_spill] sm:$0xff] }
 0xc03   : > { %9896 = vmatprep.mubr.bf16.mxu1 %v8802_v15 }
 0xc0a   : > { %9897 = vmatmul.mubr.bf16.gmra.mrb[236].mxu1 %v8801_v61  ;;  %v20907_v61 = vld [vmem:[#allocation55_spill] sm:$0xff] }
 0xca5   : > { %v9828_v55 = vpop.f32.mrb[208].mxu1 }
 0xca6   : > { %v12748_v1 = vadd.f32 %v9828_v55, %v19395_v14  ;;  %v9830_v44 = vpop.f32.mrb[209].mxu1  ;;  %v20918_v55 = vld [vmem:[#allocation66_spill] sm:$0xff] }
 0xca7   : > { %v12749_v57 = vadd.f32 %v9830_v44, %v19398_v10  ;;  %v9832_v6 = vpop.f32.mrb[210].mxu1 }
 0xca8   : > { %v19403_v3 = vadd.f32 %v12748_v1, %v20903_v38  ;;  %v12750_v26 = vadd.f32 %v9832_v6, %v19395_v14  ;;  %v9834_v37 = vpop.f32.mrb[211].mxu1 }
 0xca9   : > { %v19407_v5 = vadd.f32 %v12749_v57, %v20904_v58  ;;  %v12751_v27 = vadd.f32 %v9834_v37, %v19398_v10  ;;  %v20919_v37 = vld [vmem:[#allocation67_spill] sm:$0xff] }
 0xcaa   : > { %9939 = vst [vmem:[#allocation2] sm:$0xff] %v19403_v3  ;;  %v19412_v33 = vadd.f32 %v12750_v26, %v20905_v28 }
 0xcab   : > { %9940 = vst [vmem:[#allocation2 + $0x8] sm:$0xff] %v19407_v5  ;;  %v19416_v30 = vadd.f32 %v12751_v27, %v20906_v54  ;;  %v20920_v54 = vld [vmem:[#allocation68_spill] sm:$0xff] }
 0xcac   : > { %9941 = vst [vmem:[#allocation2 + $0x10] sm:$0xff] %v19412_v33 }
 0xcad   : > { %9942 = vst [vmem:[#allocation2 + $0x18] sm:$0xff] %v19416_v30  ;;  %v9838_v0 = vpop.f32.mrb[212].mxu1 }
 0xcae   : > { %v12752_v35 = vadd.f32 %v9838_v0, %v19395_v14  ;;  %v9840_v19 = vpop.f32.mrb[213].mxu1 }
 0xcaf   : > { %v12753_v46 = vadd.f32 %v9840_v19, %v19398_v10  ;;  %v9842_v39 = vpop.f32.mrb[214].mxu1  ;;  %v20921_v19 = vld [vmem:[#allocation69_spill] sm:$0xff] }
 0xcb0   : > { %v19423_v32 = vadd.f32 %v12752_v35, %v20907_v61  ;;  %v12754_v51 = vadd.f32 %v9842_v39, %v19395_v14  ;;  %v9844_v62 = vpop.f32.mrb[215].mxu1  ;;  %v20922_v39 = vld [vmem:[#allocation70_spill] sm:$0xff] }
 0xcb1   : > { %v19427_v25 = vadd.f32 %v12753_v46, %v20908_v47  ;;  %v12755_v56 = vadd.f32 %v9844_v62, %v19398_v10 }
 0xcb2   : > { %9943 = vst [vmem:[#allocation2 + $0x20] sm:$0xff] %v19423_v32  ;;  %v19432_v16 = vadd.f32 %v12754_v51, %v20909_v20 }
 0xcb3   : > { %9944 = vst [vmem:[#allocation2 + $0x28] sm:$0xff] %v19427_v25  ;;  %v19436_v15 = vadd.f32 %v12755_v56, %v20910_v12  ;;  %v20923_v12 = vld [vmem:[#allocation71_spill] sm:$0xff] }
 0xcb4   : > { %9945 = vst [vmem:[#allocation2 + $0x30] sm:$0xff] %v19432_v16 }
 0xcb5   : > { %9946 = vst [vmem:[#allocation2 + $0x38] sm:$0xff] %v19436_v15  ;;  %v9848_v9 = vpop.f32.mrb[216].mxu1 }
 0xcb6   : > { %v12756_v21 = vadd.f32 %v9848_v9, %v19395_v14  ;;  %v9850_v13 = vpop.f32.mrb[217].mxu1 }
 0xcb7   : > { %v12757_v2 = vadd.f32 %v9850_v13, %v19398_v10  ;;  %v9852_v23 = vpop.f32.mrb[218].mxu1 }
 0xcb8   : > { %v19443_v34 = vadd.f32 %v12756_v21, %v20911_v18  ;;  %v12758_v7 = vadd.f32 %v9852_v23, %v19395_v14  ;;  %v9854_v63 = vpop.f32.mrb[219].mxu1 }
 0xcb9   : > { %v19447_v60 = vadd.f32 %v12757_v2, %v20912_v8  ;;  %v12759_v45 = vadd.f32 %v9854_v63, %v19398_v10  ;;  %v20924_v2 = vld [vmem:[#allocation72_spill] sm:$0xff]  ;;  %v20926_v8 = vld [vmem:[#allocation74_spill] sm:$0xff] }
 0xcba   : > { %9947 = vst [vmem:[#allocation2 + $0x40] sm:$0xff] %v19443_v34  ;;  %v19452_v41 = vadd.f32 %v12758_v7, %v20913_v43  ;;  %v20925_v7 = vld [vmem:[#allocation73_spill] sm:$0xff] }
 0xcbb   : > { %9948 = vst [vmem:[#allocation2 + $0x48] sm:$0xff] %v19447_v60  ;;  %v19456_v40 = vadd.f32 %v12759_v45, %v20914_v31 }
 0xcbc   : > { %9949 = vst [vmem:[#allocation2 + $0x50] sm:$0xff] %v19452_v41 }
 0xcbd   : > { %9950 = vst [vmem:[#allocation2 + $0x58] sm:$0xff] %v19456_v40  ;;  %v9858_v42 = vpop.f32.mrb[220].mxu1 }
 0xcbe   : > { %v12760_v48 = vadd.f32 %v9858_v42, %v19395_v14  ;;  %v9860_v52 = vpop.f32.mrb[221].mxu1 }
 0xcbf   : > { %v12761_v36 = vadd.f32 %v9860_v52, %v19398_v10  ;;  %v9862_v24 = vpop.f32.mrb[222].mxu1 }
 0xcc0   : > { %v19463_v53 = vadd.f32 %v12760_v48, %v20915_v29  ;;  %v12762_v49 = vadd.f32 %v9862_v24, %v19395_v14  ;;  %v9864_v4 = vpop.f32.mrb[223].mxu1 }
 0xcc1   : > { %v19467_v59 = vadd.f32 %v12761_v36, %v20916_v17  ;;  %v12763_v22 = vadd.f32 %v9864_v4, %v19398_v10  ;;  %v20927_v36 = vld [vmem:[#allocation75_spill] sm:$0xff]  ;;  %v20928_v4 = vld [vmem:[#allocation76_spill] sm:$0xff] }
 0xcc2   : > { %9951 = vst [vmem:[#allocation2 + $0x60] sm:$0xff] %v19463_v53  ;;  %v19472_v50 = vadd.f32 %v12762_v49, %v20917_v11  ;;  %v20929_v11 = vld [vmem:[#allocation77_spill] sm:$0xff] }
 0xcc3   : > { %9952 = vst [vmem:[#allocation2 + $0x68] sm:$0xff] %v19467_v59  ;;  %v19476_v1 = vadd.f32 %v12763_v22, %v20918_v55 }
 0xcc4   : > { %9953 = vst [vmem:[#allocation2 + $0x70] sm:$0xff] %v19472_v50 }
 0xcc5   : > { %9954 = vst [vmem:[#allocation2 + $0x78] sm:$0xff] %v19476_v1  ;;  %v9868_v44 = vpop.f32.mrb[224].mxu1 }
 0xcc6   : > { %v12764_v57 = vadd.f32 %v9868_v44, %v19395_v14  ;;  %v9870_v6 = vpop.f32.mrb[225].mxu1  ;;  %v20930_v44 = vld [vmem:[#allocation78_spill] sm:$0xff] }
 0xcc7   : > { %v12765_v38 = vadd.f32 %v9870_v6, %v19398_v10  ;;  %v9872_v26 = vpop.f32.mrb[226].mxu1 }
 0xcc8   : > { %v19483_v58 = vadd.f32 %v12764_v57, %v20919_v37  ;;  %v12766_v27 = vadd.f32 %v9872_v26, %v19395_v14  ;;  %v9874_v28 = vpop.f32.mrb[227].mxu1 }
 0xcc9   : > { %v19487_v0 = vadd.f32 %v12765_v38, %v20920_v54  ;;  %v12767_v35 = vadd.f32 %v9874_v28, %v19398_v10  ;;  %v20931_v28 = vld [vmem:[#allocation79_spill] sm:$0xff] }
 0xcca   : > { %9955 = vst [vmem:[#allocation2 + $0x80] sm:$0xff] %v19483_v58  ;;  %v19492_v46 = vadd.f32 %v12766_v27, %v20921_v19 }
 0xccb   : > { %9956 = vst [vmem:[#allocation2 + $0x88] sm:$0xff] %v19487_v0  ;;  %v19496_v61 = vadd.f32 %v12767_v35, %v20922_v39  ;;  %v20932_v39 = vld [vmem:[#allocation80_spill] sm:$0xff] }
 0xccc   : > { %9957 = vst [vmem:[#allocation2 + $0x90] sm:$0xff] %v19492_v46 }
 0xccd   : > { %9958 = vst [vmem:[#allocation2 + $0x98] sm:$0xff] %v19496_v61  ;;  %v9878_v51 = vpop.f32.mrb[228].mxu1 }
 0xcce   : > { %v12768_v62 = vadd.f32 %v9878_v51, %v19395_v14  ;;  %v9880_v47 = vpop.f32.mrb[229].mxu1 }
 0xccf   : > { %v12769_v56 = vadd.f32 %v9880_v47, %v19398_v10  ;;  %v9882_v20 = vpop.f32.mrb[230].mxu1  ;;  %v20933_v47 = vld [vmem:[#allocation81_spill] sm:$0xff] }
 0xcd0   : > { %v19503_v9 = vadd.f32 %v12768_v62, %v20923_v12  ;;  %v12770_v21 = vadd.f32 %v9882_v20, %v19395_v14  ;;  %v9884_v13 = vpop.f32.mrb[231].mxu1  ;;  %v20934_v20 = vld [vmem:[#allocation82_spill] sm:$0xff] }
 0xcd1   : > { %v19507_v23 = vadd.f32 %v12769_v56, %v20924_v2  ;;  %v12771_v18 = vadd.f32 %v9884_v13, %v19398_v10  ;;  %v14788_v13 = vmov (!%p12166_p3), 1966171168  }
 0xcd2   : > { %9959 = vst [vmem:[#allocation2 + $0xa0] sm:$0xff] %v19503_v9  ;;  %v19512_v63 = vadd.f32 %v12770_v21, %v20925_v7  ;;  %v14787_v21 = vmov (!%p12166_p3), 0   ;;  %v9979_v2 = vunpack.c.l.s4 (!%p12166_p3), %v14788_v13 }
 0xcd3   : > { %9960 = vst [vmem:[#allocation2 + $0xa8] sm:$0xff] %v19507_v23  ;;  %v19516_v45 = vadd.f32 %v12771_v18, %v20926_v8  ;;  %14206 = vset.pattern.permute.xlu1 (!%p12166_p3), %v14787_v21  ;;  %14190 = vset.pattern.permute.xlu0 (!%p12166_p3), %v14787_v21  ;;  %v14789_v21 = vmov (!%p12166_p3), 0.0  }
 0xcd4   : > { %9961 = vst [vmem:[#allocation2 + $0xb0] sm:$0xff] %v19512_v63  ;;  %v9980_v18 = vunpack.c.0.s8 (!%p12166_p3), %v9979_v2 }
 0xcd5   : > { %9962 = vst [vmem:[#allocation2 + $0xb8] sm:$0xff] %v19516_v45  ;;  %v9888_v43 = vpop.f32.mrb[232].mxu1 }
 0xcd6   : > { %v12772_v31 = vadd.f32 %v9888_v43, %v19395_v14  ;;  %v9890_v42 = vpop.f32.mrb[233].mxu1  ;;  %v20936_v43 = vld [vmem:[#allocation44_spill] sm:$0xff] (!%p12166_p3) }
 0xcd7   : > { %v12773_v48 = vadd.f32 %v9890_v42, %v19398_v10  ;;  %v9892_v52 = vpop.f32.mrb[234].mxu1 }
 0xcd8   : > { %v19523_v24 = vadd.f32 %v12772_v31, %v20927_v36  ;;  %v12774_v29 = vadd.f32 %v9892_v52, %v19395_v14  ;;  %v9894_v49 = vpop.f32.mrb[235].mxu1  ;;  %v9983_v31 = vsub.s32 (!%p12166_p3), %v9980_v18, %v20936_v43 }
 0xcd9   : > { %v19527_v17 = vadd.f32 %v12773_v48, %v20928_v4  ;;  %v12775_v22 = vadd.f32 %v9894_v49, %v19398_v10 }
 0xcda   : > { %9963 = vst [vmem:[#allocation2 + $0xc0] sm:$0xff] %v19523_v24  ;;  %v19532_v55 = vadd.f32 %v12774_v29, %v20929_v11 }
 0xcdb   : > { %9964 = vst [vmem:[#allocation2 + $0xc8] sm:$0xff] %v19527_v17  ;;  %v19536_v57 = vadd.f32 %v12775_v22, %v20930_v44 }
 0xcdc   : > { %9965 = vst [vmem:[#allocation2 + $0xd0] sm:$0xff] %v19532_v55 }
 0xcdd   : > { %9966 = vst [vmem:[#allocation2 + $0xd8] sm:$0xff] %v19536_v57  ;;  %v9898_v6 = vpop.f32.mrb[236].mxu1 }
 0xcde   : > { %v12776_v38 = vadd.f32 %v9898_v6, %v19395_v14  ;;  %v9900_v26 = vpop.f32.mrb[237].mxu1 }
 0xcdf   : > { %v12777_v37 = vadd.f32 %v9900_v26, %v19398_v10  ;;  %v9902_v27 = vpop.f32.mrb[238].mxu1  ;;  %9974 = sbr.rel (%p12166_p3) target bundleno = 4117 (0x1015), region = 128 }
 0xce0   : > { %v19543_v54 = vadd.f32 %v12776_v38, %v20931_v28  ;;  %v12778_v35 = vadd.f32 %v9902_v27, %v19395_v14  ;;  %v9904_v19 = vpop.f32.mrb[239].mxu1  ;;  %v9975_v14 = vld [vmem:[%s15471_s4] sm:$0xff] (!%p12166_p3)  ;;  %v20937_v28 = vld [vmem:[#allocation46_spill] sm:$0xff] (!%p12166_p3) }
 0xce1   : > { %v19547_v51 = vadd.f32 %v12777_v37, %v20932_v39  ;;  %v12779_v62 = vadd.f32 %v9904_v19, %v19398_v10  ;;  %v9976_v10 = vld [vmem:[%s15471_s4 + $0x8] sm:$0xff] (!%p12166_p3)  ;;  %v9977_v8 = vcombine.high (!%p12166_p3), %v9975_v14, %v9975_v14  ;;  %v9984_v42 = vrot.slane (!%p12166_p3), %v9975_v14, %v9983_v31 }
 0xce2   : > { %9967 = vst [vmem:[#allocation2 + $0xe0] sm:$0xff] %v19543_v54  ;;  %v19552_v56 = vadd.f32 %v12778_v35, %v20933_v47  ;;  %v10026_v7 = vcombine.high (!%p12166_p3), %v9976_v10, %v9976_v10  ;;  %v10033_v48 = vrot.slane (!%p12166_p3), %v9976_v10, %v9983_v31 }
 0xce3   : > { %9968 = vst [vmem:[#allocation2 + $0xe8] sm:$0xff] %v19547_v51  ;;  %v19556_v12 = vadd.f32 %v12779_v62, %v20934_v20  ;;  %v9991_v52 = vrot.slane (!%p12166_p3), %v9977_v8, %v9983_v31  ;;  %v10000_v29 = vrot.slane (!%p12166_p3), %v9984_v42, %v9983_v31  ;;  %v9992_v4 = vcombine.high (!%p12166_p3), %v9984_v42, %v9984_v42 }
 0xce4   : > { %9969 = vst [vmem:[#allocation2 + $0xf0] sm:$0xff] %v19552_v56  ;;  %v10040_v36 = vrot.slane (!%p12166_p3), %v10026_v7, %v9983_v31  ;;  %v10049_v49 = vrot.slane (!%p12166_p3), %v10033_v48, %v9983_v31  ;;  %v10041_v22 = vcombine.high (!%p12166_p3), %v10033_v48, %v10033_v48 }
 0xce5   : > { %9970 = vst [vmem:[#allocation2 + $0xf8] sm:$0xff] %v19556_v12  ;;  %v9993_v11 = vcombine.high (!%p12166_p3), %v9991_v52, %v9991_v52  ;;  %v10007_v6 = vrot.slane (!%p12166_p3), %v9991_v52, %v9983_v31  ;;  %v10022_v26 = vcombine.high (!%p12166_p3), %v10000_v29, %v10000_v29  ;;  %v10014_v27 = vrot.slane (!%p12166_p3), %v9992_v4, %v9983_v31 }
 0xce6   : > { %v10042_v44 = vcombine.high %v10040_v36, %v10040_v36  ;;  %v10056_v38 = vrot.slane %v10040_v36, %v9983_v31  ;;  %v10071_v37 = vcombine.high %v10049_v49, %v10049_v49  ;;  %v10078_v35 = vrot.slane %v10000_v29, %v20937_v28 }
 0xce7   : > { %v10063_v19 = vrot.slane %v10041_v22, %v9983_v31  ;;  %v10110_v39 = vrot.slane %v10049_v49, %v20937_v28  ;;  %v10021_v62 = vrot.slane %v9993_v11, %v9983_v31  ;;  %v10086_v20 = vrot.slane %v10022_v26, %v20937_v28 }
 0xce8   : > { %v10070_v47 = vrot.slane %v10042_v44, %v9983_v31  ;;  %v10118_v14 = vrot.slane %v10071_v37, %v20937_v28  ;;  %v10082_v10 = vrot.slane %v10014_v27, %v20937_v28  ;;  %vm10139_vm4 = vcmp.eq.s32.totalorder %v20936_v43, %v10078_v35 }
 0xce9   : > { %v12167_v13 = vsel %vm10139_vm4, 1.0, %v14789_v21  ;;  %v10114_v2 = vrot.slane %v10063_v19, %v20937_v28  ;;  %vm10147_vm5 = vcmp.eq.s32.totalorder %v20936_v43, %v10110_v39  ;;  %v10098_v18 = vrot.slane %v10021_v62, %v20937_v28 }
 0xcea   : > { %vm10141_vm6 = vcmp.eq.s32.totalorder %v20936_v43, %v10086_v20  ;;  %vm10149_vm7 = vcmp.eq.s32.totalorder %v20936_v43, %v10118_v14  ;;  %vm10140_vm8 = vcmp.eq.s32.totalorder %v20936_v43, %v10082_v10  ;;  %v12175_v7 = vsel %vm10147_vm5, 1.0, %v14789_v21 }
 0xceb   : > { %v12169_v8 = vsel %vm10141_vm6, 1.0, %v14789_v21  ;;  %v12177_v31 = vsel %vm10149_vm7, 1.0, %v14789_v21  ;;  %v12168_v42 = vsel %vm10140_vm8, 1.0, %v14789_v21  ;;  %vm10148_vm9 = vcmp.eq.s32.totalorder %v20936_v43, %v10114_v2 }
 0xcec   : > { %v14207_v48 = vpack.i.bf16 %v12177_v31, %v12169_v8  ;;  %v14191_v52 = vpack.i.bf16 %v12168_v42, %v12167_v13  ;;  %v12176_v36 = vsel %vm10148_vm9, 1.0, %v14789_v21  ;;  %v10130_v29 = vrot.slane %v10070_v47, %v20937_v28 }
 0xced   : > { %v14196_v49 = vpack.i.bf16 %v12176_v36, %v12175_v7  ;;  %vm10144_vm10 = vcmp.eq.s32.totalorder %v20936_v43, %v10098_v18  ;;  %v10094_v4 = vrot.slane %v10007_v6, %v20937_v28  ;;  %v10126_v22 = vrot.slane %v10056_v38, %v20937_v28 }
 0xcee   : > { %14208 = vperm.xlu1 %14206, %v14207_v48   ;;  %14192 = vperm.xlu0 %14190, %v14191_v52   ;;  %vm10152_vm11 = vcmp.eq.s32.totalorder %v20936_v43, %v10130_v29  ;;  %v12172_v11 = vsel %vm10144_vm10, 1.0, %v14789_v21  ;;  %v10024_v44 = vcombine.high %v10014_v27, %v10014_v27  ;;  %v10073_v26 = vcombine.high %v10063_v19, %v10063_v19 }
 0xcef   : > { %v12180_v37 = vsel %vm10152_vm11, 1.0, %v14789_v21  ;;  %vm10143_vm12 = vcmp.eq.s32.totalorder %v20936_v43, %v10094_v4  ;;  %vm10151_vm13 = vcmp.eq.s32.totalorder %v20936_v43, %v10126_v22  ;;  %v10023_v35 = vcombine.high %v10007_v6, %v10007_v6 }
 0xcf0   : > { %v14212_v39 = vpack.i.bf16 %v12180_v37, %v12172_v11  ;;  %v12171_v20 = vsel %vm10143_vm12, 1.0, %v14789_v21  ;;  %v12179_v14 = vsel %vm10151_vm13, 1.0, %v14789_v21  ;;  %v10090_v10 = vrot.slane %v10024_v44, %v20937_v28 }
 0xcf1   : > { %v14201_v13 = vpack.i.bf16 %v12179_v14, %v12171_v20  ;;  %v10122_v2 = vrot.slane %v10073_v26, %v20937_v28  ;;  %v10072_v18 = vcombine.high %v10056_v38, %v10056_v38  ;;  %v10102_v7 = vrot.slane %v10023_v35, %v20937_v28 }
 0xcf2   : > { %14197 = vperm.xlu0 %14190, %v14196_v49   ;;  %14213 = vperm.xlu1 %14206, %v14212_v39   ;;  %vm10142_vm14 = vcmp.eq.s32.totalorder %v20936_v43, %v10090_v10  ;;  %v10025_v27 = vcombine.high %v10021_v62, %v10021_v62  ;;  %v10074_v19 = vcombine.high %v10070_v47, %v10070_v47  ;;  %vm10526_vm4 = vcmask 1041409  }
 0xcf3   : > { %vm10150_vm15 = vcmp.eq.s32.totalorder %v20936_v43, %v10122_v2  ;;  %v12170_v6 = vsel %vm10142_vm14, 1.0, %v14789_v21  ;;  %v10134_v8 = vrot.slane %v10072_v18, %v20937_v28  ;;  %vm10145_vm0 = vcmp.eq.s32.totalorder %v20936_v43, %v10102_v7 }
 0xcf4   : > { %v12178_v31 = vsel %vm10150_vm15, 1.0, %v14789_v21  ;;  %v12173_v42 = vsel %vm10145_vm0, 1.0, %v14789_v21  ;;  %v10106_v48 = vrot.slane %v10025_v27, %v20937_v28  ;;  %v10138_v38 = vrot.slane %v10074_v19, %v20937_v28 }
 0xcf5   : > { %v14222_v52 = vpack.i.bf16 %v12178_v31, %v12170_v6  ;;  %vm10153_vm1 = vcmp.eq.s32.totalorder %v20936_v43, %v10134_v8  ;;  %vm10528_vm5 = vcmask 1042434   ;;  %vm10530_vm6 = vcmask 1043459  }
 0xcf6   : > { %14202 = vperm.xlu0 %14190, %v14201_v13   ;;  %v12181_v36 = vsel %vm10153_vm1, 1.0, %v14789_v21  ;;  %vm10146_vm2 = vcmp.eq.s32.totalorder %v20936_v43, %v10106_v48  ;;  %vm10154_vm3 = vcmp.eq.s32.totalorder %v20936_v43, %v10138_v38  ;;  %vm10532_vm7 = vcmask 1044484  }
 0xcf7   : > { %14223 = vperm.xlu1 %14206, %v14222_v52   ;;  %v14217_v62 = vpack.i.bf16 %v12181_v36, %v12173_v42  ;;  %v12174_v47 = vsel %vm10146_vm2, 1.0, %v14789_v21  ;;  %v12182_v29 = vsel %vm10154_vm3, 1.0, %v14789_v21  ;;  %vm10534_vm8 = vcmask 1045509  }
 0xcf8   : > { %v14227_v49 = vpack.i.bf16 %v12182_v29, %v12174_v47  ;;  %vm10536_vm9 = vcmask 1046534   ;;  %vm10538_vm10 = vcmask 1047559  }
 0xcfa   : > { %14218 = vperm.xlu0 %14190, %v14217_v62  }
 0xcfb   : > { %14228 = vperm.xlu1 %14206, %v14227_v49  }
 0xd6d   : > { %v14209_v4 = vpop.permute.xlu1 %14208  ;;  %v14193_v22 = vpop.permute.xlu0 %14192 }
 0xd6e   : > { %v14211_v11 = vunpack.i.h.bf16 %v14209_v4  ;;  %v14210_v44 = vunpack.i.l.bf16 %v14209_v4  ;;  %v14195_v26 = vunpack.i.h.bf16 %v14193_v22  ;;  %v14194_v37 = vunpack.i.l.bf16 %v14193_v22 }
 0xd70   : > { %v10287_v35 = vmul.f32 %v14211_v11, %v19503_v9  ;;  %v10288_v39 = vmul.f32 %v14211_v11, %v19507_v23  ;;  %v10271_v20 = vmul.f32 %v14210_v44, %v19423_v32  ;;  %v10272_v43 = vmul.f32 %v14210_v44, %v19427_v25 }
 0xd71   : > { %v10269_v14 = vmul.f32 %v14195_v26, %v19412_v33  ;;  %v10270_v21 = vmul.f32 %v14195_v26, %v19416_v30  ;;  %v10267_v10 = vmul.f32 %v14194_v37, %v19403_v3  ;;  %v10268_v13 = vmul.f32 %v14194_v37, %v19407_v5  ;;  %v14198_v36 = vpop.permute.xlu0 %14197 }
 0xd72   : > { %v10419_v2 = vrot.slane %v10287_v35, 4  ;;  %v10425_v18 = vrot.slane %v10288_v39, 4  ;;  %v10323_v7 = vrot.slane %v10271_v20, 4  ;;  %v10329_v27 = vrot.slane %v10272_v43, 4 }
 0xd73   : > { %v10311_v19 = vrot.slane %v10269_v14, 4  ;;  %v10317_v9 = vrot.slane %v10270_v21, 4  ;;  %v10299_v6 = vrot.slane %v10267_v10, 4  ;;  %v10305_v23 = vrot.slane %v10268_v13, 4 }
 0xd74   : > { %v10420_v8 = vadd.f32 %v10419_v2, %v10287_v35  ;;  %v10426_v32 = vadd.f32 %v10425_v18, %v10288_v39  ;;  %v10324_v31 = vadd.f32 %v10323_v7, %v10271_v20  ;;  %v10330_v25 = vadd.f32 %v10329_v27, %v10272_v43  ;;  %v14214_v7 = vpop.permute.xlu1 %14213 }
 0xd75   : > { %v10312_v42 = vadd.f32 %v10311_v19, %v10269_v14  ;;  %v10318_v33 = vadd.f32 %v10317_v9, %v10270_v21  ;;  %v10300_v48 = vadd.f32 %v10299_v6, %v10267_v10  ;;  %v10306_v30 = vadd.f32 %v10305_v23, %v10268_v13  ;;  %v19606_v19 = vpop.permute.xlu0 %14202 }
 0xd76   : > { %v10421_v38 = vrot.slane %v10420_v8, 2  ;;  %v10427_v3 = vrot.slane %v10426_v32, 2  ;;  %v10325_v52 = vrot.slane %v10324_v31, 2  ;;  %v10331_v5 = vrot.slane %v10330_v25, 2 }
 0xd77   : > { %v10313_v62 = vrot.slane %v10312_v42, 2  ;;  %v10319_v47 = vrot.slane %v10318_v33, 2  ;;  %v10301_v29 = vrot.slane %v10300_v48, 2  ;;  %v10307_v49 = vrot.slane %v10306_v30, 2 }
 0xd78   : > { %v10422_v4 = vadd.f32 %v10421_v38, %v10420_v8  ;;  %v10428_v22 = vadd.f32 %v10427_v3, %v10426_v32  ;;  %v10326_v11 = vadd.f32 %v10325_v52, %v10324_v31  ;;  %v10332_v44 = vadd.f32 %v10331_v5, %v10330_v25 }
 0xd79   : > { %v10314_v26 = vadd.f32 %v10313_v62, %v10312_v42  ;;  %v10320_v37 = vadd.f32 %v10319_v47, %v10318_v33  ;;  %v10302_v35 = vadd.f32 %v10301_v29, %v10300_v48  ;;  %v10308_v39 = vadd.f32 %v10307_v49, %v10306_v30 }
 0xd7a   : > { %v10423_v20 = vrot.slane %v10422_v4, 1  ;;  %v10429_v43 = vrot.slane %v10428_v22, 1  ;;  %v10327_v14 = vrot.slane %v10326_v11, 1  ;;  %v10333_v21 = vrot.slane %v10332_v44, 1 }
 0xd7b   : > { %v10315_v10 = vrot.slane %v10314_v26, 1  ;;  %v10321_v13 = vrot.slane %v10320_v37, 1  ;;  %v10303_v2 = vrot.slane %v10302_v35, 1  ;;  %v10309_v18 = vrot.slane %v10308_v39, 1 }
 0xd7c   : > { %v19604_v27 = vadd.f32 %v10423_v20, %v10422_v4  ;;  %v19608_v9 = vadd.f32 %v10429_v43, %v10428_v22  ;;  %v19610_v6 = vadd.f32 %v10327_v14, %v10326_v11  ;;  %v19612_v23 = vadd.f32 %v10333_v21, %v10332_v44 }
 0xd7d   : > { %v19614_v8 = vadd.f32 %v10315_v10, %v10314_v26  ;;  %v14200_v32 = vunpack.i.h.bf16 %v14198_v36  ;;  %v14199_v31 = vunpack.i.l.bf16 %v14198_v36  ;;  %v14216_v25 = vunpack.i.h.bf16 %v14214_v7 }
 0xd7e   : > { %v14215_v42 = vunpack.i.l.bf16 %v14214_v7  ;;  %v19616_v33 = vadd.f32 %v10321_v13, %v10320_v37  ;;  %v19618_v48 = vadd.f32 %v10303_v2, %v10302_v35  ;;  %v19620_v30 = vadd.f32 %v10309_v18, %v10308_v39 }
 0xd7f   : > { %v14205_v38 = vunpack.i.h.bf16 %v19606_v19  ;;  %v10285_v3 = vmul.f32 %v14200_v32, %v19492_v46  ;;  %v10286_v52 = vmul.f32 %v14200_v32, %v19496_v61  ;;  %v10283_v5 = vmul.f32 %v14199_v31, %v19483_v58 }
 0xd80   : > { %v10284_v62 = vmul.f32 %v14199_v31, %v19487_v0  ;;  %v10293_v36 = vmul.f32 %v14216_v25, %v19532_v55  ;;  %v10294_v47 = vmul.f32 %v14216_v25, %v19536_v57  ;;  %v10277_v29 = vmul.f32 %v14215_v42, %v19452_v41 }
 0xd81   : > { %v10278_v49 = vmul.f32 %v14215_v42, %v19456_v40  ;;  %v10407_v4 = vrot.slane %v10285_v3, 4  ;;  %v10413_v22 = vrot.slane %v10286_v52, 4  ;;  %v10395_v11 = vrot.slane %v10283_v5, 4 }
 0xd82   : > { %v10401_v44 = vrot.slane %v10284_v62, 4  ;;  %v10455_v46 = vrot.slane %v10293_v36, 4  ;;  %v10461_v26 = vrot.slane %v10294_v47, 4  ;;  %v10359_v61 = vrot.slane %v10277_v29, 4 }
 0xd83   : > { %v10365_v37 = vrot.slane %v10278_v49, 4  ;;  %v10408_v58 = vadd.f32 %v10407_v4, %v10285_v3  ;;  %v10414_v35 = vadd.f32 %v10413_v22, %v10286_v52  ;;  %v10396_v0 = vadd.f32 %v10395_v11, %v10283_v5 }
 0xd84   : > { %v10402_v39 = vadd.f32 %v10401_v44, %v10284_v62  ;;  %v10456_v20 = vadd.f32 %v10455_v46, %v10293_v36  ;;  %v10462_v55 = vadd.f32 %v10461_v26, %v10294_v47  ;;  %v10360_v43 = vadd.f32 %v10359_v61, %v10277_v29 }
 0xd85   : > { %v10366_v57 = vadd.f32 %v10365_v37, %v10278_v49  ;;  %v10409_v14 = vrot.slane %v10408_v58, 2  ;;  %v10415_v41 = vrot.slane %v10414_v35, 2  ;;  %v10397_v21 = vrot.slane %v10396_v0, 2  ;;  %v14224_v37 = vpop.permute.xlu1 %14223 }
 0xd86   : > { %v10403_v40 = vrot.slane %v10402_v39, 2  ;;  %v10457_v10 = vrot.slane %v10456_v20, 2  ;;  %v10463_v13 = vrot.slane %v10462_v55, 2  ;;  %v10361_v2 = vrot.slane %v10360_v43, 2 }
 0xd87   : > { %v10367_v18 = vrot.slane %v10366_v57, 2  ;;  %v10410_v7 = vadd.f32 %v10409_v14, %v10408_v58  ;;  %v10416_v32 = vadd.f32 %v10415_v41, %v10414_v35  ;;  %v10398_v31 = vadd.f32 %v10397_v21, %v10396_v0 }
 0xd88   : > { %v10404_v25 = vadd.f32 %v10403_v40, %v10402_v39  ;;  %v10458_v42 = vadd.f32 %v10457_v10, %v10456_v20  ;;  %v10464_v3 = vadd.f32 %v10463_v13, %v10462_v55  ;;  %v10362_v52 = vadd.f32 %v10361_v2, %v10360_v43  ;;  %v19655_v20 = vpop.permute.xlu0 %14218 }
 0xd89   : > { %v19631_v5 = vadd.f32 %v10367_v18, %v10366_v57  ;;  %v10411_v62 = vrot.slane %v10410_v7, 1  ;;  %v10417_v36 = vrot.slane %v10416_v32, 1  ;;  %v10399_v47 = vrot.slane %v10398_v31, 1 }
 0xd8a   : > { %v10405_v29 = vrot.slane %v10404_v25, 1  ;;  %v10459_v49 = vrot.slane %v10458_v42, 1  ;;  %v10465_v4 = vrot.slane %v10464_v3, 1  ;;  %v10363_v22 = vrot.slane %v10362_v52, 1 }
 0xd8b   : > { %v14204_v11 = vunpack.i.l.bf16 %v19606_v19  ;;  %v19637_v44 = vsel %vm10526_vm4, %v19614_v8, %v19618_v48  ;;  %v19642_v46 = vsel %vm10526_vm4, %v19616_v33, %v19620_v30  ;;  %v19644_v26 = vadd.f32 %v10411_v62, %v10410_v7 }
 0xd8c   : > { %v19647_v58 = vadd.f32 %v10417_v36, %v10416_v32  ;;  %v19649_v35 = vadd.f32 %v10399_v47, %v10398_v31  ;;  %v19651_v0 = vadd.f32 %v10405_v29, %v10404_v25  ;;  %v19653_v39 = vadd.f32 %v10459_v49, %v10458_v42 }
 0xd8d   : > { %v19657_v55 = vadd.f32 %v10465_v4, %v10464_v3  ;;  %v19659_v43 = vadd.f32 %v10363_v22, %v10362_v52  ;;  %v10291_v57 = vmul.f32 %v14205_v38, %v19523_v24  ;;  %v10292_v14 = vmul.f32 %v14205_v38, %v19527_v17 }
 0xd8e   : > { %v10275_v41 = vmul.f32 %v14204_v11, %v19443_v34  ;;  %v10276_v21 = vmul.f32 %v14204_v11, %v19447_v60  ;;  %v14226_v40 = vunpack.i.h.bf16 %v14224_v37  ;;  %v14225_v10 = vunpack.i.l.bf16 %v14224_v37 }
 0xd8f   : > { %v10443_v13 = vrot.slane %v10291_v57, 4  ;;  %v10449_v2 = vrot.slane %v10292_v14, 4  ;;  %v14221_v18 = vunpack.i.h.bf16 %v19655_v20  ;;  %v14220_v7 = vunpack.i.l.bf16 %v19655_v20 }
 0xd90   : > { %v10347_v32 = vrot.slane %v10275_v41, 4  ;;  %v10353_v31 = vrot.slane %v10276_v21, 4  ;;  %v10289_v24 = vmul.f32 %v14226_v40, %v19512_v63  ;;  %v10290_v25 = vmul.f32 %v14226_v40, %v19516_v45 }
 0xd91   : > { %v10444_v19 = vadd.f32 %v10443_v13, %v10291_v57  ;;  %v10450_v17 = vadd.f32 %v10449_v2, %v10292_v14  ;;  %v10273_v34 = vmul.f32 %v14225_v10, %v19432_v16  ;;  %v10274_v60 = vmul.f32 %v14225_v10, %v19436_v15 }
 0xd92   : > { %v10348_v38 = vadd.f32 %v10347_v32, %v10275_v41  ;;  %v10354_v42 = vadd.f32 %v10353_v31, %v10276_v21  ;;  %v10431_v3 = vrot.slane %v10289_v24, 4  ;;  %v10437_v52 = vrot.slane %v10290_v25, 4 }
 0xd93   : > { %v10445_v62 = vrot.slane %v10444_v19, 2  ;;  %v10451_v36 = vrot.slane %v10450_v17, 2  ;;  %v10335_v47 = vrot.slane %v10273_v34, 4  ;;  %v10341_v29 = vrot.slane %v10274_v60, 4 }
 0xd94   : > { %v10349_v49 = vrot.slane %v10348_v38, 2  ;;  %v10355_v4 = vrot.slane %v10354_v42, 2  ;;  %v10432_v22 = vadd.f32 %v10431_v3, %v10289_v24  ;;  %v10438_v63 = vadd.f32 %v10437_v52, %v10290_v25 }
 0xd95   : > { %v10446_v11 = vadd.f32 %v10445_v62, %v10444_v19  ;;  %v10452_v45 = vadd.f32 %v10451_v36, %v10450_v17  ;;  %v10336_v37 = vadd.f32 %v10335_v47, %v10273_v34  ;;  %v10342_v20 = vadd.f32 %v10341_v29, %v10274_v60  ;;  %v14229_v47 = vpop.permute.xlu1 %14228 }
 0xd96   : > { %v10350_v57 = vadd.f32 %v10349_v49, %v10348_v38  ;;  %v10356_v16 = vadd.f32 %v10355_v4, %v10354_v42  ;;  %v10433_v14 = vrot.slane %v10432_v22, 2  ;;  %v10439_v15 = vrot.slane %v10438_v63, 2 }
 0xd97   : > { %v10447_v41 = vrot.slane %v10446_v11, 1  ;;  %v10453_v21 = vrot.slane %v10452_v45, 1  ;;  %v10337_v40 = vrot.slane %v10336_v37, 2  ;;  %v10343_v10 = vrot.slane %v10342_v20, 2 }
 0xd98   : > { %v10351_v13 = vrot.slane %v10350_v57, 1  ;;  %v10357_v2 = vrot.slane %v10356_v16, 1  ;;  %v10434_v32 = vadd.f32 %v10433_v14, %v10432_v22  ;;  %v10440_v31 = vadd.f32 %v10439_v15, %v10438_v63 }
 0xd99   : > { %v10547_v24 = vsel %vm10526_vm4, %v19644_v26, %v19649_v35  ;;  %v10554_v25 = vsel %vm10526_vm4, %v19647_v58, %v19651_v0  ;;  %v19681_v19 = vadd.f32 %v10337_v40, %v10336_v37  ;;  %v19683_v17 = vadd.f32 %v10343_v10, %v10342_v20 }
 0xd9a   : > { %v19685_v34 = vadd.f32 %v10447_v41, %v10446_v11  ;;  %v19687_v60 = vadd.f32 %v10453_v21, %v10452_v45  ;;  %v10435_v38 = vrot.slane %v10434_v32, 1  ;;  %v10441_v42 = vrot.slane %v10440_v31, 1 }
 0xd9b   : > { %v19689_v3 = vadd.f32 %v10351_v13, %v10350_v57  ;;  %v19691_v52 = vadd.f32 %v10357_v2, %v10356_v16  ;;  %v10295_v62 = vmul.f32 %v14221_v18, %v19543_v54  ;;  %v10296_v36 = vmul.f32 %v14221_v18, %v19547_v51 }
 0xd9c   : > { %v10339_v29 = vrot.slane %v19681_v19, 1  ;;  %v10345_v49 = vrot.slane %v19683_v17, 1  ;;  %v10279_v4 = vmul.f32 %v14220_v7, %v19463_v53  ;;  %v10280_v22 = vmul.f32 %v14220_v7, %v19467_v59 }
 0xd9d   : > { %v19699_v63 = vadd.f32 %v10435_v38, %v10434_v32  ;;  %v19701_v11 = vadd.f32 %v10441_v42, %v10440_v31  ;;  %v10467_v45 = vrot.slane %v10295_v62, 4  ;;  %v10473_v37 = vrot.slane %v10296_v36, 4 }
 0xd9e   : > { %v10371_v20 = vrot.slane %v10279_v4, 4  ;;  %v10377_v54 = vrot.slane %v10280_v22, 4  ;;  %v14231_v57 = vunpack.i.h.bf16 %v14229_v47  ;;  %v14230_v51 = vunpack.i.l.bf16 %v14229_v47 }
 0xd9f   : > { %v10468_v18 = vadd.f32 %v10467_v45, %v10295_v62  ;;  %v10474_v16 = vadd.f32 %v10473_v37, %v10296_v36  ;;  %v10548_v53 = vsel %vm10528_vm5, %v19604_v27, %v10547_v24  ;;  %v10555_v59 = vsel %vm10528_vm5, %v19608_v9, %v10554_v25 }
 0xda0   : > { %v10372_v7 = vadd.f32 %v10371_v20, %v10279_v4  ;;  %v10378_v14 = vadd.f32 %v10377_v54, %v10280_v22  ;;  %v10297_v15 = vmul.f32 %v14231_v57, %v19552_v56  ;;  %v10298_v41 = vmul.f32 %v14231_v57, %v19556_v12 }
 0xda1   : > { %v10469_v21 = vrot.slane %v10468_v18, 2  ;;  %v10475_v40 = vrot.slane %v10474_v16, 2  ;;  %v10281_v10 = vmul.f32 %v14230_v51, %v19472_v50  ;;  %v10282_v13 = vmul.f32 %v14230_v51, %v19476_v1 }
 0xda2   : > { %v10373_v2 = vrot.slane %v10372_v7, 2  ;;  %v10379_v32 = vrot.slane %v10378_v14, 2  ;;  %v10479_v31 = vrot.slane %v10297_v15, 4  ;;  %v10485_v24 = vrot.slane %v10298_v41, 4 }
 0xda3   : > { %v10470_v38 = vadd.f32 %v10469_v21, %v10468_v18  ;;  %v10476_v42 = vadd.f32 %v10475_v40, %v10474_v16  ;;  %v10383_v25 = vrot.slane %v10281_v10, 4  ;;  %v10389_v62 = vrot.slane %v10282_v13, 4 }
 0xda4   : > { %v10374_v36 = vadd.f32 %v10373_v2, %v10372_v7  ;;  %v10380_v56 = vadd.f32 %v10379_v32, %v10378_v14  ;;  %v10480_v47 = vadd.f32 %v10479_v31, %v10297_v15  ;;  %v10486_v12 = vadd.f32 %v10485_v24, %v10298_v41 }
 0xda5   : > { %v10471_v4 = vrot.slane %v10470_v38, 1  ;;  %v10477_v22 = vrot.slane %v10476_v42, 1  ;;  %v10384_v45 = vadd.f32 %v10383_v25, %v10281_v10  ;;  %v10390_v37 = vadd.f32 %v10389_v62, %v10282_v13 }
 0xda6   : > { %v10375_v50 = vrot.slane %v10374_v36, 1  ;;  %v10381_v20 = vrot.slane %v10380_v56, 1  ;;  %v10481_v1 = vrot.slane %v10480_v47, 2  ;;  %v10487_v54 = vrot.slane %v10486_v12, 2 }
 0xda7   : > { %v10385_v57 = vrot.slane %v10384_v45, 2  ;;  %v10391_v51 = vrot.slane %v10390_v37, 2  ;;  %v19711_v61 = vadd.f32 %v10471_v4, %v10470_v38  ;;  %v19713_v18 = vadd.f32 %v10477_v22, %v10476_v42 }
 0xda8   : > { %v10482_v16 = vadd.f32 %v10481_v1, %v10480_v47  ;;  %v10488_v21 = vadd.f32 %v10487_v54, %v10486_v12  ;;  %v10549_v7 = vsel %vm10530_vm6, %v19699_v63, %v10548_v53  ;;  %v10556_v14 = vsel %vm10530_vm6, %v19701_v11, %v10555_v59 }
 0xda9   : > { %v10386_v15 = vadd.f32 %v10385_v57, %v10384_v45  ;;  %v10392_v41 = vadd.f32 %v10391_v51, %v10390_v37  ;;  %v10550_v40 = vsel %vm10532_vm7, %v19685_v34, %v10549_v7  ;;  %v10557_v10 = vsel %vm10532_vm7, %v19687_v60, %v10556_v14 }
 0xdaa   : > { %v10483_v13 = vrot.slane %v10482_v16, 1  ;;  %v10489_v2 = vrot.slane %v10488_v21, 1  ;;  %v10551_v32 = vsel %vm10534_vm8, %v19653_v39, %v10550_v40  ;;  %v10558_v31 = vsel %vm10534_vm8, %v19657_v55, %v10557_v10 }
 0xdab   : > { %v10340_v53 = vadd.f32 %v10339_v29, %v19681_v19  ;;  %v19733_v59 = vadd.f32 %v10345_v49, %v19683_v17  ;;  %v10552_v24 = vsel %vm10536_vm9, %v19711_v61, %v10551_v32  ;;  %v10559_v38 = vsel %vm10536_vm9, %v19713_v18, %v10558_v31 }
 0xdac   : > { %v19739_v42 = vadd.f32 %v10483_v13, %v10482_v16  ;;  %v19741_v25 = vadd.f32 %v10489_v2, %v10488_v21  ;;  %v10387_v62 = vrot.slane %v10386_v15, 1  ;;  %v10393_v47 = vrot.slane %v10392_v41, 1 }
 0xdad   : > { %v20938_v19 = vrot.slane %v19631_v5, 1  ;;  %v19748_v12 = vadd.f32 %v10375_v50, %v10374_v36  ;;  %v19750_v17 = vadd.f32 %v10381_v20, %v10380_v56  ;;  %v10529_v49 = vsel %vm10528_vm5, %v19610_v6, %v19637_v44 }
 0xdae   : > { %v10553_v4 = vsel %vm10538_vm10, %v19739_v42, %v10552_v24  ;;  %v10560_v22 = vsel %vm10538_vm10, %v19741_v25, %v10559_v38  ;;  %v10388_v45 = vadd.f32 %v10387_v62, %v10386_v15  ;;  %v10394_v36 = vadd.f32 %v10393_v47, %v10392_v41 }
 0xdaf   : > { %v19746_v29 = vadd.f32 %v20938_v19, %v19631_v5  ;;  %v10541_v5 = vsel %vm10528_vm5, %v19612_v23, %v19642_v46  ;;  %v10568_v37 = vadd.f32 %v10560_v22, %v10553_v4  ;;  %v10531_v56 = vsel %vm10530_vm6, %v10340_v53, %v10529_v49 }
 0xdb0   : > { %v10542_v50 = vsel %vm10530_vm6, %v19733_v59, %v10541_v5  ;;  %v10533_v44 = vsel %vm10532_vm7, %v19689_v3, %v10531_v56 }
 0xdb1   : > { %v10543_v20 = vsel %vm10532_vm7, %v19691_v52, %v10542_v50  ;;  %10569 = vadd.xlane.f32.xlu1 %v10568_v37  ;;  %v10535_v1 = vsel %vm10534_vm8, %v19659_v43, %v10533_v44 }
 0xdb2   : > { %v10544_v46 = vsel %vm10534_vm8, %v19746_v29, %v10543_v20  ;;  %v10537_v54 = vsel %vm10536_vm9, %v19748_v12, %v10535_v1 }
 0xdb3   : > { %v10545_v57 = vsel %vm10536_vm9, %v19750_v17, %v10544_v46  ;;  %v10539_v51 = vsel %vm10538_vm10, %v10388_v45, %v10537_v54 }
 0xdb4   : > { %v10546_v16 = vsel %vm10538_vm10, %v10394_v36, %v10545_v57 }
 0xdb5   : > { %v10565_v21 = vadd.f32 %v10546_v16, %v10539_v51 }
 0xdb7   : > { %10566 = vadd.xlane.f32.xlu0 %v10565_v21 }
 0xe3e   : > { %v10570_v7 = vpop.xlane.xlu1 %10569 }
 0xe3f   : > { %v19779_v14 = vmul.f32 0.00390625, %v10570_v7 }
 0xe41   : > { %v10582_v15 = vrot.slane %v19779_v14, 1  ;;  %v10583_v41 = vrot.slane %v19779_v14, 2  ;;  %v10584_v10 = vrot.slane %v19779_v14, 3  ;;  %v10585_v13 = vrot.slane %v19779_v14, 4 }
 0xe42   : > { %v10586_v2 = vrot.slane %v19779_v14, 5  ;;  %v19790_v38 = vsub.f32 %v19649_v35, %v19779_v14  ;;  %v19794_v62 = vsub.f32 %v19651_v0, %v19779_v14 }
 0xe43   : > { %v19797_v47 = vsub.f32 %v19644_v26, %v10582_v15  ;;  %v19800_v19 = vsub.f32 %v19647_v58, %v10582_v15  ;;  %v19803_v49 = vsub.f32 %v19604_v27, %v10583_v41  ;;  %v19806_v4 = vsub.f32 %v19608_v9, %v10583_v41 }
 0xe44   : > { %v10567_v40 = vpop.xlane.xlu0 %10566  ;;  %v19809_v0 = vsub.f32 %v19699_v63, %v10584_v10  ;;  %v19812_v26 = vsub.f32 %v19701_v11, %v10584_v10  ;;  %v19815_v58 = vsub.f32 %v19685_v34, %v10585_v13  ;;  %v19824_v44 = vsub.f32 %v19687_v60, %v10585_v13 }
 0xe45   : > { %v10571_v31 = vmul.f32 0.00390625, %v10567_v40  ;;  %v19834_v34 = vsub.f32 %v19653_v39, %v10586_v2 }
 0xe47   : > { %v10575_v22 = vrot.slane %v10571_v31, 1  ;;  %v10576_v5 = vrot.slane %v10571_v31, 2  ;;  %v10577_v35 = vrot.slane %v10571_v31, 3  ;;  %v10578_v37 = vrot.slane %v10571_v31, 4 }
 0xe48   : > { %v10579_v56 = vrot.slane %v10571_v31, 5  ;;  %v10580_v50 = vrot.slane %v10571_v31, 6  ;;  %v10581_v20 = vrot.slane %v10571_v31, 7 }
 0xe49   : > { %v19818_v27 = vsub.f32 %v19614_v8, %v10575_v22  ;;  %v19821_v9 = vsub.f32 %v19610_v6, %v10576_v5  ;;  %v19827_v63 = vsub.f32 %v19616_v33, %v10575_v22  ;;  %v19829_v1 = vsub.f32 %v10340_v53, %v10577_v35 }
 0xe4a   : > { %v19837_v8 = vsub.f32 %v19618_v48, %v10571_v31  ;;  %v19840_v6 = vsub.f32 %v19620_v30, %v10571_v31  ;;  %v19843_v60 = vsub.f32 %v19612_v23, %v10576_v5  ;;  %v19846_v11 = vsub.f32 %v19689_v3, %v10578_v37 }
 0xe4b   : > { %v19849_v33 = vsub.f32 %v19733_v59, %v10577_v35  ;;  %v19852_v53 = vsub.f32 %v19691_v52, %v10578_v37  ;;  %v19855_v39 = vsub.f32 %v19659_v43, %v10579_v56  ;;  %v19858_v48 = vsub.f32 %v19746_v29, %v10579_v56 }
 0xe4c   : > { %v19861_v30 = vsub.f32 %v19748_v12, %v10580_v50  ;;  %v19864_v23 = vsub.f32 %v19750_v17, %v10580_v50  ;;  %v10639_v3 = vmul.f32 %v19818_v27, %v19818_v27  ;;  %v10641_v59 = vmul.f32 %v19821_v9, %v19821_v9 }
 0xe4d   : > { %v19870_v52 = vsub.f32 %v10388_v45, %v10581_v20  ;;  %v19872_v46 = vsub.f32 %v10394_v36, %v10581_v20  ;;  %v10640_v43 = vmul.f32 %v19827_v63, %v19827_v63  ;;  %v10643_v29 = vmul.f32 %v19829_v1, %v19829_v1 }
 0xe4e   : > { %v10637_v12 = vmul.f32 %v19837_v8, %v19837_v8  ;;  %v10638_v17 = vmul.f32 %v19840_v6, %v19840_v6  ;;  %v10642_v54 = vmul.f32 %v19843_v60, %v19843_v60  ;;  %v10645_v45 = vmul.f32 %v19846_v11, %v19846_v11 }
 0xe4f   : > { %v10644_v36 = vmul.f32 %v19849_v33, %v19849_v33  ;;  %v10646_v57 = vmul.f32 %v19852_v53, %v19852_v53  ;;  %v10647_v51 = vmul.f32 %v19855_v39, %v19855_v39  ;;  %v10701_v16 = vrot.slane %v10639_v3, 7 }
 0xe50   : > { %v10648_v21 = vmul.f32 %v19858_v48, %v19858_v48  ;;  %v10649_v7 = vmul.f32 %v19861_v30, %v19861_v30  ;;  %v10650_v15 = vmul.f32 %v19864_v23, %v19864_v23  ;;  %v10703_v41 = vrot.slane %v10641_v59, 6 }
 0xe51   : > { %v10651_v40 = vmul.f32 %v19870_v52, %v19870_v52  ;;  %v10702_v10 = vsel %vm10526_vm4, %v10701_v16, %v10637_v12  ;;  %v10705_v13 = vrot.slane %v10643_v29, 5  ;;  %v10715_v31 = vrot.slane %v10640_v43, 7 }
 0xe52   : > { %v10652_v22 = vmul.f32 %v19872_v46, %v19872_v46  ;;  %v10704_v5 = vsel %vm10528_vm5, %v10703_v41, %v10702_v10  ;;  %v10707_v35 = vrot.slane %v10645_v45, 4  ;;  %v10717_v37 = vrot.slane %v10642_v54, 6 }
 0xe53   : > { %v10706_v56 = vsel %vm10530_vm6, %v10705_v13, %v10704_v5  ;;  %v10709_v50 = vrot.slane %v10647_v51, 3  ;;  %v10716_v20 = vsel %vm10526_vm4, %v10715_v31, %v10638_v17  ;;  %v10719_v3 = vrot.slane %v10644_v36, 5 }
 0xe54   : > { %v10708_v59 = vsel %vm10532_vm7, %v10707_v35, %v10706_v56  ;;  %v10711_v24 = vrot.slane %v10649_v7, 2  ;;  %v10718_v12 = vsel %vm10528_vm5, %v10717_v37, %v10716_v20  ;;  %v10721_v29 = vrot.slane %v10646_v57, 4 }
 0xe55   : > { %v10710_v43 = vsel %vm10534_vm8, %v10709_v50, %v10708_v59  ;;  %v10713_v16 = vrot.slane %v10651_v40, 1  ;;  %v10720_v32 = vsel %vm10530_vm6, %v10719_v3, %v10718_v12  ;;  %v10723_v41 = vrot.slane %v10648_v21, 3 }
 0xe56   : > { %v10712_v54 = vsel %vm10536_vm9, %v10711_v24, %v10710_v43  ;;  %v10722_v45 = vsel %vm10532_vm7, %v10721_v29, %v10720_v32  ;;  %v10725_v51 = vrot.slane %v10650_v15, 2  ;;  %v19915_v17 = vsub.f32 %v19657_v55, %v10586_v2 }
 0xe57   : > { %v10714_v36 = vsel %vm10538_vm10, %v10713_v16, %v10712_v54  ;;  %v10724_v57 = vsel %vm10534_vm8, %v10723_v41, %v10722_v45  ;;  %v10727_v7 = vrot.slane %v10652_v22, 1  ;;  %v20939_v40 = vrot.slane %v19779_v14, 6 }
 0xe58   : > { %v10726_v24 = vsel %vm10536_vm9, %v10725_v51, %v10724_v57  ;;  %v10655_v55 = vmul.f32 %v19797_v47, %v19797_v47  ;;  %v10657_v2 = vmul.f32 %v19803_v49, %v19803_v49  ;;  %v20941_v13 = vrot.slane %v19779_v14, 7 }
 0xe59   : > { %v19922_v10 = vsub.f32 %v19711_v61, %v20939_v40  ;;  %v20940_v32 = vmov %v20939_v40  ;;  %v10728_v15 = vsel %vm10538_vm10, %v10727_v7, %v10726_v24  ;;  %v10653_v35 = vmul.f32 %v19790_v38, %v19790_v38 }
 0xe5a   : > { %v19928_v21 = vsub.f32 %v19713_v18, %v20940_v32  ;;  %v19938_v61 = vsub.f32 %v19739_v42, %v20941_v13  ;;  %v20942_v31 = vmov %v20941_v13  ;;  %v10656_v18 = vmul.f32 %v19800_v19, %v19800_v19 }
 0xe5b   : > { %v19943_v22 = vsub.f32 %v19741_v25, %v20942_v31  ;;  %v10761_v5 = vadd.f32 %v10728_v15, %v10714_v36  ;;  %v10658_v37 = vmul.f32 %v19806_v4, %v19806_v4  ;;  %v10659_v56 = vmul.f32 %v19809_v0, %v19809_v0 }
 0xe5c   : > { %v10654_v42 = vmul.f32 %v19794_v62, %v19794_v62  ;;  %v10660_v25 = vmul.f32 %v19812_v26, %v19812_v26  ;;  %v10661_v14 = vmul.f32 %v19815_v58, %v19815_v58  ;;  %v10662_v50 = vmul.f32 %v19824_v44, %v19824_v44 }
 0xe5d   : > { %10762 = vadd.xlane.f32.xlu0 %v10761_v5  ;;  %v10663_v20 = vmul.f32 %v19834_v34, %v19834_v34  ;;  %v10664_v3 = vmul.f32 %v19915_v17, %v19915_v17  ;;  %v10729_v59 = vrot.slane %v10655_v55, 7  ;;  %v10731_v12 = vrot.slane %v10657_v2, 6 }
 0xe5e   : > { %v10665_v29 = vmul.f32 %v19922_v10, %v19922_v10  ;;  %v10666_v43 = vmul.f32 %v19928_v21, %v19928_v21  ;;  %v10667_v16 = vmul.f32 %v19938_v61, %v19938_v61  ;;  %v10743_v41 = vrot.slane %v10656_v18, 7 }
 0xe5f   : > { %v10668_v54 = vmul.f32 %v19943_v22, %v19943_v22  ;;  %v10730_v45 = vsel %vm10526_vm4, %v10729_v59, %v10653_v35  ;;  %v10733_v51 = vrot.slane %v10659_v56, 5  ;;  %v10745_v36 = vrot.slane %v10658_v37, 6 }
 0xe60   : > { %v10732_v57 = vsel %vm10528_vm5, %v10731_v12, %v10730_v45  ;;  %v10735_v7 = vrot.slane %v10661_v14, 4  ;;  %v10744_v40 = vsel %vm10526_vm4, %v10743_v41, %v10654_v42  ;;  %v10747_v24 = vrot.slane %v10660_v25, 5  ;;  %v14235_v41 = vld [vmem:[#allocation21] sm:$0xff]   ;;  %v14236_v45 = vld [vmem:[#allocation21 + $0x48] sm:$0xff]  }
 0xe61   : > { %v10734_v32 = vsel %vm10530_vm6, %v10733_v51, %v10732_v57  ;;  %v10737_v55 = vrot.slane %v10663_v20, 3  ;;  %v10746_v2 = vsel %vm10528_vm5, %v10745_v36, %v10744_v40  ;;  %v10749_v15 = vrot.slane %v10662_v50, 4  ;;  %v14239_v51 = vld [vmem:[#allocation21 + $0x10] sm:$0xff]   ;;  %v14241_v36 = vld [vmem:[#allocation21 + $0x18] sm:$0xff]   ;;  %v14242_v57 = vld [vmem:[#allocation21 + $0x60] sm:$0xff]  }
 0xe62   : > { %v10736_v13 = vsel %vm10532_vm7, %v10735_v7, %v10734_v32  ;;  %v10739_v31 = vrot.slane %v10665_v29, 2  ;;  %v10748_v18 = vsel %vm10530_vm6, %v10747_v24, %v10746_v2  ;;  %v10751_v5 = vrot.slane %v10664_v3, 3  ;;  %v14234_v3 = vld [vmem:[#allocation21 + $0x40] sm:$0xff]   ;;  %v14244_v40 = vld [vmem:[#allocation21 + $0x68] sm:$0xff]   ;;  %v14246_v32 = vld [vmem:[#allocation21 + $0x70] sm:$0xff]  }
 0xe63   : > { %v10738_v35 = vsel %vm10534_vm8, %v10737_v55, %v10736_v13  ;;  %v10741_v37 = vrot.slane %v10667_v16, 1  ;;  %v10750_v56 = vsel %vm10532_vm7, %v10749_v15, %v10748_v18  ;;  %v10753_v14 = vrot.slane %v10666_v43, 2  ;;  %12342 = vmatprep.subr.bf16.mxu0 %v14234_v3  ;;  %v14237_v16 = vld [vmem:[#allocation21 + $0x8] sm:$0xff]   ;;  %v14238_v43 = vld [vmem:[#allocation21 + $0x50] sm:$0xff]   ;;  %v14243_v7 = vld [vmem:[#allocation21 + $0x20] sm:$0xff]  }
 0xe64   : > { %v10740_v42 = vsel %vm10536_vm9, %v10739_v31, %v10738_v35  ;;  %v10752_v25 = vsel %vm10534_vm8, %v10751_v5, %v10750_v56  ;;  %v10755_v20 = vrot.slane %v10668_v54, 1  ;;  %12343 = vmatpush3.bf16.msra.mxu0 %v14235_v41  ;;  %v14240_v54 = vld [vmem:[#allocation21 + $0x58] sm:$0xff]   ;;  %v14245_v24 = vld [vmem:[#allocation21 + $0x28] sm:$0xff]   ;;  %v14247_v55 = vld [vmem:[#allocation21 + $0x30] sm:$0xff]  }
 0xe65   : > { %v10742_v59 = vsel %vm10538_vm10, %v10741_v37, %v10740_v42  ;;  %v10754_v50 = vsel %vm10536_vm9, %v10753_v14, %v10752_v25  ;;  %12344 = vmatprep.subr.bf16.mxu0 %v14236_v45  ;;  %v14248_v2 = vld [vmem:[#allocation21 + $0x78] sm:$0xff]   ;;  %v20943_v25 = vld [vmem:[#allocation48_spill] sm:$0xff] }
 0xe66   : > { %v10756_v12 = vsel %vm10538_vm10, %v10755_v20, %v10754_v50  ;;  %v14249_v15 = vld [vmem:[#allocation21 + $0x38] sm:$0xff]  }
 0xe67   : > { %v10764_v29 = vadd.f32 %v10756_v12, %v10742_v59  ;;  %v10491_v35 = vld [vmem:[#allocation20] ss:$2 sm:$0x3]  ;;  %v19987_v37 = vld [vmem:[#allocation20 + $0x1] ss:$2 sm:$0x3] }
 0xe68   : > { %12345 = vmatpush3.bf16.msra.mxu0 %v14237_v16  ;;  %v19992_v20 = vrot.slane %v10491_v35, %v20943_v25  ;;  %v19996_v59 = vrot.slane %v19987_v37, %v20943_v25 }
 0xe69   : > { %10765 = vadd.xlane.f32.xlu0 %v10764_v29  ;;  %12346 = vmatprep.subr.bf16.mxu0 %v14238_v43 }
 0xe6c   : > { %12347 = vmatpush3.bf16.msra.mxu0 %v14239_v51 }
 0xe6d   : > { %12348 = vmatprep.subr.bf16.mxu0 %v14240_v54 }
 0xe70   : > { %12349 = vmatpush3.bf16.msra.mxu0 %v14241_v36 }
 0xe71   : > { %12350 = vmatprep.subr.bf16.mxu0 %v14242_v57 }
 0xe74   : > { %12351 = vmatpush3.bf16.msra.mxu0 %v14243_v7 }
 0xe75   : > { %12352 = vmatprep.subr.bf16.mxu0 %v14244_v40 }
 0xe78   : > { %12353 = vmatpush3.bf16.msra.mxu0 %v14245_v24 }
 0xe79   : > { %12354 = vmatprep.subr.bf16.mxu0 %v14246_v32 }
 0xe7c   : > { %12355 = vmatpush3.bf16.msra.mxu0 %v14247_v55 }
 0xe7d   : > { %12356 = vmatprep.subr.bf16.mxu0 %v14248_v2 }
 0xe80   : > { %12357 = vmatpush3.bf16.msra.mxu0 %v14249_v15 }
 0xeea   : > { %v10763_v13 = vpop.xlane.xlu0 %10762 }
 0xeeb   : > { %v10767_v31 = vmul.f32 0.00390625, %v10763_v13 }
 0xeed   : > { %v10769_v18 = vadd.f32 1e-05, %v10767_v31 }
 0xeef   : > { %14250 = vrsqrt.f32 %v10769_v18 }
 0xef6   : > { %v10766_v5 = vpop.xlane.xlu0 %10765 }
 0xef7   : > { %v10768_v56 = vmul.f32 0.00390625, %v10766_v5 }
 0xef9   : > { %v19989_v14 = vpop.eup %14250  ;;  %v10770_v42 = vadd.f32 1e-05, %v10768_v56 }
 0xefa   : > { %v10775_v50 = vrot.slane %v19989_v14, 1  ;;  %v10776_v12 = vrot.slane %v19989_v14, 2  ;;  %v10777_v29 = vrot.slane %v19989_v14, 3  ;;  %v10778_v3 = vrot.slane %v19989_v14, 4 }
 0xefb   : > { %14252 = vrsqrt.f32 %v10770_v42  ;;  %v20483_v41 = vrot.slane %v19989_v14, 5  ;;  %v20482_v45 = vrot.slane %v19989_v14, 6  ;;  %v20480_v16 = vrot.slane %v19989_v14, 7 }
 0xefc   : > { %v10806_v43 = vmul.f32 %v19989_v14, %v19840_v6  ;;  %v10808_v51 = vmul.f32 %v10775_v50, %v19827_v63  ;;  %v10810_v54 = vmul.f32 %v10776_v12, %v19843_v60  ;;  %v10812_v36 = vmul.f32 %v10777_v29, %v19849_v33 }
 0xefd   : > { %v10814_v57 = vmul.f32 %v10778_v3, %v19852_v53  ;;  %v10816_v6 = vmul.f32 %v20483_v41, %v19858_v48  ;;  %v10818_v63 = vmul.f32 %v20482_v45, %v19864_v23  ;;  %v10820_v60 = vmul.f32 %v20480_v16, %v19872_v46 }
 0xefe   : > { %v10849_v7 = vmul.f32 %v19992_v20, %v10806_v43  ;;  %v10851_v33 = vmul.f32 %v19992_v20, %v10808_v51  ;;  %v10853_v40 = vmul.f32 %v19992_v20, %v10810_v54  ;;  %v10855_v53 = vmul.f32 %v19992_v20, %v10812_v36 }
 0xeff   : > { %v10857_v24 = vmul.f32 %v19992_v20, %v10814_v57  ;;  %v10859_v48 = vmul.f32 %v19992_v20, %v10816_v6  ;;  %v10861_v32 = vmul.f32 %v19992_v20, %v10818_v63  ;;  %v10863_v23 = vmul.f32 %v19992_v20, %v10820_v60 }
 0xf00   : > { %v10892_v55 = vadd.f32 %v19996_v59, %v10849_v7  ;;  %v10894_v46 = vadd.f32 %v19996_v59, %v10851_v33  ;;  %v10896_v2 = vadd.f32 %v19996_v59, %v10853_v40  ;;  %v10898_v15 = vadd.f32 %v19996_v59, %v10855_v53 }
 0xf01   : > { %v10900_v13 = vadd.f32 %v19996_v59, %v10857_v24  ;;  %v10902_v31 = vadd.f32 %v19996_v59, %v10859_v48  ;;  %v10904_v18 = vadd.f32 %v19996_v59, %v10861_v32  ;;  %v10906_v5 = vadd.f32 %v19996_v59, %v10863_v23 }
 0xf02   : > { %v10956_v56 = vpack.c.bf16 %v10892_v55, %v10892_v55  ;;  %v10958_v42 = vpack.c.bf16 %v10894_v46, %v10894_v46  ;;  %v10960_v25 = vpack.c.bf16 %v10896_v2, %v10896_v2  ;;  %v20045_v43 = vrot.slane %v10491_v35, %v20937_v28 }
 0xf03   : > { %v10962_v51 = vpack.c.bf16 %v10898_v15, %v10898_v15  ;;  %v10964_v54 = vpack.c.bf16 %v10900_v13, %v10900_v13  ;;  %v10966_v36 = vpack.c.bf16 %v10902_v31, %v10902_v31  ;;  %v10968_v57 = vpack.c.bf16 %v10904_v18, %v10904_v18 }
 0xf04   : > { %v10970_v63 = vpack.c.bf16 %v10906_v5, %v10906_v5  ;;  %v11020_v60 = vunpack.c.l.b16 %v10956_v56  ;;  %v11022_v7 = vunpack.c.l.b16 %v10958_v42  ;;  %v11024_v33 = vunpack.c.l.b16 %v10960_v25 }
 0xf05   : > { %v20047_v6 = vpop.eup %14252 }
 0xf06   : > { %v10782_v40 = vrot.slane %v20047_v6, 1  ;;  %v10783_v53 = vrot.slane %v20047_v6, 2  ;;  %v20481_v24 = vrot.slane %v20047_v6, 3  ;;  %v20479_v48 = vrot.slane %v20047_v6, 4 }
 0xf07   : > { %v20478_v35 = vrot.slane %v20047_v6, 5  ;;  %v20477_v32 = vrot.slane %v20047_v6, 6  ;;  %v20476_v23 = vrot.slane %v20047_v6, 7  ;;  %v10822_v55 = vmul.f32 %v20047_v6, %v19794_v62 }
 0xf08   : > { %v10824_v46 = vmul.f32 %v10782_v40, %v19800_v19  ;;  %v10826_v2 = vmul.f32 %v10783_v53, %v19806_v4  ;;  %v10828_v15 = vmul.f32 %v20481_v24, %v19812_v26  ;;  %v10830_v13 = vmul.f32 %v20479_v48, %v19824_v44 }
 0xf09   : > { %v10832_v62 = vmul.f32 %v20478_v35, %v19915_v17  ;;  %v10834_v19 = vmul.f32 %v20477_v32, %v19928_v21  ;;  %v10836_v4 = vmul.f32 %v20476_v23, %v19943_v22  ;;  %v10865_v31 = vmul.f32 %v19992_v20, %v10822_v55 }
 0xf0a   : > { %v10867_v26 = vmul.f32 %v19992_v20, %v10824_v46  ;;  %v10869_v18 = vmul.f32 %v19992_v20, %v10826_v2  ;;  %v10871_v44 = vmul.f32 %v19992_v20, %v10828_v15  ;;  %v10873_v5 = vmul.f32 %v19992_v20, %v10830_v13 }
 0xf0b   : > { %v10875_v17 = vmul.f32 %v19992_v20, %v10832_v62  ;;  %v10877_v56 = vmul.f32 %v19992_v20, %v10834_v19  ;;  %v10879_v21 = vmul.f32 %v19992_v20, %v10836_v4  ;;  %v10908_v42 = vadd.f32 %v19996_v59, %v10865_v31 }
 0xf0c   : > { %v10910_v22 = vadd.f32 %v19996_v59, %v10867_v26  ;;  %v10912_v25 = vadd.f32 %v19996_v59, %v10869_v18  ;;  %v10914_v55 = vadd.f32 %v19996_v59, %v10871_v44  ;;  %v10916_v46 = vadd.f32 %v19996_v59, %v10873_v5 }
 0xf0d   : > { %v10918_v2 = vadd.f32 %v19996_v59, %v10875_v17  ;;  %v10920_v15 = vadd.f32 %v19996_v59, %v10877_v56  ;;  %v10922_v13 = vadd.f32 %v19996_v59, %v10879_v21  ;;  %v10972_v62 = vpack.c.bf16 %v10908_v42, %v10908_v42 }
 0xf0e   : > { %v10974_v19 = vpack.c.bf16 %v10910_v22, %v10910_v22  ;;  %v10976_v23 = vpack.c.bf16 %v10912_v25, %v10912_v25  ;;  %v10978_v20 = vpack.c.bf16 %v10914_v55, %v10914_v55  ;;  %v10980_v4 = vpack.c.bf16 %v10916_v46, %v10916_v46 }
 0xf0f   : > { %v10982_v31 = vpack.c.bf16 %v10918_v2, %v10918_v2  ;;  %v10984_v32 = vpack.c.bf16 %v10920_v15, %v10920_v15  ;;  %v11026_v26 = vunpack.c.l.b16 %v10962_v51  ;;  %v11028_v35 = vunpack.c.l.b16 %v10964_v54 }
 0xf10   : > { %v10986_v18 = vpack.c.bf16 %v10922_v13, %v10922_v13  ;;  %v11030_v48 = vunpack.c.l.b16 %v10966_v36  ;;  %v11038_v44 = vunpack.c.l.b16 %v10974_v19  ;;  %v11040_v16 = vunpack.c.l.b16 %v10976_v23 }
 0xf11   : > { %v11032_v5 = vunpack.c.l.b16 %v10968_v57  ;;  %v11034_v24 = vunpack.c.l.b16 %v10970_v63  ;;  %v11042_v17 = vunpack.c.l.b16 %v10978_v20  ;;  %v11065_v45 = vrot.slane %v11022_v7, 7 }
 0xf12   : > { %v11036_v56 = vunpack.c.l.b16 %v10972_v62  ;;  %v11044_v41 = vunpack.c.l.b16 %v10980_v4  ;;  %v11046_v59 = vunpack.c.l.b16 %v10982_v31  ;;  %v11067_v21 = vrot.slane %v11024_v33, 6 }
 0xf13   : > { %v11048_v42 = vunpack.c.l.b16 %v10984_v32  ;;  %v11066_v22 = vsel %vm10526_vm4, %v11065_v45, %v11020_v60  ;;  %v11069_v25 = vrot.slane %v11026_v26, 5  ;;  %v11093_v55 = vrot.slane %v11038_v44, 7 }
 0xf14   : > { %v11050_v46 = vunpack.c.l.b16 %v10986_v18  ;;  %v11068_v51 = vsel %vm10528_vm5, %v11067_v21, %v11066_v22  ;;  %v11071_v54 = vrot.slane %v11028_v35, 4  ;;  %v11095_v36 = vrot.slane %v11040_v16, 6 }
 0xf15   : > { %v11070_v23 = vsel %vm10530_vm6, %v11069_v25, %v11068_v51  ;;  %v11073_v57 = vrot.slane %v11030_v48, 3  ;;  %v11094_v63 = vsel %vm10526_vm4, %v11093_v55, %v11036_v56  ;;  %v11097_v7 = vrot.slane %v11042_v17, 5 }
 0xf16   : > { %v11072_v2 = vsel %vm10532_vm7, %v11071_v54, %v11070_v23  ;;  %v11075_v15 = vrot.slane %v11032_v5, 2  ;;  %v11096_v33 = vsel %vm10528_vm5, %v11095_v36, %v11094_v63  ;;  %v11099_v32 = vrot.slane %v11044_v41, 4 }
 0xf17   : > { %v20103_v45 = vrot.slane %v19987_v37, %v20937_v28  ;;  %v11074_v60 = vsel %vm10534_vm8, %v11073_v57, %v11072_v2  ;;  %v11098_v16 = vsel %vm10530_vm6, %v11097_v7, %v11096_v33  ;;  %v11101_v35 = vrot.slane %v11046_v59, 3 }
 0xf18   : > { %v11076_v48 = vsel %vm10536_vm9, %v11075_v15, %v11074_v60  ;;  %v11077_v13 = vrot.slane %v11034_v24, 1  ;;  %v11100_v62 = vsel %vm10532_vm7, %v11099_v32, %v11098_v16  ;;  %v11103_v19 = vrot.slane %v11048_v42, 2 }
 0xf19   : > { %v11102_v20 = vsel %vm10534_vm8, %v11101_v35, %v11100_v62  ;;  %v11105_v4 = vrot.slane %v11050_v46, 1  ;;  %v10807_v41 = vmul.f32 %v10775_v50, %v19818_v27  ;;  %v10809_v28 = vmul.f32 %v10776_v12, %v19821_v9 }
 0xf1a   : > { %v11104_v37 = vsel %vm10536_vm9, %v11103_v19, %v11102_v20  ;;  %v10805_v31 = vmul.f32 %v19989_v14, %v19837_v8  ;;  %v10811_v24 = vmul.f32 %v10777_v29, %v19829_v1  ;;  %v10813_v26 = vmul.f32 %v10778_v3, %v19846_v11 }
 0xf1b   : > { %v11078_v18 = vsel %vm10538_vm10, %v11077_v13, %v11076_v48  ;;  %v11106_v27 = vsel %vm10538_vm10, %v11105_v4, %v11104_v37  ;;  %v10823_v9 = vmul.f32 %v10782_v40, %v19797_v47  ;;  %v10825_v8 = vmul.f32 %v10783_v53, %v19803_v49 }
 0xf1c   : > { %v11108_v50 = vpack.c.b16 %v11106_v27, %v11078_v18  ;;  %v20944_v1 = vrot.slane %v19989_v14, 5  ;;  %v20945_v11 = vrot.slane %v19989_v14, 6  ;;  %v20946_v3 = vrot.slane %v20047_v6, 3 }
 0xf1d   : > { %v20947_v47 = vrot.slane %v19989_v14, 7  ;;  %v20948_v49 = vrot.slane %v20047_v6, 4  ;;  %v10850_v5 = vmul.f32 %v20045_v43, %v10807_v41  ;;  %v20949_v17 = vrot.slane %v20047_v6, 5 }
 0xf1e   : > { %v10815_v12 = vmul.f32 %v20944_v1, %v19855_v39  ;;  %v10817_v29 = vmul.f32 %v20945_v11, %v19861_v30  ;;  %v10827_v44 = vmul.f32 %v20946_v3, %v19809_v0  ;;  %v10852_v39 = vmul.f32 %v20045_v43, %v10809_v28  ;;  %11239 = vmatprep.mubr.bf16.mxu0 %v11108_v50 }
 0xf1f   : > { %v10819_v40 = vmul.f32 %v20947_v47, %v19870_v52  ;;  %v10829_v53 = vmul.f32 %v20948_v49, %v19815_v58  ;;  %v10821_v30 = vmul.f32 %v20047_v6, %v19790_v38  ;;  %v10831_v0 = vmul.f32 %v20949_v17, %v19834_v34 }
 0xf20   : > { %v20950_v14 = vrot.slane %v20047_v6, 6  ;;  %v20951_v56 = vrot.slane %v20047_v6, 7  ;;  %v10848_v59 = vmul.f32 %v20045_v43, %v10805_v31  ;;  %v10854_v21 = vmul.f32 %v20045_v43, %v10811_v24 }
 0xf21   : > { %v10866_v42 = vmul.f32 %v20045_v43, %v10823_v9  ;;  %v10868_v38 = vmul.f32 %v20045_v43, %v10825_v8  ;;  %v10856_v22 = vmul.f32 %v20045_v43, %v10813_v26  ;;  %v10858_v34 = vmul.f32 %v20045_v43, %v10815_v12 }
 0xf22   : > { %v10833_v52 = vmul.f32 %v20950_v14, %v19922_v10  ;;  %v10835_v58 = vmul.f32 %v20951_v56, %v19938_v61  ;;  %v10860_v25 = vmul.f32 %v20045_v43, %v10817_v29  ;;  %v10870_v10 = vmul.f32 %v20045_v43, %v10827_v44 }
 0xf23   : > { %v10862_v55 = vmul.f32 %v20045_v43, %v10819_v40  ;;  %v10872_v61 = vmul.f32 %v20045_v43, %v10829_v53  ;;  %v10893_v6 = vadd.f32 %v20103_v45, %v10850_v5  ;;  %v10895_v46 = vadd.f32 %v20103_v45, %v10852_v39 }
 0xf24   : > { %v10864_v51 = vmul.f32 %v20045_v43, %v10821_v30  ;;  %v10874_v54 = vmul.f32 %v20045_v43, %v10831_v0  ;;  %v10876_v36 = vmul.f32 %v20045_v43, %v10833_v52  ;;  %v10878_v23 = vmul.f32 %v20045_v43, %v10835_v58 }
 0xf25   : > { %v10891_v57 = vadd.f32 %v20103_v45, %v10848_v59  ;;  %v10897_v63 = vadd.f32 %v20103_v45, %v10854_v21  ;;  %v10909_v7 = vadd.f32 %v20103_v45, %v10866_v42  ;;  %v10911_v2 = vadd.f32 %v20103_v45, %v10868_v38 }
 0xf26   : > { %v10899_v15 = vadd.f32 %v20103_v45, %v10856_v22  ;;  %v10901_v33 = vadd.f32 %v20103_v45, %v10858_v34  ;;  %v10903_v32 = vadd.f32 %v20103_v45, %v10860_v25  ;;  %v10913_v60 = vadd.f32 %v20103_v45, %v10870_v10 }
 0xf27   : > { %v10905_v16 = vadd.f32 %v20103_v45, %v10862_v55  ;;  %v10915_v43 = vadd.f32 %v20103_v45, %v10872_v61  ;;  %v10957_v35 = vpack.c.bf16 %v10893_v6, %v10893_v6  ;;  %v10959_v48 = vpack.c.bf16 %v10895_v46, %v10895_v46 }
 0xf28   : > { %v10907_v13 = vadd.f32 %v20103_v45, %v10864_v51  ;;  %v10917_v62 = vadd.f32 %v20103_v45, %v10874_v54  ;;  %v10919_v19 = vadd.f32 %v20103_v45, %v10876_v36  ;;  %v10921_v20 = vadd.f32 %v20103_v45, %v10878_v23 }
 0xf29   : > { %v10955_v4 = vpack.c.bf16 %v10891_v57, %v10891_v57  ;;  %v10961_v41 = vpack.c.bf16 %v10897_v63, %v10897_v63  ;;  %v10973_v28 = vpack.c.bf16 %v10909_v7, %v10909_v7  ;;  %v10975_v37 = vpack.c.bf16 %v10911_v2, %v10911_v2 }
 0xf2a   : > { %v10963_v31 = vpack.c.bf16 %v10899_v15, %v10899_v15  ;;  %v10965_v24 = vpack.c.bf16 %v10901_v33, %v10901_v33  ;;  %v10967_v26 = vpack.c.bf16 %v10903_v32, %v10903_v32  ;;  %v10977_v18 = vpack.c.bf16 %v10913_v60, %v10913_v60 }
 0xf2b   : > { %v10969_v27 = vpack.c.bf16 %v10905_v16, %v10905_v16  ;;  %v10979_v9 = vpack.c.bf16 %v10915_v43, %v10915_v43  ;;  %v11021_v8 = vunpack.c.l.b16 %v10957_v35  ;;  %v11023_v50 = vunpack.c.l.b16 %v10959_v48 }
 0xf2c   : > { %v10971_v1 = vpack.c.bf16 %v10907_v13, %v10907_v13  ;;  %v10981_v12 = vpack.c.bf16 %v10917_v62, %v10917_v62  ;;  %v10983_v11 = vpack.c.bf16 %v10919_v19, %v10919_v19  ;;  %v10985_v29 = vpack.c.bf16 %v10921_v20, %v10921_v20 }
 0xf2d   : > { %v11019_v3 = vunpack.c.l.b16 %v10955_v4  ;;  %v11025_v44 = vunpack.c.l.b16 %v10961_v41  ;;  %v11037_v47 = vunpack.c.l.b16 %v10973_v28  ;;  %v11039_v45 = vunpack.c.l.b16 %v10975_v37 }
 0xf2e   : > { %v11027_v40 = vunpack.c.l.b16 %v10963_v31  ;;  %v11029_v49 = vunpack.c.l.b16 %v10965_v24  ;;  %v11031_v53 = vunpack.c.l.b16 %v10967_v26  ;;  %v11041_v5 = vunpack.c.l.b16 %v10977_v18 }
 0xf2f   : > { %v11033_v39 = vunpack.c.l.b16 %v10969_v27  ;;  %v11043_v30 = vunpack.c.l.b16 %v10979_v9  ;;  %v11051_v17 = vrot.slane %v11021_v8, 7  ;;  %v11053_v0 = vrot.slane %v11023_v50, 6 }
 0xf30   : > { %v11035_v14 = vunpack.c.l.b16 %v10971_v1  ;;  %v11045_v52 = vunpack.c.l.b16 %v10981_v12  ;;  %v11047_v56 = vunpack.c.l.b16 %v10983_v11  ;;  %v11079_v58 = vrot.slane %v11037_v47, 7 }
 0xf31   : > { %v11049_v59 = vunpack.c.l.b16 %v10985_v29  ;;  %v11052_v21 = vsel %vm10526_vm4, %v11051_v17, %v11019_v3  ;;  %v11055_v42 = vrot.slane %v11025_v44, 5  ;;  %v11081_v38 = vrot.slane %v11039_v45, 6 }
 0xf32   : > { %v11054_v22 = vsel %vm10528_vm5, %v11053_v0, %v11052_v21  ;;  %v11057_v34 = vrot.slane %v11027_v40, 4  ;;  %v11080_v25 = vsel %vm10526_vm4, %v11079_v58, %v11035_v14  ;;  %v11083_v10 = vrot.slane %v11041_v5, 5 }
 0xf33   : > { %v11056_v55 = vsel %vm10530_vm6, %v11055_v42, %v11054_v22  ;;  %v11059_v61 = vrot.slane %v11029_v49, 3  ;;  %v11082_v6 = vsel %vm10528_vm5, %v11081_v38, %v11080_v25  ;;  %v11085_v46 = vrot.slane %v11043_v30, 4 }
 0xf34   : > { %v11058_v51 = vsel %vm10532_vm7, %v11057_v34, %v11056_v55  ;;  %v11061_v54 = vrot.slane %v11031_v53, 2  ;;  %v11084_v36 = vsel %vm10530_vm6, %v11083_v10, %v11082_v6  ;;  %v11087_v23 = vrot.slane %v11045_v52, 3 }
 0xf35   : > { %v11060_v57 = vsel %vm10534_vm8, %v11059_v61, %v11058_v51  ;;  %v11086_v63 = vsel %vm10532_vm7, %v11085_v46, %v11084_v36  ;;  %v11089_v7 = vrot.slane %v11047_v56, 2  ;;  %v11063_v15 = vrot.slane %v11033_v39, 1 }
 0xf36   : > { %v11062_v2 = vsel %vm10536_vm9, %v11061_v54, %v11060_v57  ;;  %v11088_v33 = vsel %vm10534_vm8, %v11087_v23, %v11086_v63  ;;  %v11091_v32 = vrot.slane %v11049_v59, 1 }
 0xf37   : > { %v11090_v60 = vsel %vm10536_vm9, %v11089_v7, %v11088_v33  ;;  %v11064_v16 = vsel %vm10538_vm10, %v11063_v15, %v11062_v2 }
 0xf38   : > { %v11092_v43 = vsel %vm10538_vm10, %v11091_v32, %v11090_v60 }
 0xf39   : > { %v11107_v35 = vpack.c.b16 %v11092_v43, %v11064_v16 }
 0xf3b   : > { %11240 = vmatmul.mubr.bf16.vlgmr.msra.gmra.mrb[0].mxu0 %v11107_v35 }
0x100e   : > { %v12358_v48 = vpop.f32.mrb[0].mxu0 }
0x100f   : > { %v12359_v13 = vpop.f32.mrb[1].mxu0 }
0x1010   : > { %v12360_v62 = vadd.f32 %v12359_v13, %v12358_v48  ;;  %v12361_v19 = vpop.f32.mrb[2].mxu0 }
0x1011   : > { %v12362_v20 = vpop.f32.mrb[3].mxu0 }
0x1012   : > { %11248 = vst [vmem:[%s15473_s15] sm:$0xff] %v12360_v62  ;;  %v12363_v4 = vadd.f32 %v12362_v20, %v12361_v19 }
0x1014   : > { %11249 = vst [vmem:[%s15473_s15 + $0x8] sm:$0xff] %v12363_v4 }
0x1015 PF: > { %s20952_s19 = sld [smem:[#allocation36_spill]]  ;;  %s20953_s14 = sld [smem:[#allocation157_spill]] }
0x1016   : > { %s11264_s10 = sshll.u32 %s15473_s15, 4  ;;  %s11251_s12 = scalar_lea.sflag [#allocation5], %s15401_s21  ;;  %s20214_s10 = int_to_ptr.vmem [resolvable:$true] %s11264_s10 }
0x1017   : > { %s14610_s7 = scalar_lea.vmem %s20214_s10, 256  ;;  %p20955_p11 = scmp.ne.s32.totalorder %s20531_s2, 0 }
0x1018   : > { %p14611_p4 = scmp.ne.s32.totalorder %s20214_s10, %s14610_s7  ;;  %s14790_s22 = smov [#allocation23]  }
0x1019   : > { %s14614_s6 = sshll.u32 %s14790_s22, 4  ;;  %s14615_s6 = int_to_ptr.vmem [resolvable:$false] %s14614_s6 }
0x101a   : > { %p14612_p2 = pnand %p14611_p4, %p20955_p11  ;;  %s14616_s11 = scalar_lea.vmem %s14615_s6, 512 }
0x101b   : > { %s12213_s5 = sshll.u32 %s20952_s19, 8  ;;  %s20954_s13 = smov %s20953_s14 }
0x101c   : > { %s20211_s9 = scalar_lea.hbm %s20953_s14, %s12213_s5  ;;  %p14613_p12 = pneg %p14612_p2 }
0x101d   : > { %p14617_p9 = scmp.lt.s32.totalorder %s20214_s10, %s14615_s6  ;;  %p14618_p5 = scmp.lt.s32.totalorder %s14616_s11, %s14610_s7 }
0x101f   : > { %p14619_p13 = por %p14618_p5, %p14617_p9 }
0x1021   : > { %p14620_p0 = pnand %p14619_p13, %p14613_p12 }
0x1023   : > { %14623 = shalt.err (!%p14620_p0)
}
0x1024   : > { %s14624_s17 = scalar_lea.hbm %s20211_s9, 256  ;;  %s14628_s28 = scalar_lea.hbm %s20954_s13, 512 }
0x1025   : > { %p14625_p7 = scmp.ne.s32.totalorder %s20211_s9, %s14624_s17  ;;  %p14629_p1 = scmp.lt.u32.totalorder %s20211_s9, %s20954_s13 }
0x1026   : > { %p14630_p6 = scmp.lt.u32.totalorder %s14628_s28, %s14624_s17  ;;  %p14632_p4 = scmp.lt.u32.totalorder %s14624_s17, %s20211_s9 }
0x1027   : > { %p14626_p10 = pnand %p14625_p7, %p20955_p11 }
0x1028   : > { %p14631_p3 = por %p14630_p6, %p14629_p1 }
0x1029   : > { %p14627_p8 = pneg %p14626_p10 }
0x102a   : > { %p14633_p2 = por %p14632_p4, %p14631_p3 }
0x102c   : > { %p14634_p12 = pnand %p14633_p2, %p14627_p8 }
0x102e   : > { %14637 = shalt.err (!%p14634_p12)
}
0x102f   : > { %s14791_s15 = smov 128   ;;  %s14792_s8 = smov 8  }
0x1030   : > { %12910 = dma.vmem_to_hbm [thread:$0]  (%p20955_p11), %s20214_s10, 256, %s20211_s9, %s11251_s12, %s14791_s15, %s14791_s15, %s14792_s8  }
0x1031 PF: > { %s20956_s19 = sld [smem:[#allocation34_spill]]  ;;  %s20957_s5 = sld [smem:[#allocation40_spill]] }
0x1032   : > { %p12959_p9 = scmp.ge.s32.totalorder %s14760_s18, 2 }
0x1037   : > { %s11279_s24 = sand.u32 1, %s20956_s19   ;;  %p20958_p5 = scmp.ne.s32.totalorder %s20957_s5, 0 }
0x1038   : > { %s11280_s26 = scalar_lea.sflag [#allocation5], %s11279_s24 }
0x1039   : > { %p12951_p13 = pnand %p12959_p9, %p20958_p5 }
0x103b   : > { %14715 = dma.done.wait (!%p12951_p13), %s11280_s26, 256  }
0x103c   : > { %14717 = vsyncadd (!%p12951_p13), %s11280_s26, 4294967040  ;;  %s45_s18 = sadd.s32 1, %s14760_s18   ;;  %s20959_s25 = sld [smem:[#allocation33_spill]] }
0x103d   : > { %p42_p0 = scmp.ge.s32.totalorder %s45_s18, 10   ;;  %s20960_s15 = sld [smem:[#allocation37_spill]] }
0x103e   : > { %s20961_s2 = sld [smem:[#allocation42_spill]]  ;;  %s20962_s17 = sld [smem:[#allocation43_spill]] }
0x103f   : > { %s20963_s26 = smov %s14728_s27  ;;  %s20964_s27 = smov %s15196_s23 }
0x1040   : > { %s20965_s28 = smov %s14736_s29  ;;  %s20966_s29 = smov %s14740_s30 }
0x1041   : > { %s20967_s30 = smov %s15202_s1  ;;  %s20968_s14 = smov %s14752_s16 }
0x1042   :  { %44 = sbr.rel (!%p42_p0) target bundleno = 35 (0x23), region = 246 }
0x1044   : > { %s20969_s16 = smov %s20961_s2 }
0x1049   :  { %11285 = vsyncpa [#allocation4], 1 }
0x104a   :  { %11287 = vsyncpa [#allocation4 + $0x1], 1 }
0x104b   :  { %11288 = vsyncpa [#allocation7], 1 }
0x104c   :  { %11290 = vsyncpa [#allocation7 + $0x1], 1 }
0x104d   :  { %11291 = vsyncpa [#allocation10], 1 }
0x104e   :  { %11293 = vsyncpa [#allocation10 + $0x1], 1 }
0x104f   :  { %11294 = vsyncpa [#allocation13], 1 }
0x1050   :  { %11296 = vsyncpa [#allocation13 + $0x1], 1 }
0x1051   :  { %11297 = vsyncpa [#allocation16], 1 }
0x1052   :  { %11299 = vsyncpa [#allocation16 + $0x1], 1 }
0x1053   :  { %11300 = vsyncpa [#allocation19], 1 }
0x1054   :  { %11302 = vsyncpa [#allocation19 + $0x1], 1 }
0x1055   :  { %11303 = vsyncpa [#allocation22], 1 }
0x1056   :  { %11304 = vsyncpa [#allocation5], 1 }
0x1057   :  { %11306 = vsyncpa [#allocation5 + $0x1], 1 }

</bundles_post_ra>
